<compile_context>
chip_gen: v6e
topology: v6e:2x2x1
jax: 0.10.0
libtpu: 0.0.40
codegen_flags: <defaults>
</compile_context>

<pallas_src>
import functools

import jax
import jax.numpy as jnp
from jax.experimental import pallas as pl
from jax.experimental.pallas import tpu as pltpu


# --------------------------------------------------------------------------
# Fused SPPF kernel: conv1 -> cascaded separable 5x5 pools -> concat -> conv2
# --------------------------------------------------------------------------
def _sppf_fused_kernel(x_ref, w1_ref, s1_ref, b1_ref, w2_ref, s2_ref, b2_ref,
                       o_ref,
                       xpad_ref, poolpad_ref, catpad_ref,
                       *, H, W, Mid, Cout, mxu_dtype):
    f32 = jnp.float32

    # ---------------- helpers ------------------------------------------------
    def frame_fill(ref, pad, value):
        """Write only the `pad`-wide border frame of a (Hp, Wp, C) scratch
        (the interior is fully overwritten right after -> no full-buffer vst)."""
        Hp, Wp, C = ref.shape
        row = jnp.full((pad, Wp, C), value, ref.dtype)
        col = jnp.full((Hp - 2 * pad, pad, C), value, ref.dtype)
        ref[0:pad, :, :] = row
        ref[Hp - pad:Hp, :, :] = row
        ref[pad:Hp - pad, 0:pad, :] = col
        ref[pad:Hp - pad, Wp - pad:Wp, :] = col

    def conv3x3(pad_ref, w_ref, cout):
        """3x3 stride-1 'same' conv as nine accumulating MXU contractions.
        Operands are mxu_dtype; accumulation is f32 (preferred_element_type)."""
        pad = pad_ref[...]                                    # (H+2, W+2, Cin)
        acc = jnp.zeros((H, W, cout), f32)
        t = 0
        for dh in range(3):
            for dw in range(3):
                acc = acc + jnp.einsum(
                    "hwk,ko->hwo", pad[dh:dh + H, dw:dw + W, :], w_ref[t],
                    preferred_element_type=f32)
                t += 1
        return acc

    # ---------------- conv1: 3x3, stride 1, pad 1 (+ folded BN + SiLU) -------
    frame_fill(xpad_ref, 1, 0.0)
    xpad_ref[1:H + 1, 1:W + 1, :] = x_ref[0]                  # already mxu_dtype
    acc1 = conv3x3(xpad_ref, w1_ref, Mid)                     # (H, W, Mid) f32
    y1 = acc1 * s1_ref[...] + b1_ref[...]                     # folded BN (f32)
    x1f = y1 * jax.nn.sigmoid(y1)                             # SiLU (f32)
    x1 = x1f.astype(mxu_dtype)                                # staged once

    # ---------------- cascaded separable 5x5 max pools -----------------------
    # -inf border written ONCE per image; every pool5 rewrites the interior.
    frame_fill(poolpad_ref, 2, -jnp.inf)

    def pool5(a):
        poolpad_ref[2:H + 2, 2:W + 2, :] = a
        b = poolpad_ref[...]
        rmax = b[:, 0:W, :]                                   # 5-wide row max
        for dw in range(1, 5):
            rmax = jnp.maximum(rmax, b[:, dw:dw + W, :])
        out = rmax[0:H, :, :]                                 # 5-tall col max
        for dh in range(1, 5):
            out = jnp.maximum(out, rmax[dh:dh + H, :, :])
        return out

    p5 = pool5(x1)        # == MaxPool2d(k=5,  s=1, p=2)
    p9 = pool5(p5)        # == MaxPool2d(k=9,  s=1, p=4)
    p13 = pool5(p9)       # == MaxPool2d(k=13, s=1, p=6)

    # ---------------- concat (VMEM only) + conv2 (+ folded BN + SiLU) --------
    frame_fill(catpad_ref, 1, 0.0)
    catpad_ref[1:H + 1, 1:W + 1, 0 * Mid:1 * Mid] = x1
    catpad_ref[1:H + 1, 1:W + 1, 1 * Mid:2 * Mid] = p5
    catpad_ref[1:H + 1, 1:W + 1, 2 * Mid:3 * Mid] = p9
    catpad_ref[1:H + 1, 1:W + 1, 3 * Mid:4 * Mid] = p13
    acc2 = conv3x3(catpad_ref, w2_ref, Cout)                  # (H, W, Cout) f32
    y2 = acc2 * s2_ref[...] + b2_ref[...]
    out = y2 * jax.nn.sigmoid(y2)
    o_ref[0] = out.astype(o_ref.dtype)


# --------------------------------------------------------------------------
# SPPFBottleneck forward (NCHW in / NCHW out, like the PyTorch module).
# --------------------------------------------------------------------------
def sppf_bottleneck(x_nchw, params, mxu_dtype=jnp.bfloat16):
    """mxu_dtype: dtype of MXU operands and of the in-kernel staging scratch
    (bf16 default per v6e/v7x guidance); accumulation / BN / SiLU stay f32."""
    N, Cin, H, W = x_nchw.shape
    c1, c2 = params["conv1"], params["conv2"]
    Mid = c1["w"].shape[-1]
    Cout = c2["w"].shape[-1]
    Ccat = 4 * Mid
    assert c2["w"].shape[2] == Ccat

    # NCHW -> NHWC; MXU operands (input + weights) staged in mxu_dtype.
    x = jnp.transpose(x_nchw, (0, 2, 3, 1)).astype(mxu_dtype)
    # (3, 3, Cin, Cout) -> (9, Cin, Cout): per-tap slabs indexed on the leading
    # dim inside the kernel (no misaligned sublane slices of the weight).
    w1 = c1["w"].reshape(9, Cin, Mid).astype(mxu_dtype)
    w2 = c2["w"].reshape(9, Ccat, Cout).astype(mxu_dtype)

    kern = functools.partial(_sppf_fused_kernel, H=H, W=W, Mid=Mid, Cout=Cout,
                             mxu_dtype=mxu_dtype)
    out = pl.pallas_call(
        kern,
        out_shape=jax.ShapeDtypeStruct((N, H, W, Cout), x_nchw.dtype),
        grid=(N,),
        in_specs=[
            pl.BlockSpec((1, H, W, Cin), lambda n: (n, 0, 0, 0)),   # x
            pl.BlockSpec((9, Cin, Mid), lambda n: (0, 0, 0)),       # w1 taps
            pl.BlockSpec((1, Mid), lambda n: (0, 0)),               # scale1
            pl.BlockSpec((1, Mid), lambda n: (0, 0)),               # bias1
            pl.BlockSpec((9, Ccat, Cout), lambda n: (0, 0, 0)),     # w2 taps
            pl.BlockSpec((1, Cout), lambda n: (0, 0)),              # scale2
            pl.BlockSpec((1, Cout), lambda n: (0, 0)),              # bias2
        ],
        out_specs=pl.BlockSpec((1, H, W, Cout), lambda n: (n, 0, 0, 0)),
        scratch_shapes=[
            pltpu.VMEM((H + 2, W + 2, Cin), mxu_dtype),    # zero-padded x
            pltpu.VMEM((H + 4, W + 4, Mid), mxu_dtype),    # -inf padded pool buf
            pltpu.VMEM((H + 2, W + 2, Ccat), mxu_dtype),   # zero-padded concat
        ],
        compiler_params=pltpu.CompilerParams(
            dimension_semantics=("parallel",)),
    )(x, w1, c1["scale"], c1["bias"], w2, c2["scale"], c2["bias"])
    return jnp.transpose(out, (0, 3, 1, 2))                        # NHWC->NCHW


# --------------------------------------------------------------------------
# Parameter construction (deterministic, in-script) with BN folding.
# --------------------------------------------------------------------------
def _make_convmodule_params(key, cin, cout, eps=1e-5):
    kw, kb, kg, kbeta, km, kv = jax.random.split(key, 6)
    w = jax.random.normal(kw, (3, 3, cin, cout), jnp.float32) * 0.1
    b_conv = jax.random.normal(kb, (cout,), jnp.float32) * 0.1
    gamma = 1.0 + 0.1 * jax.random.normal(kg, (cout,), jnp.float32)
    beta = 0.1 * jax.random.normal(kbeta, (cout,), jnp.float32)
    run_mean = 0.1 * jax.random.normal(km, (cout,), jnp.float32)
    run_var = 1.0 + 0.1 * jax.random.uniform(kv, (cout,), jnp.float32)
    # fold conv-bias + BN(eval) into a per-channel scale / bias
    scale = gamma / jnp.sqrt(run_var + eps)                        # (Cout,)
    bias = beta + (b_conv - run_mean) * scale                      # (Cout,)
    return {"w": w, "scale": scale[None, :], "bias": bias[None, :]}


def init_sppf_params(key, in_channels, out_channels):
    assert out_channels % 2 == 0, "out_channels must be even."
    mid = out_channels // 2
    k1, k2 = jax.random.split(key, 2)
    return {
        "conv1": _make_convmodule_params(k1, in_channels, mid),
        "conv2": _make_convmodule_params(k2, out_channels * 2, out_channels),
    }


# --------------------------------------------------------------------------
# Pure-JAX reference (same folded-BN semantics) for a correctness check.
# --------------------------------------------------------------------------
def _ref_convmodule(x_nhwc, w, scale, bias):
    y = jax.lax.conv_general_dilated(
        x_nhwc, w, window_strides=(1, 1), padding=((1, 1), (1, 1)),
        dimension_numbers=("NHWC", "HWIO", "NHWC"),
        precision=jax.lax.Precision.HIGHEST)
    y = y * scale.reshape(1, 1, 1, -1) + bias.reshape(1, 1, 1, -1)
    return y * jax.nn.sigmoid(y)


def _ref_maxpool(x_nhwc, k):
    p = k // 2
    return jax.lax.reduce_window(
        x_nhwc, -jnp.inf, jax.lax.max,
        (1, k, k, 1), (1, 1, 1, 1), ((0, 0), (p, p), (p, p), (0, 0)))


def sppf_reference(x_nchw, params):
    x = jnp.transpose(x_nchw, (0, 2, 3, 1))
    c1, c2 = params["conv1"], params["conv2"]
    x1 = _ref_convmodule(x, c1["w"], c1["scale"], c1["bias"])
    cat = jnp.concatenate(
        [x1, _ref_maxpool(x1, 5), _ref_maxpool(x1, 9), _ref_maxpool(x1, 13)],
        axis=-1)
    out = _ref_convmodule(cat, c2["w"], c2["scale"], c2["bias"])
    return jnp.transpose(out, (0, 3, 1, 2))


if __name__ == "__main__":
    key = jax.random.PRNGKey(0)
    k_param, k_x = jax.random.split(key)

    N, Cin, H, W = 2, 4, 16, 16
    Cout = 8

    params = init_sppf_params(k_param, Cin, Cout)
    x = jax.random.normal(k_x, (N, Cin, H, W), jnp.float32)

    ref = sppf_reference(x, params)

    # Exact-precision path (f32 MXU operands / f32 scratch) vs pure-JAX ref.
    out_f32 = jax.jit(
        functools.partial(sppf_bottleneck, mxu_dtype=jnp.float32))(x, params)
    out_f32 = jax.block_until_ready(out_f32)
    assert out_f32.shape == (N, Cout, H, W), out_f32.shape
    assert jnp.allclose(out_f32, ref, rtol=2e-2, atol=2e-2)

    # Default fast path (bf16 MXU operands + bf16 staging, f32 acc / epilogue).
    out = jax.jit(sppf_bottleneck)(x, params)
    out = jax.block_until_ready(out)
    assert out.shape == (N, Cout, H, W), out.shape
    assert jnp.all(jnp.isfinite(out))
    assert jnp.allclose(out, ref, rtol=1e-1, atol=1e-1)

    print("KERNEL_OK")
</pallas_src>

<mosaic_0001>
module attributes {stable_mosaic.version = 11 : i64} {
  func.func @_sppf_fused_kernel(%arg0: i32, %arg1: memref<1x16x16x4xf32, #tpu.memory_space<vmem>>, %arg2: memref<9x4x4xf32, #tpu.memory_space<vmem>>, %arg3: memref<1x4xf32, #tpu.memory_space<vmem>>, %arg4: memref<1x4xf32, #tpu.memory_space<vmem>>, %arg5: memref<9x16x8xf32, #tpu.memory_space<vmem>>, %arg6: memref<1x8xf32, #tpu.memory_space<vmem>>, %arg7: memref<1x8xf32, #tpu.memory_space<vmem>>, %arg8: memref<1x16x16x8xf32, #tpu.memory_space<vmem>>, %arg9: memref<18x18x4xf32, #tpu.memory_space<vmem>>, %arg10: memref<20x20x4xf32, #tpu.memory_space<vmem>>, %arg11: memref<18x18x16xf32, #tpu.memory_space<vmem>>) attributes {dimension_semantics = [#tpu.dimension_semantics<parallel>], iteration_bounds = array<i64: 2>, scalar_prefetch = 0 : i64, scratch_operands = 3 : i64, tpu.core_type = #tpu.core_type<tc>, window_params = [{transform_indices = @transform_0, window_bounds = array<i64: 1, 16, 16, 4>}, {pipeline_mode = #tpu.pipeline_mode<synchronous>, transform_indices = @transform_1, window_bounds = array<i64: 9, 4, 4>}, {pipeline_mode = #tpu.pipeline_mode<synchronous>, transform_indices = @transform_2, window_bounds = array<i64: 1, 4>}, {pipeline_mode = #tpu.pipeline_mode<synchronous>, transform_indices = @transform_3, window_bounds = array<i64: 1, 4>}, {pipeline_mode = #tpu.pipeline_mode<synchronous>, transform_indices = @transform_4, window_bounds = array<i64: 9, 16, 8>}, {pipeline_mode = #tpu.pipeline_mode<synchronous>, transform_indices = @transform_5, window_bounds = array<i64: 1, 8>}, {pipeline_mode = #tpu.pipeline_mode<synchronous>, transform_indices = @transform_6, window_bounds = array<i64: 1, 8>}, {transform_indices = @transform_7, window_bounds = array<i64: 1, 16, 16, 8>}]} {
    %cst = arith.constant 0.000000e+00 : f32
    %0 = vector.broadcast %cst : f32 to vector<1x18x4xf32>
    %cst_0 = arith.constant 0.000000e+00 : f32
    %1 = vector.broadcast %cst_0 : f32 to vector<16x1x4xf32>
    %c0 = arith.constant 0 : index
    %c0_1 = arith.constant 0 : index
    %c0_2 = arith.constant 0 : index
    %2 = vector.load %arg9[%c0, %c0_1, %c0_2] : memref<18x18x4xf32, #tpu.memory_space<vmem>>, vector<1x18x4xf32>
    tpu.vector_store %arg9[%c0, %c0_1, %c0_2], %0 {strides = array<i32>} : memref<18x18x4xf32, #tpu.memory_space<vmem>>, vector<1x18x4xf32>,
    %c17 = arith.constant 17 : index
    %c0_3 = arith.constant 0 : index
    %c0_4 = arith.constant 0 : index
    %3 = vector.load %arg9[%c17, %c0_3, %c0_4] : memref<18x18x4xf32, #tpu.memory_space<vmem>>, vector<1x18x4xf32>
    tpu.vector_store %arg9[%c17, %c0_3, %c0_4], %0 {strides = array<i32>} : memref<18x18x4xf32, #tpu.memory_space<vmem>>, vector<1x18x4xf32>,
    %c1 = arith.constant 1 : index
    %c0_5 = arith.constant 0 : index
    %c0_6 = arith.constant 0 : index
    %4 = vector.load %arg9[%c1, %c0_5, %c0_6] : memref<18x18x4xf32, #tpu.memory_space<vmem>>, vector<16x1x4xf32>
    tpu.vector_store %arg9[%c1, %c0_5, %c0_6], %1 {strides = array<i32>} : memref<18x18x4xf32, #tpu.memory_space<vmem>>, vector<16x1x4xf32>,
    %c1_7 = arith.constant 1 : index
    %c17_8 = arith.constant 17 : index
    %c0_9 = arith.constant 0 : index
    %5 = vector.load %arg9[%c1_7, %c17_8, %c0_9] : memref<18x18x4xf32, #tpu.memory_space<vmem>>, vector<16x1x4xf32>
    tpu.vector_store %arg9[%c1_7, %c17_8, %c0_9], %1 {strides = array<i32>} : memref<18x18x4xf32, #tpu.memory_space<vmem>>, vector<16x1x4xf32>,
    %c0_10 = arith.constant 0 : index
    %c0_11 = arith.constant 0 : index
    %c0_12 = arith.constant 0 : index
    %c0_13 = arith.constant 0 : index
    %6 = vector.load %arg1[%c0_10, %c0_11, %c0_12, %c0_13] : memref<1x16x16x4xf32, #tpu.memory_space<vmem>>, vector<1x16x16x4xf32>
    %7 = vector.shape_cast %6 : vector<1x16x16x4xf32> to vector<16x16x4xf32>
    %c1_14 = arith.constant 1 : index
    %c1_15 = arith.constant 1 : index
    %c0_16 = arith.constant 0 : index
    %8 = vector.load %arg9[%c1_14, %c1_15, %c0_16] : memref<18x18x4xf32, #tpu.memory_space<vmem>>, vector<16x16x4xf32>
    tpu.vector_store %arg9[%c1_14, %c1_15, %c0_16], %7 {strides = array<i32>} : memref<18x18x4xf32, #tpu.memory_space<vmem>>, vector<16x16x4xf32>,
    %c0_17 = arith.constant 0 : index
    %c0_18 = arith.constant 0 : index
    %c0_19 = arith.constant 0 : index
    %9 = vector.load %arg9[%c0_17, %c0_18, %c0_19] : memref<18x18x4xf32, #tpu.memory_space<vmem>>, vector<18x18x4xf32>
    %cst_20 = arith.constant 0.000000e+00 : f32
    %10 = vector.broadcast %cst_20 : f32 to vector<16x16x4xf32>
    %11 = vector.extract_strided_slice %9 {offsets = [0, 0, 0], sizes = [16, 16, 4], strides = [1, 1, 1]} : vector<18x18x4xf32> to vector<16x16x4xf32>
    %c0_21 = arith.constant 0 : index
    %c0_22 = arith.constant 0 : index
    %c0_23 = arith.constant 0 : index
    %12 = vector.load %arg2[%c0_21, %c0_22, %c0_23] : memref<9x4x4xf32, #tpu.memory_space<vmem>>, vector<1x4x4xf32>
    %13 = vector.shape_cast %12 : vector<1x4x4xf32> to vector<4x4xf32>
    "tpu.trace_start"() <{level = 10 : i32, message = "hwk,ko->hwo"}> : () -> ()
    %cst_24 = arith.constant dense<0.000000e+00> : vector<16x16x4xf32>
    %14 = tpu.matmul %11, %13, %cst_24 {dimension_numbers = #tpu.dot_dimension_numbers<[2], [0], [0, 1], [1], [0, 0, 0, 1, 1, 1], [], []>} : vector<16x16x4xf32>, vector<4x4xf32>, vector<16x16x4xf32> -> vector<16x16x4xf32>
    "tpu.trace_stop"() : () -> ()
    %15 = arith.addf %10, %14 : vector<16x16x4xf32>
    %16 = vector.extract_strided_slice %9 {offsets = [0, 1, 0], sizes = [16, 16, 4], strides = [1, 1, 1]} : vector<18x18x4xf32> to vector<16x16x4xf32>
    %c1_25 = arith.constant 1 : index
    %c0_26 = arith.constant 0 : index
    %c0_27 = arith.constant 0 : index
    %17 = vector.load %arg2[%c1_25, %c0_26, %c0_27] : memref<9x4x4xf32, #tpu.memory_space<vmem>>, vector<1x4x4xf32>
    %18 = vector.shape_cast %17 : vector<1x4x4xf32> to vector<4x4xf32>
    "tpu.trace_start"() <{level = 10 : i32, message = "hwk,ko->hwo"}> : () -> ()
    %cst_28 = arith.constant dense<0.000000e+00> : vector<16x16x4xf32>
    %19 = tpu.matmul %16, %18, %cst_28 {dimension_numbers = #tpu.dot_dimension_numbers<[2], [0], [0, 1], [1], [0, 0, 0, 1, 1, 1], [], []>} : vector<16x16x4xf32>, vector<4x4xf32>, vector<16x16x4xf32> -> vector<16x16x4xf32>
    "tpu.trace_stop"() : () -> ()
    %20 = arith.addf %15, %19 : vector<16x16x4xf32>
    %21 = vector.extract_strided_slice %9 {offsets = [0, 2, 0], sizes = [16, 16, 4], strides = [1, 1, 1]} : vector<18x18x4xf32> to vector<16x16x4xf32>
    %c2 = arith.constant 2 : index
    %c0_29 = arith.constant 0 : index
    %c0_30 = arith.constant 0 : index
    %22 = vector.load %arg2[%c2, %c0_29, %c0_30] : memref<9x4x4xf32, #tpu.memory_space<vmem>>, vector<1x4x4xf32>
    %23 = vector.shape_cast %22 : vector<1x4x4xf32> to vector<4x4xf32>
    "tpu.trace_start"() <{level = 10 : i32, message = "hwk,ko->hwo"}> : () -> ()
    %cst_31 = arith.constant dense<0.000000e+00> : vector<16x16x4xf32>
    %24 = tpu.matmul %21, %23, %cst_31 {dimension_numbers = #tpu.dot_dimension_numbers<[2], [0], [0, 1], [1], [0, 0, 0, 1, 1, 1], [], []>} : vector<16x16x4xf32>, vector<4x4xf32>, vector<16x16x4xf32> -> vector<16x16x4xf32>
    "tpu.trace_stop"() : () -> ()
    %25 = arith.addf %20, %24 : vector<16x16x4xf32>
    %26 = vector.extract_strided_slice %9 {offsets = [1, 0, 0], sizes = [16, 16, 4], strides = [1, 1, 1]} : vector<18x18x4xf32> to vector<16x16x4xf32>
    %c3 = arith.constant 3 : index
    %c0_32 = arith.constant 0 : index
    %c0_33 = arith.constant 0 : index
    %27 = vector.load %arg2[%c3, %c0_32, %c0_33] : memref<9x4x4xf32, #tpu.memory_space<vmem>>, vector<1x4x4xf32>
    %28 = vector.shape_cast %27 : vector<1x4x4xf32> to vector<4x4xf32>
    "tpu.trace_start"() <{level = 10 : i32, message = "hwk,ko->hwo"}> : () -> ()
    %cst_34 = arith.constant dense<0.000000e+00> : vector<16x16x4xf32>
    %29 = tpu.matmul %26, %28, %cst_34 {dimension_numbers = #tpu.dot_dimension_numbers<[2], [0], [0, 1], [1], [0, 0, 0, 1, 1, 1], [], []>} : vector<16x16x4xf32>, vector<4x4xf32>, vector<16x16x4xf32> -> vector<16x16x4xf32>
    "tpu.trace_stop"() : () -> ()
    %30 = arith.addf %25, %29 : vector<16x16x4xf32>
    %31 = vector.extract_strided_slice %9 {offsets = [1, 1, 0], sizes = [16, 16, 4], strides = [1, 1, 1]} : vector<18x18x4xf32> to vector<16x16x4xf32>
    %c4 = arith.constant 4 : index
    %c0_35 = arith.constant 0 : index
    %c0_36 = arith.constant 0 : index
    %32 = vector.load %arg2[%c4, %c0_35, %c0_36] : memref<9x4x4xf32, #tpu.memory_space<vmem>>, vector<1x4x4xf32>
    %33 = vector.shape_cast %32 : vector<1x4x4xf32> to vector<4x4xf32>
    "tpu.trace_start"() <{level = 10 : i32, message = "hwk,ko->hwo"}> : () -> ()
    %cst_37 = arith.constant dense<0.000000e+00> : vector<16x16x4xf32>
    %34 = tpu.matmul %31, %33, %cst_37 {dimension_numbers = #tpu.dot_dimension_numbers<[2], [0], [0, 1], [1], [0, 0, 0, 1, 1, 1], [], []>} : vector<16x16x4xf32>, vector<4x4xf32>, vector<16x16x4xf32> -> vector<16x16x4xf32>
    "tpu.trace_stop"() : () -> ()
    %35 = arith.addf %30, %34 : vector<16x16x4xf32>
    %36 = vector.extract_strided_slice %9 {offsets = [1, 2, 0], sizes = [16, 16, 4], strides = [1, 1, 1]} : vector<18x18x4xf32> to vector<16x16x4xf32>
    %c5 = arith.constant 5 : index
    %c0_38 = arith.constant 0 : index
    %c0_39 = arith.constant 0 : index
    %37 = vector.load %arg2[%c5, %c0_38, %c0_39] : memref<9x4x4xf32, #tpu.memory_space<vmem>>, vector<1x4x4xf32>
    %38 = vector.shape_cast %37 : vector<1x4x4xf32> to vector<4x4xf32>
    "tpu.trace_start"() <{level = 10 : i32, message = "hwk,ko->hwo"}> : () -> ()
    %cst_40 = arith.constant dense<0.000000e+00> : vector<16x16x4xf32>
    %39 = tpu.matmul %36, %38, %cst_40 {dimension_numbers = #tpu.dot_dimension_numbers<[2], [0], [0, 1], [1], [0, 0, 0, 1, 1, 1], [], []>} : vector<16x16x4xf32>, vector<4x4xf32>, vector<16x16x4xf32> -> vector<16x16x4xf32>
    "tpu.trace_stop"() : () -> ()
    %40 = arith.addf %35, %39 : vector<16x16x4xf32>
    %41 = vector.extract_strided_slice %9 {offsets = [2, 0, 0], sizes = [16, 16, 4], strides = [1, 1, 1]} : vector<18x18x4xf32> to vector<16x16x4xf32>
    %c6 = arith.constant 6 : index
    %c0_41 = arith.constant 0 : index
    %c0_42 = arith.constant 0 : index
    %42 = vector.load %arg2[%c6, %c0_41, %c0_42] : memref<9x4x4xf32, #tpu.memory_space<vmem>>, vector<1x4x4xf32>
    %43 = vector.shape_cast %42 : vector<1x4x4xf32> to vector<4x4xf32>
    "tpu.trace_start"() <{level = 10 : i32, message = "hwk,ko->hwo"}> : () -> ()
    %cst_43 = arith.constant dense<0.000000e+00> : vector<16x16x4xf32>
    %44 = tpu.matmul %41, %43, %cst_43 {dimension_numbers = #tpu.dot_dimension_numbers<[2], [0], [0, 1], [1], [0, 0, 0, 1, 1, 1], [], []>} : vector<16x16x4xf32>, vector<4x4xf32>, vector<16x16x4xf32> -> vector<16x16x4xf32>
    "tpu.trace_stop"() : () -> ()
    %45 = arith.addf %40, %44 : vector<16x16x4xf32>
    %46 = vector.extract_strided_slice %9 {offsets = [2, 1, 0], sizes = [16, 16, 4], strides = [1, 1, 1]} : vector<18x18x4xf32> to vector<16x16x4xf32>
    %c7 = arith.constant 7 : index
    %c0_44 = arith.constant 0 : index
    %c0_45 = arith.constant 0 : index
    %47 = vector.load %arg2[%c7, %c0_44, %c0_45] : memref<9x4x4xf32, #tpu.memory_space<vmem>>, vector<1x4x4xf32>
    %48 = vector.shape_cast %47 : vector<1x4x4xf32> to vector<4x4xf32>
    "tpu.trace_start"() <{level = 10 : i32, message = "hwk,ko->hwo"}> : () -> ()
    %cst_46 = arith.constant dense<0.000000e+00> : vector<16x16x4xf32>
    %49 = tpu.matmul %46, %48, %cst_46 {dimension_numbers = #tpu.dot_dimension_numbers<[2], [0], [0, 1], [1], [0, 0, 0, 1, 1, 1], [], []>} : vector<16x16x4xf32>, vector<4x4xf32>, vector<16x16x4xf32> -> vector<16x16x4xf32>
    "tpu.trace_stop"() : () -> ()
    %50 = arith.addf %45, %49 : vector<16x16x4xf32>
    %51 = vector.extract_strided_slice %9 {offsets = [2, 2, 0], sizes = [16, 16, 4], strides = [1, 1, 1]} : vector<18x18x4xf32> to vector<16x16x4xf32>
    %c8 = arith.constant 8 : index
    %c0_47 = arith.constant 0 : index
    %c0_48 = arith.constant 0 : index
    %52 = vector.load %arg2[%c8, %c0_47, %c0_48] : memref<9x4x4xf32, #tpu.memory_space<vmem>>, vector<1x4x4xf32>
    %53 = vector.shape_cast %52 : vector<1x4x4xf32> to vector<4x4xf32>
    "tpu.trace_start"() <{level = 10 : i32, message = "hwk,ko->hwo"}> : () -> ()
    %cst_49 = arith.constant dense<0.000000e+00> : vector<16x16x4xf32>
    %54 = tpu.matmul %51, %53, %cst_49 {dimension_numbers = #tpu.dot_dimension_numbers<[2], [0], [0, 1], [1], [0, 0, 0, 1, 1, 1], [], []>} : vector<16x16x4xf32>, vector<4x4xf32>, vector<16x16x4xf32> -> vector<16x16x4xf32>
    "tpu.trace_stop"() : () -> ()
    %55 = arith.addf %50, %54 : vector<16x16x4xf32>
    %c0_50 = arith.constant 0 : index
    %c0_51 = arith.constant 0 : index
    %56 = vector.load %arg3[%c0_50, %c0_51] : memref<1x4xf32, #tpu.memory_space<vmem>>, vector<1x4xf32>
    %57 = vector.shape_cast %56 : vector<1x4xf32> to vector<1x1x4xf32>
    %58 = vector.broadcast %57 : vector<1x1x4xf32> to vector<16x16x4xf32>
    %59 = arith.mulf %55, %58 : vector<16x16x4xf32>
    %c0_52 = arith.constant 0 : index
    %c0_53 = arith.constant 0 : index
    %60 = vector.load %arg4[%c0_52, %c0_53] : memref<1x4xf32, #tpu.memory_space<vmem>>, vector<1x4xf32>
    %61 = vector.shape_cast %60 : vector<1x4xf32> to vector<1x1x4xf32>
    %62 = vector.broadcast %61 : vector<1x1x4xf32> to vector<16x16x4xf32>
    %63 = arith.addf %59, %62 : vector<16x16x4xf32>
    %64 = arith.negf %63 : vector<16x16x4xf32>
    %65 = math.exp %64 : vector<16x16x4xf32>
    %cst_54 = arith.constant 1.000000e+00 : f32
    %66 = vector.broadcast %cst_54 : f32 to vector<16x16x4xf32>
    %67 = arith.addf %66, %65 : vector<16x16x4xf32>
    %68 = arith.divf %66, %67 : vector<16x16x4xf32>
    %69 = arith.mulf %63, %68 : vector<16x16x4xf32>
    %cst_55 = arith.constant 0xFF800000 : f32
    %70 = vector.broadcast %cst_55 : f32 to vector<2x20x4xf32>
    %cst_56 = arith.constant 0xFF800000 : f32
    %71 = vector.broadcast %cst_56 : f32 to vector<16x2x4xf32>
    %c0_57 = arith.constant 0 : index
    %c0_58 = arith.constant 0 : index
    %c0_59 = arith.constant 0 : index
    %72 = vector.load %arg10[%c0_57, %c0_58, %c0_59] : memref<20x20x4xf32, #tpu.memory_space<vmem>>, vector<2x20x4xf32>
    tpu.vector_store %arg10[%c0_57, %c0_58, %c0_59], %70 {strides = array<i32>} : memref<20x20x4xf32, #tpu.memory_space<vmem>>, vector<2x20x4xf32>,
    %c18 = arith.constant 18 : index
    %c0_60 = arith.constant 0 : index
    %c0_61 = arith.constant 0 : index
    %73 = vector.load %arg10[%c18, %c0_60, %c0_61] : memref<20x20x4xf32, #tpu.memory_space<vmem>>, vector<2x20x4xf32>
    tpu.vector_store %arg10[%c18, %c0_60, %c0_61], %70 {strides = array<i32>} : memref<20x20x4xf32, #tpu.memory_space<vmem>>, vector<2x20x4xf32>,
    %c2_62 = arith.constant 2 : index
    %c0_63 = arith.constant 0 : index
    %c0_64 = arith.constant 0 : index
    %74 = vector.load %arg10[%c2_62, %c0_63, %c0_64] : memref<20x20x4xf32, #tpu.memory_space<vmem>>, vector<16x2x4xf32>
    tpu.vector_store %arg10[%c2_62, %c0_63, %c0_64], %71 {strides = array<i32>} : memref<20x20x4xf32, #tpu.memory_space<vmem>>, vector<16x2x4xf32>,
    %c2_65 = arith.constant 2 : index
    %c18_66 = arith.constant 18 : index
    %c0_67 = arith.constant 0 : index
    %75 = vector.load %arg10[%c2_65, %c18_66, %c0_67] : memref<20x20x4xf32, #tpu.memory_space<vmem>>, vector<16x2x4xf32>
    tpu.vector_store %arg10[%c2_65, %c18_66, %c0_67], %71 {strides = array<i32>} : memref<20x20x4xf32, #tpu.memory_space<vmem>>, vector<16x2x4xf32>,
    %c2_68 = arith.constant 2 : index
    %c2_69 = arith.constant 2 : index
    %c0_70 = arith.constant 0 : index
    %76 = vector.load %arg10[%c2_68, %c2_69, %c0_70] : memref<20x20x4xf32, #tpu.memory_space<vmem>>, vector<16x16x4xf32>
    tpu.vector_store %arg10[%c2_68, %c2_69, %c0_70], %69 {strides = array<i32>} : memref<20x20x4xf32, #tpu.memory_space<vmem>>, vector<16x16x4xf32>,
    %c0_71 = arith.constant 0 : index
    %c0_72 = arith.constant 0 : index
    %c0_73 = arith.constant 0 : index
    %77 = vector.load %arg10[%c0_71, %c0_72, %c0_73] : memref<20x20x4xf32, #tpu.memory_space<vmem>>, vector<20x20x4xf32>
    %78 = vector.extract_strided_slice %77 {offsets = [0, 0, 0], sizes = [20, 16, 4], strides = [1, 1, 1]} : vector<20x20x4xf32> to vector<20x16x4xf32>
    %79 = vector.extract_strided_slice %77 {offsets = [0, 1, 0], sizes = [20, 16, 4], strides = [1, 1, 1]} : vector<20x20x4xf32> to vector<20x16x4xf32>
    %80 = arith.maximumf %78, %79 : vector<20x16x4xf32>
    %81 = vector.extract_strided_slice %77 {offsets = [0, 2, 0], sizes = [20, 16, 4], strides = [1, 1, 1]} : vector<20x20x4xf32> to vector<20x16x4xf32>
    %82 = arith.maximumf %80, %81 : vector<20x16x4xf32>
    %83 = vector.extract_strided_slice %77 {offsets = [0, 3, 0], sizes = [20, 16, 4], strides = [1, 1, 1]} : vector<20x20x4xf32> to vector<20x16x4xf32>
    %84 = arith.maximumf %82, %83 : vector<20x16x4xf32>
    %85 = vector.extract_strided_slice %77 {offsets = [0, 4, 0], sizes = [20, 16, 4], strides = [1, 1, 1]} : vector<20x20x4xf32> to vector<20x16x4xf32>
    %86 = arith.maximumf %84, %85 : vector<20x16x4xf32>
    %87 = vector.extract_strided_slice %86 {offsets = [0, 0, 0], sizes = [16, 16, 4], strides = [1, 1, 1]} : vector<20x16x4xf32> to vector<16x16x4xf32>
    %88 = vector.extract_strided_slice %86 {offsets = [1, 0, 0], sizes = [16, 16, 4], strides = [1, 1, 1]} : vector<20x16x4xf32> to vector<16x16x4xf32>
    %89 = arith.maximumf %87, %88 : vector<16x16x4xf32>
    %90 = vector.extract_strided_slice %86 {offsets = [2, 0, 0], sizes = [16, 16, 4], strides = [1, 1, 1]} : vector<20x16x4xf32> to vector<16x16x4xf32>
    %91 = arith.maximumf %89, %90 : vector<16x16x4xf32>
    %92 = vector.extract_strided_slice %86 {offsets = [3, 0, 0], sizes = [16, 16, 4], strides = [1, 1, 1]} : vector<20x16x4xf32> to vector<16x16x4xf32>
    %93 = arith.maximumf %91, %92 : vector<16x16x4xf32>
    %94 = vector.extract_strided_slice %86 {offsets = [4, 0, 0], sizes = [16, 16, 4], strides = [1, 1, 1]} : vector<20x16x4xf32> to vector<16x16x4xf32>
    %95 = arith.maximumf %93, %94 : vector<16x16x4xf32>
    %c2_74 = arith.constant 2 : index
    %c2_75 = arith.constant 2 : index
    %c0_76 = arith.constant 0 : index
    %96 = vector.load %arg10[%c2_74, %c2_75, %c0_76] : memref<20x20x4xf32, #tpu.memory_space<vmem>>, vector<16x16x4xf32>
    tpu.vector_store %arg10[%c2_74, %c2_75, %c0_76], %95 {strides = array<i32>} : memref<20x20x4xf32, #tpu.memory_space<vmem>>, vector<16x16x4xf32>,
    %c0_77 = arith.constant 0 : index
    %c0_78 = arith.constant 0 : index
    %c0_79 = arith.constant 0 : index
    %97 = vector.load %arg10[%c0_77, %c0_78, %c0_79] : memref<20x20x4xf32, #tpu.memory_space<vmem>>, vector<20x20x4xf32>
    %98 = vector.extract_strided_slice %97 {offsets = [0, 0, 0], sizes = [20, 16, 4], strides = [1, 1, 1]} : vector<20x20x4xf32> to vector<20x16x4xf32>
    %99 = vector.extract_strided_slice %97 {offsets = [0, 1, 0], sizes = [20, 16, 4], strides = [1, 1, 1]} : vector<20x20x4xf32> to vector<20x16x4xf32>
    %100 = arith.maximumf %98, %99 : vector<20x16x4xf32>
    %101 = vector.extract_strided_slice %97 {offsets = [0, 2, 0], sizes = [20, 16, 4], strides = [1, 1, 1]} : vector<20x20x4xf32> to vector<20x16x4xf32>
    %102 = arith.maximumf %100, %101 : vector<20x16x4xf32>
    %103 = vector.extract_strided_slice %97 {offsets = [0, 3, 0], sizes = [20, 16, 4], strides = [1, 1, 1]} : vector<20x20x4xf32> to vector<20x16x4xf32>
    %104 = arith.maximumf %102, %103 : vector<20x16x4xf32>
    %105 = vector.extract_strided_slice %97 {offsets = [0, 4, 0], sizes = [20, 16, 4], strides = [1, 1, 1]} : vector<20x20x4xf32> to vector<20x16x4xf32>
    %106 = arith.maximumf %104, %105 : vector<20x16x4xf32>
    %107 = vector.extract_strided_slice %106 {offsets = [0, 0, 0], sizes = [16, 16, 4], strides = [1, 1, 1]} : vector<20x16x4xf32> to vector<16x16x4xf32>
    %108 = vector.extract_strided_slice %106 {offsets = [1, 0, 0], sizes = [16, 16, 4], strides = [1, 1, 1]} : vector<20x16x4xf32> to vector<16x16x4xf32>
    %109 = arith.maximumf %107, %108 : vector<16x16x4xf32>
    %110 = vector.extract_strided_slice %106 {offsets = [2, 0, 0], sizes = [16, 16, 4], strides = [1, 1, 1]} : vector<20x16x4xf32> to vector<16x16x4xf32>
    %111 = arith.maximumf %109, %110 : vector<16x16x4xf32>
    %112 = vector.extract_strided_slice %106 {offsets = [3, 0, 0], sizes = [16, 16, 4], strides = [1, 1, 1]} : vector<20x16x4xf32> to vector<16x16x4xf32>
    %113 = arith.maximumf %111, %112 : vector<16x16x4xf32>
    %114 = vector.extract_strided_slice %106 {offsets = [4, 0, 0], sizes = [16, 16, 4], strides = [1, 1, 1]} : vector<20x16x4xf32> to vector<16x16x4xf32>
    %115 = arith.maximumf %113, %114 : vector<16x16x4xf32>
    %c2_80 = arith.constant 2 : index
    %c2_81 = arith.constant 2 : index
    %c0_82 = arith.constant 0 : index
    %116 = vector.load %arg10[%c2_80, %c2_81, %c0_82] : memref<20x20x4xf32, #tpu.memory_space<vmem>>, vector<16x16x4xf32>
    tpu.vector_store %arg10[%c2_80, %c2_81, %c0_82], %115 {strides = array<i32>} : memref<20x20x4xf32, #tpu.memory_space<vmem>>, vector<16x16x4xf32>,
    %c0_83 = arith.constant 0 : index
    %c0_84 = arith.constant 0 : index
    %c0_85 = arith.constant 0 : index
    %117 = vector.load %arg10[%c0_83, %c0_84, %c0_85] : memref<20x20x4xf32, #tpu.memory_space<vmem>>, vector<20x20x4xf32>
    %118 = vector.extract_strided_slice %117 {offsets = [0, 0, 0], sizes = [20, 16, 4], strides = [1, 1, 1]} : vector<20x20x4xf32> to vector<20x16x4xf32>
    %119 = vector.extract_strided_slice %117 {offsets = [0, 1, 0], sizes = [20, 16, 4], strides = [1, 1, 1]} : vector<20x20x4xf32> to vector<20x16x4xf32>
    %120 = arith.maximumf %118, %119 : vector<20x16x4xf32>
    %121 = vector.extract_strided_slice %117 {offsets = [0, 2, 0], sizes = [20, 16, 4], strides = [1, 1, 1]} : vector<20x20x4xf32> to vector<20x16x4xf32>
    %122 = arith.maximumf %120, %121 : vector<20x16x4xf32>
    %123 = vector.extract_strided_slice %117 {offsets = [0, 3, 0], sizes = [20, 16, 4], strides = [1, 1, 1]} : vector<20x20x4xf32> to vector<20x16x4xf32>
    %124 = arith.maximumf %122, %123 : vector<20x16x4xf32>
    %125 = vector.extract_strided_slice %117 {offsets = [0, 4, 0], sizes = [20, 16, 4], strides = [1, 1, 1]} : vector<20x20x4xf32> to vector<20x16x4xf32>
    %126 = arith.maximumf %124, %125 : vector<20x16x4xf32>
    %127 = vector.extract_strided_slice %126 {offsets = [0, 0, 0], sizes = [16, 16, 4], strides = [1, 1, 1]} : vector<20x16x4xf32> to vector<16x16x4xf32>
    %128 = vector.extract_strided_slice %126 {offsets = [1, 0, 0], sizes = [16, 16, 4], strides = [1, 1, 1]} : vector<20x16x4xf32> to vector<16x16x4xf32>
    %129 = arith.maximumf %127, %128 : vector<16x16x4xf32>
    %130 = vector.extract_strided_slice %126 {offsets = [2, 0, 0], sizes = [16, 16, 4], strides = [1, 1, 1]} : vector<20x16x4xf32> to vector<16x16x4xf32>
    %131 = arith.maximumf %129, %130 : vector<16x16x4xf32>
    %132 = vector.extract_strided_slice %126 {offsets = [3, 0, 0], sizes = [16, 16, 4], strides = [1, 1, 1]} : vector<20x16x4xf32> to vector<16x16x4xf32>
    %133 = arith.maximumf %131, %132 : vector<16x16x4xf32>
    %134 = vector.extract_strided_slice %126 {offsets = [4, 0, 0], sizes = [16, 16, 4], strides = [1, 1, 1]} : vector<20x16x4xf32> to vector<16x16x4xf32>
    %135 = arith.maximumf %133, %134 : vector<16x16x4xf32>
    %cst_86 = arith.constant 0.000000e+00 : f32
    %136 = vector.broadcast %cst_86 : f32 to vector<1x18x16xf32>
    %cst_87 = arith.constant 0.000000e+00 : f32
    %137 = vector.broadcast %cst_87 : f32 to vector<16x1x16xf32>
    %c0_88 = arith.constant 0 : index
    %c0_89 = arith.constant 0 : index
    %c0_90 = arith.constant 0 : index
    %138 = vector.load %arg11[%c0_88, %c0_89, %c0_90] : memref<18x18x16xf32, #tpu.memory_space<vmem>>, vector<1x18x16xf32>
    tpu.vector_store %arg11[%c0_88, %c0_89, %c0_90], %136 {strides = array<i32>} : memref<18x18x16xf32, #tpu.memory_space<vmem>>, vector<1x18x16xf32>,
    %c17_91 = arith.constant 17 : index
    %c0_92 = arith.constant 0 : index
    %c0_93 = arith.constant 0 : index
    %139 = vector.load %arg11[%c17_91, %c0_92, %c0_93] : memref<18x18x16xf32, #tpu.memory_space<vmem>>, vector<1x18x16xf32>
    tpu.vector_store %arg11[%c17_91, %c0_92, %c0_93], %136 {strides = array<i32>} : memref<18x18x16xf32, #tpu.memory_space<vmem>>, vector<1x18x16xf32>,
    %c1_94 = arith.constant 1 : index
    %c0_95 = arith.constant 0 : index
    %c0_96 = arith.constant 0 : index
    %140 = vector.load %arg11[%c1_94, %c0_95, %c0_96] : memref<18x18x16xf32, #tpu.memory_space<vmem>>, vector<16x1x16xf32>
    tpu.vector_store %arg11[%c1_94, %c0_95, %c0_96], %137 {strides = array<i32>} : memref<18x18x16xf32, #tpu.memory_space<vmem>>, vector<16x1x16xf32>,
    %c1_97 = arith.constant 1 : index
    %c17_98 = arith.constant 17 : index
    %c0_99 = arith.constant 0 : index
    %141 = vector.load %arg11[%c1_97, %c17_98, %c0_99] : memref<18x18x16xf32, #tpu.memory_space<vmem>>, vector<16x1x16xf32>
    tpu.vector_store %arg11[%c1_97, %c17_98, %c0_99], %137 {strides = array<i32>} : memref<18x18x16xf32, #tpu.memory_space<vmem>>, vector<16x1x16xf32>,
    %c1_100 = arith.constant 1 : index
    %c1_101 = arith.constant 1 : index
    %c0_102 = arith.constant 0 : index
    %142 = vector.load %arg11[%c1_100, %c1_101, %c0_102] : memref<18x18x16xf32, #tpu.memory_space<vmem>>, vector<16x16x4xf32>
    tpu.vector_store %arg11[%c1_100, %c1_101, %c0_102], %69 {strides = array<i32>} : memref<18x18x16xf32, #tpu.memory_space<vmem>>, vector<16x16x4xf32>,
    %c1_103 = arith.constant 1 : index
    %c1_104 = arith.constant 1 : index
    %c4_105 = arith.constant 4 : index
    %143 = vector.load %arg11[%c1_103, %c1_104, %c4_105] : memref<18x18x16xf32, #tpu.memory_space<vmem>>, vector<16x16x4xf32>
    tpu.vector_store %arg11[%c1_103, %c1_104, %c4_105], %95 {strides = array<i32>} : memref<18x18x16xf32, #tpu.memory_space<vmem>>, vector<16x16x4xf32>,
    %c1_106 = arith.constant 1 : index
    %c1_107 = arith.constant 1 : index
    %c8_108 = arith.constant 8 : index
    %144 = vector.load %arg11[%c1_106, %c1_107, %c8_108] : memref<18x18x16xf32, #tpu.memory_space<vmem>>, vector<16x16x4xf32>
    tpu.vector_store %arg11[%c1_106, %c1_107, %c8_108], %115 {strides = array<i32>} : memref<18x18x16xf32, #tpu.memory_space<vmem>>, vector<16x16x4xf32>,
    %c1_109 = arith.constant 1 : index
    %c1_110 = arith.constant 1 : index
    %c12 = arith.constant 12 : index
    %145 = vector.load %arg11[%c1_109, %c1_110, %c12] : memref<18x18x16xf32, #tpu.memory_space<vmem>>, vector<16x16x4xf32>
    tpu.vector_store %arg11[%c1_109, %c1_110, %c12], %135 {strides = array<i32>} : memref<18x18x16xf32, #tpu.memory_space<vmem>>, vector<16x16x4xf32>,
    %c0_111 = arith.constant 0 : index
    %c0_112 = arith.constant 0 : index
    %c0_113 = arith.constant 0 : index
    %146 = vector.load %arg11[%c0_111, %c0_112, %c0_113] : memref<18x18x16xf32, #tpu.memory_space<vmem>>, vector<18x18x16xf32>
    %cst_114 = arith.constant 0.000000e+00 : f32
    %147 = vector.broadcast %cst_114 : f32 to vector<16x16x8xf32>
    %148 = vector.extract_strided_slice %146 {offsets = [0, 0, 0], sizes = [16, 16, 16], strides = [1, 1, 1]} : vector<18x18x16xf32> to vector<16x16x16xf32>
    %c0_115 = arith.constant 0 : index
    %c0_116 = arith.constant 0 : index
    %c0_117 = arith.constant 0 : index
    %149 = vector.load %arg5[%c0_115, %c0_116, %c0_117] : memref<9x16x8xf32, #tpu.memory_space<vmem>>, vector<1x16x8xf32>
    %150 = vector.shape_cast %149 : vector<1x16x8xf32> to vector<16x8xf32>
    "tpu.trace_start"() <{level = 10 : i32, message = "hwk,ko->hwo"}> : () -> ()
    %cst_118 = arith.constant dense<0.000000e+00> : vector<16x16x8xf32>
    %151 = tpu.matmul %148, %150, %cst_118 {dimension_numbers = #tpu.dot_dimension_numbers<[2], [0], [0, 1], [1], [0, 0, 0, 1, 1, 1], [], []>} : vector<16x16x16xf32>, vector<16x8xf32>, vector<16x16x8xf32> -> vector<16x16x8xf32>
    "tpu.trace_stop"() : () -> ()
    %152 = arith.addf %147, %151 : vector<16x16x8xf32>
    %153 = vector.extract_strided_slice %146 {offsets = [0, 1, 0], sizes = [16, 16, 16], strides = [1, 1, 1]} : vector<18x18x16xf32> to vector<16x16x16xf32>
    %c1_119 = arith.constant 1 : index
    %c0_120 = arith.constant 0 : index
    %c0_121 = arith.constant 0 : index
    %154 = vector.load %arg5[%c1_119, %c0_120, %c0_121] : memref<9x16x8xf32, #tpu.memory_space<vmem>>, vector<1x16x8xf32>
    %155 = vector.shape_cast %154 : vector<1x16x8xf32> to vector<16x8xf32>
    "tpu.trace_start"() <{level = 10 : i32, message = "hwk,ko->hwo"}> : () -> ()
    %cst_122 = arith.constant dense<0.000000e+00> : vector<16x16x8xf32>
    %156 = tpu.matmul %153, %155, %cst_122 {dimension_numbers = #tpu.dot_dimension_numbers<[2], [0], [0, 1], [1], [0, 0, 0, 1, 1, 1], [], []>} : vector<16x16x16xf32>, vector<16x8xf32>, vector<16x16x8xf32> -> vector<16x16x8xf32>
    "tpu.trace_stop"() : () -> ()
    %157 = arith.addf %152, %156 : vector<16x16x8xf32>
    %158 = vector.extract_strided_slice %146 {offsets = [0, 2, 0], sizes = [16, 16, 16], strides = [1, 1, 1]} : vector<18x18x16xf32> to vector<16x16x16xf32>
    %c2_123 = arith.constant 2 : index
    %c0_124 = arith.constant 0 : index
    %c0_125 = arith.constant 0 : index
    %159 = vector.load %arg5[%c2_123, %c0_124, %c0_125] : memref<9x16x8xf32, #tpu.memory_space<vmem>>, vector<1x16x8xf32>
    %160 = vector.shape_cast %159 : vector<1x16x8xf32> to vector<16x8xf32>
    "tpu.trace_start"() <{level = 10 : i32, message = "hwk,ko->hwo"}> : () -> ()
    %cst_126 = arith.constant dense<0.000000e+00> : vector<16x16x8xf32>
    %161 = tpu.matmul %158, %160, %cst_126 {dimension_numbers = #tpu.dot_dimension_numbers<[2], [0], [0, 1], [1], [0, 0, 0, 1, 1, 1], [], []>} : vector<16x16x16xf32>, vector<16x8xf32>, vector<16x16x8xf32> -> vector<16x16x8xf32>
    "tpu.trace_stop"() : () -> ()
    %162 = arith.addf %157, %161 : vector<16x16x8xf32>
    %163 = vector.extract_strided_slice %146 {offsets = [1, 0, 0], sizes = [16, 16, 16], strides = [1, 1, 1]} : vector<18x18x16xf32> to vector<16x16x16xf32>
    %c3_127 = arith.constant 3 : index
    %c0_128 = arith.constant 0 : index
    %c0_129 = arith.constant 0 : index
    %164 = vector.load %arg5[%c3_127, %c0_128, %c0_129] : memref<9x16x8xf32, #tpu.memory_space<vmem>>, vector<1x16x8xf32>
    %165 = vector.shape_cast %164 : vector<1x16x8xf32> to vector<16x8xf32>
    "tpu.trace_start"() <{level = 10 : i32, message = "hwk,ko->hwo"}> : () -> ()
    %cst_130 = arith.constant dense<0.000000e+00> : vector<16x16x8xf32>
    %166 = tpu.matmul %163, %165, %cst_130 {dimension_numbers = #tpu.dot_dimension_numbers<[2], [0], [0, 1], [1], [0, 0, 0, 1, 1, 1], [], []>} : vector<16x16x16xf32>, vector<16x8xf32>, vector<16x16x8xf32> -> vector<16x16x8xf32>
    "tpu.trace_stop"() : () -> ()
    %167 = arith.addf %162, %166 : vector<16x16x8xf32>
    %168 = vector.extract_strided_slice %146 {offsets = [1, 1, 0], sizes = [16, 16, 16], strides = [1, 1, 1]} : vector<18x18x16xf32> to vector<16x16x16xf32>
    %c4_131 = arith.constant 4 : index
    %c0_132 = arith.constant 0 : index
    %c0_133 = arith.constant 0 : index
    %169 = vector.load %arg5[%c4_131, %c0_132, %c0_133] : memref<9x16x8xf32, #tpu.memory_space<vmem>>, vector<1x16x8xf32>
    %170 = vector.shape_cast %169 : vector<1x16x8xf32> to vector<16x8xf32>
    "tpu.trace_start"() <{level = 10 : i32, message = "hwk,ko->hwo"}> : () -> ()
    %cst_134 = arith.constant dense<0.000000e+00> : vector<16x16x8xf32>
    %171 = tpu.matmul %168, %170, %cst_134 {dimension_numbers = #tpu.dot_dimension_numbers<[2], [0], [0, 1], [1], [0, 0, 0, 1, 1, 1], [], []>} : vector<16x16x16xf32>, vector<16x8xf32>, vector<16x16x8xf32> -> vector<16x16x8xf32>
    "tpu.trace_stop"() : () -> ()
    %172 = arith.addf %167, %171 : vector<16x16x8xf32>
    %173 = vector.extract_strided_slice %146 {offsets = [1, 2, 0], sizes = [16, 16, 16], strides = [1, 1, 1]} : vector<18x18x16xf32> to vector<16x16x16xf32>
    %c5_135 = arith.constant 5 : index
    %c0_136 = arith.constant 0 : index
    %c0_137 = arith.constant 0 : index
    %174 = vector.load %arg5[%c5_135, %c0_136, %c0_137] : memref<9x16x8xf32, #tpu.memory_space<vmem>>, vector<1x16x8xf32>
    %175 = vector.shape_cast %174 : vector<1x16x8xf32> to vector<16x8xf32>
    "tpu.trace_start"() <{level = 10 : i32, message = "hwk,ko->hwo"}> : () -> ()
    %cst_138 = arith.constant dense<0.000000e+00> : vector<16x16x8xf32>
    %176 = tpu.matmul %173, %175, %cst_138 {dimension_numbers = #tpu.dot_dimension_numbers<[2], [0], [0, 1], [1], [0, 0, 0, 1, 1, 1], [], []>} : vector<16x16x16xf32>, vector<16x8xf32>, vector<16x16x8xf32> -> vector<16x16x8xf32>
    "tpu.trace_stop"() : () -> ()
    %177 = arith.addf %172, %176 : vector<16x16x8xf32>
    %178 = vector.extract_strided_slice %146 {offsets = [2, 0, 0], sizes = [16, 16, 16], strides = [1, 1, 1]} : vector<18x18x16xf32> to vector<16x16x16xf32>
    %c6_139 = arith.constant 6 : index
    %c0_140 = arith.constant 0 : index
    %c0_141 = arith.constant 0 : index
    %179 = vector.load %arg5[%c6_139, %c0_140, %c0_141] : memref<9x16x8xf32, #tpu.memory_space<vmem>>, vector<1x16x8xf32>
    %180 = vector.shape_cast %179 : vector<1x16x8xf32> to vector<16x8xf32>
    "tpu.trace_start"() <{level = 10 : i32, message = "hwk,ko->hwo"}> : () -> ()
    %cst_142 = arith.constant dense<0.000000e+00> : vector<16x16x8xf32>
    %181 = tpu.matmul %178, %180, %cst_142 {dimension_numbers = #tpu.dot_dimension_numbers<[2], [0], [0, 1], [1], [0, 0, 0, 1, 1, 1], [], []>} : vector<16x16x16xf32>, vector<16x8xf32>, vector<16x16x8xf32> -> vector<16x16x8xf32>
    "tpu.trace_stop"() : () -> ()
    %182 = arith.addf %177, %181 : vector<16x16x8xf32>
    %183 = vector.extract_strided_slice %146 {offsets = [2, 1, 0], sizes = [16, 16, 16], strides = [1, 1, 1]} : vector<18x18x16xf32> to vector<16x16x16xf32>
    %c7_143 = arith.constant 7 : index
    %c0_144 = arith.constant 0 : index
    %c0_145 = arith.constant 0 : index
    %184 = vector.load %arg5[%c7_143, %c0_144, %c0_145] : memref<9x16x8xf32, #tpu.memory_space<vmem>>, vector<1x16x8xf32>
    %185 = vector.shape_cast %184 : vector<1x16x8xf32> to vector<16x8xf32>
    "tpu.trace_start"() <{level = 10 : i32, message = "hwk,ko->hwo"}> : () -> ()
    %cst_146 = arith.constant dense<0.000000e+00> : vector<16x16x8xf32>
    %186 = tpu.matmul %183, %185, %cst_146 {dimension_numbers = #tpu.dot_dimension_numbers<[2], [0], [0, 1], [1], [0, 0, 0, 1, 1, 1], [], []>} : vector<16x16x16xf32>, vector<16x8xf32>, vector<16x16x8xf32> -> vector<16x16x8xf32>
    "tpu.trace_stop"() : () -> ()
    %187 = arith.addf %182, %186 : vector<16x16x8xf32>
    %188 = vector.extract_strided_slice %146 {offsets = [2, 2, 0], sizes = [16, 16, 16], strides = [1, 1, 1]} : vector<18x18x16xf32> to vector<16x16x16xf32>
    %c8_147 = arith.constant 8 : index
    %c0_148 = arith.constant 0 : index
    %c0_149 = arith.constant 0 : index
    %189 = vector.load %arg5[%c8_147, %c0_148, %c0_149] : memref<9x16x8xf32, #tpu.memory_space<vmem>>, vector<1x16x8xf32>
    %190 = vector.shape_cast %189 : vector<1x16x8xf32> to vector<16x8xf32>
    "tpu.trace_start"() <{level = 10 : i32, message = "hwk,ko->hwo"}> : () -> ()
    %cst_150 = arith.constant dense<0.000000e+00> : vector<16x16x8xf32>
    %191 = tpu.matmul %188, %190, %cst_150 {dimension_numbers = #tpu.dot_dimension_numbers<[2], [0], [0, 1], [1], [0, 0, 0, 1, 1, 1], [], []>} : vector<16x16x16xf32>, vector<16x8xf32>, vector<16x16x8xf32> -> vector<16x16x8xf32>
    "tpu.trace_stop"() : () -> ()
    %192 = arith.addf %187, %191 : vector<16x16x8xf32>
    %c0_151 = arith.constant 0 : index
    %c0_152 = arith.constant 0 : index
    %193 = vector.load %arg6[%c0_151, %c0_152] : memref<1x8xf32, #tpu.memory_space<vmem>>, vector<1x8xf32>
    %194 = vector.shape_cast %193 : vector<1x8xf32> to vector<1x1x8xf32>
    %195 = vector.broadcast %194 : vector<1x1x8xf32> to vector<16x16x8xf32>
    %196 = arith.mulf %192, %195 : vector<16x16x8xf32>
    %c0_153 = arith.constant 0 : index
    %c0_154 = arith.constant 0 : index
    %197 = vector.load %arg7[%c0_153, %c0_154] : memref<1x8xf32, #tpu.memory_space<vmem>>, vector<1x8xf32>
    %198 = vector.shape_cast %197 : vector<1x8xf32> to vector<1x1x8xf32>
    %199 = vector.broadcast %198 : vector<1x1x8xf32> to vector<16x16x8xf32>
    %200 = arith.addf %196, %199 : vector<16x16x8xf32>
    %201 = arith.negf %200 : vector<16x16x8xf32>
    %202 = math.exp %201 : vector<16x16x8xf32>
    %cst_155 = arith.constant 1.000000e+00 : f32
    %203 = vector.broadcast %cst_155 : f32 to vector<16x16x8xf32>
    %204 = arith.addf %203, %202 : vector<16x16x8xf32>
    %205 = arith.divf %203, %204 : vector<16x16x8xf32>
    %206 = arith.mulf %200, %205 : vector<16x16x8xf32>
    %c0_156 = arith.constant 0 : index
    %c0_157 = arith.constant 0 : index
    %c0_158 = arith.constant 0 : index
    %c0_159 = arith.constant 0 : index
    %207 = vector.load %arg8[%c0_156, %c0_157, %c0_158, %c0_159] : memref<1x16x16x8xf32, #tpu.memory_space<vmem>>, vector<1x16x16x8xf32>
    %208 = vector.shape_cast %207 : vector<1x16x16x8xf32> to vector<16x16x8xf32>
    %209 = vector.shape_cast %206 : vector<16x16x8xf32> to vector<1x16x16x8xf32>
    tpu.vector_store %arg8[%c0_156, %c0_157, %c0_158, %c0_159], %209 {strides = array<i32>} : memref<1x16x16x8xf32, #tpu.memory_space<vmem>>, vector<1x16x16x8xf32>,
    return
  }
  func.func @transform_0(%arg0: i32) -> (i32, i32, i32, i32) {
    %c0_i32 = arith.constant 0 : i32
    %c0_i32_0 = arith.constant 0 : i32
    %c0_i32_1 = arith.constant 0 : i32
    %c0_i32_2 = arith.constant 0 : i32
    return %arg0, %c0_i32, %c0_i32_0, %c0_i32_1 : i32, i32, i32, i32
  }
  func.func @transform_1(%arg0: i32) -> (i32, i32, i32) {
    %c0_i32 = arith.constant 0 : i32
    %c0_i32_0 = arith.constant 0 : i32
    %c0_i32_1 = arith.constant 0 : i32
    %c0_i32_2 = arith.constant 0 : i32
    return %c0_i32, %c0_i32_0, %c0_i32_1 : i32, i32, i32
  }
  func.func @transform_2(%arg0: i32) -> (i32, i32) {
    %c0_i32 = arith.constant 0 : i32
    %c0_i32_0 = arith.constant 0 : i32
    %c0_i32_1 = arith.constant 0 : i32
    return %c0_i32, %c0_i32_0 : i32, i32
  }
  func.func @transform_3(%arg0: i32) -> (i32, i32) {
    %c0_i32 = arith.constant 0 : i32
    %c0_i32_0 = arith.constant 0 : i32
    %c0_i32_1 = arith.constant 0 : i32
    return %c0_i32, %c0_i32_0 : i32, i32
  }
  func.func @transform_4(%arg0: i32) -> (i32, i32, i32) {
    %c0_i32 = arith.constant 0 : i32
    %c0_i32_0 = arith.constant 0 : i32
    %c0_i32_1 = arith.constant 0 : i32
    %c0_i32_2 = arith.constant 0 : i32
    return %c0_i32, %c0_i32_0, %c0_i32_1 : i32, i32, i32
  }
  func.func @transform_5(%arg0: i32) -> (i32, i32) {
    %c0_i32 = arith.constant 0 : i32
    %c0_i32_0 = arith.constant 0 : i32
    %c0_i32_1 = arith.constant 0 : i32
    return %c0_i32, %c0_i32_0 : i32, i32
  }
  func.func @transform_6(%arg0: i32) -> (i32, i32) {
    %c0_i32 = arith.constant 0 : i32
    %c0_i32_0 = arith.constant 0 : i32
    %c0_i32_1 = arith.constant 0 : i32
    return %c0_i32, %c0_i32_0 : i32, i32
  }
  func.func @transform_7(%arg0: i32) -> (i32, i32, i32, i32) {
    %c0_i32 = arith.constant 0 : i32
    %c0_i32_0 = arith.constant 0 : i32
    %c0_i32_1 = arith.constant 0 : i32
    %c0_i32_2 = arith.constant 0 : i32
    return %arg0, %c0_i32, %c0_i32_0, %c0_i32_1 : i32, i32, i32, i32
  }
}

</mosaic_0001>

<bundles_post_ra>
// kernel: sppf_bottleneck.1
= control target key start
LH: loop header
LB: loop body
LE: loop exit
PB: predicated region body
PF: predicated region fallthrough
CT: control target
= control target key end

     0   :  { %s12805_s24 = smov 0   ;;  %s19516_s0 = inlined_call_operand.vmem [shape: f32[2,16,16,4], index: 0, kind: input, shape index: {}]   ;;  %s19517_s1 = inlined_call_operand.vmem [shape: f32[9,4,4], index: 1, kind: input, shape index: {}]   ;;  %s19518_s2 = inlined_call_operand.vmem [shape: f32[1,4], index: 2, kind: input, shape index: {}]   ;;  %s19519_s3 = inlined_call_operand.vmem [shape: f32[1,4], index: 3, kind: input, shape index: {}]   ;;  %s19520_s4 = inlined_call_operand.vmem [shape: f32[9,16,8], index: 4, kind: input, shape index: {}]   ;;  %s19521_s5 = inlined_call_operand.vmem [shape: f32[1,8], index: 5, kind: input, shape index: {}]   ;;  %s19522_s6 = inlined_call_operand.vmem [shape: f32[1,8], index: 6, kind: input, shape index: {}]   ;;  %s19523_s7 = inlined_call_operand.vmem [shape: f32[2,16,16,8], index: 7, kind: output, shape index: {}]  }
   0x1 LB: > { %s10263_s25 = sadd.s32 4294967295, %s12758_s24   ;;  %p10267_p0 = scmp.ge.s32.totalorder %s12758_s24, 1  ;;  %s12758_s24 = sphi %s12805_s24, %s17_s24  }
   0x2   : > { %p237_p1 = scmp.lt.s32.totalorder %s12758_s24, 3 }
   0x4   : > { %p238_p2 = pnand %p10267_p0, %p237_p1 }
   0x6   : > { %241 = sbr.rel (%p238_p2) target bundleno = 1694 (0x69e), region = 48 }
   0xb   : > { %v10272_v0 = vld [vmem:[%s19517_s1 + $0x4] sm:$0xf]  ;;  %vm636_vm0 = vcmask 1043456   ;;  %v440_v1 = vld [vmem:[%s19517_s1] sm:$0xf]  ;;  %vm279_vm1 = vcmask 31744  }
   0xc   : > { %11556 = vmatprep.subr.msk.mxu0 %vm636_vm0, %v10272_v0  ;;  %11606 = vmatprep.subr.msk.mxu1 %vm636_vm0, %v440_v1  ;;  %vm282_vm2 = vcmask 25600   ;;  %v12824_v2 = vld [vmem:[%s19517_s1 + $0x8] sm:$0xf]  ;;  %p269_p3 = scmp.lt.s32.totalorder %s10263_s25, 1  ;;  %v19524_v3 = vmov 0.0   ;;  %vm289_vm3 = vcmask 24576  }
   0xd   : > { %11557 = vmatpush3.msk.msra.mxu0 %vm636_vm0, %v10272_v0  ;;  %280 = vst.msk [vmem:[#allocation2] sm:$0xff] %vm279_vm1, %v19524_v3  ;;  %281 = vst.msk [vmem:[#allocation2 + $0x8] sm:$0xff] %vm279_vm1, %v19524_v3  ;;  %11607 = vmatpush3.msk.msra.mxu1 %vm636_vm0, %v440_v1  ;;  %v12843_v4 = vld [vmem:[%s19517_s1 + $0xc] sm:$0xf]  ;;  %vm491_vm4 = vcmask 1046528   ;;  %vm1159_vm5 = vcmask 1045504  }
   0xe   : > { %285 = vst.msk [vmem:[#allocation2 + $0x198] sm:$0xff] %vm279_vm1, %v19524_v3  ;;  %286 = vst.msk [vmem:[#allocation2 + $0x1a0] sm:$0xff] %vm279_vm1, %v19524_v3  ;;  %11656 = vmatprep.subr.msk.mxu0 %vm636_vm0, %v12824_v2  ;;  %s20260_s25 = smov (!%p269_p3, %s10263_s25), 1  ;;  %11706 = vmatprep.subr.msk.mxu1 %vm636_vm0, %v12843_v4  ;;  %v12947_v25 = vld [vmem:[%s19517_s1 + $0x10] sm:$0xf]  ;;  %vm3490_vm6 = vcmask 27648  }
   0xf   : > { %283 = vst.msk [vmem:[#allocation2 + $0x10] sm:$0x3] %vm282_vm2, %v19524_v3  ;;  %287 = vst.msk [vmem:[#allocation2 + $0x1a8] sm:$0x3] %vm282_vm2, %v19524_v3  ;;  %s10951_s11 = sshll.u32 %s20260_s25, 8  ;;  %vm4047_vm7 = vcmask 1044480  }
  0x10   : > { %290 = vst.msk [vmem:[#allocation2 + $0x18] sm:$0x1] %vm289_vm3, %v19524_v3  ;;  %291 = vst.msk [vmem:[#allocation2 + $0x30] sm:$0x1] %vm289_vm3, %v19524_v3  ;;  %s12921_s14 = scalar_lea.vmem %s19516_s0, %s10951_s11  ;;  %s12762_s8 = smov 4   ;;  %vm6739_vm8 = vcmask 64544  }
  0x11   : > { %292 = vst.msk [vmem:[#allocation2 + $0x48] sm:$0x1] %vm289_vm3, %v19524_v3  ;;  %293 = vst.msk [vmem:[#allocation2 + $0x60] sm:$0x1] %vm289_vm3, %v19524_v3  ;;  %v322_v5 = vld [vmem:[%s12921_s14] sm:$0xff]  ;;  %v323_v6 = vld [vmem:[%s12921_s14 + $0x8] sm:$0xff]  ;;  %s19319_s16 = scalar_lea.vmem %s19523_s7, %s10951_s11 }
  0x12   : > { %294 = vst.msk [vmem:[#allocation2 + $0x78] sm:$0x1] %vm289_vm3, %v19524_v3  ;;  %295 = vst.msk [vmem:[#allocation2 + $0x90] sm:$0x1] %vm289_vm3, %v19524_v3  ;;  %v324_v7 = vld [vmem:[%s12921_s14 + $0x10] sm:$0xff]  ;;  %v325_v8 = vld [vmem:[%s12921_s14 + $0x18] sm:$0xff] }
  0x13   : > { %296 = vst.msk [vmem:[#allocation2 + $0xa8] sm:$0x1] %vm289_vm3, %v19524_v3  ;;  %297 = vst.msk [vmem:[#allocation2 + $0xc0] sm:$0x1] %vm289_vm3, %v19524_v3  ;;  %v326_v9 = vld [vmem:[%s12921_s14 + $0x20] sm:$0xff]  ;;  %v327_v10 = vld [vmem:[%s12921_s14 + $0x28] sm:$0xff] }
  0x14   : > { %298 = vst.msk [vmem:[#allocation2 + $0xd8] sm:$0x1] %vm289_vm3, %v19524_v3  ;;  %299 = vst.msk [vmem:[#allocation2 + $0xf0] sm:$0x1] %vm289_vm3, %v19524_v3  ;;  %v386_v11 = vld [vmem:[#allocation2] sm:$0xff]  ;;  %v387_v12 = vld [vmem:[#allocation2 + $0x8] sm:$0xff] }
  0x15   : > { %300 = vst.msk [vmem:[#allocation2 + $0x108] sm:$0x1] %vm289_vm3, %v19524_v3  ;;  %301 = vst.msk [vmem:[#allocation2 + $0x120] sm:$0x1] %vm289_vm3, %v19524_v3  ;;  %v492_v14 = vrot.slane %v386_v11, 1  ;;  %v493_v15 = vrot.slane %v387_v12, 1  ;;  %11608 = vmatprep.mubr.msk.f32.mxu1 %vm279_vm1, %v386_v11 }
  0x16   : > { %302 = vst.msk [vmem:[#allocation2 + $0x138] sm:$0x1] %vm289_vm3, %v19524_v3  ;;  %303 = vst.msk [vmem:[#allocation2 + $0x150] sm:$0x1] %vm289_vm3, %v19524_v3  ;;  %v388_v13 = vld [vmem:[#allocation2 + $0x10] sm:$0x3]  ;;  %11609 = vmatmul.mubr.msk.f32.vlgmr.msra.gmra.mxu1 %vm279_vm1, %v387_v12 }
  0x17   : > { %304 = vst.msk [vmem:[#allocation2 + $0x168] sm:$0x1] %vm289_vm3, %v19524_v3  ;;  %305 = vst.msk [vmem:[#allocation2 + $0x180] sm:$0x1] %vm289_vm3, %v19524_v3  ;;  %v495_v16 = vrot.slane %v388_v13, 1  ;;  %v1163_v17 = vrot.slane %v388_v13, 2  ;;  %v494_v26 = vsel %vm491_vm4, %v492_v14, %v493_v15  ;;  %11707 = vmatpush3.msk.msra.mxu1 %vm636_vm0, %v12843_v4 }
  0x18   : > { %306 = vst.msk [vmem:[#allocation2 + $0x29] sm:$0x1] %vm289_vm3, %v19524_v3  ;;  %307 = vst.msk [vmem:[#allocation2 + $0x41] sm:$0x1] %vm289_vm3, %v19524_v3  ;;  %v328_v18 = vld [vmem:[%s12921_s14 + $0x30] sm:$0xff]  ;;  %v329_v19 = vld [vmem:[%s12921_s14 + $0x38] sm:$0xff]  ;;  %11558 = vmatprep.mubr.msk.f32.mxu0 %vm279_vm1, %v494_v26 }
  0x19   : > { %308 = vst.msk [vmem:[#allocation2 + $0x59] sm:$0x1] %vm289_vm3, %v19524_v3  ;;  %309 = vst.msk [vmem:[#allocation2 + $0x71] sm:$0x1] %vm289_vm3, %v19524_v3  ;;  %v330_v20 = vld [vmem:[%s12921_s14 + $0x40] sm:$0xff]  ;;  %v331_v21 = vld [vmem:[%s12921_s14 + $0x48] sm:$0xff]  ;;  %v496_v27 = vsel %vm491_vm4, %v493_v15, %v495_v16 }
  0x1a   : > { %310 = vst.msk [vmem:[#allocation2 + $0x89] sm:$0x1] %vm289_vm3, %v19524_v3  ;;  %311 = vst.msk [vmem:[#allocation2 + $0xa1] sm:$0x1] %vm289_vm3, %v19524_v3  ;;  %v332_v22 = vld [vmem:[%s12921_s14 + $0x50] sm:$0xff]  ;;  %v1160_v23 = vrot.slane %v386_v11, 2  ;;  %11559 = vmatmul.mubr.msk.f32.vlgmr.msra.gmra.mxu0 %vm279_vm1, %v496_v27 }
  0x1b   : > { %312 = vst.msk [vmem:[#allocation2 + $0xb9] sm:$0x1] %vm289_vm3, %v19524_v3  ;;  %313 = vst.msk [vmem:[#allocation2 + $0xd1] sm:$0x1] %vm289_vm3, %v19524_v3  ;;  %v1161_v24 = vrot.slane %v387_v12, 2  ;;  %v333_v28 = vld [vmem:[%s12921_s14 + $0x58] sm:$0xff]  ;;  %11657 = vmatpush3.msk.msra.mxu0 %vm636_vm0, %v12824_v2 }
  0x1c   : > { %314 = vst.msk [vmem:[#allocation2 + $0xe9] sm:$0x1] %vm289_vm3, %v19524_v3  ;;  %315 = vst.msk [vmem:[#allocation2 + $0x101] sm:$0x1] %vm289_vm3, %v19524_v3  ;;  %v334_v29 = vld [vmem:[%s12921_s14 + $0x60] sm:$0xff]  ;;  %v335_v30 = vld [vmem:[%s12921_s14 + $0x68] sm:$0xff]  ;;  %11756 = vmatprep.subr.msk.mxu0 %vm636_vm0, %v12947_v25 }
  0x1d   : > { %316 = vst.msk [vmem:[#allocation2 + $0x119] sm:$0x1] %vm289_vm3, %v19524_v3  ;;  %317 = vst.msk [vmem:[#allocation2 + $0x131] sm:$0x1] %vm289_vm3, %v19524_v3  ;;  %v336_v31 = vld [vmem:[%s12921_s14 + $0x70] sm:$0xff]  ;;  %v337_v32 = vld [vmem:[%s12921_s14 + $0x78] sm:$0xff]  ;;  %v12967_v34 = vsel %vm1159_vm5, %v1160_v23, %v1161_v24  ;;  %v12970_v35 = vsel %vm1159_vm5, %v1161_v24, %v1163_v17 }
  0x1e   : > { %318 = vst.msk [vmem:[#allocation2 + $0x149] sm:$0x1] %vm289_vm3, %v19524_v3  ;;  %319 = vst.msk [vmem:[#allocation2 + $0x161] sm:$0x1] %vm289_vm3, %v19524_v3  ;;  %v338_v33 = vld [vmem:[%s12921_s14 + $0x80] sm:$0xff]  ;;  %v339_v36 = vld [vmem:[%s12921_s14 + $0x88] sm:$0xff] }
  0x1f   : > { %320 = vst.msk [vmem:[#allocation2 + $0x179] sm:$0x1] %vm289_vm3, %v19524_v3  ;;  %321 = vst.msk [vmem:[#allocation2 + $0x191] sm:$0x1] %vm289_vm3, %v19524_v3  ;;  %v340_v37 = vld [vmem:[%s12921_s14 + $0x90] sm:$0xff]  ;;  %v341_v38 = vld [vmem:[%s12921_s14 + $0x98] sm:$0xff] }
  0x20   : > { %354 = vst.msk [vmem:[#allocation2 + $0x19] sm:$0xff] %vm279_vm1, %v322_v5  ;;  %355 = vst.msk [vmem:[#allocation2 + $0x21] sm:$0xff] %vm279_vm1, %v323_v6  ;;  %v343_v15 = vld [vmem:[%s12921_s14 + $0xa8] sm:$0xff]  ;;  %v344_v16 = vld [vmem:[%s12921_s14 + $0xb0] sm:$0xff]  ;;  %s12763_s9 = smov 8   ;;  %s12764_s10 = smov 12  }
  0x21   : > { %356 = vst.msk [vmem:[#allocation2 + $0x31] sm:$0xff] %vm279_vm1, %v324_v7  ;;  %357 = vst.msk [vmem:[#allocation2 + $0x39] sm:$0xff] %vm279_vm1, %v325_v8  ;;  %v345_v17 = vld [vmem:[%s12921_s14 + $0xb8] sm:$0xff]  ;;  %v350_v26 = vld [vmem:[%s12921_s14 + $0xe0] sm:$0xff]  ;;  %vm6900_vm9 = vcmask 97344   ;;  %vm7061_vm10 = vcmask 130144  }
  0x22   : > { %358 = vst.msk [vmem:[#allocation2 + $0x49] sm:$0xff] %vm279_vm1, %v326_v9  ;;  %359 = vst.msk [vmem:[#allocation2 + $0x51] sm:$0xff] %vm279_vm1, %v327_v10  ;;  %v342_v9 = vld [vmem:[%s12921_s14 + $0xa0] sm:$0xff]  ;;  %v351_v27 = vld [vmem:[%s12921_s14 + $0xe8] sm:$0xff]  ;;  %vm6536_vm11 = vcmask 130048   ;;  %vm6546_vm12 = vcmask 122880  }
  0x23   : > { %360 = vst.msk [vmem:[#allocation2 + $0x61] sm:$0xff] %vm279_vm1, %v328_v18  ;;  %361 = vst.msk [vmem:[#allocation2 + $0x69] sm:$0xff] %vm279_vm1, %v329_v19  ;;  %v346_v18 = vld [vmem:[%s12921_s14 + $0xc0] sm:$0xff]  ;;  %vm6539_vm13 = vcmask 123904   ;;  %vm10175_vm14 = vcmask 64512  }
  0x24   : > { %362 = vst.msk [vmem:[#allocation2 + $0x79] sm:$0xff] %vm279_vm1, %v330_v20  ;;  %363 = vst.msk [vmem:[#allocation2 + $0x81] sm:$0xff] %vm279_vm1, %v331_v21  ;;  %v347_v20 = vld [vmem:[%s12921_s14 + $0xc8] sm:$0xff]  ;;  %v348_v21 = vld [vmem:[%s12921_s14 + $0xd0] sm:$0xff] }
  0x25   : > { %364 = vst.msk [vmem:[#allocation2 + $0x91] sm:$0xff] %vm279_vm1, %v332_v22  ;;  %365 = vst.msk [vmem:[#allocation2 + $0x99] sm:$0xff] %vm279_vm1, %v333_v28  ;;  %v349_v22 = vld [vmem:[%s12921_s14 + $0xd8] sm:$0xff]  ;;  %v352_v28 = vld [vmem:[%s12921_s14 + $0xf0] sm:$0xff] }
  0x26   : > { %366 = vst.msk [vmem:[#allocation2 + $0xa9] sm:$0xff] %vm279_vm1, %v334_v29  ;;  %367 = vst.msk [vmem:[#allocation2 + $0xb1] sm:$0xff] %vm279_vm1, %v335_v30 }
  0x27   : > { %368 = vst.msk [vmem:[#allocation2 + $0xc1] sm:$0xff] %vm279_vm1, %v336_v31  ;;  %369 = vst.msk [vmem:[#allocation2 + $0xc9] sm:$0xff] %vm279_vm1, %v337_v32  ;;  %v12981_v39 = vld [vmem:[#allocation2 + $0x18] sm:$0xff]  ;;  %v12983_v40 = vld [vmem:[#allocation2 + $0x20] sm:$0xff] }
  0x28   : > { %370 = vst.msk [vmem:[#allocation2 + $0xd9] sm:$0xff] %vm279_vm1, %v338_v33  ;;  %v12985_v41 = vld [vmem:[#allocation2 + $0x28] sm:$0x3]  ;;  %371 = vst.msk [vmem:[#allocation2 + $0xe1] sm:$0xff] %vm279_vm1, %v339_v36  ;;  %v497_v42 = vrot.slane %v12981_v39, 1  ;;  %v498_v43 = vrot.slane %v12983_v40, 1  ;;  %11611 = vmatprep.mubr.msk.f32.mxu1 %vm279_vm1, %v12981_v39 }
  0x29   : > { %372 = vst.msk [vmem:[#allocation2 + $0xf1] sm:$0xff] %vm279_vm1, %v340_v37  ;;  %373 = vst.msk [vmem:[#allocation2 + $0xf9] sm:$0xff] %vm279_vm1, %v341_v38  ;;  %v500_v44 = vrot.slane %v12985_v41, 1  ;;  %v12995_v45 = vld [vmem:[#allocation2 + $0x30] sm:$0xff]  ;;  %v12997_v46 = vld [vmem:[#allocation2 + $0x38] sm:$0xff]  ;;  %11612 = vmatmul.mubr.msk.f32.gmra.mxu1 %vm279_vm1, %v12983_v40 }
  0x2a   : > { %v12999_v47 = vld [vmem:[#allocation2 + $0x48] sm:$0xff]  ;;  %v502_v48 = vrot.slane %v12995_v45, 1  ;;  %v503_v49 = vrot.slane %v12997_v46, 1  ;;  %v13007_v50 = vld [vmem:[#allocation2 + $0x40] sm:$0x3]  ;;  %v13009_v51 = vld [vmem:[#allocation2 + $0x50] sm:$0xff]  ;;  %v13013_v53 = vsel %vm491_vm4, %v497_v42, %v498_v43  ;;  %11614 = vmatprep.mubr.msk.f32.mxu1 %vm279_vm1, %v12995_v45 }
  0x2b   : > { %v507_v52 = vrot.slane %v12999_v47, 1  ;;  %v13016_v54 = vsel %vm491_vm4, %v498_v43, %v500_v44  ;;  %v505_v55 = vrot.slane %v13007_v50, 1  ;;  %v508_v56 = vrot.slane %v13009_v51, 1  ;;  %v13022_v57 = vld [vmem:[#allocation2 + $0x58] sm:$0x3]  ;;  %11561 = vmatprep.mubr.msk.f32.mxu0 %vm279_vm1, %v13013_v53  ;;  %v13029_v59 = vld [vmem:[#allocation2 + $0x60] sm:$0xff] }
  0x2c   : > { %v13027_v58 = vsel %vm491_vm4, %v502_v48, %v503_v49  ;;  %19680 = vst [vmem:[#allocation5_spill] sm:$0xff] %v13029_v59  ;;  %v13031_v60 = vld [vmem:[#allocation2 + $0x68] sm:$0xff]  ;;  %11562 = vmatmul.mubr.msk.f32.gmra.mxu0 %vm279_vm1, %v13016_v54  ;;  %v510_v62 = vrot.slane %v13022_v57, 1  ;;  %v512_v0 = vrot.slane %v13029_v59, 1  ;;  %v13050_v2 = vld [vmem:[#allocation2 + $0x70] sm:$0x3] }
  0x2d   : > { %11564 = vmatprep.mubr.msk.f32.mxu0 %vm279_vm1, %v13027_v58  ;;  %v13038_v61 = vsel %vm491_vm4, %v503_v49, %v505_v55  ;;  %11615 = vmatmul.mubr.msk.f32.gmra.mxu1 %vm279_vm1, %v12997_v46  ;;  %v13044_v63 = vsel %vm491_vm4, %v507_v52, %v508_v56  ;;  %v513_v1 = vrot.slane %v13031_v60, 1  ;;  %v13052_v4 = vld [vmem:[#allocation2 + $0x78] sm:$0xff]  ;;  %v13054_v5 = vld [vmem:[#allocation2 + $0x80] sm:$0xff]  ;;  %v515_v7 = vrot.slane %v13050_v2, 1  ;;  %v13066_v8 = vld [vmem:[#allocation2 + $0x88] sm:$0x3] }
  0x2e   : > { %11617 = vmatprep.mubr.msk.f32.mxu1 %vm279_vm1, %v12999_v47  ;;  %19681 = vst [vmem:[#allocation6_spill] sm:$0xff] %v13052_v4  ;;  %v13061_v6 = vsel %vm491_vm4, %v508_v56, %v510_v62  ;;  %v517_v11 = vrot.slane %v13052_v4, 1  ;;  %v518_v12 = vrot.slane %v13054_v5, 1  ;;  %v13076_v13 = vld [vmem:[#allocation2 + $0x90] sm:$0xff]  ;;  %v13078_v14 = vld [vmem:[#allocation2 + $0x98] sm:$0xff]  ;;  %374 = vst.msk [vmem:[#allocation2 + $0x109] sm:$0xff] %vm279_vm1, %v342_v9 }
  0x2f   : > { %19682 = vst [vmem:[#allocation7_spill] sm:$0xff] %v13061_v6  ;;  %v13070_v10 = vsel %vm491_vm4, %v512_v0, %v513_v1  ;;  %19684 = vst [vmem:[#allocation9_spill] sm:$0xff] %v13076_v13  ;;  %v13088_v19 = vld [vmem:[#allocation2 + $0xa0] sm:$0x3]  ;;  %v13099_v23 = vsel %vm491_vm4, %v513_v1, %v515_v7  ;;  %v520_v24 = vrot.slane %v13066_v8, 1  ;;  %v522_v30 = vrot.slane %v13076_v13, 1 }
  0x30   : > { %11565 = vmatmul.mubr.msk.f32.gmra.mxu0 %vm279_vm1, %v13038_v61  ;;  %19683 = vst [vmem:[#allocation8_spill] sm:$0xff] %v13070_v10  ;;  %375 = vst.msk [vmem:[#allocation2 + $0x111] sm:$0xff] %vm279_vm1, %v343_v15  ;;  %v13111_v29 = vsel %vm491_vm4, %v517_v11, %v518_v12  ;;  %v523_v31 = vrot.slane %v13078_v14, 1  ;;  %v13123_v32 = vld [vmem:[%s19517_s1 + $0x14] sm:$0xf]  ;;  %v353_v33 = vld [vmem:[%s12921_s14 + $0xf8] sm:$0xff] }
  0x31   : > { %11567 = vmatprep.mubr.msk.f32.mxu0 %vm279_vm1, %v13044_v63  ;;  %11618 = vmatmul.mubr.msk.f32.gmra.mxu1 %vm279_vm1, %v13009_v51  ;;  %376 = vst.msk [vmem:[#allocation2 + $0x121] sm:$0xff] %vm279_vm1, %v344_v16  ;;  %377 = vst.msk [vmem:[#allocation2 + $0x129] sm:$0xff] %vm279_vm1, %v345_v17  ;;  %v13126_v36 = vld [vmem:[#allocation2 + $0xa8] sm:$0xff]  ;;  %v13128_v37 = vld [vmem:[#allocation2 + $0xb0] sm:$0xff]  ;;  %v13138_v38 = vsel %vm491_vm4, %v518_v12, %v520_v24  ;;  %v525_v42 = vrot.slane %v13088_v19, 1 }
  0x32   : > { %11620 = vmatprep.mubr.msk.f32.mxu1 %vm279_vm1, %v13029_v59  ;;  %378 = vst.msk [vmem:[#allocation2 + $0x139] sm:$0xff] %vm279_vm1, %v346_v18  ;;  %19685 = vst [vmem:[#allocation10_spill] sm:$0xff] %v13099_v23  ;;  %11806 = vmatprep.subr.msk.mxu1 %vm636_vm0, %v13123_v32  ;;  %v13144_v43 = vsel %vm491_vm4, %v522_v30, %v523_v31  ;;  %v527_v44 = vrot.slane %v13126_v36, 1  ;;  %v528_v48 = vrot.slane %v13128_v37, 1  ;;  %v13150_v49 = vld [vmem:[#allocation2 + $0xb8] sm:$0x3] }
  0x33   : > { %379 = vst.msk [vmem:[#allocation2 + $0x141] sm:$0xff] %vm279_vm1, %v347_v20  ;;  %380 = vst.msk [vmem:[#allocation2 + $0x151] sm:$0xff] %vm279_vm1, %v348_v21  ;;  %v13152_v52 = vld [vmem:[#allocation2 + $0xc0] sm:$0xff]  ;;  %v13154_v55 = vld [vmem:[#allocation2 + $0xc8] sm:$0xff]  ;;  %v13161_v56 = vsel %vm491_vm4, %v523_v31, %v525_v42  ;;  %v530_v62 = vrot.slane %v13150_v49, 1 }
  0x34   : > { %11568 = vmatmul.mubr.msk.f32.gmra.mxu0 %vm279_vm1, %v13061_v6  ;;  %381 = vst.msk [vmem:[#allocation2 + $0x159] sm:$0xff] %vm279_vm1, %v349_v22  ;;  %19686 = vst [vmem:[#allocation11_spill] sm:$0xff] %v13111_v29  ;;  %v13167_v0 = vsel %vm491_vm4, %v527_v44, %v528_v48  ;;  %v532_v1 = vrot.slane %v13152_v52, 1  ;;  %v533_v7 = vrot.slane %v13154_v55, 1  ;;  %v13173_v9 = vld [vmem:[#allocation2 + $0xd0] sm:$0x3] }
  0x35   : > { %11570 = vmatprep.mubr.msk.f32.mxu0 %vm279_vm1, %v13070_v10  ;;  %11621 = vmatmul.mubr.msk.f32.gmra.mxu1 %vm279_vm1, %v13031_v60  ;;  %382 = vst.msk [vmem:[#allocation2 + $0x169] sm:$0xff] %vm279_vm1, %v350_v26  ;;  %383 = vst.msk [vmem:[#allocation2 + $0x171] sm:$0xff] %vm279_vm1, %v351_v27  ;;  %v13175_v11 = vld [vmem:[#allocation2 + $0xd8] sm:$0xff]  ;;  %v13177_v12 = vld [vmem:[#allocation2 + $0xe0] sm:$0xff]  ;;  %v13184_v15 = vsel %vm491_vm4, %v528_v48, %v530_v62  ;;  %v535_v16 = vrot.slane %v13173_v9, 1 }
  0x36   : > { %11623 = vmatprep.mubr.msk.f32.mxu1 %vm279_vm1, %v13052_v4  ;;  %384 = vst.msk [vmem:[#allocation2 + $0x181] sm:$0xff] %vm279_vm1, %v352_v28  ;;  %19687 = vst [vmem:[#allocation12_spill] sm:$0xff] %v13126_v36  ;;  %v13190_v17 = vsel %vm491_vm4, %v532_v1, %v533_v7  ;;  %v537_v18 = vrot.slane %v13175_v11, 1  ;;  %v538_v20 = vrot.slane %v13177_v12, 1  ;;  %v13196_v21 = vld [vmem:[#allocation2 + $0xe8] sm:$0x3] }
  0x37   : > { %385 = vst.msk [vmem:[#allocation2 + $0x189] sm:$0xff] %vm279_vm1, %v353_v33  ;;  %19688 = vst [vmem:[#allocation13_spill] sm:$0xff] %v13138_v38  ;;  %v13198_v22 = vld [vmem:[#allocation2 + $0xf0] sm:$0xff]  ;;  %v13200_v24 = vld [vmem:[#allocation2 + $0xf8] sm:$0xff]  ;;  %v13207_v26 = vsel %vm491_vm4, %v533_v7, %v535_v16  ;;  %v540_v27 = vrot.slane %v13196_v21, 1 }
  0x38   : > { %11571 = vmatmul.mubr.msk.f32.gmra.mxu0 %vm279_vm1, %v13099_v23  ;;  %19689 = vst [vmem:[#allocation14_spill] sm:$0xff] %v13144_v43  ;;  %19690 = vst [vmem:[#allocation15_spill] sm:$0xff] %v13152_v52  ;;  %v13213_v28 = vsel %vm491_vm4, %v537_v18, %v538_v20  ;;  %v542_v30 = vrot.slane %v13198_v22, 1  ;;  %v543_v31 = vrot.slane %v13200_v24, 1  ;;  %v13219_v33 = vld [vmem:[#allocation2 + $0x100] sm:$0x3] }
  0x39   : > { %11573 = vmatprep.mubr.msk.f32.mxu0 %vm279_vm1, %v13111_v29  ;;  %11624 = vmatmul.mubr.msk.f32.gmra.mxu1 %vm279_vm1, %v13054_v5  ;;  %19691 = vst [vmem:[#allocation16_spill] sm:$0xff] %v13161_v56  ;;  %19692 = vst [vmem:[#allocation17_spill] sm:$0xff] %v13167_v0  ;;  %v13221_v42 = vld [vmem:[#allocation2 + $0x108] sm:$0xff]  ;;  %v13223_v44 = vld [vmem:[#allocation2 + $0x110] sm:$0xff]  ;;  %v13230_v48 = vsel %vm491_vm4, %v538_v20, %v540_v27  ;;  %v545_v62 = vrot.slane %v13219_v33, 1 }
  0x3a   : > { %11626 = vmatprep.mubr.msk.f32.mxu1 %vm279_vm1, %v13076_v13  ;;  %19693 = vst [vmem:[#allocation18_spill] sm:$0xff] %v13175_v11  ;;  %19694 = vst [vmem:[#allocation19_spill] sm:$0xff] %v13184_v15  ;;  %v13236_v1 = vsel %vm491_vm4, %v542_v30, %v543_v31  ;;  %v547_v7 = vrot.slane %v13221_v42, 1  ;;  %v548_v16 = vrot.slane %v13223_v44, 1  ;;  %v13242_v18 = vld [vmem:[#allocation2 + $0x118] sm:$0x3] }
  0x3b   : > { %19695 = vst [vmem:[#allocation20_spill] sm:$0xff] %v13190_v17  ;;  %19696 = vst [vmem:[#allocation21_spill] sm:$0xff] %v13198_v22  ;;  %v13244_v3 = vld [vmem:[#allocation2 + $0x120] sm:$0xff]  ;;  %v13246_v20 = vld [vmem:[#allocation2 + $0x128] sm:$0xff]  ;;  %v13253_v27 = vsel %vm491_vm4, %v543_v31, %v545_v62  ;;  %v550_v30 = vrot.slane %v13242_v18, 1 }
  0x3c   : > { %11574 = vmatmul.mubr.msk.f32.gmra.mxu0 %vm279_vm1, %v13138_v38  ;;  %19697 = vst [vmem:[#allocation22_spill] sm:$0xff] %v13207_v26  ;;  %19698 = vst [vmem:[#allocation23_spill] sm:$0xff] %v13213_v28  ;;  %v13269_v31 = vld [vmem:[#allocation2 + $0x140] sm:$0xff]  ;;  %v13334_v6 = vld [vmem:[#allocation2 + $0x178] sm:$0x3] }
  0x3d   : > { %11576 = vmatprep.mubr.msk.f32.mxu0 %vm279_vm1, %v13144_v43  ;;  %11627 = vmatmul.mubr.msk.f32.gmra.mxu1 %vm279_vm1, %v13078_v14  ;;  %19699 = vst [vmem:[#allocation24_spill] sm:$0xff] %v13221_v42  ;;  %19700 = vst [vmem:[#allocation25_spill] sm:$0xff] %v13230_v48  ;;  %v13276_v62 = vsel %vm491_vm4, %v548_v16, %v550_v30  ;;  %v13311_v29 = vld [vmem:[#allocation2 + $0x160] sm:$0x3] }
  0x3e   : > { %11629 = vmatprep.mubr.msk.f32.mxu1 %vm279_vm1, %v13126_v36  ;;  %19701 = vst [vmem:[#allocation26_spill] sm:$0xff] %v13236_v1  ;;  %19702 = vst [vmem:[#allocation27_spill] sm:$0xff] %v13244_v3 }
  0x3f   : > { %19703 = vst [vmem:[#allocation28_spill] sm:$0xff] %v13253_v27  ;;  %19706 = vst [vmem:[#allocation31_spill] sm:$0xff] %v13276_v62 }
  0x40   : > { %11577 = vmatmul.mubr.msk.f32.gmra.mxu0 %vm279_vm1, %v13161_v56  ;;  %v13288_v56 = vld [vmem:[#allocation2 + $0x148] sm:$0x3] }
  0x41   : > { %11579 = vmatprep.mubr.msk.f32.mxu0 %vm279_vm1, %v13167_v0  ;;  %11630 = vmatmul.mubr.msk.f32.gmra.mxu1 %vm279_vm1, %v13128_v37  ;;  %v560_v30 = vrot.slane %v13288_v56, 1 }
  0x42   : > { %11632 = vmatprep.mubr.msk.f32.mxu1 %vm279_vm1, %v13152_v52 }
  0x44   : > { %11580 = vmatmul.mubr.msk.f32.gmra.mxu0 %vm279_vm1, %v13184_v15 }
  0x45   : > { %11582 = vmatprep.mubr.msk.f32.mxu0 %vm279_vm1, %v13190_v17  ;;  %11633 = vmatmul.mubr.msk.f32.gmra.mxu1 %vm279_vm1, %v13154_v55  ;;  %v13265_v17 = vld [vmem:[#allocation2 + $0x130] sm:$0x3] }
  0x46   : > { %11635 = vmatprep.mubr.msk.f32.mxu1 %vm279_vm1, %v13175_v11 }
  0x48   : > { %11583 = vmatmul.mubr.msk.f32.gmra.mxu0 %vm279_vm1, %v13207_v26  ;;  %v552_v26 = vrot.slane %v13244_v3, 1 }
  0x49   : > { %11585 = vmatprep.mubr.msk.f32.mxu0 %vm279_vm1, %v13213_v28  ;;  %11636 = vmatmul.mubr.msk.f32.gmra.mxu1 %vm279_vm1, %v13177_v12  ;;  %v13259_v28 = vsel %vm491_vm4, %v547_v7, %v548_v16  ;;  %v555_v7 = vrot.slane %v13265_v17, 1  ;;  %v13292_v16 = vld [vmem:[#allocation2 + $0x158] sm:$0xff] }
  0x4a   : > { %11638 = vmatprep.mubr.msk.f32.mxu1 %vm279_vm1, %v13198_v22  ;;  %19704 = vst [vmem:[#allocation29_spill] sm:$0xff] %v13259_v28 }
  0x4c   : > { %11586 = vmatmul.mubr.msk.f32.gmra.mxu0 %vm279_vm1, %v13230_v48  ;;  %v553_v48 = vrot.slane %v13246_v20, 1 }
  0x4d   : > { %11588 = vmatprep.mubr.msk.f32.mxu0 %vm279_vm1, %v13236_v1  ;;  %11639 = vmatmul.mubr.msk.f32.gmra.mxu1 %vm279_vm1, %v13200_v24  ;;  %v13267_v1 = vld [vmem:[#allocation2 + $0x138] sm:$0xff] }
  0x4e   : > { %11641 = vmatprep.mubr.msk.f32.mxu1 %vm279_vm1, %v13221_v42  ;;  %19705 = vst [vmem:[#allocation30_spill] sm:$0xff] %v13267_v1  ;;  %v13282_v15 = vsel %vm491_vm4, %v552_v26, %v553_v48  ;;  %v557_v0 = vrot.slane %v13267_v1, 1  ;;  %v13299_v26 = vsel %vm491_vm4, %v553_v48, %v555_v7  ;;  %v13315_v48 = vld [vmem:[#allocation2 + $0x170] sm:$0xff]  ;;  %v565_v7 = vrot.slane %v13311_v29, 1 }
  0x4f   : > { %19707 = vst [vmem:[#allocation32_spill] sm:$0xff] %v13282_v15  ;;  %19709 = vst [vmem:[#allocation34_spill] sm:$0xff] %v13299_v26 }
  0x50   : > { %11589 = vmatmul.mubr.msk.f32.gmra.mxu0 %vm279_vm1, %v13253_v27  ;;  %v558_v27 = vrot.slane %v13269_v31, 1 }
  0x51   : > { %11591 = vmatprep.mubr.msk.f32.mxu0 %vm279_vm1, %v13259_v28  ;;  %11642 = vmatmul.mubr.msk.f32.gmra.mxu1 %vm279_vm1, %v13223_v44  ;;  %v13290_v28 = vld [vmem:[#allocation2 + $0x150] sm:$0xff] }
  0x52   : > { %11644 = vmatprep.mubr.msk.f32.mxu1 %vm279_vm1, %v13244_v3  ;;  %19708 = vst [vmem:[#allocation33_spill] sm:$0xff] %v13290_v28  ;;  %v13305_v43 = vsel %vm491_vm4, %v557_v0, %v558_v27  ;;  %v562_v38 = vrot.slane %v13290_v28, 1  ;;  %v13322_v0 = vsel %vm491_vm4, %v558_v27, %v560_v30 }
  0x54   : > { %11592 = vmatmul.mubr.msk.f32.gmra.mxu0 %vm279_vm1, %v13276_v62  ;;  %v563_v62 = vrot.slane %v13292_v16, 1 }
  0x55   : > { %11594 = vmatprep.mubr.msk.f32.mxu0 %vm279_vm1, %v13282_v15  ;;  %11645 = vmatmul.mubr.msk.f32.gmra.mxu1 %vm279_vm1, %v13246_v20  ;;  %v13313_v15 = vld [vmem:[#allocation2 + $0x168] sm:$0xff] }
  0x56   : > { %11647 = vmatprep.mubr.msk.f32.mxu1 %vm279_vm1, %v13267_v1  ;;  %19710 = vst [vmem:[#allocation35_spill] sm:$0xff] %v13313_v15  ;;  %v13328_v23 = vsel %vm491_vm4, %v562_v38, %v563_v62  ;;  %v567_v10 = vrot.slane %v13313_v15, 1  ;;  %v13341_v27 = vsel %vm491_vm4, %v563_v62, %v565_v7  ;;  %v570_v38 = vrot.slane %v13334_v6, 1 }
  0x57   : > { %v1166_v7 = vrot.slane %v12983_v40, 2 }
  0x58   : > { %11595 = vmatmul.mubr.msk.f32.gmra.mxu0 %vm279_vm1, %v13299_v26  ;;  %v568_v26 = vrot.slane %v13315_v48, 1 }
  0x59   : > { %11597 = vmatprep.mubr.msk.f32.mxu0 %vm279_vm1, %v13305_v43  ;;  %11648 = vmatmul.mubr.msk.f32.gmra.mxu1 %vm279_vm1, %v13269_v31 }
  0x5a   : > { %11650 = vmatprep.mubr.msk.f32.mxu1 %vm279_vm1, %v13290_v28  ;;  %v13347_v30 = vsel %vm491_vm4, %v567_v10, %v568_v26  ;;  %v13356_v62 = vsel %vm491_vm4, %v568_v26, %v570_v38  ;;  %v1165_v10 = vrot.slane %v12981_v39, 2  ;;  %v1168_v26 = vrot.slane %v12985_v41, 2 }
  0x5b   : > { %19711 = vst [vmem:[#allocation36_spill] sm:$0xff] %v13347_v30  ;;  %19712 = vst [vmem:[#allocation37_spill] sm:$0xff] %v13356_v62  ;;  %v1170_v38 = vrot.slane %v12995_v45, 2  ;;  %v1173_v41 = vrot.slane %v13007_v50, 2  ;;  %v1178_v50 = vrot.slane %v13022_v57, 2 }
  0x5c   : > { %11598 = vmatmul.mubr.msk.f32.gmra.mxu0 %vm279_vm1, %v13322_v0 }
  0x5d   : > { %11600 = vmatprep.mubr.msk.f32.mxu0 %vm279_vm1, %v13328_v23  ;;  %11651 = vmatmul.mubr.msk.f32.gmra.mxu1 %vm279_vm1, %v13292_v16 }
  0x5e   : > { %11653 = vmatprep.mubr.msk.f32.mxu1 %vm279_vm1, %v13313_v15 }
  0x60   : > { %11601 = vmatmul.mubr.msk.f32.gmra.mxu0 %vm279_vm1, %v13341_v27 }
  0x61   : > { %11603 = vmatprep.mubr.msk.f32.mxu0 %vm279_vm1, %v13347_v30  ;;  %11654 = vmatmul.mubr.msk.f32.gmra.mxu1 %vm279_vm1, %v13315_v48  ;;  %v13369_v30 = vld [vmem:[%s19517_s1 + $0x1c] sm:$0xf] }
  0x62   : > { %11708 = vmatprep.mubr.msk.f32.mxu1 %vm279_vm1, %v12981_v39  ;;  %v13377_v39 = vsel %vm1159_vm5, %v1165_v10, %v1166_v7  ;;  %v1175_v10 = vrot.slane %v12999_v47, 2 }
  0x64   : > { %11604 = vmatmul.mubr.msk.f32.gmra.mxu0 %vm279_vm1, %v13356_v62  ;;  %v1171_v62 = vrot.slane %v12997_v46, 2 }
  0x65   : > { %11658 = vmatprep.mubr.msk.f32.mxu0 %vm279_vm1, %v12967_v34  ;;  %11709 = vmatmul.mubr.msk.f32.vlgmr.msra.gmra.mxu1 %vm279_vm1, %v12983_v40  ;;  %v13388_v34 = vld [vmem:[%s19517_s1 + $0x18] sm:$0xf]  ;;  %v13399_v40 = vsel %vm1159_vm5, %v1166_v7, %v1168_v26  ;;  %v1180_v26 = vrot.slane %v13029_v59, 2 }
  0x66   : > { %11711 = vmatprep.mubr.msk.f32.mxu1 %vm279_vm1, %v12995_v45  ;;  %11807 = vmatpush3.msk.msra.mxu1 %vm636_vm0, %v13123_v32  ;;  %v13405_v32 = vsel %vm1159_vm5, %v1170_v38, %v1171_v62  ;;  %v1181_v38 = vrot.slane %v13031_v60, 2 }
  0x67   : > { %11906 = vmatprep.subr.msk.mxu1 %vm636_vm0, %v13369_v30 }
  0x68   : > { %11659 = vmatmul.mubr.msk.f32.vlgmr.msra.gmra.mxu0 %vm279_vm1, %v12970_v35  ;;  %v1176_v35 = vrot.slane %v13009_v51, 2 }
  0x69   : > { %11757 = vmatpush3.msk.msra.mxu0 %vm636_vm0, %v12947_v25  ;;  %11661 = vmatprep.mubr.msk.f32.mxu0 %vm279_vm1, %v13377_v39  ;;  %v13418_v25 = vsel %vm1159_vm5, %v1171_v62, %v1173_v41  ;;  %v1183_v62 = vrot.slane %v13050_v2, 2  ;;  %v13441_v41 = vsel %vm1159_vm5, %v1180_v26, %v1181_v38  ;;  %v1190_v26 = vrot.slane %v13076_v13, 2 }
  0x6a   : > { %11712 = vmatmul.mubr.msk.f32.gmra.mxu1 %vm279_vm1, %v12997_v46  ;;  %11856 = vmatprep.subr.msk.mxu0 %vm636_vm0, %v13388_v34  ;;  %v13424_v7 = vsel %vm1159_vm5, %v1175_v10, %v1176_v35  ;;  %v13435_v57 = vsel %vm1159_vm5, %v1176_v35, %v1178_v50  ;;  %v1185_v10 = vrot.slane %v13052_v4, 2  ;;  %v1188_v35 = vrot.slane %v13066_v8, 2 }
  0x6b   : > { %11714 = vmatprep.mubr.msk.f32.mxu1 %vm279_vm1, %v12999_v47  ;;  %v13452_v2 = vsel %vm1159_vm5, %v1181_v38, %v1183_v62  ;;  %v1193_v38 = vrot.slane %v13088_v19, 2  ;;  %v1198_v19 = vrot.slane %v13150_v49, 2  ;;  %v1203_v49 = vrot.slane %v13173_v9, 2 }
  0x6c   : > { %11662 = vmatmul.mubr.msk.f32.gmra.mxu0 %vm279_vm1, %v13399_v40  ;;  %v1208_v9 = vrot.slane %v13196_v21, 2  ;;  %v1213_v21 = vrot.slane %v13219_v33, 2  ;;  %v1218_v33 = vrot.slane %v13242_v18, 2  ;;  %v1223_v18 = vrot.slane %v13265_v17, 2 }
  0x6d   : > { %11664 = vmatprep.mubr.msk.f32.mxu0 %vm279_vm1, %v13405_v32 }
  0x6e   : > { %11715 = vmatmul.mubr.msk.f32.gmra.mxu1 %vm279_vm1, %v13009_v51 }
  0x6f   : > { %11717 = vmatprep.mubr.msk.f32.mxu1 %vm279_vm1, %v13029_v59  ;;  %v1186_v59 = vrot.slane %v13054_v5, 2 }
  0x70   : > { %11665 = vmatmul.mubr.msk.f32.gmra.mxu0 %vm279_vm1, %v13418_v25 }
  0x71   : > { %11667 = vmatprep.mubr.msk.f32.mxu0 %vm279_vm1, %v13424_v7  ;;  %v13458_v50 = vsel %vm1159_vm5, %v1185_v10, %v1186_v59  ;;  %v13469_v8 = vsel %vm1159_vm5, %v1186_v59, %v1188_v35  ;;  %v1195_v10 = vrot.slane %v13126_v36, 2 }
  0x72   : > { %11718 = vmatmul.mubr.msk.f32.gmra.mxu1 %vm279_vm1, %v13031_v60  ;;  %19713 = vst [vmem:[#allocation38_spill] sm:$0xff] %v13458_v50  ;;  %19714 = vst [vmem:[#allocation39_spill] sm:$0xff] %v13469_v8 }
  0x73   : > { %11720 = vmatprep.mubr.msk.f32.mxu1 %vm279_vm1, %v13052_v4  ;;  %v1191_v4 = vrot.slane %v13078_v14, 2 }
  0x74   : > { %11668 = vmatmul.mubr.msk.f32.gmra.mxu0 %vm279_vm1, %v13435_v57 }
  0x75   : > { %11670 = vmatprep.mubr.msk.f32.mxu0 %vm279_vm1, %v13441_v41  ;;  %v13475_v62 = vsel %vm1159_vm5, %v1190_v26, %v1191_v4  ;;  %v13486_v59 = vsel %vm1159_vm5, %v1191_v4, %v1193_v38  ;;  %v1200_v26 = vrot.slane %v13152_v52, 2 }
  0x76   : > { %11721 = vmatmul.mubr.msk.f32.gmra.mxu1 %vm279_vm1, %v13054_v5  ;;  %19715 = vst [vmem:[#allocation40_spill] sm:$0xff] %v13475_v62  ;;  %19716 = vst [vmem:[#allocation41_spill] sm:$0xff] %v13486_v59 }
  0x77   : > { %11723 = vmatprep.mubr.msk.f32.mxu1 %vm279_vm1, %v13076_v13  ;;  %v1196_v13 = vrot.slane %v13128_v37, 2 }
  0x78   : > { %11671 = vmatmul.mubr.msk.f32.gmra.mxu0 %vm279_vm1, %v13452_v2 }
  0x79   : > { %11673 = vmatprep.mubr.msk.f32.mxu0 %vm279_vm1, %v13458_v50  ;;  %v13492_v35 = vsel %vm1159_vm5, %v1195_v10, %v1196_v13  ;;  %v13503_v4 = vsel %vm1159_vm5, %v1196_v13, %v1198_v19  ;;  %v1205_v10 = vrot.slane %v13175_v11, 2 }
  0x7a   : > { %11724 = vmatmul.mubr.msk.f32.gmra.mxu1 %vm279_vm1, %v13078_v14  ;;  %19717 = vst [vmem:[#allocation42_spill] sm:$0xff] %v13492_v35  ;;  %19718 = vst [vmem:[#allocation43_spill] sm:$0xff] %v13503_v4 }
  0x7b   : > { %11726 = vmatprep.mubr.msk.f32.mxu1 %vm279_vm1, %v13126_v36  ;;  %v1201_v36 = vrot.slane %v13154_v55, 2 }
  0x7c   : > { %11674 = vmatmul.mubr.msk.f32.gmra.mxu0 %vm279_vm1, %v13469_v8 }
  0x7d   : > { %11676 = vmatprep.mubr.msk.f32.mxu0 %vm279_vm1, %v13475_v62  ;;  %v13509_v38 = vsel %vm1159_vm5, %v1200_v26, %v1201_v36  ;;  %v13520_v13 = vsel %vm1159_vm5, %v1201_v36, %v1203_v49  ;;  %v1210_v26 = vrot.slane %v13198_v22, 2 }
  0x7e   : > { %11727 = vmatmul.mubr.msk.f32.gmra.mxu1 %vm279_vm1, %v13128_v37  ;;  %19719 = vst [vmem:[#allocation44_spill] sm:$0xff] %v13509_v38  ;;  %19720 = vst [vmem:[#allocation45_spill] sm:$0xff] %v13520_v13 }
  0x7f   : > { %11729 = vmatprep.mubr.msk.f32.mxu1 %vm279_vm1, %v13152_v52  ;;  %v1206_v52 = vrot.slane %v13177_v12, 2 }
  0x80   : > { %11677 = vmatmul.mubr.msk.f32.gmra.mxu0 %vm279_vm1, %v13486_v59 }
  0x81   : > { %11679 = vmatprep.mubr.msk.f32.mxu0 %vm279_vm1, %v13492_v35  ;;  %v13526_v19 = vsel %vm1159_vm5, %v1205_v10, %v1206_v52  ;;  %v13537_v36 = vsel %vm1159_vm5, %v1206_v52, %v1208_v9  ;;  %v1215_v10 = vrot.slane %v13221_v42, 2 }
  0x82   : > { %11730 = vmatmul.mubr.msk.f32.gmra.mxu1 %vm279_vm1, %v13154_v55  ;;  %19721 = vst [vmem:[#allocation46_spill] sm:$0xff] %v13526_v19  ;;  %19722 = vst [vmem:[#allocation47_spill] sm:$0xff] %v13537_v36 }
  0x83   : > { %11732 = vmatprep.mubr.msk.f32.mxu1 %vm279_vm1, %v13175_v11  ;;  %v1211_v11 = vrot.slane %v13200_v24, 2 }
  0x84   : > { %11680 = vmatmul.mubr.msk.f32.gmra.mxu0 %vm279_vm1, %v13503_v4 }
  0x85   : > { %11682 = vmatprep.mubr.msk.f32.mxu0 %vm279_vm1, %v13509_v38  ;;  %v13543_v49 = vsel %vm1159_vm5, %v1210_v26, %v1211_v11  ;;  %v13554_v52 = vsel %vm1159_vm5, %v1211_v11, %v1213_v21  ;;  %v1220_v26 = vrot.slane %v13244_v3, 2 }
  0x86   : > { %11733 = vmatmul.mubr.msk.f32.gmra.mxu1 %vm279_vm1, %v13177_v12  ;;  %19723 = vst [vmem:[#allocation48_spill] sm:$0xff] %v13543_v49  ;;  %19724 = vst [vmem:[#allocation49_spill] sm:$0xff] %v13554_v52 }
  0x87   : > { %11735 = vmatprep.mubr.msk.f32.mxu1 %vm279_vm1, %v13198_v22  ;;  %v1216_v22 = vrot.slane %v13223_v44, 2 }
  0x88   : > { %11683 = vmatmul.mubr.msk.f32.gmra.mxu0 %vm279_vm1, %v13520_v13 }
  0x89   : > { %11685 = vmatprep.mubr.msk.f32.mxu0 %vm279_vm1, %v13526_v19  ;;  %v13560_v9 = vsel %vm1159_vm5, %v1215_v10, %v1216_v22  ;;  %v13571_v11 = vsel %vm1159_vm5, %v1216_v22, %v1218_v33  ;;  %v1225_v10 = vrot.slane %v13267_v1, 2  ;;  %v1228_v22 = vrot.slane %v13288_v56, 2 }
  0x8a   : > { %11736 = vmatmul.mubr.msk.f32.gmra.mxu1 %vm279_vm1, %v13200_v24  ;;  %19725 = vst [vmem:[#allocation50_spill] sm:$0xff] %v13560_v9  ;;  %19726 = vst [vmem:[#allocation51_spill] sm:$0xff] %v13571_v11 }
  0x8b   : > { %11738 = vmatprep.mubr.msk.f32.mxu1 %vm279_vm1, %v13221_v42  ;;  %v1221_v42 = vrot.slane %v13246_v20, 2 }
  0x8c   : > { %11686 = vmatmul.mubr.msk.f32.gmra.mxu0 %vm279_vm1, %v13537_v36 }
  0x8d   : > { %11688 = vmatprep.mubr.msk.f32.mxu0 %vm279_vm1, %v13543_v49  ;;  %v13577_v21 = vsel %vm1159_vm5, %v1220_v26, %v1221_v42  ;;  %v13588_v17 = vsel %vm1159_vm5, %v1221_v42, %v1223_v18  ;;  %v1230_v26 = vrot.slane %v13290_v28, 2  ;;  %v1233_v42 = vrot.slane %v13311_v29, 2 }
  0x8e   : > { %11739 = vmatmul.mubr.msk.f32.gmra.mxu1 %vm279_vm1, %v13223_v44  ;;  %19727 = vst [vmem:[#allocation52_spill] sm:$0xff] %v13577_v21  ;;  %19728 = vst [vmem:[#allocation53_spill] sm:$0xff] %v13588_v17 }
  0x8f   : > { %11741 = vmatprep.mubr.msk.f32.mxu1 %vm279_vm1, %v13244_v3  ;;  %v1226_v3 = vrot.slane %v13269_v31, 2 }
  0x90   : > { %11689 = vmatmul.mubr.msk.f32.gmra.mxu0 %vm279_vm1, %v13554_v52 }
  0x91   : > { %11691 = vmatprep.mubr.msk.f32.mxu0 %vm279_vm1, %v13560_v9  ;;  %v13594_v33 = vsel %vm1159_vm5, %v1225_v10, %v1226_v3  ;;  %v13605_v56 = vsel %vm1159_vm5, %v1226_v3, %v1228_v22  ;;  %v1235_v10 = vrot.slane %v13313_v15, 2  ;;  %v13619_v3 = vld [vmem:[#allocation2 + $0x180] sm:$0xff]  ;;  %v1238_v22 = vrot.slane %v13334_v6, 2 }
  0x92   : > { %11742 = vmatmul.mubr.msk.f32.gmra.mxu1 %vm279_vm1, %v13246_v20  ;;  %19729 = vst [vmem:[#allocation54_spill] sm:$0xff] %v13594_v33  ;;  %19730 = vst [vmem:[#allocation55_spill] sm:$0xff] %v13605_v56  ;;  %v13660_v6 = vld [vmem:[%s19517_s1 + $0x20] sm:$0xf] }
  0x93   : > { %11744 = vmatprep.mubr.msk.f32.mxu1 %vm279_vm1, %v13267_v1  ;;  %v1231_v1 = vrot.slane %v13292_v16, 2 }
  0x94   : > { %11692 = vmatmul.mubr.msk.f32.gmra.mxu0 %vm279_vm1, %v13571_v11 }
  0x95   : > { %11694 = vmatprep.mubr.msk.f32.mxu0 %vm279_vm1, %v13577_v21  ;;  %v13611_v18 = vsel %vm1159_vm5, %v1230_v26, %v1231_v1  ;;  %v13624_v29 = vsel %vm1159_vm5, %v1231_v1, %v1233_v42  ;;  %v19741_v42 = vld [vmem:[#allocation17_spill] sm:$0xff] }
  0x96   : > { %11745 = vmatmul.mubr.msk.f32.gmra.mxu1 %vm279_vm1, %v13269_v31  ;;  %19731 = vst [vmem:[#allocation56_spill] sm:$0xff] %v13611_v18  ;;  %19732 = vst [vmem:[#allocation57_spill] sm:$0xff] %v13624_v29 }
  0x97   : > { %11747 = vmatprep.mubr.msk.f32.mxu1 %vm279_vm1, %v13290_v28  ;;  %v1236_v28 = vrot.slane %v13315_v48, 2 }
  0x98   : > { %11695 = vmatmul.mubr.msk.f32.gmra.mxu0 %vm279_vm1, %v13588_v17 }
  0x99   : > { %11697 = vmatprep.mubr.msk.f32.mxu0 %vm279_vm1, %v13594_v33  ;;  %v13630_v26 = vsel %vm1159_vm5, %v1235_v10, %v1236_v28  ;;  %v13641_v1 = vsel %vm1159_vm5, %v1236_v28, %v1238_v22  ;;  %v19736_v28 = vld [vmem:[#allocation10_spill] sm:$0xff]  ;;  %v19742_v10 = vld [vmem:[#allocation19_spill] sm:$0xff]  ;;  %v19743_v22 = vld [vmem:[#allocation20_spill] sm:$0xff] }
  0x9a   : > { %11748 = vmatmul.mubr.msk.f32.gmra.mxu1 %vm279_vm1, %v13292_v16  ;;  %19733 = vst [vmem:[#allocation58_spill] sm:$0xff] %v13630_v26 }
  0x9b   : > { %11750 = vmatprep.mubr.msk.f32.mxu1 %vm279_vm1, %v13313_v15  ;;  %v13634_v15 = vld [vmem:[#allocation2 + $0x188] sm:$0xff] }
  0x9c   : > { %11698 = vmatmul.mubr.msk.f32.gmra.mxu0 %vm279_vm1, %v13605_v56 }
  0x9d   : > { %11700 = vmatprep.mubr.msk.f32.mxu0 %vm279_vm1, %v13611_v18 }
  0x9e   : > { %11751 = vmatmul.mubr.msk.f32.gmra.mxu1 %vm279_vm1, %v13315_v48 }
  0x9f   : > { %11753 = vmatprep.mubr.msk.f32.mxu1 %vm279_vm1, %v13619_v3 }
  0xa0   : > { %11701 = vmatmul.mubr.msk.f32.gmra.mxu0 %vm279_vm1, %v13624_v29 }
  0xa1   : > { %11703 = vmatprep.mubr.msk.f32.mxu0 %vm279_vm1, %v13630_v26 }
  0xa2   : > { %11754 = vmatmul.mubr.msk.f32.gmra.mxu1 %vm279_vm1, %v13634_v15 }
  0xa3   : > { %11808 = vmatprep.mubr.msk.f32.mxu1 %vm279_vm1, %v13377_v39  ;;  %v19738_v39 = vld [vmem:[#allocation13_spill] sm:$0xff] }
  0xa4   : > { %11704 = vmatmul.mubr.msk.f32.gmra.mxu0 %vm279_vm1, %v13641_v1 }
  0xa5   : > { %11758 = vmatprep.mubr.msk.f32.mxu0 %vm279_vm1, %v13013_v53  ;;  %v19734_v53 = vld [vmem:[#allocation7_spill] sm:$0xff] }
  0xa6   : > { %11809 = vmatmul.mubr.msk.f32.vlgmr.msra.gmra.mxu1 %vm279_vm1, %v13399_v40  ;;  %v19740_v40 = vld [vmem:[#allocation16_spill] sm:$0xff] }
  0xa7   : > { %11811 = vmatprep.mubr.msk.f32.mxu1 %vm279_vm1, %v13405_v32  ;;  %11907 = vmatpush3.msk.msra.mxu1 %vm636_vm0, %v13369_v30  ;;  %v19737_v30 = vld [vmem:[#allocation11_spill] sm:$0xff] }
  0xa8   : > { %11759 = vmatmul.mubr.msk.f32.vlgmr.msra.gmra.mxu0 %vm279_vm1, %v13016_v54  ;;  %v19735_v54 = vld [vmem:[#allocation8_spill] sm:$0xff] }
  0xa9   : > { %11857 = vmatpush3.msk.msra.mxu0 %vm636_vm0, %v13388_v34  ;;  %11761 = vmatprep.mubr.msk.f32.mxu0 %vm279_vm1, %v13027_v58  ;;  %v19739_v34 = vld [vmem:[#allocation14_spill] sm:$0xff] }
  0xaa   : > { %11812 = vmatmul.mubr.msk.f32.gmra.mxu1 %vm279_vm1, %v13418_v25  ;;  %11956 = vmatprep.subr.msk.mxu0 %vm636_vm0, %v13660_v6 }
  0xab   : > { %11814 = vmatprep.mubr.msk.f32.mxu1 %vm279_vm1, %v13424_v7 }
  0xac   : > { %11762 = vmatmul.mubr.msk.f32.gmra.mxu0 %vm279_vm1, %v13038_v61 }
  0xad   : > { %11764 = vmatprep.mubr.msk.f32.mxu0 %vm279_vm1, %v13044_v63 }
  0xae   : > { %11815 = vmatmul.mubr.msk.f32.gmra.mxu1 %vm279_vm1, %v13435_v57 }
  0xaf   : > { %11817 = vmatprep.mubr.msk.f32.mxu1 %vm279_vm1, %v13441_v41 }
  0xb0   : > { %11765 = vmatmul.mubr.msk.f32.gmra.mxu0 %vm279_vm1, %v19734_v53 }
  0xb1   : > { %11767 = vmatprep.mubr.msk.f32.mxu0 %vm279_vm1, %v19735_v54 }
  0xb2   : > { %11818 = vmatmul.mubr.msk.f32.gmra.mxu1 %vm279_vm1, %v13452_v2 }
  0xb3   : > { %11820 = vmatprep.mubr.msk.f32.mxu1 %vm279_vm1, %v13458_v50  ;;  %v19754_v50 = vld [vmem:[#allocation37_spill] sm:$0xff] }
  0xb4   : > { %11768 = vmatmul.mubr.msk.f32.gmra.mxu0 %vm279_vm1, %v19736_v28 }
  0xb5   : > { %11770 = vmatprep.mubr.msk.f32.mxu0 %vm279_vm1, %v19737_v30 }
  0xb6   : > { %11821 = vmatmul.mubr.msk.f32.gmra.mxu1 %vm279_vm1, %v13469_v8 }
  0xb7   : > { %11823 = vmatprep.mubr.msk.f32.mxu1 %vm279_vm1, %v13475_v62  ;;  %v19753_v62 = vld [vmem:[#allocation36_spill] sm:$0xff] }
  0xb8   : > { %11771 = vmatmul.mubr.msk.f32.gmra.mxu0 %vm279_vm1, %v19738_v39 }
  0xb9   : > { %11773 = vmatprep.mubr.msk.f32.mxu0 %vm279_vm1, %v19739_v34 }
  0xba   : > { %11824 = vmatmul.mubr.msk.f32.gmra.mxu1 %vm279_vm1, %v13486_v59  ;;  %v19745_v59 = vld [vmem:[#allocation23_spill] sm:$0xff] }
  0xbb   : > { %11826 = vmatprep.mubr.msk.f32.mxu1 %vm279_vm1, %v13492_v35  ;;  %v19744_v35 = vld [vmem:[#allocation22_spill] sm:$0xff] }
  0xbc   : > { %11774 = vmatmul.mubr.msk.f32.gmra.mxu0 %vm279_vm1, %v19740_v40 }
  0xbd   : > { %11776 = vmatprep.mubr.msk.f32.mxu0 %vm279_vm1, %v19741_v42 }
  0xbe   : > { %11827 = vmatmul.mubr.msk.f32.gmra.mxu1 %vm279_vm1, %v13503_v4  ;;  %v19747_v4 = vld [vmem:[#allocation26_spill] sm:$0xff] }
  0xbf   : > { %11829 = vmatprep.mubr.msk.f32.mxu1 %vm279_vm1, %v13509_v38  ;;  %v19746_v38 = vld [vmem:[#allocation25_spill] sm:$0xff] }
  0xc0   : > { %11777 = vmatmul.mubr.msk.f32.gmra.mxu0 %vm279_vm1, %v19742_v10 }
  0xc1   : > { %11779 = vmatprep.mubr.msk.f32.mxu0 %vm279_vm1, %v19743_v22 }
  0xc2   : > { %11830 = vmatmul.mubr.msk.f32.gmra.mxu1 %vm279_vm1, %v13520_v13  ;;  %v19749_v13 = vld [vmem:[#allocation29_spill] sm:$0xff] }
  0xc3   : > { %11832 = vmatprep.mubr.msk.f32.mxu1 %vm279_vm1, %v13526_v19  ;;  %v19748_v19 = vld [vmem:[#allocation28_spill] sm:$0xff] }
  0xc4   : > { %11780 = vmatmul.mubr.msk.f32.gmra.mxu0 %vm279_vm1, %v19744_v35 }
  0xc5   : > { %11782 = vmatprep.mubr.msk.f32.mxu0 %vm279_vm1, %v19745_v59 }
  0xc6   : > { %11833 = vmatmul.mubr.msk.f32.gmra.mxu1 %vm279_vm1, %v13537_v36  ;;  %v19751_v36 = vld [vmem:[#allocation32_spill] sm:$0xff] }
  0xc7   : > { %11835 = vmatprep.mubr.msk.f32.mxu1 %vm279_vm1, %v13543_v49  ;;  %v19750_v49 = vld [vmem:[#allocation31_spill] sm:$0xff] }
  0xc8   : > { %11783 = vmatmul.mubr.msk.f32.gmra.mxu0 %vm279_vm1, %v19746_v38 }
  0xc9   : > { %11785 = vmatprep.mubr.msk.f32.mxu0 %vm279_vm1, %v19747_v4 }
  0xca   : > { %11836 = vmatmul.mubr.msk.f32.gmra.mxu1 %vm279_vm1, %v13554_v52 }
  0xcb   : > { %11838 = vmatprep.mubr.msk.f32.mxu1 %vm279_vm1, %v13560_v9  ;;  %v19752_v9 = vld [vmem:[#allocation34_spill] sm:$0xff] }
  0xcc   : > { %11786 = vmatmul.mubr.msk.f32.gmra.mxu0 %vm279_vm1, %v19748_v19 }
  0xcd   : > { %11788 = vmatprep.mubr.msk.f32.mxu0 %vm279_vm1, %v19749_v13 }
  0xce   : > { %11839 = vmatmul.mubr.msk.f32.gmra.mxu1 %vm279_vm1, %v13571_v11  ;;  %v2107_v11 = vrot.slane %v13634_v15, 2 }
  0xcf   : > { %11841 = vmatprep.mubr.msk.f32.mxu1 %vm279_vm1, %v13577_v21  ;;  %v2106_v21 = vrot.slane %v13619_v3, 2 }
  0xd0   : > { %11789 = vmatmul.mubr.msk.f32.gmra.mxu0 %vm279_vm1, %v19750_v49 }
  0xd1   : > { %11791 = vmatprep.mubr.msk.f32.mxu0 %vm279_vm1, %v19751_v36  ;;  %v13777_v52 = vsel %vm1159_vm5, %v2106_v21, %v2107_v11 }
  0xd2   : > { %11842 = vmatmul.mubr.msk.f32.gmra.mxu1 %vm279_vm1, %v13588_v17  ;;  %v1836_v17 = vrot.slane %v13634_v15, 1 }
  0xd3   : > { %11844 = vmatprep.mubr.msk.f32.mxu1 %vm279_vm1, %v13594_v33  ;;  %v1835_v33 = vrot.slane %v13619_v3, 1 }
  0xd4   : > { %11792 = vmatmul.mubr.msk.f32.gmra.mxu0 %vm279_vm1, %v19752_v9 }
  0xd5   : > { %11794 = vmatprep.mubr.msk.f32.mxu0 %vm279_vm1, %v13305_v43 }
  0xd6   : > { %11845 = vmatmul.mubr.msk.f32.gmra.mxu1 %vm279_vm1, %v13605_v56  ;;  %v436_v56 = vld [vmem:[#allocation2 + $0x190] sm:$0x3] }
  0xd7   : > { %11847 = vmatprep.mubr.msk.f32.mxu1 %vm279_vm1, %v13611_v18  ;;  %v2109_v18 = vrot.slane %v436_v56, 2  ;;  %v1838_v8 = vrot.slane %v436_v56, 1 }
  0xd8   : > { %11795 = vmatmul.mubr.msk.f32.gmra.mxu0 %vm279_vm1, %v13322_v0 }
  0xd9   : > { %11797 = vmatprep.mubr.msk.f32.mxu0 %vm279_vm1, %v13328_v23  ;;  %v13796_v21 = vsel %vm491_vm4, %v1836_v17, %v1838_v8 }
  0xda   : > { %11848 = vmatmul.mubr.msk.f32.gmra.mxu1 %vm279_vm1, %v13624_v29  ;;  %v13784_v29 = vsel %vm491_vm4, %v1835_v33, %v1836_v17  ;;  %v11610_v33 = vpop.f32.mrf.mxu1 }
  0xdb   : > { %11850 = vmatprep.mubr.msk.f32.mxu1 %vm279_vm1, %v13630_v26  ;;  %v13789_v26 = vsel %vm1159_vm5, %v2107_v11, %v2109_v18  ;;  %v11560_v11 = vpop.f32.mrf.mxu0  ;;  %v19755_v18 = vld [vmem:[#allocation5_spill] sm:$0xff] }
  0xdc   : > { %11798 = vmatmul.mubr.msk.f32.gmra.mxu0 %vm279_vm1, %v13341_v27  ;;  %v998_v56 = vpop.f32.mrf.mxu1  ;;  %v13808_v8 = vadd.f32 %v11610_v33, %v11560_v11  ;;  %v19756_v11 = vld [vmem:[#allocation6_spill] sm:$0xff] }
  0xdd   : > { %11800 = vmatprep.mubr.msk.f32.mxu0 %vm279_vm1, %v19753_v62  ;;  %v706_v17 = vpop.f32.mrf.mxu0 }
  0xde   : > { %11851 = vmatmul.mubr.msk.f32.gmra.mxu1 %vm279_vm1, %v13641_v1 }
  0xdf   : > { %11853 = vmatprep.mubr.msk.f32.mxu1 %vm279_vm1, %v13777_v52 }
  0xe0   : > { %11801 = vmatmul.mubr.msk.f32.gmra.mxu0 %vm279_vm1, %v19754_v50 }
  0xe1   : > { %11803 = vmatprep.mubr.msk.f32.mxu0 %vm279_vm1, %v13784_v29 }
  0xe2   : > { %11854 = vmatmul.mubr.msk.f32.gmra.mxu1 %vm279_vm1, %v13789_v26 }
  0xe3   : > { %11908 = vmatprep.mubr.msk.f32.mxu1 %vm279_vm1, %v13027_v58  ;;  %v13814_v58 = vadd.f32 %v998_v56, %v706_v17 }
  0xe4   : > { %11804 = vmatmul.mubr.msk.f32.gmra.mxu0 %vm279_vm1, %v13796_v21 }
  0xe5   : > { %11858 = vmatprep.mubr.msk.f32.mxu0 %vm279_vm1, %v12995_v45 }
  0xe6   : > { %11909 = vmatmul.mubr.msk.f32.vlgmr.msra.gmra.mxu1 %vm279_vm1, %v13038_v61 }
  0xe7   : > { %11911 = vmatprep.mubr.msk.f32.mxu1 %vm279_vm1, %v13044_v63 }
  0xe8   : > { %11859 = vmatmul.mubr.msk.f32.vlgmr.msra.gmra.mxu0 %vm279_vm1, %v12997_v46 }
  0xe9   : > { %11957 = vmatpush3.msk.msra.mxu0 %vm636_vm0, %v13660_v6  ;;  %11861 = vmatprep.mubr.msk.f32.mxu0 %vm279_vm1, %v12999_v47  ;;  %v11613_v45 = vpop.f32.mrf.mxu1 }
  0xea   : > { %11912 = vmatmul.mubr.msk.f32.gmra.mxu1 %vm279_vm1, %v19734_v53 }
  0xeb   : > { %v1008_v61 = vpop.f32.mrf.mxu1  ;;  %11914 = vmatprep.mubr.msk.f32.mxu1 %vm279_vm1, %v19735_v54 }
  0xec   : > { %v11563_v63 = vpop.f32.mrf.mxu0  ;;  %11862 = vmatmul.mubr.msk.f32.gmra.mxu0 %vm279_vm1, %v13009_v51 }
  0xed   : > { %v13826_v46 = vadd.f32 %v11613_v45, %v11563_v63  ;;  %11864 = vmatprep.mubr.msk.f32.mxu0 %vm279_vm1, %v19755_v18  ;;  %v11616_v6 = vpop.f32.mrf.mxu1 }
  0xee   : > { %v716_v33 = vpop.f32.mrf.mxu0  ;;  %11915 = vmatmul.mubr.msk.f32.gmra.mxu1 %vm279_vm1, %v19736_v28 }
  0xef   : > { %v13832_v47 = vadd.f32 %v1008_v61, %v716_v33  ;;  %v1018_v53 = vpop.f32.mrf.mxu1  ;;  %11917 = vmatprep.mubr.msk.f32.mxu1 %vm279_vm1, %v19737_v30  ;;  %v19757_v61 = vld [vmem:[#allocation9_spill] sm:$0xff]  ;;  %v19758_v33 = vld [vmem:[#allocation12_spill] sm:$0xff] }
  0xf0   : > { %v11566_v54 = vpop.f32.mrf.mxu0  ;;  %11865 = vmatmul.mubr.msk.f32.gmra.mxu0 %vm279_vm1, %v13031_v60 }
  0xf1   : > { %v13838_v51 = vadd.f32 %v11616_v6, %v11566_v54  ;;  %11867 = vmatprep.mubr.msk.f32.mxu0 %vm279_vm1, %v19756_v11  ;;  %v11619_v56 = vpop.f32.mrf.mxu1 }
  0xf2   : > { %v726_v17 = vpop.f32.mrf.mxu0  ;;  %11918 = vmatmul.mubr.msk.f32.gmra.mxu1 %vm279_vm1, %v19738_v39 }
  0xf3   : > { %v13844_v28 = vadd.f32 %v1018_v53, %v726_v17  ;;  %v1028_v45 = vpop.f32.mrf.mxu1  ;;  %11920 = vmatprep.mubr.msk.f32.mxu1 %vm279_vm1, %v19739_v34 }
  0xf4   : > { %v11569_v30 = vpop.f32.mrf.mxu0  ;;  %11868 = vmatmul.mubr.msk.f32.gmra.mxu0 %vm279_vm1, %v13054_v5 }
  0xf5   : > { %v13850_v60 = vadd.f32 %v11619_v56, %v11569_v30  ;;  %11870 = vmatprep.mubr.msk.f32.mxu0 %vm279_vm1, %v19757_v61  ;;  %v11622_v63 = vpop.f32.mrf.mxu1  ;;  %v19759_v56 = vld [vmem:[#allocation15_spill] sm:$0xff]  ;;  %v19760_v61 = vld [vmem:[#allocation18_spill] sm:$0xff] }
  0xf6   : > { %v736_v18 = vpop.f32.mrf.mxu0  ;;  %11921 = vmatmul.mubr.msk.f32.gmra.mxu1 %vm279_vm1, %v19740_v40 }
  0xf7   : > { %v13856_v39 = vadd.f32 %v1028_v45, %v736_v18  ;;  %v1038_v6 = vpop.f32.mrf.mxu1  ;;  %11923 = vmatprep.mubr.msk.f32.mxu1 %vm279_vm1, %v19741_v42 }
  0xf8   : > { %v11572_v34 = vpop.f32.mrf.mxu0  ;;  %11871 = vmatmul.mubr.msk.f32.gmra.mxu0 %vm279_vm1, %v13078_v14 }
  0xf9   : > { %v13862_v5 = vadd.f32 %v11622_v63, %v11572_v34  ;;  %11873 = vmatprep.mubr.msk.f32.mxu0 %vm279_vm1, %v19758_v33  ;;  %v11625_v53 = vpop.f32.mrf.mxu1  ;;  %v19761_v34 = vld [vmem:[#allocation21_spill] sm:$0xff] }
  0xfa   : > { %v746_v54 = vpop.f32.mrf.mxu0  ;;  %11924 = vmatmul.mubr.msk.f32.gmra.mxu1 %vm279_vm1, %v19742_v10 }
  0xfb   : > { %v13868_v40 = vadd.f32 %v1038_v6, %v746_v54  ;;  %v1048_v11 = vpop.f32.mrf.mxu1  ;;  %11926 = vmatprep.mubr.msk.f32.mxu1 %vm279_vm1, %v19743_v22 }
  0xfc   : > { %v11575_v42 = vpop.f32.mrf.mxu0  ;;  %11874 = vmatmul.mubr.msk.f32.gmra.mxu0 %vm279_vm1, %v13128_v37 }
  0xfd   : > { %v13874_v14 = vadd.f32 %v11625_v53, %v11575_v42  ;;  %11876 = vmatprep.mubr.msk.f32.mxu0 %vm279_vm1, %v19759_v56  ;;  %v11628_v17 = vpop.f32.mrf.mxu1 }
  0xfe   : > { %v756_v45 = vpop.f32.mrf.mxu0  ;;  %11927 = vmatmul.mubr.msk.f32.gmra.mxu1 %vm279_vm1, %v19744_v35 }
  0xff   : > { %v13880_v10 = vadd.f32 %v1048_v11, %v756_v45  ;;  %v1058_v30 = vpop.f32.mrf.mxu1  ;;  %11929 = vmatprep.mubr.msk.f32.mxu1 %vm279_vm1, %v19745_v59  ;;  %v19762_v11 = vld [vmem:[#allocation24_spill] sm:$0xff] }
 0x100   : > { %v11578_v22 = vpop.f32.mrf.mxu0  ;;  %11877 = vmatmul.mubr.msk.f32.gmra.mxu0 %vm279_vm1, %v13154_v55 }
 0x101   : > { %v13886_v37 = vadd.f32 %v11628_v17, %v11578_v22  ;;  %11879 = vmatprep.mubr.msk.f32.mxu0 %vm279_vm1, %v19760_v61  ;;  %v11631_v63 = vpop.f32.mrf.mxu1  ;;  %v19763_v17 = vld [vmem:[#allocation27_spill] sm:$0xff]  ;;  %v19764_v22 = vld [vmem:[#allocation30_spill] sm:$0xff] }
 0x102   : > { %v766_v18 = vpop.f32.mrf.mxu0  ;;  %11930 = vmatmul.mubr.msk.f32.gmra.mxu1 %vm279_vm1, %v19746_v38 }
 0x103   : > { %v13892_v35 = vadd.f32 %v1058_v30, %v766_v18  ;;  %v1068_v6 = vpop.f32.mrf.mxu1  ;;  %11932 = vmatprep.mubr.msk.f32.mxu1 %vm279_vm1, %v19747_v4  ;;  %v19765_v18 = vld [vmem:[#allocation33_spill] sm:$0xff] }
 0x104   : > { %v11581_v59 = vpop.f32.mrf.mxu0  ;;  %11880 = vmatmul.mubr.msk.f32.gmra.mxu0 %vm279_vm1, %v13177_v12 }
 0x105   : > { %v13898_v55 = vadd.f32 %v11631_v63, %v11581_v59  ;;  %11882 = vmatprep.mubr.msk.f32.mxu0 %vm279_vm1, %v19761_v34  ;;  %v11634_v33 = vpop.f32.mrf.mxu1  ;;  %v13958_v59 = vld [vmem:[#allocation2 + $0x198] sm:$0xff]  ;;  %v13960_v34 = vld [vmem:[#allocation2 + $0x1a0] sm:$0xff] }
 0x106   : > { %v776_v53 = vpop.f32.mrf.mxu0  ;;  %11933 = vmatmul.mubr.msk.f32.gmra.mxu1 %vm279_vm1, %v19748_v19 }
 0x107   : > { %v13904_v38 = vadd.f32 %v1068_v6, %v776_v53  ;;  %v13906_v54 = vpop.f32.mrf.mxu1  ;;  %11935 = vmatprep.mubr.msk.f32.mxu1 %vm279_vm1, %v19749_v13  ;;  %v2647_v53 = vrot.slane %v13960_v34, 1 }
 0x108   : > { %v11584_v4 = vpop.f32.mrf.mxu0  ;;  %11883 = vmatmul.mubr.msk.f32.gmra.mxu0 %vm279_vm1, %v13200_v24 }
 0x109   : > { %v13912_v12 = vadd.f32 %v11634_v33, %v11584_v4  ;;  %11885 = vmatprep.mubr.msk.f32.mxu0 %vm279_vm1, %v19762_v11  ;;  %v11637_v42 = vpop.f32.mrf.mxu1  ;;  %v2646_v33 = vrot.slane %v13958_v59, 1  ;;  %v13974_v4 = vld [vmem:[#allocation2 + $0x1a8] sm:$0x3] }
 0x10a   : > { %v13916_v56 = vpop.f32.mrf.mxu0  ;;  %11936 = vmatmul.mubr.msk.f32.gmra.mxu1 %vm279_vm1, %v19750_v49 }
 0x10b   : > { %v13920_v19 = vpop.f32.mrf.mxu1  ;;  %11938 = vmatprep.mubr.msk.f32.mxu1 %vm279_vm1, %v19751_v36 }
 0x10c   : > { %v11587_v13 = vpop.f32.mrf.mxu0  ;;  %11886 = vmatmul.mubr.msk.f32.gmra.mxu0 %vm279_vm1, %v13223_v44 }
 0x10d   : > { %v13926_v24 = vadd.f32 %v11637_v42, %v11587_v13  ;;  %11888 = vmatprep.mubr.msk.f32.mxu0 %vm279_vm1, %v19763_v17  ;;  %v11640_v45 = vpop.f32.mrf.mxu1  ;;  %v19766_v42 = vld [vmem:[#allocation35_spill] sm:$0xff] }
 0x10e   : > { %v13930_v30 = vpop.f32.mrf.mxu0  ;;  %11939 = vmatmul.mubr.msk.f32.gmra.mxu1 %vm279_vm1, %v19752_v9 }
 0x10f   : > { %v13934_v49 = vpop.f32.mrf.mxu1  ;;  %11941 = vmatprep.mubr.msk.f32.mxu1 %vm279_vm1, %v13305_v43 }
 0x110   : > { %v11590_v36 = vpop.f32.mrf.mxu0  ;;  %11889 = vmatmul.mubr.msk.f32.gmra.mxu0 %vm279_vm1, %v13246_v20 }
 0x111   : > { %v13940_v44 = vadd.f32 %v11640_v45, %v11590_v36  ;;  %11891 = vmatprep.mubr.msk.f32.mxu0 %vm279_vm1, %v19764_v22  ;;  %v11643_v61 = vpop.f32.mrf.mxu1  ;;  %v2648_v45 = vsel %vm491_vm4, %v2646_v33, %v2647_v53 }
 0x112   : > { %v13944_v63 = vpop.f32.mrf.mxu0  ;;  %11942 = vmatmul.mubr.msk.f32.gmra.mxu1 %vm279_vm1, %v13322_v0 }
 0x113   : > { %v13948_v9 = vpop.f32.mrf.mxu1  ;;  %11944 = vmatprep.mubr.msk.f32.mxu1 %vm279_vm1, %v13328_v23 }
 0x114   : > { %v11593_v43 = vpop.f32.mrf.mxu0  ;;  %11892 = vmatmul.mubr.msk.f32.gmra.mxu0 %vm279_vm1, %v13269_v31 }
 0x115   : > { %v13954_v20 = vadd.f32 %v11643_v61, %v11593_v43  ;;  %11894 = vmatprep.mubr.msk.f32.mxu0 %vm279_vm1, %v19765_v18  ;;  %v11646_v6 = vpop.f32.mrf.mxu1 }
 0x116   : > { %v13962_v0 = vpop.f32.mrf.mxu0  ;;  %11945 = vmatmul.mubr.msk.f32.gmra.mxu1 %vm279_vm1, %v13341_v27 }
 0x117   : > { %v13966_v23 = vpop.f32.mrf.mxu1  ;;  %11947 = vmatprep.mubr.msk.f32.mxu1 %vm279_vm1, %v19753_v62 }
 0x118   : > { %v11596_v31 = vpop.f32.mrf.mxu0  ;;  %11895 = vmatmul.mubr.msk.f32.gmra.mxu0 %vm279_vm1, %v13292_v16  ;;  %v2649_v16 = vrot.slane %v13974_v4, 1 }
 0x119   : > { %v13976_v11 = vadd.f32 %v11646_v6, %v11596_v31  ;;  %11897 = vmatprep.mubr.msk.f32.mxu0 %vm279_vm1, %v19766_v42  ;;  %v11649_v27 = vpop.f32.mrf.mxu1 }
 0x11a   : > { %v13980_v13 = vpop.f32.mrf.mxu0  ;;  %11948 = vmatmul.mubr.msk.f32.gmra.mxu1 %vm279_vm1, %v19754_v50  ;;  %v2650_v61 = vsel %vm491_vm4, %v2647_v53, %v2649_v16 }
 0x11b   : > { %v13984_v62 = vpop.f32.mrf.mxu1  ;;  %11950 = vmatprep.mubr.msk.f32.mxu1 %vm279_vm1, %v13784_v29 }
 0x11c   : > { %v11599_v17 = vpop.f32.mrf.mxu0  ;;  %11898 = vmatmul.mubr.msk.f32.gmra.mxu0 %vm279_vm1, %v13315_v48 }
 0x11d   : > { %v13992_v36 = vadd.f32 %v11649_v27, %v11599_v17  ;;  %11900 = vmatprep.mubr.msk.f32.mxu0 %vm279_vm1, %v13619_v3  ;;  %v11652_v22 = vpop.f32.mrf.mxu1 }
 0x11e   : > { %v13996_v50 = vpop.f32.mrf.mxu0  ;;  %11951 = vmatmul.mubr.msk.f32.gmra.mxu1 %vm279_vm1, %v13796_v21 }
 0x11f   : > { %v14000_v29 = vpop.f32.mrf.mxu1  ;;  %11953 = vmatprep.mubr.msk.f32.mxu1 %vm279_vm1, %v2648_v45 }
 0x120   : > { %v11602_v48 = vpop.f32.mrf.mxu0  ;;  %11901 = vmatmul.mubr.msk.f32.gmra.mxu0 %vm279_vm1, %v13634_v15 }
 0x121   : > { %v14006_v43 = vadd.f32 %v11652_v22, %v11602_v48  ;;  %11903 = vmatprep.mubr.msk.f32.mxu0 %vm279_vm1, %v13958_v59  ;;  %v11655_v3 = vpop.f32.mrf.mxu1 }
 0x122   : > { %v14010_v18 = vpop.f32.mrf.mxu0  ;;  %11954 = vmatmul.mubr.msk.f32.gmra.mxu1 %vm279_vm1, %v2650_v61 }
 0x123   : > { %v14013_v21 = vpop.f32.mrf.mxu1 }
 0x124   : > { %v11605_v6 = vpop.f32.mrf.mxu0  ;;  %11904 = vmatmul.mubr.msk.f32.gmra.mxu0 %vm279_vm1, %v13960_v34 }
 0x125   : > { %v14017_v31 = vadd.f32 %v11655_v3, %v11605_v6  ;;  %11958 = vmatprep.mubr.msk.f32.mxu0 %vm279_vm1, %v13405_v32  ;;  %v11710_v15 = vpop.f32.mrf.mxu1 }
 0x126   : > { %v14021_v33 = vpop.f32.mrf.mxu0 }
 0x127   : > { %v14023_v53 = vpop.f32.mrf.mxu1 }
 0x128   : > { %v11660_v42 = vpop.f32.mrf.mxu0  ;;  %11959 = vmatmul.mubr.msk.f32.vlgmr.msra.gmra.mxu0 %vm279_vm1, %v13418_v25 }
 0x129   : > { %v1533_v27 = vadd.f32 %v11660_v42, %v13808_v8  ;;  %11961 = vmatprep.mubr.msk.f32.mxu0 %vm279_vm1, %v13424_v7 }
 0x12a   : > { %v1373_v16 = vpop.f32.mrf.mxu0  ;;  %v11713_v17 = vpop.f32.mrf.mxu1 }
 0x12b   : > { %v14031_v45 = vadd.f32 %v1373_v16, %v13814_v58  ;;  %v14033_v32 = vadd.f32 %v11710_v15, %v1533_v27  ;;  %v19767_v15 = vld [vmem:[#allocation38_spill] sm:$0xff]  ;;  %v19768_v16 = vld [vmem:[#allocation39_spill] sm:$0xff] }
 0x12c   : > { %v11663_v22 = vpop.f32.mrf.mxu0  ;;  %11962 = vmatmul.mubr.msk.f32.gmra.mxu0 %vm279_vm1, %v13435_v57  ;;  %v14037_v61 = vpop.f32.mrf.mxu1 }
 0x12d   : > { %v1535_v25 = vadd.f32 %v11663_v22, %v13826_v46  ;;  %11964 = vmatprep.mubr.msk.f32.mxu0 %vm279_vm1, %v13441_v41  ;;  %v19769_v22 = vld [vmem:[#allocation40_spill] sm:$0xff] }
 0x12e   : > { %v1383_v8 = vpop.f32.mrf.mxu0  ;;  %v11716_v7 = vpop.f32.mrf.mxu1 }
 0x12f   : > { %v14043_v48 = vadd.f32 %v1383_v8, %v13832_v47  ;;  %v14045_v58 = vadd.f32 %v11713_v17, %v1535_v25 }
 0x130   : > { %v11666_v3 = vpop.f32.mrf.mxu0  ;;  %11965 = vmatmul.mubr.msk.f32.gmra.mxu0 %vm279_vm1, %v13452_v2  ;;  %v14049_v6 = vpop.f32.mrf.mxu1 }
 0x131   : > { %v1537_v57 = vadd.f32 %v11666_v3, %v13838_v51  ;;  %11967 = vmatprep.mubr.msk.f32.mxu0 %vm279_vm1, %v19767_v15  ;;  %v19770_v3 = vld [vmem:[#allocation41_spill] sm:$0xff] }
 0x132   : > { %v1393_v46 = vpop.f32.mrf.mxu0  ;;  %v11719_v41 = vpop.f32.mrf.mxu1 }
 0x133   : > { %v14055_v42 = vadd.f32 %v1393_v46, %v13844_v28  ;;  %v14057_v47 = vadd.f32 %v11716_v7, %v1537_v57  ;;  %v19771_v46 = vld [vmem:[#allocation42_spill] sm:$0xff] }
 0x134   : > { %v11669_v27 = vpop.f32.mrf.mxu0  ;;  %11968 = vmatmul.mubr.msk.f32.gmra.mxu0 %vm279_vm1, %v19768_v16  ;;  %v14061_v17 = vpop.f32.mrf.mxu1 }
 0x135   : > { %v1539_v2 = vadd.f32 %v11669_v27, %v13850_v60  ;;  %11970 = vmatprep.mubr.msk.f32.mxu0 %vm279_vm1, %v19769_v22 }
 0x136   : > { %v1403_v51 = vpop.f32.mrf.mxu0  ;;  %v11722_v25 = vpop.f32.mrf.mxu1 }
 0x137   : > { %v14067_v8 = vadd.f32 %v1403_v51, %v13856_v39  ;;  %v14069_v28 = vadd.f32 %v11719_v41, %v1539_v2  ;;  %v19772_v2 = vld [vmem:[#allocation43_spill] sm:$0xff] }
 0x138   : > { %v11672_v7 = vpop.f32.mrf.mxu0  ;;  %11971 = vmatmul.mubr.msk.f32.gmra.mxu0 %vm279_vm1, %v19770_v3  ;;  %v14073_v57 = vpop.f32.mrf.mxu1  ;;  %v19774_v3 = vld [vmem:[#allocation44_spill] sm:$0xff] }
 0x139   : > { %v1541_v15 = vadd.f32 %v11672_v7, %v13862_v5  ;;  %11973 = vmatprep.mubr.msk.f32.mxu0 %vm279_vm1, %v19771_v46 }
 0x13a   : > { %v1413_v60 = vpop.f32.mrf.mxu0  ;;  %v11725_v27 = vpop.f32.mrf.mxu1 }
 0x13b   : > { %v14079_v16 = vadd.f32 %v1413_v60, %v13868_v40  ;;  %v14081_v39 = vadd.f32 %v11722_v25, %v1541_v15  ;;  %v19776_v15 = vld [vmem:[#allocation45_spill] sm:$0xff] }
 0x13c   : > { %v11675_v41 = vpop.f32.mrf.mxu0  ;;  %11974 = vmatmul.mubr.msk.f32.gmra.mxu0 %vm279_vm1, %v19772_v2  ;;  %v14085_v22 = vpop.f32.mrf.mxu1 }
 0x13d   : > { %19773 = vst [vmem:[#allocation7_spill] sm:$0xff] %v14085_v22  ;;  %v1543_v51 = vadd.f32 %v11675_v41, %v13874_v14  ;;  %11976 = vmatprep.mubr.msk.f32.mxu0 %vm279_vm1, %v19774_v3  ;;  %v19778_v22 = vld [vmem:[#allocation46_spill] sm:$0xff] }
 0x13e   : > { %v1423_v5 = vpop.f32.mrf.mxu0  ;;  %v11728_v7 = vpop.f32.mrf.mxu1 }
 0x13f   : > { %v14091_v46 = vadd.f32 %v1423_v5, %v13880_v10  ;;  %v14093_v40 = vadd.f32 %v11725_v27, %v1543_v51  ;;  %v19780_v51 = vld [vmem:[#allocation47_spill] sm:$0xff] }
 0x140   : > { %v11678_v25 = vpop.f32.mrf.mxu0  ;;  %11977 = vmatmul.mubr.msk.f32.gmra.mxu0 %vm279_vm1, %v19776_v15  ;;  %v14097_v60 = vpop.f32.mrf.mxu1 }
 0x141   : > { %19775 = vst [vmem:[#allocation8_spill] sm:$0xff] %v14091_v46  ;;  %19777 = vst [vmem:[#allocation10_spill] sm:$0xff] %v14097_v60  ;;  %v1545_v2 = vadd.f32 %v11678_v25, %v13886_v37  ;;  %11979 = vmatprep.mubr.msk.f32.mxu0 %vm279_vm1, %v19778_v22  ;;  %v19782_v60 = vld [vmem:[#allocation48_spill] sm:$0xff]  ;;  %v19796_v46 = vld [vmem:[#allocation57_spill] sm:$0xff] }
 0x142   : > { %v1433_v14 = vpop.f32.mrf.mxu0  ;;  %v11731_v41 = vpop.f32.mrf.mxu1 }
 0x143   : > { %v14103_v3 = vadd.f32 %v1433_v14, %v13892_v35  ;;  %v14105_v10 = vadd.f32 %v11728_v7, %v1545_v2  ;;  %v19784_v2 = vld [vmem:[#allocation49_spill] sm:$0xff] }
 0x144   : > { %v11681_v27 = vpop.f32.mrf.mxu0  ;;  %11980 = vmatmul.mubr.msk.f32.gmra.mxu0 %vm279_vm1, %v19780_v51  ;;  %v14109_v5 = vpop.f32.mrf.mxu1 }
 0x145   : > { %19779 = vst [vmem:[#allocation11_spill] sm:$0xff] %v14103_v3  ;;  %19781 = vst [vmem:[#allocation13_spill] sm:$0xff] %v14109_v5  ;;  %v1547_v15 = vadd.f32 %v11681_v27, %v13898_v55  ;;  %11982 = vmatprep.mubr.msk.f32.mxu0 %vm279_vm1, %v19782_v60  ;;  %v19786_v5 = vld [vmem:[#allocation50_spill] sm:$0xff]  ;;  %v19793_v3 = vld [vmem:[#allocation55_spill] sm:$0xff] }
 0x146   : > { %v1443_v37 = vpop.f32.mrf.mxu0  ;;  %v11734_v22 = vpop.f32.mrf.mxu1 }
 0x147   : > { %v14115_v25 = vadd.f32 %v1443_v37, %v13904_v38  ;;  %v14117_v35 = vadd.f32 %v11731_v41, %v1547_v15  ;;  %v19787_v37 = vld [vmem:[#allocation51_spill] sm:$0xff] }
 0x148   : > { %v11684_v7 = vpop.f32.mrf.mxu0  ;;  %11983 = vmatmul.mubr.msk.f32.gmra.mxu0 %vm279_vm1, %v19784_v2  ;;  %v14121_v14 = vpop.f32.mrf.mxu1  ;;  %v19789_v2 = vld [vmem:[#allocation52_spill] sm:$0xff] }
 0x149   : > { %19783 = vst [vmem:[#allocation14_spill] sm:$0xff] %v14115_v25  ;;  %19785 = vst [vmem:[#allocation16_spill] sm:$0xff] %v14121_v14  ;;  %v1549_v51 = vadd.f32 %v11684_v7, %v13912_v12  ;;  %11985 = vmatprep.mubr.msk.f32.mxu0 %vm279_vm1, %v19786_v5  ;;  %v19790_v25 = vld [vmem:[#allocation53_spill] sm:$0xff] }
 0x14a   : > { %v14126_v55 = vpop.f32.mrf.mxu0  ;;  %v11737_v60 = vpop.f32.mrf.mxu1 }
 0x14b   : > { %v14128_v27 = vadd.f32 %v11734_v22, %v1549_v51 }
 0x14c   : > { %v11687_v38 = vpop.f32.mrf.mxu0  ;;  %11986 = vmatmul.mubr.msk.f32.gmra.mxu0 %vm279_vm1, %v19787_v37  ;;  %v14132_v41 = vpop.f32.mrf.mxu1  ;;  %v19792_v37 = vld [vmem:[#allocation54_spill] sm:$0xff] }
 0x14d   : > { %19788 = vst [vmem:[#allocation17_spill] sm:$0xff] %v14132_v41  ;;  %v1551_v15 = vadd.f32 %v11687_v38, %v13926_v24  ;;  %11988 = vmatprep.mubr.msk.f32.mxu0 %vm279_vm1, %v19789_v2 }
 0x14e   : > { %v14137_v12 = vpop.f32.mrf.mxu0  ;;  %v11740_v7 = vpop.f32.mrf.mxu1 }
 0x14f   : > { %v14139_v5 = vadd.f32 %v11737_v60, %v1551_v15  ;;  %v19795_v15 = vld [vmem:[#allocation56_spill] sm:$0xff] }
 0x150   : > { %v11690_v14 = vpop.f32.mrf.mxu0  ;;  %11989 = vmatmul.mubr.msk.f32.gmra.mxu0 %vm279_vm1, %v19790_v25  ;;  %v14143_v22 = vpop.f32.mrf.mxu1 }
 0x151   : > { %19791 = vst [vmem:[#allocation19_spill] sm:$0xff] %v14143_v22  ;;  %v1553_v51 = vadd.f32 %v11690_v14, %v13940_v44  ;;  %11991 = vmatprep.mubr.msk.f32.mxu0 %vm279_vm1, %v19792_v37 }
 0x152   : > { %v14148_v24 = vpop.f32.mrf.mxu0  ;;  %v11743_v38 = vpop.f32.mrf.mxu1 }
 0x153   : > { %v14150_v2 = vadd.f32 %v11740_v7, %v1553_v51  ;;  %v19797_v51 = vld [vmem:[#allocation58_spill] sm:$0xff] }
 0x154   : > { %v11693_v41 = vpop.f32.mrf.mxu0  ;;  %11992 = vmatmul.mubr.msk.f32.gmra.mxu0 %vm279_vm1, %v19793_v3  ;;  %v14154_v60 = vpop.f32.mrf.mxu1 }
 0x155   : > { %19794 = vst [vmem:[#allocation20_spill] sm:$0xff] %v14154_v60  ;;  %v1555_v25 = vadd.f32 %v11693_v41, %v13954_v20  ;;  %11994 = vmatprep.mubr.msk.f32.mxu0 %vm279_vm1, %v19795_v15  ;;  %v2917_v20 = vrot.slane %v13958_v59, 2  ;;  %v2918_v60 = vrot.slane %v13960_v34, 2  ;;  %v2920_v59 = vrot.slane %v13974_v4, 2 }
 0x156   : > { %v14159_v44 = vpop.f32.mrf.mxu0  ;;  %v11746_v14 = vpop.f32.mrf.mxu1 }
 0x157   : > { %v14161_v37 = vadd.f32 %v11743_v38, %v1555_v25  ;;  %v2919_v34 = vsel %vm1159_vm5, %v2917_v20, %v2918_v60 }
 0x158   : > { %v11696_v22 = vpop.f32.mrf.mxu0  ;;  %11995 = vmatmul.mubr.msk.f32.gmra.mxu0 %vm279_vm1, %v19796_v46  ;;  %v14165_v7 = vpop.f32.mrf.mxu1 }
 0x159   : > { %v1557_v3 = vadd.f32 %v11696_v22, %v13976_v11  ;;  %11997 = vmatprep.mubr.msk.f32.mxu0 %vm279_vm1, %v19797_v51 }
 0x15a   : > { %v14171_v41 = vpop.f32.mrf.mxu0  ;;  %v11749_v15 = vpop.f32.mrf.mxu1 }
 0x15b   : > { %v14174_v38 = vadd.f32 %v11746_v14, %v1557_v3 }
 0x15c   : > { %v11699_v25 = vpop.f32.mrf.mxu0  ;;  %11998 = vmatmul.mubr.msk.f32.gmra.mxu0 %vm279_vm1, %v13641_v1  ;;  %v14178_v46 = vpop.f32.mrf.mxu1 }
 0x15d   : > { %19798 = vst [vmem:[#allocation22_spill] sm:$0xff] %v14178_v46  ;;  %v1559_v11 = vadd.f32 %v11699_v25, %v13992_v36  ;;  %12000 = vmatprep.mubr.msk.f32.mxu0 %vm279_vm1, %v13777_v52  ;;  %v2921_v52 = vsel %vm1159_vm5, %v2918_v60, %v2920_v59 }
 0x15e   : > { %v14184_v22 = vpop.f32.mrf.mxu0  ;;  %v11752_v51 = vpop.f32.mrf.mxu1 }
 0x15f   : > { %v14187_v14 = vadd.f32 %v11749_v15, %v1559_v11 }
 0x160   : > { %v11702_v3 = vpop.f32.mrf.mxu0  ;;  %12001 = vmatmul.mubr.msk.f32.gmra.mxu0 %vm279_vm1, %v13789_v26  ;;  %v14191_v1 = vpop.f32.mrf.mxu1 }
 0x161   : > { %19799 = vst [vmem:[#allocation23_spill] sm:$0xff] %v14191_v1  ;;  %v1561_v36 = vadd.f32 %v11702_v3, %v14006_v43  ;;  %12003 = vmatprep.mubr.msk.f32.mxu0 %vm279_vm1, %v2919_v34 }
 0x162   : > { %v14196_v4 = vpop.f32.mrf.mxu0  ;;  %v11755_v25 = vpop.f32.mrf.mxu1 }
 0x163   : > { %v14198_v46 = vadd.f32 %v11752_v51, %v1561_v36 }
 0x164   : > { %v11705_v20 = vpop.f32.mrf.mxu0  ;;  %12004 = vmatmul.mubr.msk.f32.gmra.mxu0 %vm279_vm1, %v2921_v52  ;;  %v14201_v15 = vpop.f32.mrf.mxu1 }
 0x165   : > { %v1563_v26 = vadd.f32 %v11705_v20, %v14017_v31 }
 0x166   : > { %v14204_v11 = vpop.f32.mrf.mxu0  ;;  %v14206_v1 = vpop.f32.mrf.mxu1 }
 0x167   : > { %19800 = vst [vmem:[#allocation25_spill] sm:$0xff] %v14206_v1  ;;  %v14208_v43 = vadd.f32 %v11755_v25, %v1563_v26 }
 0x168   : > { %v11760_v34 = vpop.f32.mrf.mxu0  ;;  %v14210_v60 = vpop.f32.mrf.mxu1 }
 0x169   : > { %19801 = vst [vmem:[#allocation26_spill] sm:$0xff] %v14210_v60  ;;  %v14213_v59 = vadd.f32 %v11760_v34, %v14033_v32 }
 0x16a   : > { %v14215_v51 = vpop.f32.mrf.mxu0  ;;  %v14217_v3 = vpop.f32.mrf.mxu1 }
 0x16b   : > { %19802 = vst [vmem:[#allocation28_spill] sm:$0xff] %v14213_v59  ;;  %19803 = vst [vmem:[#allocation29_spill] sm:$0xff] %v14217_v3 }
 0x16c   : > { %v11763_v36 = vpop.f32.mrf.mxu0  ;;  %v14219_v52 = vpop.f32.mrf.mxu1 }
 0x16d   : > { %19804 = vst [vmem:[#allocation31_spill] sm:$0xff] %v14219_v52  ;;  %v14222_v31 = vadd.f32 %v11763_v36, %v14045_v58 }
 0x16e   : > { %v14224_v20 = vpop.f32.mrf.mxu0  ;;  %v14226_v25 = vpop.f32.mrf.mxu1 }
 0x16f   : > { %19805 = vst [vmem:[#allocation32_spill] sm:$0xff] %v14222_v31  ;;  %19806 = vst [vmem:[#allocation34_spill] sm:$0xff] %v14226_v25 }
 0x170   : > { %v11766_v26 = vpop.f32.mrf.mxu0  ;;  %v14228_v1 = vpop.f32.mrf.mxu1 }
 0x171   : > { %19807 = vst [vmem:[#allocation36_spill] sm:$0xff] %v14228_v1  ;;  %v14231_v32 = vadd.f32 %v11766_v26, %v14057_v47 }
 0x172   : > { %v14233_v34 = vpop.f32.mrf.mxu0  ;;  %v14235_v60 = vpop.f32.mrf.mxu1 }
 0x173   : > { %19808 = vst [vmem:[#allocation37_spill] sm:$0xff] %v14231_v32  ;;  %19809 = vst [vmem:[#allocation5_spill] sm:$0xff] %v14235_v60 }
 0x174   : > { %v11769_v3 = vpop.f32.mrf.mxu0  ;;  %v14237_v59 = vpop.f32.mrf.mxu1 }
 0x175   : > { %19810 = vst [vmem:[#allocation6_spill] sm:$0xff] %v14237_v59  ;;  %v14240_v58 = vadd.f32 %v11769_v3, %v14069_v28 }
 0x176   : > { %v14242_v36 = vpop.f32.mrf.mxu0  ;;  %v14244_v52 = vpop.f32.mrf.mxu1 }
 0x177   : > { %19811 = vst [vmem:[#allocation9_spill] sm:$0xff] %v14240_v58  ;;  %19812 = vst [vmem:[#allocation12_spill] sm:$0xff] %v14244_v52 }
 0x178   : > { %v11772_v25 = vpop.f32.mrf.mxu0  ;;  %v14246_v31 = vpop.f32.mrf.mxu1 }
 0x179   : > { %19813 = vst [vmem:[#allocation15_spill] sm:$0xff] %v14246_v31  ;;  %v14249_v47 = vadd.f32 %v11772_v25, %v14081_v39 }
 0x17a   : > { %v14251_v26 = vpop.f32.mrf.mxu0  ;;  %v14253_v1 = vpop.f32.mrf.mxu1 }
 0x17b   : > { %19814 = vst [vmem:[#allocation18_spill] sm:$0xff] %v14249_v47  ;;  %19815 = vst [vmem:[#allocation21_spill] sm:$0xff] %v14253_v1 }
 0x17c   : > { %v11775_v60 = vpop.f32.mrf.mxu0  ;;  %v14255_v32 = vpop.f32.mrf.mxu1 }
 0x17d   : > { %19816 = vst [vmem:[#allocation24_spill] sm:$0xff] %v14255_v32  ;;  %v14258_v28 = vadd.f32 %v11775_v60, %v14093_v40 }
 0x17e   : > { %v14260_v3 = vpop.f32.mrf.mxu0  ;;  %v14262_v59 = vpop.f32.mrf.mxu1 }
 0x17f   : > { %19817 = vst [vmem:[#allocation27_spill] sm:$0xff] %v14258_v28  ;;  %19818 = vst [vmem:[#allocation30_spill] sm:$0xff] %v14262_v59 }
 0x180   : > { %v11778_v52 = vpop.f32.mrf.mxu0  ;;  %v14264_v58 = vpop.f32.mrf.mxu1 }
 0x181   : > { %19819 = vst [vmem:[#allocation33_spill] sm:$0xff] %v14264_v58  ;;  %v14267_v39 = vadd.f32 %v11778_v52, %v14105_v10 }
 0x182   : > { %v14269_v25 = vpop.f32.mrf.mxu0  ;;  %v14271_v31 = vpop.f32.mrf.mxu1 }
 0x183   : > { %19820 = vst [vmem:[#allocation35_spill] sm:$0xff] %v14267_v39  ;;  %19821 = vst [vmem:[#allocation38_spill] sm:$0xff] %v14271_v31 }
 0x184   : > { %v11781_v1 = vpop.f32.mrf.mxu0  ;;  %v14273_v47 = vpop.f32.mrf.mxu1 }
 0x185   : > { %19822 = vst [vmem:[#allocation39_spill] sm:$0xff] %v14273_v47  ;;  %v14276_v40 = vadd.f32 %v11781_v1, %v14117_v35 }
 0x186   : > { %v14278_v60 = vpop.f32.mrf.mxu0  ;;  %v14280_v32 = vpop.f32.mrf.mxu1 }
 0x187   : > { %19823 = vst [vmem:[#allocation40_spill] sm:$0xff] %v14276_v40  ;;  %19824 = vst [vmem:[#allocation41_spill] sm:$0xff] %v14280_v32 }
 0x188   : > { %v11784_v59 = vpop.f32.mrf.mxu0  ;;  %v14282_v28 = vpop.f32.mrf.mxu1 }
 0x189   : > { %19825 = vst [vmem:[#allocation42_spill] sm:$0xff] %v14282_v28  ;;  %v14285_v10 = vadd.f32 %v11784_v59, %v14128_v27 }
 0x18a   : > { %v14287_v52 = vpop.f32.mrf.mxu0  ;;  %v14289_v58 = vpop.f32.mrf.mxu1 }
 0x18b   : > { %19826 = vst [vmem:[#allocation43_spill] sm:$0xff] %v14285_v10  ;;  %19827 = vst [vmem:[#allocation44_spill] sm:$0xff] %v14289_v58 }
 0x18c   : > { %v11787_v31 = vpop.f32.mrf.mxu0  ;;  %v14291_v39 = vpop.f32.mrf.mxu1 }
 0x18d   : > { %19828 = vst [vmem:[#allocation45_spill] sm:$0xff] %v14291_v39  ;;  %v14294_v35 = vadd.f32 %v11787_v31, %v14139_v5  ;;  %v19601_v31 = vmov -inf  }
 0x18e   : > { %v14296_v1 = vpop.f32.mrf.mxu0  ;;  %v14298_v47 = vpop.f32.mrf.mxu1  ;;  %3488 = vst.msk [vmem:[#allocation3] sm:$0xff] %vm279_vm1, %v19601_v31  ;;  %3489 = vst.msk [vmem:[#allocation3 + $0x8] sm:$0xff] %vm279_vm1, %v19601_v31 }
 0x18f   : > { %19829 = vst [vmem:[#allocation46_spill] sm:$0xff] %v14298_v47  ;;  %3492 = vst.msk [vmem:[#allocation3 + $0x18] sm:$0xff] %vm279_vm1, %v19601_v31 }
 0x190   : > { %v11790_v32 = vpop.f32.mrf.mxu0  ;;  %v14300_v40 = vpop.f32.mrf.mxu1  ;;  %3493 = vst.msk [vmem:[#allocation3 + $0x20] sm:$0xff] %vm279_vm1, %v19601_v31  ;;  %3496 = vst.msk [vmem:[#allocation3 + $0x1b0] sm:$0xff] %vm279_vm1, %v19601_v31 }
 0x191   : > { %19830 = vst [vmem:[#allocation47_spill] sm:$0xff] %v14300_v40  ;;  %v14303_v27 = vadd.f32 %v11790_v32, %v14150_v2  ;;  %3503 = vst.msk [vmem:[#allocation3 + $0x30] sm:$0x3] %vm282_vm2, %v19601_v31 }
 0x192   : > { %v14305_v59 = vpop.f32.mrf.mxu0  ;;  %v14307_v28 = vpop.f32.mrf.mxu1  ;;  %3504 = vst.msk [vmem:[#allocation3 + $0x48] sm:$0x3] %vm282_vm2, %v19601_v31  ;;  %3505 = vst.msk [vmem:[#allocation3 + $0x60] sm:$0x3] %vm282_vm2, %v19601_v31 }
 0x193   : > { %19831 = vst [vmem:[#allocation48_spill] sm:$0xff] %v14303_v27  ;;  %19832 = vst [vmem:[#allocation49_spill] sm:$0xff] %v14307_v28 }
 0x194   : > { %v11793_v58 = vpop.f32.mrf.mxu0  ;;  %v14309_v10 = vpop.f32.mrf.mxu1  ;;  %3497 = vst.msk [vmem:[#allocation3 + $0x1b8] sm:$0xff] %vm279_vm1, %v19601_v31  ;;  %3499 = vst.msk [vmem:[#allocation3 + $0x1c8] sm:$0xff] %vm279_vm1, %v19601_v31 }
 0x195   : > { %19833 = vst [vmem:[#allocation50_spill] sm:$0xff] %v14309_v10  ;;  %v14312_v5 = vadd.f32 %v11793_v58, %v14161_v37  ;;  %3500 = vst.msk [vmem:[#allocation3 + $0x1d0] sm:$0xff] %vm279_vm1, %v19601_v31 }
 0x196   : > { %3506 = vst.msk [vmem:[#allocation3 + $0x78] sm:$0x3] %vm282_vm2, %v19601_v31  ;;  %3507 = vst.msk [vmem:[#allocation3 + $0x90] sm:$0x3] %vm282_vm2, %v19601_v31  ;;  %v14394_v2 = vpop.f32.mrf.mxu0  ;;  %v14396_v37 = vpop.f32.mrf.mxu1 }
 0x197   : > { %19834 = vst [vmem:[#allocation51_spill] sm:$0xff] %v14312_v5  ;;  %3508 = vst.msk [vmem:[#allocation3 + $0xa8] sm:$0x3] %vm282_vm2, %v19601_v31 }
 0x198   : > { %3509 = vst.msk [vmem:[#allocation3 + $0xc0] sm:$0x3] %vm282_vm2, %v19601_v31  ;;  %3510 = vst.msk [vmem:[#allocation3 + $0xd8] sm:$0x3] %vm282_vm2, %v19601_v31  ;;  %v11796_v32 = vpop.f32.mrf.mxu0  ;;  %v14398_v58 = vpop.f32.mrf.mxu1 }
 0x199   : > { %3511 = vst.msk [vmem:[#allocation3 + $0xf0] sm:$0x3] %vm282_vm2, %v19601_v31  ;;  %3512 = vst.msk [vmem:[#allocation3 + $0x108] sm:$0x3] %vm282_vm2, %v19601_v31  ;;  %v14401_v10 = vadd.f32 %v11796_v32, %v14174_v38 }
 0x19a   : > { %3513 = vst.msk [vmem:[#allocation3 + $0x120] sm:$0x3] %vm282_vm2, %v19601_v31  ;;  %3514 = vst.msk [vmem:[#allocation3 + $0x138] sm:$0x3] %vm282_vm2, %v19601_v31  ;;  %v14403_v28 = vpop.f32.mrf.mxu0  ;;  %v14405_v5 = vpop.f32.mrf.mxu1 }
 0x19b   : > { %3515 = vst.msk [vmem:[#allocation3 + $0x150] sm:$0x3] %vm282_vm2, %v19601_v31  ;;  %3516 = vst.msk [vmem:[#allocation3 + $0x168] sm:$0x3] %vm282_vm2, %v19601_v31 }
 0x19c   : > { %3517 = vst.msk [vmem:[#allocation3 + $0x180] sm:$0x3] %vm282_vm2, %v19601_v31  ;;  %3518 = vst.msk [vmem:[#allocation3 + $0x198] sm:$0x3] %vm282_vm2, %v19601_v31  ;;  %v11799_v40 = vpop.f32.mrf.mxu0  ;;  %v14407_v47 = vpop.f32.mrf.mxu1 }
 0x19d   : > { %3519 = vst.msk [vmem:[#allocation3 + $0x42] sm:$0x3] %vm282_vm2, %v19601_v31  ;;  %3520 = vst.msk [vmem:[#allocation3 + $0x5a] sm:$0x3] %vm282_vm2, %v19601_v31  ;;  %v14410_v27 = vadd.f32 %v11799_v40, %v14187_v14 }
 0x19e   : > { %3521 = vst.msk [vmem:[#allocation3 + $0x72] sm:$0x3] %vm282_vm2, %v19601_v31  ;;  %3522 = vst.msk [vmem:[#allocation3 + $0x8a] sm:$0x3] %vm282_vm2, %v19601_v31  ;;  %v14414_v39 = vpop.f32.mrf.mxu1 }
 0x19f   : > { %3523 = vst.msk [vmem:[#allocation3 + $0xa2] sm:$0x3] %vm282_vm2, %v19601_v31  ;;  %3524 = vst.msk [vmem:[#allocation3 + $0xba] sm:$0x3] %vm282_vm2, %v19601_v31 }
 0x1a0   : > { %3525 = vst.msk [vmem:[#allocation3 + $0xd2] sm:$0x3] %vm282_vm2, %v19601_v31  ;;  %3526 = vst.msk [vmem:[#allocation3 + $0xea] sm:$0x3] %vm282_vm2, %v19601_v31 }
 0x1a1   : > { %3527 = vst.msk [vmem:[#allocation3 + $0x102] sm:$0x3] %vm282_vm2, %v19601_v31  ;;  %3528 = vst.msk [vmem:[#allocation3 + $0x11a] sm:$0x3] %vm282_vm2, %v19601_v31 }
 0x1a2   : > { %3529 = vst.msk [vmem:[#allocation3 + $0x132] sm:$0x3] %vm282_vm2, %v19601_v31  ;;  %3530 = vst.msk [vmem:[#allocation3 + $0x14a] sm:$0x3] %vm282_vm2, %v19601_v31 }
 0x1a3   : > { %3531 = vst.msk [vmem:[#allocation3 + $0x162] sm:$0x3] %vm282_vm2, %v19601_v31  ;;  %3532 = vst.msk [vmem:[#allocation3 + $0x17a] sm:$0x3] %vm282_vm2, %v19601_v31 }
 0x1a4   : > { %3533 = vst.msk [vmem:[#allocation3 + $0x192] sm:$0x3] %vm282_vm2, %v19601_v31  ;;  %3534 = vst.msk [vmem:[#allocation3 + $0x1aa] sm:$0x3] %vm282_vm2, %v19601_v31  ;;  %v14412_v31 = vpop.f32.mrf.mxu0 }
 0x1a5   : > { %19835 = vst [vmem:[#allocation52_spill] sm:$0xff] %v14394_v2  ;;  %19836 = vst [vmem:[#allocation53_spill] sm:$0xff] %v14396_v37  ;;  %v14416_v2 = vpop.f32.mrf.mxu1 }
 0x1a6   : > { %19837 = vst [vmem:[#allocation54_spill] sm:$0xff] %v14398_v58  ;;  %19838 = vst [vmem:[#allocation55_spill] sm:$0xff] %v14401_v10  ;;  %v11802_v37 = vpop.f32.mrf.mxu0 }
 0x1a7   : > { %19839 = vst [vmem:[#allocation56_spill] sm:$0xff] %v14405_v5  ;;  %19840 = vst [vmem:[#allocation57_spill] sm:$0xff] %v14407_v47  ;;  %v14419_v38 = vadd.f32 %v11802_v37, %v14198_v46  ;;  %v14423_v58 = vpop.f32.mrf.mxu1 }
 0x1a8   : > { %19841 = vst [vmem:[#allocation58_spill] sm:$0xff] %v14414_v39  ;;  %19842 = vst [vmem:[#allocation59_spill] sm:$0xff] %v14416_v2  ;;  %v14421_v32 = vpop.f32.mrf.mxu0 }
 0x1a9   : > { %19843 = vst [vmem:[#allocation60_spill] sm:$0xff] %v14419_v38  ;;  %19844 = vst [vmem:[#allocation61_spill] sm:$0xff] %v14423_v58  ;;  %v14425_v10 = vpop.f32.mrf.mxu1 }
 0x1aa   : > { %v11805_v5 = vpop.f32.mrf.mxu0  ;;  %19845 = vst [vmem:[#allocation62_spill] sm:$0xff] %v14425_v10 }
 0x1ab   : > { %v14428_v14 = vadd.f32 %v11805_v5, %v14208_v43  ;;  %v14432_v47 = vpop.f32.mrf.mxu1 }
 0x1ac   : > { %v14430_v40 = vpop.f32.mrf.mxu0  ;;  %19847 = vst [vmem:[#allocation64_spill] sm:$0xff] %v14432_v47 }
 0x1ad   : > { %19846 = vst [vmem:[#allocation63_spill] sm:$0xff] %v14428_v14  ;;  %v14436_v2 = vpop.f32.mrf.mxu1 }
 0x1ae   : > { %v14434_v39 = vpop.f32.mrf.mxu0  ;;  %19849 = vst [vmem:[#allocation66_spill] sm:$0xff] %v14436_v2 }
 0x1af   : > { %19848 = vst [vmem:[#allocation65_spill] sm:$0xff] %v14434_v39  ;;  %v14440_v37 = vpop.f32.mrf.mxu1  ;;  %v19858_v39 = vmov -inf  }
 0x1b0   : > { %v14438_v46 = vpop.f32.mrf.mxu0  ;;  %19851 = vst [vmem:[#allocation68_spill] sm:$0xff] %v14440_v37  ;;  %3491 = vst.msk [vmem:[#allocation3 + $0x10] sm:$0xf] %vm3490_vm6, %v19858_v39 }
 0x1b1   : > { %19850 = vst [vmem:[#allocation67_spill] sm:$0xff] %v14438_v46  ;;  %v14444_v58 = vpop.f32.mrf.mxu1  ;;  %3494 = vst.msk [vmem:[#allocation3 + $0x28] sm:$0xf] %vm3490_vm6, %v19858_v39 }
 0x1b2   : > { %v14442_v38 = vpop.f32.mrf.mxu0  ;;  %19853 = vst [vmem:[#allocation70_spill] sm:$0xff] %v14444_v58  ;;  %3498 = vst.msk [vmem:[#allocation3 + $0x1c0] sm:$0xf] %vm3490_vm6, %v19858_v39 }
 0x1b3   : > { %19852 = vst [vmem:[#allocation69_spill] sm:$0xff] %v14442_v38  ;;  %v14448_v43 = vpop.f32.mrf.mxu1  ;;  %3501 = vst.msk [vmem:[#allocation3 + $0x1d8] sm:$0xf] %vm3490_vm6, %v19858_v39 }
 0x1b4   : > { %v14446_v10 = vpop.f32.mrf.mxu0  ;;  %19855 = vst [vmem:[#allocation72_spill] sm:$0xff] %v14448_v43 }
 0x1b5   : > { %19854 = vst [vmem:[#allocation71_spill] sm:$0xff] %v14446_v10  ;;  %v14452_v47 = vpop.f32.mrf.mxu1 }
 0x1b6   : > { %v14450_v5 = vpop.f32.mrf.mxu0  ;;  %19857 = vst [vmem:[#allocation74_spill] sm:$0xff] %v14452_v47 }
 0x1b7   : > { %19856 = vst [vmem:[#allocation73_spill] sm:$0xff] %v14450_v5  ;;  %v14460_v58 = vpop.f32.mrf.mxu1 }
 0x1b8   : > { %v14458_v37 = vpop.f32.mrf.mxu0  ;;  %19860 = vst [vmem:[#allocation76_spill] sm:$0xff] %v14460_v58 }
 0x1b9   : > { %19859 = vst [vmem:[#allocation75_spill] sm:$0xff] %v14458_v37  ;;  %v14464_v43 = vpop.f32.mrf.mxu1 }
 0x1ba   : > { %v14462_v2 = vpop.f32.mrf.mxu0  ;;  %19862 = vst [vmem:[#allocation78_spill] sm:$0xff] %v14464_v43 }
 0x1bb   : > { %19861 = vst [vmem:[#allocation77_spill] sm:$0xff] %v14462_v2  ;;  %v14468_v5 = vpop.f32.mrf.mxu1 }
 0x1bc   : > { %v14466_v10 = vpop.f32.mrf.mxu0  ;;  %19864 = vst [vmem:[#allocation80_spill] sm:$0xff] %v14468_v5 }
 0x1bd   : > { %19863 = vst [vmem:[#allocation79_spill] sm:$0xff] %v14466_v10  ;;  %v14472_v38 = vpop.f32.mrf.mxu1 }
 0x1be   : > { %v14470_v47 = vpop.f32.mrf.mxu0  ;;  %19865 = vst [vmem:[#allocation81_spill] sm:$0xff] %v14472_v38  ;;  %v1079_v38 = vadd.f32 %v13906_v54, %v13916_v56  ;;  %v1149_v54 = vadd.f32 %v14013_v21, %v14021_v33 }
 0x1bf   : > { %v14476_v14 = vpop.f32.mrf.mxu1 }
 0x1c0   : > { %v14474_v46 = vpop.f32.mrf.mxu0  ;;  %19866 = vst [vmem:[#allocation82_spill] sm:$0xff] %v14476_v14  ;;  %v1089_v14 = vadd.f32 %v13920_v19, %v13930_v30  ;;  %v1800_v19 = vadd.f32 %v14023_v53, %v14031_v45  ;;  %v1802_v30 = vadd.f32 %v14037_v61, %v14043_v48  ;;  %v19872_v53 = vld [vmem:[#allocation8_spill] sm:$0xff]  ;;  %v19873_v45 = vld [vmem:[#allocation7_spill] sm:$0xff] }
 0x1c1   : > { %v14480_v37 = vpop.f32.mrf.mxu1  ;;  %v1810_v61 = vadd.f32 %v19873_v45, %v19872_v53  ;;  %v19874_v48 = vld [vmem:[#allocation11_spill] sm:$0xff] }
 0x1c2   : > { %v14478_v39 = vpop.f32.mrf.mxu0  ;;  %19868 = vst [vmem:[#allocation84_spill] sm:$0xff] %v14480_v37  ;;  %v1109_v37 = vadd.f32 %v13948_v9, %v13962_v0  ;;  %v1806_v0 = vadd.f32 %v14061_v17, %v14067_v8  ;;  %v1562_v17 = vadd.f32 %v14204_v11, %v1149_v54  ;;  %v2072_v8 = vadd.f32 %v14215_v51, %v1800_v19  ;;  %v19881_v11 = vld [vmem:[#allocation20_spill] sm:$0xff]  ;;  %v19882_v54 = vld [vmem:[#allocation22_spill] sm:$0xff] }
 0x1c3   : > { %19867 = vst [vmem:[#allocation83_spill] sm:$0xff] %v14478_v39  ;;  %v14484_v2 = vpop.f32.mrf.mxu1  ;;  %v1099_v39 = vadd.f32 %v13934_v49, %v13944_v63  ;;  %v1804_v49 = vadd.f32 %v14049_v6, %v14055_v42  ;;  %v1548_v63 = vadd.f32 %v14126_v55, %v1079_v38  ;;  %v19875_v6 = vld [vmem:[#allocation10_spill] sm:$0xff]  ;;  %v19880_v38 = vld [vmem:[#allocation19_spill] sm:$0xff] }
 0x1c4   : > { %v14482_v58 = vpop.f32.mrf.mxu0  ;;  %19869 = vst [vmem:[#allocation85_spill] sm:$0xff] %v14484_v2  ;;  %v1119_v2 = vadd.f32 %v13966_v23, %v13980_v13  ;;  %v1550_v23 = vadd.f32 %v14137_v12, %v1089_v14  ;;  %v1812_v42 = vadd.f32 %v19875_v6, %v19874_v48  ;;  %v19876_v12 = vld [vmem:[#allocation14_spill] sm:$0xff]  ;;  %v2078_v51 = vadd.f32 %v14242_v36, %v1806_v0  ;;  %v19893_v48 = vld [vmem:[#allocation36_spill] sm:$0xff] }
 0x1c5   : > { %v14488_v10 = vpop.f32.mrf.mxu1  ;;  %v1552_v13 = vadd.f32 %v14148_v24, %v1099_v39  ;;  %v19878_v24 = vld [vmem:[#allocation16_spill] sm:$0xff]  ;;  %v2082_v36 = vadd.f32 %v14260_v3, %v1810_v61  ;;  %v19894_v3 = vld [vmem:[#allocation9_spill] sm:$0xff] }
 0x1c6   : > { %v14486_v43 = vpop.f32.mrf.mxu0  ;;  %19870 = vst [vmem:[#allocation86_spill] sm:$0xff] %v14488_v10  ;;  %v1129_v10 = vadd.f32 %v13984_v62, %v13996_v50  ;;  %v1554_v62 = vadd.f32 %v14159_v44, %v1109_v37  ;;  %v1816_v44 = vadd.f32 %v19878_v24, %v1548_v63  ;;  %v19883_v63 = vld [vmem:[#allocation23_spill] sm:$0xff]  ;;  %v19895_v61 = vld [vmem:[#allocation5_spill] sm:$0xff] }
 0x1c7   : > { %v14517_v9 = vpop.f32.mrf.mxu1  ;;  %v1820_v14 = vadd.f32 %v19880_v38, %v1552_v13  ;;  %v19886_v13 = vld [vmem:[#allocation26_spill] sm:$0xff] }
 0x1c8   : > { %v14490_v5 = vpop.f32.mrf.mxu0  ;;  %v1558_v21 = vadd.f32 %v14184_v22, %v1129_v10  ;;  %v2076_v22 = vadd.f32 %v14233_v34, %v1804_v49  ;;  %v19879_v10 = vld [vmem:[#allocation17_spill] sm:$0xff]  ;;  %v1822_v37 = vadd.f32 %v19881_v11, %v1554_v62  ;;  %v19884_v49 = vld [vmem:[#allocation28_spill] sm:$0xff]  ;;  %v14562_v62 = vadd.f32 %v19886_v13, %v2072_v8  ;;  %v14583_v8 = vld [vmem:[#allocation3] sm:$0xff] }
 0x1c9   : > { %19871 = vst [vmem:[#allocation87_spill] sm:$0xff] %v14490_v5  ;;  %v1139_v5 = vadd.f32 %v14000_v29, %v14010_v18  ;;  %v1808_v29 = vadd.f32 %v14073_v57, %v14079_v16  ;;  %v1556_v18 = vadd.f32 %v14171_v41, %v1119_v2  ;;  %v19877_v57 = vld [vmem:[#allocation13_spill] sm:$0xff]  ;;  %v2074_v41 = vadd.f32 %v14224_v20, %v1802_v30  ;;  %v14596_v11 = vld [vmem:[#allocation3 + $0x8] sm:$0xff]  ;;  %v19900_v13 = vld [vmem:[#allocation15_spill] sm:$0xff] }
 0x1ca   : > { %v14508_v56 = vpop.f32.mrf.mxu0  ;;  %v1814_v16 = vadd.f32 %v19877_v57, %v19876_v12  ;;  %v1818_v2 = vadd.f32 %v19879_v10, %v1550_v23  ;;  %v1826_v19 = vadd.f32 %v19882_v54, %v1558_v21  ;;  %v1830_v30 = vadd.f32 %v14201_v15, %v1562_v17  ;;  %v19885_v23 = vld [vmem:[#allocation25_spill] sm:$0xff]  ;;  %v19892_v15 = vld [vmem:[#allocation34_spill] sm:$0xff]  ;;  %v14600_v54 = vld [vmem:[#allocation3 + $0x20] sm:$0xff] }
 0x1cb   : > { %v1560_v33 = vadd.f32 %v14196_v4, %v1139_v5  ;;  %v14544_v4 = vpop.f32.mrf.mxu1  ;;  %v1824_v39 = vadd.f32 %v14165_v7, %v1556_v18  ;;  %v2080_v34 = vadd.f32 %v14251_v26, %v1808_v29  ;;  %v14559_v53 = vadd.f32 %v19885_v23, %v19884_v49  ;;  %v19888_v7 = vld [vmem:[#allocation32_spill] sm:$0xff]  ;;  %v19889_v18 = vld [vmem:[#allocation29_spill] sm:$0xff]  ;;  %v19896_v57 = vld [vmem:[#allocation6_spill] sm:$0xff] }
 0x1cc   : > { %v14524_v50 = vpop.f32.mrf.mxu0  ;;  %v14569_v21 = vadd.f32 %v19889_v18, %v19888_v7  ;;  %v19891_v26 = vld [vmem:[#allocation37_spill] sm:$0xff]  ;;  %v14579_v6 = vadd.f32 %v19893_v48, %v2076_v22  ;;  %v14587_v12 = vadd.f32 %v19895_v61, %v19894_v3  ;;  %v14590_v24 = vadd.f32 %v19896_v57, %v2078_v51  ;;  %v14598_v22 = vld [vmem:[#allocation3 + $0x18] sm:$0xff]  ;;  %v19899_v49 = vld [vmem:[#allocation12_spill] sm:$0xff] }
 0x1cd   : > { %v1828_v20 = vadd.f32 %v19883_v63, %v1560_v33  ;;  %v19890_v33 = vld [vmem:[#allocation31_spill] sm:$0xff]  ;;  %v14576_v29 = vadd.f32 %v19892_v15, %v19891_v26  ;;  %v14581_v17 = vpop.f32.mrf.mxu1  ;;  %v2086_v10 = vadd.f32 %v14278_v60, %v1814_v16  ;;  %v19898_v63 = vld [vmem:[#allocation18_spill] sm:$0xff]  ;;  %v14607_v7 = vadd.f32 %v19900_v13, %v2080_v34  ;;  %v19902_v18 = vld [vmem:[#allocation21_spill] sm:$0xff] }
 0x1ce   : > { %v14537_v55 = vpop.f32.mrf.mxu0  ;;  %v14572_v45 = vadd.f32 %v19890_v33, %v2074_v41  ;;  %v2084_v41 = vadd.f32 %v14269_v25, %v1812_v42  ;;  %v14604_v23 = vadd.f32 %v19899_v49, %v19898_v63  ;;  %v19901_v51 = vld [vmem:[#allocation27_spill] sm:$0xff]  ;;  %v2088_v60 = vadd.f32 %v14287_v52, %v1816_v44  ;;  %v19903_v42 = vld [vmem:[#allocation24_spill] sm:$0xff]  ;;  %v19905_v26 = vld [vmem:[#allocation30_spill] sm:$0xff] }
 0x1cf   : > { %v14611_v25 = vadd.f32 %v19902_v18, %v19901_v51  ;;  %v14615_v16 = vadd.f32 %v19903_v42, %v2082_v36  ;;  %v19904_v33 = vld [vmem:[#allocation35_spill] sm:$0xff]  ;;  %v2090_v48 = vadd.f32 %v14296_v1, %v1818_v2  ;;  %v2092_v3 = vadd.f32 %v14305_v59, %v1820_v14  ;;  %v14625_v34 = vpop.f32.mrf.mxu1  ;;  %v19908_v36 = vld [vmem:[#allocation33_spill] sm:$0xff]  ;;  %v19909_v1 = vld [vmem:[#allocation40_spill] sm:$0xff] }
 0x1d0   : > { %v14550_v5 = vpop.f32.mrf.mxu0  ;;  %v14619_v15 = vadd.f32 %v19905_v26, %v19904_v33  ;;  %19907 = vst [vmem:[#allocation10_spill] sm:$0xff] %v14625_v34  ;;  %v3687_v57 = vrot.slane %v14583_v8, 1  ;;  %v14629_v63 = vrot.slane %v14596_v11, 1  ;;  %v3692_v52 = vrot.slane %v14598_v22, 1  ;;  %v19910_v2 = vld [vmem:[#allocation38_spill] sm:$0xff]  ;;  %v19911_v14 = vld [vmem:[#allocation39_spill] sm:$0xff] }
 0x1d1   : > { %v14633_v44 = vrot.slane %v14600_v54, 1  ;;  %v14636_v49 = vadd.f32 %v19908_v36, %v2084_v41  ;;  %v14640_v59 = vadd.f32 %v19910_v2, %v19909_v1  ;;  %v14643_v13 = vadd.f32 %v19911_v14, %v2086_v10  ;;  %v19912_v51 = vld [vmem:[#allocation43_spill] sm:$0xff]  ;;  %v19913_v18 = vld [vmem:[#allocation41_spill] sm:$0xff]  ;;  %v19915_v26 = vld [vmem:[#allocation42_spill] sm:$0xff] }
 0x1d2   : > { %v14565_v0 = vpop.f32.mrf.mxu0  ;;  %v14647_v42 = vadd.f32 %v19913_v18, %v19912_v51  ;;  %v19918_v36 = vld [vmem:[#allocation52_spill] sm:$0xff]  ;;  %v2096_v1 = vadd.f32 %v14403_v28, %v1824_v39  ;;  %v19919_v2 = vld [vmem:[#allocation45_spill] sm:$0xff]  ;;  %v19923_v18 = vld [vmem:[#allocation47_spill] sm:$0xff]  ;;  %v2100_v28 = vadd.f32 %v14421_v32, %v1828_v20  ;;  %v3689_v39 = vsel %vm491_vm4, %v3687_v57, %v14629_v63 }
 0x1d3   : > { %19887 = vst [vmem:[#allocation8_spill] sm:$0xff] %v14565_v0  ;;  %v2094_v34 = vadd.f32 %v19918_v36, %v1822_v37  ;;  %v14661_v10 = vadd.f32 %v19919_v2, %v2090_v48  ;;  %v19920_v14 = vld [vmem:[#allocation48_spill] sm:$0xff]  ;;  %v19921_v0 = vld [vmem:[#allocation46_spill] sm:$0xff]  ;;  %v14678_v37 = vpop.f32.mrf.mxu1  ;;  %v14692_v36 = vrot.slane %v14600_v54, 2  ;;  %v19933_v2 = vld [vmem:[#allocation55_spill] sm:$0xff] }
 0x1d4   : > { %v14594_v38 = vpop.f32.mrf.mxu0  ;;  %v14665_v51 = vadd.f32 %v19921_v0, %v19920_v14  ;;  %19929 = vst [vmem:[#allocation22_spill] sm:$0xff] %v14678_v37  ;;  %v3694_v0 = vsel %vm491_vm4, %v3692_v52, %v14633_v44  ;;  %v19931_v32 = vld [vmem:[#allocation50_spill] sm:$0xff]  ;;  %v19934_v57 = vld [vmem:[#allocation53_spill] sm:$0xff] }
 0x1d5   : > { %19897 = vst [vmem:[#allocation7_spill] sm:$0xff] %v14594_v38  ;;  %v19916_v38 = vld [vmem:[#allocation44_spill] sm:$0xff]  ;;  %v14695_v20 = vadd.f32 %v19931_v32, %v2094_v34  ;;  %v14699_v14 = vadd.f32 %v19934_v57, %v19933_v2  ;;  %v19936_v52 = vld [vmem:[#allocation54_spill] sm:$0xff]  ;;  %v3827_v34 = vmax.f32 %v14583_v8, %v3689_v39  ;;  %v3829_v32 = vmax.f32 %v14598_v22, %v3694_v0  ;;  %v14716_v2 = vpop.f32.mrf.mxu1 }
 0x1d6   : > { %v14623_v61 = vpop.f32.mrf.mxu0  ;;  %v14656_v41 = vadd.f32 %v19916_v38, %v14294_v35  ;;  %19922 = vst [vmem:[#allocation16_spill] sm:$0xff] %v14665_v51  ;;  %v19926_v35 = vld [vmem:[#allocation51_spill] sm:$0xff]  ;;  %v19927_v38 = vld [vmem:[#allocation49_spill] sm:$0xff]  ;;  %19943 = vst [vmem:[#allocation37_spill] sm:$0xff] %v14716_v2  ;;  %v14720_v57 = vrot.slane %v14596_v11, 3 }
 0x1d7   : > { %19906 = vst [vmem:[#allocation11_spill] sm:$0xff] %v14623_v61  ;;  %v14652_v61 = vadd.f32 %v19915_v26, %v2088_v60  ;;  %v2098_v60 = vadd.f32 %v14412_v31, %v1826_v19  ;;  %v3867_v31 = vrot.slane %v14583_v8, 2  ;;  %v14688_v19 = vrot.slane %v14596_v11, 2  ;;  %19932 = vst [vmem:[#allocation28_spill] sm:$0xff] %v14695_v20 }
 0x1d8   : > { %v14649_v33 = vpop.f32.mrf.mxu0  ;;  %19917 = vst [vmem:[#allocation13_spill] sm:$0xff] %v14656_v41  ;;  %v14675_v41 = vadd.f32 %v19927_v38, %v19926_v35  ;;  %19935 = vst [vmem:[#allocation25_spill] sm:$0xff] %v14699_v14  ;;  %v2102_v35 = vadd.f32 %v14430_v40, %v1830_v30  ;;  %v19938_v38 = vld [vmem:[#allocation56_spill] sm:$0xff]  ;;  %v4053_v40 = vrot.slane %v14598_v22, 3  ;;  %v19953_v14 = vld [vmem:[#allocation62_spill] sm:$0xff] }
 0x1d9   : > { %19914 = vst [vmem:[#allocation14_spill] sm:$0xff] %v14649_v33  ;;  %v14668_v33 = vadd.f32 %v19923_v18, %v2092_v3  ;;  %v3872_v3 = vrot.slane %v14598_v22, 2  ;;  %v14702_v18 = vadd.f32 %v19936_v52, %v2096_v1  ;;  %v4048_v1 = vrot.slane %v14583_v8, 3  ;;  %v19944_v30 = vld [vmem:[#allocation60_spill] sm:$0xff]  ;;  %v19947_v52 = vld [vmem:[#allocation59_spill] sm:$0xff] }
 0x1da   : > { %v14671_v26 = vpop.f32.mrf.mxu0  ;;  %19928 = vst [vmem:[#allocation20_spill] sm:$0xff] %v14675_v41  ;;  %v14731_v39 = vadd.f32 %v19947_v52, %v2100_v28  ;;  %v14744_v20 = vadd.f32 %v19953_v14, %v2102_v35  ;;  %v19956_v28 = vld [vmem:[#allocation67_spill] sm:$0xff]  ;;  %v14758_v14 = vld [vmem:[#allocation3 + $0x10] sm:$0xf] }
 0x1db   : > { %19924 = vst [vmem:[#allocation17_spill] sm:$0xff] %v14668_v33  ;;  %19925 = vst [vmem:[#allocation19_spill] sm:$0xff] %v14671_v26  ;;  %v19940_v26 = vld [vmem:[#allocation57_spill] sm:$0xff]  ;;  %v2611_v52 = vadd.f32 %v19956_v28, %v14562_v62  ;;  %v4233_v28 = vrot.slane %v14598_v22, 4 }
 0x1dc   : > { %v14684_v48 = vpop.f32.mrf.mxu0  ;;  %19937 = vst [vmem:[#allocation26_spill] sm:$0xff] %v14702_v18  ;;  %v14710_v41 = vadd.f32 %v19940_v26, %v2098_v60  ;;  %v19945_v60 = vld [vmem:[#allocation58_spill] sm:$0xff]  ;;  %19948 = vst [vmem:[#allocation36_spill] sm:$0xff] %v14731_v39  ;;  %v19951_v18 = vld [vmem:[#allocation61_spill] sm:$0xff] }
 0x1dd   : > { %19930 = vst [vmem:[#allocation23_spill] sm:$0xff] %v14684_v48  ;;  %v14707_v48 = vadd.f32 %v19938_v38, %v14410_v27  ;;  %v14724_v27 = vrot.slane %v14600_v54, 3  ;;  %v14728_v26 = vadd.f32 %v19945_v60, %v19944_v30  ;;  %v3869_v38 = vsel %vm1159_vm5, %v3867_v31, %v14688_v19  ;;  %19954 = vst [vmem:[#allocation6_spill] sm:$0xff] %v14744_v20  ;;  %v19955_v30 = vld [vmem:[#allocation65_spill] sm:$0xff]  ;;  %v19958_v31 = vld [vmem:[#allocation71_spill] sm:$0xff] }
 0x1de   : > { %19941 = vst [vmem:[#allocation29_spill] sm:$0xff] %v14710_v41  ;;  %v14712_v33 = vpop.f32.mrf.mxu0  ;;  %v3874_v41 = vsel %vm1159_vm5, %v3872_v3, %v14692_v36  ;;  %v2612_v60 = vadd.f32 %v19955_v30, %v14559_v53  ;;  %v19957_v39 = vld [vmem:[#allocation69_spill] sm:$0xff]  ;;  %v14762_v53 = vpop.f32.mrf.mxu1  ;;  %v4007_v35 = vmax.f32 %v3827_v34, %v3869_v38  ;;  %v14772_v30 = vrot.slane %v14596_v11, 4  ;;  %v19963_v34 = vld [vmem:[#allocation64_spill] sm:$0xff] }
 0x1df   : > { %19939 = vst [vmem:[#allocation32_spill] sm:$0xff] %v14707_v48  ;;  %19942 = vst [vmem:[#allocation31_spill] sm:$0xff] %v14712_v33  ;;  %v19950_v48 = vld [vmem:[#allocation63_spill] sm:$0xff]  ;;  %v19959_v3 = vld [vmem:[#allocation73_spill] sm:$0xff]  ;;  %v4009_v62 = vmax.f32 %v3829_v32, %v3874_v41 }
 0x1e0   : > { %19946 = vst [vmem:[#allocation34_spill] sm:$0xff] %v14728_v26  ;;  %v14733_v0 = vpop.f32.mrf.mxu0  ;;  %v14741_v33 = vadd.f32 %v19951_v18, %v19950_v48  ;;  %v2614_v26 = vadd.f32 %v19957_v39, %v14569_v21  ;;  %v2616_v2 = vadd.f32 %v19959_v3, %v14576_v29  ;;  %v14760_v18 = vld [vmem:[#allocation3 + $0x28] sm:$0xf]  ;;  %19961 = vst [vmem:[#allocation12_spill] sm:$0xff] %v14762_v53  ;;  %v4228_v29 = vrot.slane %v14583_v8, 4  ;;  %v19964_v32 = vld [vmem:[#allocation66_spill] sm:$0xff]  ;;  %v14799_v51 = vpop.f32.mrf.mxu1 }
 0x1e1   : > { %19949 = vst [vmem:[#allocation9_spill] sm:$0xff] %v14733_v0  ;;  %v2613_v0 = vadd.f32 %v19958_v31, %v14572_v45  ;;  %v4050_v21 = vsel %vm4047_vm7, %v4048_v1, %v14720_v57  ;;  %v4055_v45 = vsel %vm4047_vm7, %v4053_v40, %v14724_v27  ;;  %v14776_v31 = vrot.slane %v14600_v54, 4  ;;  %v19965_v3 = vld [vmem:[#allocation68_spill] sm:$0xff]  ;;  %v19966_v8 = vld [vmem:[#allocation70_spill] sm:$0xff] }
 0x1e2   : > { %19952 = vst [vmem:[#allocation5_spill] sm:$0xff] %v14741_v33  ;;  %v14756_v48 = vpop.f32.mrf.mxu0  ;;  %v2884_v41 = vadd.f32 %v19963_v34, %v2612_v60  ;;  %v2883_v38 = vadd.f32 %v19964_v32, %v2611_v52  ;;  %v3690_v1 = vrot.slane %v14758_v14, 1  ;;  %v3695_v40 = vrot.slane %v14760_v18, 1  ;;  %v19969_v60 = vld [vmem:[#allocation72_spill] sm:$0xff]  ;;  %v19970_v34 = vld [vmem:[#allocation79_spill] sm:$0xff] }
 0x1e3   : > { %19960 = vst [vmem:[#allocation18_spill] sm:$0xff] %v14756_v48  ;;  %v14783_v20 = vadd.f32 %v19965_v3, %v2614_v26  ;;  %v14786_v33 = vadd.f32 %v19966_v8, %v2613_v0  ;;  %v19968_v48 = vld [vmem:[#allocation77_spill] sm:$0xff]  ;;  %v14795_v52 = vadd.f32 %v19969_v60, %v2616_v2  ;;  %v2617_v32 = vadd.f32 %v19970_v34, %v14590_v24  ;;  %v14834_v60 = vpop.f32.mrf.mxu1 }
 0x1e4   : > { %v14768_v39 = vpop.f32.mrf.mxu0  ;;  %v2618_v53 = vadd.f32 %v19968_v48, %v14587_v12  ;;  %v4188_v26 = vmax.f32 %v4007_v35, %v4050_v21  ;;  %v4190_v3 = vmax.f32 %v4009_v62, %v4055_v45  ;;  %v2620_v0 = vadd.f32 %v14470_v47, %v14604_v23  ;;  %v19971_v23 = vld [vmem:[#allocation74_spill] sm:$0xff]  ;;  %v19973_v21 = vld [vmem:[#allocation83_spill] sm:$0xff] }
 0x1e5   : > { %19962 = vst [vmem:[#allocation15_spill] sm:$0xff] %v14768_v39  ;;  %v19967_v39 = vld [vmem:[#allocation75_spill] sm:$0xff]  ;;  %v4230_v12 = vsel %vm636_vm0, %v4228_v29, %v14772_v30  ;;  %v4235_v2 = vsel %vm636_vm0, %v4233_v28, %v14776_v31  ;;  %v3691_v24 = vsel %vm491_vm4, %v14629_v63, %v3690_v1  ;;  %v3696_v48 = vsel %vm491_vm4, %v14633_v44, %v3695_v40  ;;  %v19974_v1 = vld [vmem:[#allocation78_spill] sm:$0xff] }
 0x1e6   : > { %v2615_v22 = vadd.f32 %v19967_v39, %v14579_v6  ;;  %v14792_v37 = vpop.f32.mrf.mxu0  ;;  %v2619_v6 = vadd.f32 %v14474_v46, %v14607_v7  ;;  %v3870_v35 = vrot.slane %v14758_v14, 2  ;;  %v3875_v47 = vrot.slane %v14760_v18, 2  ;;  %v19972_v7 = vld [vmem:[#allocation76_spill] sm:$0xff] }
 0x1e7   : > { %v14821_v62 = vadd.f32 %v19972_v7, %v2618_v53  ;;  %v2622_v45 = vadd.f32 %v19973_v21, %v14611_v25  ;;  %v2621_v29 = vadd.f32 %v14482_v58, %v14615_v16  ;;  %v14830_v40 = vadd.f32 %v19974_v1, %v2617_v32  ;;  %v19975_v53 = vld [vmem:[#allocation80_spill] sm:$0xff]  ;;  %v19976_v25 = vld [vmem:[#allocation81_spill] sm:$0xff] }
 0x1e8   : > { %v14805_v39 = vpop.f32.mrf.mxu0  ;;  %v14818_v46 = vadd.f32 %v19971_v23, %v2615_v22  ;;  %v2624_v8 = vadd.f32 %v14486_v43, %v14619_v15  ;;  %v4368_v22 = vmax.f32 %v4188_v26, %v4230_v12  ;;  %v14836_v34 = vmax.f32 %v4190_v3, %v4235_v2 }
 0x1e9   : > { %v14839_v23 = vadd.f32 %v19975_v53, %v2620_v0  ;;  %v14842_v7 = vadd.f32 %v19976_v25, %v2619_v6  ;;  %v3828_v16 = vmax.f32 %v14596_v11, %v3691_v24  ;;  %v3830_v32 = vmax.f32 %v14600_v54, %v3696_v48  ;;  %v19977_v0 = vld [vmem:[#allocation82_spill] sm:$0xff]  ;;  %v19978_v6 = vld [vmem:[#allocation84_spill] sm:$0xff]  ;;  %v19979_v11 = vld [vmem:[#allocation87_spill] sm:$0xff] }
 0x1ea   : > { %v14827_v28 = vpop.f32.mrf.mxu0  ;;  %v3871_v43 = vsel %vm1159_vm5, %v14688_v19, %v3870_v35  ;;  %v3876_v15 = vsel %vm1159_vm5, %v14692_v36, %v3875_v47  ;;  %v4051_v26 = vrot.slane %v14758_v14, 3  ;;  %v4056_v3 = vrot.slane %v14760_v18, 3  ;;  %v14867_v35 = vld [vmem:[%s19518_s2] ss:$0 sm:$0xff] }
 0x1eb   : > { %v14855_v12 = vadd.f32 %v19977_v0, %v2622_v45  ;;  %v14858_v2 = vadd.f32 %v19978_v6, %v2621_v29  ;;  %v2623_v24 = vadd.f32 %v19979_v11, %v14636_v49  ;;  %v2626_v54 = vadd.f32 %v14508_v56, %v14640_v59  ;;  %v19980_v47 = vld [vmem:[#allocation85_spill] sm:$0xff]  ;;  %v14874_v29 = vpop.f32.mrf.mxu1  ;;  %v19981_v6 = vld [vmem:[#allocation86_spill] sm:$0xff] }
 0x1ec   : > { %v14844_v58 = vpop.f32.mrf.mxu0  ;;  %v14870_v21 = vadd.f32 %v19980_v47, %v2624_v8  ;;  %v2625_v45 = vadd.f32 %v14524_v50, %v14643_v13  ;;  %v14877_v49 = vmax.f32 %v4368_v22, %v14836_v34  ;;  %v14882_v56 = vld [vmem:[%s19519_s3] ss:$0 sm:$0xff]  ;;  %v4008_v53 = vmax.f32 %v3828_v16, %v3871_v43 }
 0x1ed   : > { %v4010_v25 = vmax.f32 %v3830_v32, %v3876_v15  ;;  %v4231_v8 = vrot.slane %v14758_v14, 4  ;;  %v4236_v0 = vrot.slane %v14760_v18, 4  ;;  %v4057_v22 = vsel %vm4047_vm7, %v14724_v27, %v4056_v3  ;;  %v14904_v32 = vpop.f32.mrf.mxu1  ;;  %v19982_v47 = vld [vmem:[#allocation13_spill] sm:$0xff] }
 0x1ee   : > { %v11960_v48 = vpop.f32.mrf.mxu0  ;;  %v14892_v11 = vadd.f32 %v19981_v6, %v2623_v24  ;;  %v2628_v14 = vadd.f32 %v14537_v55, %v14647_v42  ;;  %v2627_v18 = vadd.f32 %v14550_v5, %v14652_v61 }
 0x1ef   : > { %v3155_v1 = vadd.f32 %v11960_v48, %v2884_v41  ;;  %v4052_v41 = vsel %vm4047_vm7, %v14720_v57, %v4051_v26  ;;  %v14895_v48 = vadd.f32 %v14517_v9, %v2626_v54  ;;  %v4191_v24 = vmax.f32 %v4010_v25, %v4057_v22  ;;  %v19985_v25 = vld [vmem:[#allocation7_spill] sm:$0xff] }
 0x1f0   : > { %v2995_v59 = vpop.f32.mrf.mxu0  ;;  %v4189_v3 = vmax.f32 %v4008_v53, %v4052_v41  ;;  %v4232_v55 = vsel %vm636_vm0, %v14772_v30, %v4231_v8  ;;  %v4237_v5 = vsel %vm636_vm0, %v14776_v31, %v4236_v0  ;;  %v2629_v8 = vadd.f32 %v19985_v25, %v14661_v10  ;;  %v19986_v41 = vld [vmem:[#allocation16_spill] sm:$0xff]  ;;  %v19987_v22 = vld [vmem:[#allocation11_spill] sm:$0xff] }
 0x1f1   : > { %v3194_v50 = vmul.f32 %v14867_v35, %v3155_v1  ;;  %v3154_v13 = vadd.f32 %v2995_v59, %v2883_v38  ;;  %v14902_v38 = vadd.f32 %v14544_v4, %v2625_v45  ;;  %v19983_v45 = vld [vmem:[#allocation8_spill] sm:$0xff]  ;;  %v19984_v59 = vld [vmem:[#allocation10_spill] sm:$0xff]  ;;  %v2632_v6 = vadd.f32 %v19987_v22, %v19986_v41 }
 0x1f2   : > { %v11963_v16 = vpop.f32.mrf.mxu0  ;;  %v2630_v1 = vadd.f32 %v19983_v45, %v19982_v47  ;;  %v14927_v53 = vadd.f32 %v19984_v59, %v2627_v18  ;;  %v14943_v10 = vmax.f32 %v4191_v24, %v4237_v5  ;;  %v19991_v45 = vld [vmem:[#allocation14_spill] sm:$0xff] }
 0x1f3   : > { %v14907_v43 = vadd.f32 %v14882_v56, %v3194_v50  ;;  %v3193_v15 = vmul.f32 %v14867_v35, %v3154_v13  ;;  %v3157_v9 = vadd.f32 %v11963_v16, %v14783_v20  ;;  %v14922_v20 = vadd.f32 %v14581_v17, %v2628_v14  ;;  %v14931_v50 = vpop.f32.mrf.mxu1 }
 0x1f4   : > { %v3005_v26 = vpop.f32.mrf.mxu0  ;;  %v14941_v16 = vmax.f32 %v4189_v3, %v4232_v55 }
 0x1f5   : > { %v10580_v4 = vmul.f32 -1.442695, %v14907_v43  ;;  %v14917_v61 = vadd.f32 %v14882_v56, %v3193_v15  ;;  %v3196_v42 = vmul.f32 %v14867_v35, %v3157_v9  ;;  %v3156_v54 = vadd.f32 %v3005_v26, %v14786_v33  ;;  %v11949_v5 = vpop.f32.mrf.mxu1 }
 0x1f6   : > { %v11966_v0 = vpop.f32.mrf.mxu0 }
 0x1f7   : > { %12487 = vpow2.f32 %v10580_v4  ;;  %v10579_v13 = vmul.f32 -1.442695, %v14917_v61  ;;  %v14935_v33 = vadd.f32 %v14882_v56, %v3196_v42  ;;  %v3195_v17 = vmul.f32 %v14867_v35, %v3156_v54  ;;  %v19988_v4 = vld [vmem:[#allocation22_spill] sm:$0xff]  ;;  %v19989_v54 = vld [vmem:[#allocation37_spill] sm:$0xff] }
 0x1f8   : > { %v3159_v14 = vadd.f32 %v11966_v0, %v14795_v52  ;;  %v3015_v18 = vpop.f32.mrf.mxu0  ;;  %v14951_v42 = vadd.f32 %v19988_v4, %v2630_v1  ;;  %v14954_v47 = vadd.f32 %v19989_v54, %v2629_v8  ;;  %v19990_v52 = vld [vmem:[#allocation17_spill] sm:$0xff]  ;;  %v19992_v0 = vld [vmem:[#allocation12_spill] sm:$0xff]  ;;  %v19994_v8 = vld [vmem:[#allocation19_spill] sm:$0xff] }
 0x1f9   : > { %12489 = vpow2.f32 %v10579_v13  ;;  %v10582_v15 = vmul.f32 -1.442695, %v14935_v33  ;;  %v14947_v9 = vadd.f32 %v14882_v56, %v3195_v17  ;;  %v3158_v26 = vadd.f32 %v3015_v18, %v14818_v46  ;;  %v19993_v13 = vld [vmem:[#allocation20_spill] sm:$0xff]  ;;  %v19996_v4 = vld [vmem:[#allocation23_spill] sm:$0xff] }
 0x1fa   : > { %v2631_v3 = vadd.f32 %v19991_v45, %v19990_v52  ;;  %v3198_v24 = vmul.f32 %v14867_v35, %v3159_v14  ;;  %v11969_v55 = vpop.f32.mrf.mxu0  ;;  %v14963_v1 = vadd.f32 %v19992_v0, %v2632_v6  ;;  %v2634_v17 = vadd.f32 %v19994_v8, %v19993_v13  ;;  %v19997_v52 = vld [vmem:[#allocation25_spill] sm:$0xff]  ;;  %v19998_v45 = vld [vmem:[#allocation31_spill] sm:$0xff] }
 0x1fb   : > { %12491 = vpow2.f32 %v10582_v15  ;;  %v10581_v59 = vmul.f32 -1.442695, %v14947_v9  ;;  %v3197_v25 = vmul.f32 %v14867_v35, %v3158_v26  ;;  %v3161_v46 = vadd.f32 %v11969_v55, %v14821_v62  ;;  %v19995_v26 = vld [vmem:[#allocation28_spill] sm:$0xff]  ;;  %v20000_v8 = vld [vmem:[#allocation9_spill] sm:$0xff] }
 0x1fc   : > { %v14968_v41 = vadd.f32 %v14882_v56, %v3198_v24  ;;  %v3025_v22 = vpop.f32.mrf.mxu0  ;;  %v14978_v6 = vadd.f32 %v14799_v51, %v2631_v3  ;;  %v2633_v54 = vadd.f32 %v19996_v4, %v19995_v26  ;;  %v2636_v24 = vadd.f32 %v19998_v45, %v19997_v52  ;;  %v20001_v26 = vld [vmem:[#allocation32_spill] sm:$0xff]  ;;  %v20002_v4 = vld [vmem:[#allocation18_spill] sm:$0xff] }
 0x1fd   : > { %12493 = vpow2.f32 %v10581_v59  ;;  %v14973_v18 = vadd.f32 %v14882_v56, %v3197_v25  ;;  %v3200_v15 = vmul.f32 %v14867_v35, %v3161_v46  ;;  %v3160_v62 = vadd.f32 %v3025_v22, %v14830_v40  ;;  %v2854_v59 = vpop.f32.mrf.mxu1  ;;  %v19999_v46 = vld [vmem:[#allocation26_spill] sm:$0xff] }
 0x1fe   : > { %v10584_v55 = vmul.f32 -1.442695, %v14968_v41  ;;  %v11972_v0 = vpop.f32.mrf.mxu0  ;;  %v14992_v3 = vadd.f32 %v14834_v60, %v2634_v17  ;;  %v2635_v22 = vadd.f32 %v20000_v8, %v19999_v46  ;;  %v2638_v52 = vadd.f32 %v20002_v4, %v20001_v26  ;;  %v20003_v17 = vld [vmem:[#allocation29_spill] sm:$0xff] }
 0x1ff   : > { %v10583_v25 = vmul.f32 -1.442695, %v14973_v18  ;;  %v14987_v13 = vadd.f32 %v14882_v56, %v3200_v15  ;;  %v3199_v40 = vmul.f32 %v14867_v35, %v3160_v62  ;;  %v3163_v51 = vadd.f32 %v11972_v0, %v14839_v23  ;;  %v20004_v0 = vld [vmem:[#allocation15_spill] sm:$0xff] }
 0x200   : > { %12495 = vpow2.f32 %v10584_v55  ;;  %v3035_v45 = vpop.f32.mrf.mxu0  ;;  %v15004_v23 = vadd.f32 %v14874_v29, %v2633_v54  ;;  %v15007_v60 = vadd.f32 %v14904_v32, %v2636_v24  ;;  %v2637_v46 = vadd.f32 %v20004_v0, %v20003_v17  ;;  %v20005_v24 = vld [vmem:[#allocation34_spill] sm:$0xff] }
 0x201   : > { %12497 = vpow2.f32 %v10583_v25  ;;  %v10586_v14 = vmul.f32 -1.442695, %v14987_v13  ;;  %v15000_v15 = vadd.f32 %v14882_v56, %v3199_v40  ;;  %v3202_v62 = vmul.f32 %v14867_v35, %v3163_v51  ;;  %v11952_v25 = vpop.f32.mrf.mxu1 }
 0x202   : > { %v3162_v55 = vadd.f32 %v3035_v45, %v14842_v7  ;;  %v11975_v8 = vpop.f32.mrf.mxu0  ;;  %v15018_v54 = vadd.f32 %v14931_v50, %v2635_v22  ;;  %v15020_v32 = vadd.f32 %v11949_v5, %v2638_v52  ;;  %v2640_v4 = vadd.f32 %v14792_v37, %v20005_v24 }
 0x203   : > { %12499 = vpow2.f32 %v10586_v14  ;;  %v10585_v26 = vmul.f32 -1.442695, %v15000_v15  ;;  %v15014_v40 = vadd.f32 %v14882_v56, %v3202_v62  ;;  %v3165_v51 = vadd.f32 %v11975_v8, %v14855_v12  ;;  %v20006_v8 = vld [vmem:[#allocation36_spill] sm:$0xff]  ;;  %v2864_v52 = vpop.f32.mrf.mxu1 }
 0x204   : > { %v12488_v29 = vpop.eup %12487  ;;  %v3201_v7 = vmul.f32 %v14867_v35, %v3162_v55  ;;  %v3045_v45 = vpop.f32.mrf.mxu0  ;;  %v15027_v12 = vadd.f32 %v2854_v59, %v2637_v46  ;;  %v2639_v50 = vadd.f32 %v14805_v39, %v20006_v8  ;;  %v15039_v59 = vadd.f32 %v11952_v25, %v2640_v4 }
 0x205   : > { %v3361_v14 = vadd.f32 1.0, %v12488_v29  ;;  %12501 = vpow2.f32 %v10585_v26  ;;  %v10588_v17 = vmul.f32 -1.442695, %v15014_v40  ;;  %v3204_v62 = vmul.f32 %v14867_v35, %v3165_v51 }
 0x206   : > { %v12490_v0 = vpop.eup %12489  ;;  %v15032_v5 = vadd.f32 %v14882_v56, %v3201_v7  ;;  %v3164_v37 = vadd.f32 %v3045_v45, %v14858_v2  ;;  %v11978_v22 = vpop.f32.mrf.mxu0 }
 0x207   : > { %12503 = vrcp.f32 %v3361_v14  ;;  %v3360_v55 = vadd.f32 1.0, %v12490_v0  ;;  %v15036_v26 = vadd.f32 %v14882_v56, %v3204_v62  ;;  %v3167_v51 = vadd.f32 %v11978_v22, %v14870_v21  ;;  %v20007_v62 = vld [vmem:[#allocation5_spill] sm:$0xff] }
 0x208   : > { %v12492_v29 = vpop.eup %12491  ;;  %12505 = vpow2.f32 %v10588_v17  ;;  %v10587_v39 = vmul.f32 -1.442695, %v15032_v5  ;;  %v3203_v46 = vmul.f32 %v14867_v35, %v3164_v37  ;;  %v3055_v24 = vpop.f32.mrf.mxu0  ;;  %v2642_v0 = vadd.f32 %v14827_v28, %v20007_v62 }
 0x209   : > { %12507 = vrcp.f32 %v3360_v55  ;;  %v3363_v2 = vadd.f32 1.0, %v12492_v29  ;;  %v10590_v7 = vmul.f32 -1.442695, %v15036_v26  ;;  %v3206_v45 = vmul.f32 %v14867_v35, %v3167_v51  ;;  %v11955_v17 = vpop.f32.mrf.mxu1 }
 0x20a   : > { %v12494_v14 = vpop.eup %12493  ;;  %12509 = vpow2.f32 %v10587_v39  ;;  %v15048_v21 = vadd.f32 %v14882_v56, %v3203_v46  ;;  %v3166_v25 = vadd.f32 %v3055_v24, %v14892_v11  ;;  %v11981_v4 = vpop.f32.mrf.mxu0  ;;  %v15055_v55 = vadd.f32 %v2864_v52, %v2639_v50 }
 0x20b   : > { %12511 = vrcp.f32 %v3363_v2  ;;  %v3362_v8 = vadd.f32 1.0, %v12494_v14  ;;  %v15052_v37 = vadd.f32 %v14882_v56, %v3206_v45  ;;  %v3169_v22 = vadd.f32 %v11981_v4, %v14895_v48  ;;  %v20008_v45 = vld [vmem:[#allocation6_spill] sm:$0xff]  ;;  %v2874_v14 = vpop.f32.mrf.mxu1 }
 0x20c   : > { %12513 = vpow2.f32 %v10590_v7  ;;  %v10589_v28 = vmul.f32 -1.442695, %v15048_v21  ;;  %v3205_v51 = vmul.f32 %v14867_v35, %v3166_v25  ;;  %v3065_v29 = vpop.f32.mrf.mxu0  ;;  %v2641_v48 = vadd.f32 %v14844_v58, %v20008_v45 }
 0x20d   : > { %v12496_v39 = vpop.eup %12495  ;;  %12515 = vrcp.f32 %v3362_v8  ;;  %v10592_v11 = vmul.f32 -1.442695, %v15052_v37  ;;  %v3208_v46 = vmul.f32 %v14867_v35, %v3169_v22  ;;  %v3168_v24 = vadd.f32 %v3065_v29, %v14902_v38 }
 0x20e   : > { %v12498_v2 = vpop.eup %12497  ;;  %v3365_v50 = vadd.f32 1.0, %v12496_v39  ;;  %12517 = vpow2.f32 %v10589_v28  ;;  %v15065_v52 = vadd.f32 %v14882_v56, %v3205_v51  ;;  %v11984_v7 = vpop.f32.mrf.mxu0  ;;  %v15071_v38 = vadd.f32 %v11955_v17, %v2642_v0 }
 0x20f   : > { %v3364_v62 = vadd.f32 1.0, %v12498_v2  ;;  %12519 = vpow2.f32 %v10592_v11  ;;  %v15068_v25 = vadd.f32 %v14882_v56, %v3208_v46  ;;  %v3207_v4 = vmul.f32 %v14867_v35, %v3168_v24 }
 0x210   : > { %v12500_v8 = vpop.eup %12499  ;;  %12521 = vrcp.f32 %v3365_v50  ;;  %v10591_v58 = vmul.f32 -1.442695, %v15065_v52  ;;  %v3171_v22 = vadd.f32 %v11984_v7, %v14922_v20  ;;  %v3075_v28 = vpop.f32.mrf.mxu0  ;;  %v15079_v46 = vadd.f32 %v2874_v14, %v2641_v48  ;;  %v4570_v50 = vld [vmem:[#allocation3 + $0x10] sm:$0xf] }
 0x211   : > { %12523 = vrcp.f32 %v3364_v62  ;;  %v3367_v51 = vadd.f32 1.0, %v12500_v8  ;;  %v10594_v29 = vmul.f32 -1.442695, %v15068_v25  ;;  %v15077_v39 = vadd.f32 %v14882_v56, %v3207_v4 }
 0x212   : > { %v12502_v11 = vpop.eup %12501  ;;  %12525 = vpow2.f32 %v10591_v58  ;;  %v3210_v0 = vmul.f32 %v14867_v35, %v3171_v22  ;;  %v3170_v17 = vadd.f32 %v3075_v28, %v14927_v53  ;;  %v11987_v24 = vpop.f32.mrf.mxu0  ;;  %v4691_v4 = vrot.slane %v4570_v50, 1 }
 0x213   : > { %12527 = vrcp.f32 %v3367_v51  ;;  %v3366_v2 = vadd.f32 1.0, %v12502_v11  ;;  %v10593_v20 = vmul.f32 -1.442695, %v15077_v39  ;;  %v3173_v45 = vadd.f32 %v11987_v24, %v14951_v42 }
 0x214   : > { %v12504_v7 = vpop.eup %12503  ;;  %12529 = vpow2.f32 %v10594_v29  ;;  %v15086_v62 = vadd.f32 %v14882_v56, %v3210_v0  ;;  %v3209_v48 = vmul.f32 %v14867_v35, %v3170_v17  ;;  %v3085_v14 = vpop.f32.mrf.mxu0 }
 0x215   : > { %v12506_v8 = vpop.eup %12505  ;;  %v3457_v53 = vmul.f32 %v12504_v7, %v14907_v43  ;;  %12531 = vrcp.f32 %v3366_v2  ;;  %v3212_v58 = vmul.f32 %v14867_v35, %v3173_v45  ;;  %v3172_v22 = vadd.f32 %v3085_v14, %v14954_v47 }
 0x216   : > { %v12508_v28 = vpop.eup %12507  ;;  %v3369_v42 = vadd.f32 1.0, %v12506_v8  ;;  %12533 = vpow2.f32 %v10593_v20  ;;  %v10596_v51 = vmul.f32 -1.442695, %v15086_v62  ;;  %v15094_v29 = vadd.f32 %v14882_v56, %v3209_v48  ;;  %v11990_v11 = vpop.f32.mrf.mxu0 }
 0x217   : > { %v12510_v0 = vpop.eup %12509  ;;  %3536 = vst.msk [vmem:[#allocation3 + $0x3a] sm:$0xff] %vm279_vm1, %v3457_v53  ;;  %6580 = vst.msk [vmem:[#allocation4 + $0x21] sm:$0xff] %vm279_vm1, %v3457_v53  ;;  %v3456_v43 = vmul.f32 %v12508_v28, %v14917_v61  ;;  %v15100_v17 = vadd.f32 %v14882_v56, %v3212_v58  ;;  %v3211_v47 = vmul.f32 %v14867_v35, %v3172_v22 }
 0x218   : > { %v3175_v24 = vadd.f32 %v11990_v11, %v14963_v1  ;;  %v12512_v2 = vpop.eup %12511  ;;  %12535 = vrcp.f32 %v3369_v42  ;;  %v3368_v20 = vadd.f32 1.0, %v12510_v0  ;;  %v10595_v45 = vmul.f32 -1.442695, %v15094_v29  ;;  %v3095_v50 = vpop.f32.mrf.mxu0 }
 0x219   : > { %v15107_v7 = vsel %vm491_vm4, %v14629_v63, %v4691_v4  ;;  %v12514_v48 = vpop.eup %12513  ;;  %3535 = vst.msk [vmem:[#allocation3 + $0x32] sm:$0xff] %vm279_vm1, %v3456_v43  ;;  %6579 = vst.msk [vmem:[#allocation4 + $0x19] sm:$0xff] %vm279_vm1, %v3456_v43  ;;  %v3459_v61 = vmul.f32 %v12512_v2, %v14935_v33  ;;  %12537 = vpow2.f32 %v10596_v51  ;;  %v10598_v1 = vmul.f32 -1.442695, %v15100_v17 }
 0x21a   : > { %v15114_v14 = vadd.f32 %v14882_v56, %v3211_v47  ;;  %v12516_v8 = vpop.eup %12515  ;;  %12539 = vrcp.f32 %v3368_v20  ;;  %v3371_v53 = vadd.f32 1.0, %v12514_v48  ;;  %v3214_v58 = vmul.f32 %v14867_v35, %v3175_v24  ;;  %v11993_v4 = vpop.f32.mrf.mxu0 }
 0x21b   : > { %v3174_v63 = vadd.f32 %v3095_v50, %v14978_v6  ;;  %v12518_v22 = vpop.eup %12517  ;;  %3538 = vst.msk [vmem:[#allocation3 + $0x52] sm:$0xff] %vm279_vm1, %v3459_v61  ;;  %6582 = vst.msk [vmem:[#allocation4 + $0x39] sm:$0xff] %vm279_vm1, %v3459_v61  ;;  %v3458_v33 = vmul.f32 %v12516_v8, %v14947_v9  ;;  %12541 = vpow2.f32 %v10595_v45  ;;  %v3177_v42 = vadd.f32 %v11993_v4, %v14992_v3 }
 0x21c   : > { %v10597_v28 = vmul.f32 -1.442695, %v15114_v14  ;;  %v12520_v51 = vpop.eup %12519  ;;  %12543 = vrcp.f32 %v3371_v53  ;;  %v3370_v11 = vadd.f32 1.0, %v12518_v22  ;;  %v15124_v0 = vadd.f32 %v14882_v56, %v3214_v58  ;;  %v3105_v43 = vpop.f32.mrf.mxu0 }
 0x21d   : > { %v3213_v6 = vmul.f32 %v14867_v35, %v3174_v63  ;;  %v12522_v47 = vpop.eup %12521  ;;  %3537 = vst.msk [vmem:[#allocation3 + $0x4a] sm:$0xff] %vm279_vm1, %v3458_v33  ;;  %6581 = vst.msk [vmem:[#allocation4 + $0x31] sm:$0xff] %vm279_vm1, %v3458_v33  ;;  %v3373_v9 = vadd.f32 1.0, %v12520_v51  ;;  %12545 = vpow2.f32 %v10598_v1  ;;  %v3216_v24 = vmul.f32 %v14867_v35, %v3177_v42 }
 0x21e   : > { %v3176_v3 = vadd.f32 %v3105_v43, %v15004_v23  ;;  %v12524_v2 = vpop.eup %12523  ;;  %v3461_v20 = vmul.f32 %v12522_v47, %v14968_v41  ;;  %12547 = vrcp.f32 %v3370_v11  ;;  %v10600_v45 = vmul.f32 -1.442695, %v15124_v0  ;;  %v11996_v48 = vpop.f32.mrf.mxu0 }
 0x21f   : > { %v15134_v50 = vadd.f32 %v14882_v56, %v3213_v6  ;;  %v12526_v61 = vpop.eup %12525  ;;  %v3460_v8 = vmul.f32 %v12524_v2, %v14973_v18  ;;  %12549 = vrcp.f32 %v3373_v9  ;;  %v15138_v1 = vadd.f32 %v14882_v56, %v3216_v24 }
 0x220   : > { %v3215_v53 = vmul.f32 %v14867_v35, %v3176_v3  ;;  %v12528_v23 = vpop.eup %12527  ;;  %3540 = vst.msk [vmem:[#allocation3 + $0x6a] sm:$0xff] %vm279_vm1, %v3461_v20  ;;  %6584 = vst.msk [vmem:[#allocation4 + $0x51] sm:$0xff] %vm279_vm1, %v3461_v20  ;;  %v3372_v41 = vadd.f32 1.0, %v12526_v61  ;;  %12551 = vpow2.f32 %v10597_v28  ;;  %v3179_v63 = vadd.f32 %v11996_v48, %v15007_v60  ;;  %v3115_v4 = vpop.f32.mrf.mxu0  ;;  %v15154_v43 = vld [vmem:[#allocation3 + $0x30] sm:$0xff] }
 0x221   : > { %v10599_v58 = vmul.f32 -1.442695, %v15134_v50  ;;  %v12530_v22 = vpop.eup %12529  ;;  %3539 = vst.msk [vmem:[#allocation3 + $0x62] sm:$0xff] %vm279_vm1, %v3460_v8  ;;  %6583 = vst.msk [vmem:[#allocation4 + $0x49] sm:$0xff] %vm279_vm1, %v3460_v8  ;;  %v3463_v18 = vmul.f32 %v12528_v23, %v14987_v13  ;;  %12553 = vpow2.f32 %v10600_v45  ;;  %v10602_v33 = vmul.f32 -1.442695, %v15138_v1 }
 0x222   : > { %v15150_v42 = vadd.f32 %v14882_v56, %v3215_v53  ;;  %v12532_v51 = vpop.eup %12531  ;;  %12555 = vrcp.f32 %v3372_v41  ;;  %v3375_v28 = vadd.f32 1.0, %v12530_v22  ;;  %v3218_v11 = vmul.f32 %v14867_v35, %v3179_v63  ;;  %v11999_v6 = vpop.f32.mrf.mxu0 }
 0x223   : > { %v3178_v60 = vadd.f32 %v3115_v4, %v15018_v54  ;;  %v12534_v47 = vpop.eup %12533  ;;  %3542 = vst.msk [vmem:[#allocation3 + $0x82] sm:$0xff] %vm279_vm1, %v3463_v18  ;;  %6586 = vst.msk [vmem:[#allocation4 + $0x69] sm:$0xff] %vm279_vm1, %v3463_v18  ;;  %v3462_v13 = vmul.f32 %v12532_v51, %v15000_v15  ;;  %12557 = vpow2.f32 %v10599_v58  ;;  %v3181_v24 = vadd.f32 %v11999_v6, %v15020_v32 }
 0x224   : > { %v10601_v9 = vmul.f32 -1.442695, %v15150_v42  ;;  %12559 = vrcp.f32 %v3375_v28  ;;  %v3374_v3 = vadd.f32 1.0, %v12534_v47  ;;  %v15162_v2 = vadd.f32 %v14882_v56, %v3218_v11  ;;  %v3125_v20 = vpop.f32.mrf.mxu0 }
 0x225   : > { %v3217_v54 = vmul.f32 %v14867_v35, %v3178_v60  ;;  %v12536_v45 = vpop.eup %12535  ;;  %3541 = vst.msk [vmem:[#allocation3 + $0x7a] sm:$0xff] %vm279_vm1, %v3462_v13  ;;  %6585 = vst.msk [vmem:[#allocation4 + $0x61] sm:$0xff] %vm279_vm1, %v3462_v13  ;;  %12561 = vpow2.f32 %v10602_v33  ;;  %v3220_v15 = vmul.f32 %v14867_v35, %v3181_v24  ;;  %v3180_v48 = vadd.f32 %v3125_v20, %v15027_v12 }
 0x226   : > { %v3697_v32 = vrot.slane %v15154_v43, 1  ;;  %v12538_v61 = vpop.eup %12537  ;;  %v3465_v8 = vmul.f32 %v12536_v45, %v15014_v40  ;;  %12563 = vrcp.f32 %v3374_v3  ;;  %v10604_v53 = vmul.f32 -1.442695, %v15162_v2  ;;  %v12002_v41 = vpop.f32.mrf.mxu0 }
 0x227   : > { %v15173_v23 = vadd.f32 %v14882_v56, %v3217_v54  ;;  %v12540_v58 = vpop.eup %12539  ;;  %v3377_v63 = vadd.f32 1.0, %v12538_v61  ;;  %12565 = vpow2.f32 %v10601_v9  ;;  %v15176_v4 = vadd.f32 %v14882_v56, %v3220_v15  ;;  %v15202_v61 = vld [vmem:[#allocation3 + $0x38] sm:$0xff] }
 0x228   : > { %v3219_v12 = vmul.f32 %v14867_v35, %v3180_v48  ;;  %v12542_v22 = vpop.eup %12541  ;;  %3544 = vst.msk [vmem:[#allocation3 + $0x9a] sm:$0xff] %vm279_vm1, %v3465_v8  ;;  %6588 = vst.msk [vmem:[#allocation4 + $0x81] sm:$0xff] %vm279_vm1, %v3465_v8  ;;  %v3464_v40 = vmul.f32 %v12540_v58, %v15032_v5  ;;  %12567 = vpow2.f32 %v10604_v53  ;;  %v3183_v33 = vadd.f32 %v12002_v41, %v15039_v59  ;;  %v3135_v51 = vpop.f32.mrf.mxu0  ;;  %v15207_v58 = vld [vmem:[#allocation3 + $0x48] sm:$0xff] }
 0x229   : > { %v10603_v18 = vmul.f32 -1.442695, %v15173_v23  ;;  %v12544_v28 = vpop.eup %12543  ;;  %12569 = vrcp.f32 %v3377_v63  ;;  %v3376_v11 = vadd.f32 1.0, %v12542_v22  ;;  %v10606_v60 = vmul.f32 -1.442695, %v15176_v4 }
 0x22a   : > { %v15186_v6 = vadd.f32 %v14882_v56, %v3219_v12  ;;  %v12546_v47 = vpop.eup %12545  ;;  %3543 = vst.msk [vmem:[#allocation3 + $0x92] sm:$0xff] %vm279_vm1, %v3464_v40  ;;  %6587 = vst.msk [vmem:[#allocation4 + $0x79] sm:$0xff] %vm279_vm1, %v3464_v40  ;;  %v3467_v5 = vmul.f32 %v12544_v28, %v15036_v26  ;;  %v3222_v13 = vmul.f32 %v14867_v35, %v3183_v33  ;;  %v12005_v9 = vpop.f32.mrf.mxu0  ;;  %v15221_v33 = vld [vmem:[#allocation3 + $0x50] sm:$0xff] }
 0x22b   : > { %12571 = vpow2.f32 %v10603_v18  ;;  %v3182_v59 = vadd.f32 %v3135_v51, %v15055_v55  ;;  %v12548_v24 = vpop.eup %12547  ;;  %v3379_v3 = vadd.f32 1.0, %v12546_v47  ;;  %v3185_v20 = vadd.f32 %v12005_v9, %v15071_v38  ;;  %v15226_v47 = vld [vmem:[#allocation3 + $0x60] sm:$0xff] }
 0x22c   : > { %12573 = vrcp.f32 %v3376_v11  ;;  %v10605_v54 = vmul.f32 -1.442695, %v15186_v6  ;;  %v12550_v45 = vpop.eup %12549  ;;  %3546 = vst.msk [vmem:[#allocation3 + $0xb2] sm:$0xff] %vm279_vm1, %v3467_v5  ;;  %6590 = vst.msk [vmem:[#allocation4 + $0x99] sm:$0xff] %vm279_vm1, %v3467_v5  ;;  %v3466_v26 = vmul.f32 %v12548_v24, %v15048_v21  ;;  %v15199_v15 = vadd.f32 %v14882_v56, %v3222_v13  ;;  %v3145_v48 = vpop.f32.mrf.mxu0  ;;  %v15233_v24 = vld [vmem:[#allocation3 + $0x68] sm:$0xff] }
 0x22d   : > { %12575 = vpow2.f32 %v10606_v60  ;;  %v3221_v55 = vmul.f32 %v14867_v35, %v3182_v59  ;;  %v12552_v8 = vpop.eup %12551  ;;  %v3469_v53 = vmul.f32 %v12550_v45, %v15052_v37  ;;  %v3224_v38 = vmul.f32 %v14867_v35, %v3185_v20 }
 0x22e   : > { %12577 = vrcp.f32 %v3379_v3  ;;  %v3184_v41 = vadd.f32 %v3145_v48, %v15079_v46  ;;  %v12554_v21 = vpop.eup %12553  ;;  %3545 = vst.msk [vmem:[#allocation3 + $0xaa] sm:$0xff] %vm279_vm1, %v3466_v26  ;;  %6589 = vst.msk [vmem:[#allocation4 + $0x91] sm:$0xff] %vm279_vm1, %v3466_v26  ;;  %v3378_v63 = vadd.f32 1.0, %v12552_v8  ;;  %v10608_v12 = vmul.f32 -1.442695, %v15199_v15 }
 0x22f   : > { %12579 = vpow2.f32 %v10605_v54  ;;  %v15213_v22 = vadd.f32 %v14882_v56, %v3221_v55  ;;  %v12556_v37 = vpop.eup %12555  ;;  %3548 = vst.msk [vmem:[#allocation3 + $0xca] sm:$0xff] %vm279_vm1, %v3469_v53  ;;  %6592 = vst.msk [vmem:[#allocation4 + $0xb1] sm:$0xff] %vm279_vm1, %v3469_v53  ;;  %v3381_v46 = vadd.f32 1.0, %v12554_v21  ;;  %v15218_v40 = vadd.f32 %v14882_v56, %v3224_v38 }
 0x230   : > { %v3223_v18 = vmul.f32 %v14867_v35, %v3184_v41  ;;  %v3698_v51 = vrot.slane %v15202_v61, 1  ;;  %v12558_v28 = vpop.eup %12557  ;;  %v3468_v11 = vmul.f32 %v12556_v37, %v15065_v52  ;;  %12581 = vrcp.f32 %v3378_v63 }
 0x231   : > { %v10607_v60 = vmul.f32 -1.442695, %v15213_v22  ;;  %v3702_v5 = vrot.slane %v15207_v58, 1  ;;  %v12560_v13 = vpop.eup %12559  ;;  %12583 = vrcp.f32 %v3381_v46  ;;  %v3380_v59 = vadd.f32 1.0, %v12558_v28 }
 0x232   : > { %v10610_v9 = vmul.f32 -1.442695, %v15218_v40  ;;  %v15231_v35 = vadd.f32 %v14882_v56, %v3223_v18  ;;  %v12562_v3 = vpop.eup %12561  ;;  %3547 = vst.msk [vmem:[#allocation3 + $0xc2] sm:$0xff] %vm279_vm1, %v3468_v11  ;;  %6591 = vst.msk [vmem:[#allocation4 + $0xa9] sm:$0xff] %vm279_vm1, %v3468_v11  ;;  %v3471_v52 = vmul.f32 %v12560_v13, %v15068_v25  ;;  %12585 = vpow2.f32 %v10608_v12 }
 0x233   : > { %v3699_v54 = vsel %vm491_vm4, %v3697_v32, %v3698_v51  ;;  %v3703_v20 = vrot.slane %v15221_v33, 1  ;;  %v12564_v56 = vpop.eup %12563  ;;  %12587 = vrcp.f32 %v3380_v59  ;;  %v3383_v45 = vadd.f32 1.0, %v12562_v3 }
 0x234   : > { %v10609_v26 = vmul.f32 -1.442695, %v15231_v35  ;;  %v3707_v55 = vrot.slane %v15226_v47, 1  ;;  %v12566_v48 = vpop.eup %12565  ;;  %3550 = vst.msk [vmem:[#allocation3 + $0xe2] sm:$0xff] %vm279_vm1, %v3471_v52  ;;  %6594 = vst.msk [vmem:[#allocation4 + $0xc9] sm:$0xff] %vm279_vm1, %v3471_v52  ;;  %v3470_v25 = vmul.f32 %v12564_v56, %v15077_v39  ;;  %12589 = vpow2.f32 %v10607_v60 }
 0x235   : > { %v3704_v32 = vsel %vm491_vm4, %v3702_v5, %v3703_v20  ;;  %v3708_v8 = vrot.slane %v15233_v24, 1  ;;  %v12568_v53 = vpop.eup %12567  ;;  %12591 = vrcp.f32 %v3383_v45  ;;  %v3382_v38 = vadd.f32 1.0, %v12566_v48 }
 0x236   : > { %v3831_v41 = vmax.f32 %v15154_v43, %v3699_v54  ;;  %v3833_v21 = vmax.f32 %v15207_v58, %v3704_v32  ;;  %v12570_v63 = vpop.eup %12569  ;;  %3549 = vst.msk [vmem:[#allocation3 + $0xda] sm:$0xff] %vm279_vm1, %v3470_v25  ;;  %6593 = vst.msk [vmem:[#allocation4 + $0xc1] sm:$0xff] %vm279_vm1, %v3470_v25  ;;  %v3385_v39 = vadd.f32 1.0, %v12568_v53  ;;  %12593 = vpow2.f32 %v10610_v9 }
 0x237   : > { %v3709_v12 = vsel %vm491_vm4, %v3707_v55, %v3708_v8  ;;  %v3877_v37 = vrot.slane %v15154_v43, 2  ;;  %v3473_v18 = vmul.f32 %v12570_v63, %v15086_v62  ;;  %12595 = vrcp.f32 %v3382_v38 }
 0x238   : > { %v12572_v46 = vpop.eup %12571  ;;  %v3835_v28 = vmax.f32 %v15226_v47, %v3709_v12  ;;  %v3878_v11 = vrot.slane %v15202_v61, 2  ;;  %12597 = vrcp.f32 %v3385_v39  ;;  %v3882_v13 = vrot.slane %v15207_v58, 2 }
 0x239   : > { %v12574_v60 = vpop.eup %12573  ;;  %v3384_v5 = vadd.f32 1.0, %v12572_v46  ;;  %v3883_v59 = vrot.slane %v15221_v33, 2  ;;  %3552 = vst.msk [vmem:[#allocation3 + $0xfa] sm:$0xff] %vm279_vm1, %v3473_v18  ;;  %6596 = vst.msk [vmem:[#allocation4 + $0xe1] sm:$0xff] %vm279_vm1, %v3473_v18  ;;  %12599 = vpow2.f32 %v10609_v26  ;;  %v3887_v52 = vrot.slane %v15226_v47, 2 }
 0x23a   : > { %v12576_v9 = vpop.eup %12575  ;;  %v3472_v3 = vmul.f32 %v12574_v60, %v15094_v29  ;;  %v3879_v62 = vsel %vm1159_vm5, %v3877_v37, %v3878_v11  ;;  %v3888_v55 = vrot.slane %v15233_v24, 2  ;;  %v4058_v32 = vrot.slane %v15154_v43, 3 }
 0x23b   : > { %v12578_v54 = vpop.eup %12577  ;;  %12601 = vrcp.f32 %v3384_v5  ;;  %v3387_v56 = vadd.f32 1.0, %v12576_v9  ;;  %v3884_v45 = vsel %vm1159_vm5, %v3882_v13, %v3883_v59  ;;  %v4011_v26 = vmax.f32 %v3831_v41, %v3879_v62 }
 0x23c   : > { %v12580_v48 = vpop.eup %12579  ;;  %3551 = vst.msk [vmem:[#allocation3 + $0xf2] sm:$0xff] %vm279_vm1, %v3472_v3  ;;  %6595 = vst.msk [vmem:[#allocation4 + $0xd9] sm:$0xff] %vm279_vm1, %v3472_v3  ;;  %v3475_v29 = vmul.f32 %v12578_v54, %v15100_v17  ;;  %v4013_v25 = vmax.f32 %v3833_v21, %v3884_v45  ;;  %v3889_v38 = vsel %vm1159_vm5, %v3887_v52, %v3888_v55  ;;  %v4059_v63 = vrot.slane %v15202_v61, 3 }
 0x23d   : > { %12603 = vrcp.f32 %v3387_v56  ;;  %v3386_v53 = vadd.f32 1.0, %v12580_v48  ;;  %v12582_v39 = vpop.eup %12581  ;;  %v4015_v12 = vmax.f32 %v3835_v28, %v3889_v38  ;;  %v4063_v17 = vrot.slane %v15207_v58, 3 }
 0x23e   : > { %3554 = vst.msk [vmem:[#allocation3 + $0x112] sm:$0xff] %vm279_vm1, %v3475_v29  ;;  %6598 = vst.msk [vmem:[#allocation4 + $0xf9] sm:$0xff] %vm279_vm1, %v3475_v29  ;;  %v4064_v41 = vrot.slane %v15221_v33, 3  ;;  %v4068_v21 = vrot.slane %v15226_v47, 3  ;;  %v12584_v37 = vpop.eup %12583  ;;  %v3474_v46 = vmul.f32 %v12582_v39, %v15114_v14  ;;  %v4060_v18 = vsel %vm4047_vm7, %v4058_v32, %v4059_v63  ;;  %v15317_v39 = vld [vmem:[#allocation3 + $0x58] sm:$0xf] }
 0x23f   : > { %12605 = vrcp.f32 %v3386_v53  ;;  %v4069_v60 = vrot.slane %v15233_v24, 3  ;;  %v12586_v5 = vpop.eup %12585  ;;  %v3477_v13 = vmul.f32 %v12584_v37, %v15124_v0  ;;  %v4192_v9 = vmax.f32 %v4011_v26, %v4060_v18  ;;  %v15311_v26 = vld [vmem:[#allocation3 + $0x40] sm:$0xf]  ;;  %v15330_v18 = vld [vmem:[#allocation3 + $0x70] sm:$0xf] }
 0x240   : > { %v4065_v28 = vsel %vm4047_vm7, %v4063_v17, %v4064_v41  ;;  %v4238_v3 = vrot.slane %v15154_v43, 4  ;;  %v12588_v62 = vpop.eup %12587  ;;  %3553 = vst.msk [vmem:[#allocation3 + $0x10a] sm:$0xff] %vm279_vm1, %v3474_v46  ;;  %6597 = vst.msk [vmem:[#allocation4 + $0xf1] sm:$0xff] %vm279_vm1, %v3474_v46  ;;  %v3389_v14 = vadd.f32 1.0, %v12586_v5  ;;  %v4239_v0 = vrot.slane %v15202_v61, 4 }
 0x241   : > { %v4070_v52 = vsel %vm4047_vm7, %v4068_v21, %v4069_v60  ;;  %v4194_v54 = vmax.f32 %v4013_v25, %v4065_v28  ;;  %v12590_v56 = vpop.eup %12589  ;;  %3556 = vst.msk [vmem:[#allocation3 + $0x12a] sm:$0xff] %vm279_vm1, %v3477_v13  ;;  %6600 = vst.msk [vmem:[#allocation4 + $0x111] sm:$0xff] %vm279_vm1, %v3477_v13  ;;  %v3476_v43 = vmul.f32 %v12588_v62, %v15134_v50  ;;  %v4243_v48 = vrot.slane %v15207_v58, 4 }
 0x242   : > { %v4196_v45 = vmax.f32 %v4015_v12, %v4070_v52  ;;  %v4244_v29 = vrot.slane %v15221_v33, 4  ;;  %v12592_v32 = vpop.eup %12591  ;;  %12607 = vrcp.f32 %v3389_v14  ;;  %v3388_v53 = vadd.f32 1.0, %v12590_v56 }
 0x243   : > { %v4240_v25 = vsel %vm636_vm0, %v4238_v3, %v4239_v0  ;;  %v4248_v38 = vrot.slane %v15226_v47, 4  ;;  %v12594_v17 = vpop.eup %12593  ;;  %3555 = vst.msk [vmem:[#allocation3 + $0x122] sm:$0xff] %vm279_vm1, %v3476_v43  ;;  %6599 = vst.msk [vmem:[#allocation4 + $0x109] sm:$0xff] %vm279_vm1, %v3476_v43  ;;  %v3479_v50 = vmul.f32 %v12592_v32, %v15138_v1  ;;  %v4249_v12 = vrot.slane %v15233_v24, 4 }
 0x244   : > { %v4245_v58 = vsel %vm636_vm0, %v4243_v48, %v4244_v29  ;;  %v15326_v21 = vmax.f32 %v4192_v9, %v4240_v25  ;;  %v12596_v37 = vpop.eup %12595  ;;  %12609 = vrcp.f32 %v3388_v53  ;;  %v3391_v47 = vadd.f32 1.0, %v12594_v17 }
 0x245   : > { %v15328_v46 = vmax.f32 %v4194_v54, %v4245_v58  ;;  %v3700_v5 = vrot.slane %v15311_v26, 1  ;;  %v12598_v13 = vpop.eup %12597  ;;  %3558 = vst.msk [vmem:[#allocation3 + $0x142] sm:$0xff] %vm279_vm1, %v3479_v50  ;;  %6602 = vst.msk [vmem:[#allocation4 + $0x129] sm:$0xff] %vm279_vm1, %v3479_v50  ;;  %v3478_v1 = vmul.f32 %v12596_v37, %v15150_v42  ;;  %v4250_v28 = vsel %vm636_vm0, %v4248_v38, %v4249_v12 }
 0x246   : > { %v4440_v9 = vmax.f32 %v14877_v49, %v15326_v21  ;;  %v3705_v3 = vrot.slane %v15317_v39, 1  ;;  %v12600_v62 = vpop.eup %12599  ;;  %v3481_v14 = vmul.f32 %v12598_v13, %v15162_v2  ;;  %12611 = vrcp.f32 %v3391_v47 }
 0x247   : > { %v15343_v52 = vmax.f32 %v4196_v45, %v4250_v28  ;;  %v3701_v54 = vsel %vm491_vm4, %v3698_v51, %v3700_v5  ;;  %3557 = vst.msk [vmem:[#allocation3 + $0x13a] sm:$0xff] %vm279_vm1, %v3478_v1  ;;  %6601 = vst.msk [vmem:[#allocation4 + $0x121] sm:$0xff] %vm279_vm1, %v3478_v1  ;;  %v3390_v56 = vadd.f32 1.0, %v12600_v62  ;;  %v3710_v2 = vrot.slane %v15330_v18, 1 }
 0x248   : > { %v12602_v42 = vpop.eup %12601  ;;  %v4472_v43 = vmax.f32 %v4440_v9, %v15328_v46  ;;  %v3706_v48 = vsel %vm491_vm4, %v3703_v20, %v3705_v3  ;;  %3560 = vst.msk [vmem:[#allocation3 + $0x15a] sm:$0xff] %vm279_vm1, %v3481_v14  ;;  %6604 = vst.msk [vmem:[#allocation4 + $0x141] sm:$0xff] %vm279_vm1, %v3481_v14  ;;  %v3832_v45 = vmax.f32 %v15202_v61, %v3701_v54  ;;  %v3880_v53 = vrot.slane %v15311_v26, 2  ;;  %v15388_v3 = vld [vmem:[#allocation3 + $0x80] sm:$0xff]  ;;  %v3584_v54 = vld [vmem:[#allocation3 + $0x88] sm:$0xf] }
 0x249   : > { %v3480_v51 = vmul.f32 %v12602_v42, %v15173_v23  ;;  %v3834_v32 = vmax.f32 %v15221_v33, %v3706_v48  ;;  %12613 = vrcp.f32 %v3390_v56  ;;  %v3711_v20 = vsel %vm491_vm4, %v3708_v8, %v3710_v2 }
 0x24a   : > { %v12604_v25 = vpop.eup %12603  ;;  %v4504_v38 = vmax.f32 %v4472_v43, %v15343_v52  ;;  %v3885_v17 = vrot.slane %v15317_v39, 2  ;;  %v3836_v50 = vmax.f32 %v15233_v24, %v3711_v20  ;;  %v3881_v58 = vsel %vm1159_vm5, %v3878_v11, %v3880_v53 }
 0x24b   : > { %3559 = vst.msk [vmem:[#allocation3 + $0x152] sm:$0xff] %vm279_vm1, %v3480_v51  ;;  %6603 = vst.msk [vmem:[#allocation4 + $0x139] sm:$0xff] %vm279_vm1, %v3480_v51  ;;  %v3483_v23 = vmul.f32 %v12604_v25, %v15176_v4  ;;  %v3890_v37 = vrot.slane %v15330_v18, 2  ;;  %v4012_v5 = vmax.f32 %v3832_v45, %v3881_v58  ;;  %v4061_v4 = vrot.slane %v15311_v26, 3  ;;  %v3582_v25 = vld [vmem:[#allocation3 + $0x78] sm:$0xff] }
 0x24c   : > { %v12606_v47 = vpop.eup %12605  ;;  %6643 = vrot.lane.b32.xlu0 %v4504_v38, %s12762_s8  ;;  %4536 = vst.msk [vmem:[#allocation3 + $0x32] sm:$0xff] %vm279_vm1, %v4504_v38  ;;  %v3886_v8 = vsel %vm1159_vm5, %v3883_v59, %v3885_v17  ;;  %v4066_v13 = vrot.slane %v15317_v39, 3  ;;  %v4071_v9 = vrot.slane %v15330_v18, 3  ;;  %v4246_v43 = vrot.slane %v15317_v39, 4 }
 0x24d   : > { %3562 = vst.msk [vmem:[#allocation3 + $0x172] sm:$0xff] %vm279_vm1, %v3483_v23  ;;  %6606 = vst.msk [vmem:[#allocation4 + $0x159] sm:$0xff] %vm279_vm1, %v3483_v23  ;;  %v3482_v11 = vmul.f32 %v12606_v47, %v15186_v6  ;;  %v3891_v1 = vsel %vm1159_vm5, %v3888_v55, %v3890_v37  ;;  %v4014_v28 = vmax.f32 %v3834_v32, %v3886_v8  ;;  %v4241_v6 = vrot.slane %v15311_v26, 4 }
 0x24e   : > { %v4016_v59 = vmax.f32 %v3836_v50, %v3891_v1  ;;  %v4062_v62 = vsel %vm4047_vm7, %v4059_v63, %v4061_v4  ;;  %v4067_v14 = vsel %vm4047_vm7, %v4064_v41, %v4066_v13  ;;  %v4072_v55 = vsel %vm4047_vm7, %v4069_v60, %v4071_v9 }
 0x24f   : > { %3561 = vst.msk [vmem:[#allocation3 + $0x16a] sm:$0xff] %vm279_vm1, %v3482_v11  ;;  %6605 = vst.msk [vmem:[#allocation4 + $0x151] sm:$0xff] %vm279_vm1, %v3482_v11  ;;  %v4193_v42 = vmax.f32 %v4012_v5, %v4062_v62  ;;  %v4195_v56 = vmax.f32 %v4014_v28, %v4067_v14  ;;  %v12608_v63 = vpop.eup %12607  ;;  %v4242_v41 = vsel %vm636_vm0, %v4239_v0, %v4241_v6  ;;  %v4251_v26 = vrot.slane %v15330_v18, 4  ;;  %v15441_v11 = vld [vmem:[#allocation3 + $0x98] sm:$0xff]  ;;  %v3587_v14 = vld [vmem:[#allocation3 + $0xa0] sm:$0xf] }
 0x250   : > { %v4197_v48 = vmax.f32 %v4016_v59, %v4072_v55  ;;  %v3713_v2 = vrot.slane %v15388_v3, 1  ;;  %v3485_v51 = vmul.f32 %v12608_v63, %v15199_v15  ;;  %v4247_v60 = vsel %vm636_vm0, %v4244_v29, %v4246_v43 }
 0x251   : > { %v15412_v45 = vmax.f32 %v4193_v42, %v4242_v41  ;;  %v3715_v32 = vrot.slane %v3584_v54, 1  ;;  %v12610_v39 = vpop.eup %12609  ;;  %v4252_v61 = vsel %vm636_vm0, %v4249_v12, %v4251_v26  ;;  %v15417_v53 = vmax.f32 %v4195_v56, %v4247_v60 }
 0x252   : > { %v3893_v0 = vrot.slane %v15388_v3, 2  ;;  %v3895_v18 = vrot.slane %v3584_v54, 2  ;;  %3564 = vst.msk [vmem:[#allocation3 + $0x18a] sm:$0xff] %vm279_vm1, %v3485_v51  ;;  %6608 = vst.msk [vmem:[#allocation4 + $0x171] sm:$0xff] %vm279_vm1, %v3485_v51  ;;  %v3484_v15 = vmul.f32 %v12610_v39, %v15213_v22  ;;  %v15423_v33 = vmax.f32 %v4197_v48, %v4252_v61  ;;  %v3585_v61 = vld [vmem:[#allocation3 + $0x90] sm:$0xff] }
 0x253   : > { %v20009_v29 = vmax.f32 %v14941_v16, %v14943_v10  ;;  %v3716_v12 = vsel %vm491_vm4, %v3713_v2, %v3715_v32  ;;  %v12612_v38 = vpop.eup %12611  ;;  %v4074_v23 = vrot.slane %v15388_v3, 3  ;;  %v4076_v50 = vrot.slane %v3584_v54, 3 }
 0x254   : > { %v3838_v20 = vmax.f32 %v15388_v3, %v3716_v12  ;;  %v3896_v17 = vsel %vm1159_vm5, %v3893_v0, %v3895_v18  ;;  %3563 = vst.msk [vmem:[#allocation3 + $0x182] sm:$0xff] %vm279_vm1, %v3484_v15  ;;  %6607 = vst.msk [vmem:[#allocation4 + $0x169] sm:$0xff] %vm279_vm1, %v3484_v15  ;;  %v3487_v22 = vmul.f32 %v12612_v38, %v15218_v40  ;;  %v4254_v58 = vrot.slane %v15388_v3, 4 }
 0x255   : > { %v4441_v24 = vmax.f32 %v20009_v29, %v15412_v45  ;;  %v4256_v37 = vrot.slane %v3584_v54, 4  ;;  %v4077_v8 = vsel %vm4047_vm7, %v4074_v23, %v4076_v50  ;;  %v4411_v5 = vmax.f32 %v14943_v10, %v15412_v45 }
 0x256   : > { %v4018_v47 = vmax.f32 %v3838_v20, %v3896_v17  ;;  %v3712_v4 = vrot.slane %v3582_v25, 1  ;;  %v12614_v13 = vpop.eup %12613  ;;  %3566 = vst.msk [vmem:[#allocation3 + $0x1a2] sm:$0xff] %vm279_vm1, %v3487_v22  ;;  %6610 = vst.msk [vmem:[#allocation4 + $0x189] sm:$0xff] %vm279_vm1, %v3487_v22  ;;  %v3892_v28 = vrot.slane %v3582_v25, 2  ;;  %v4073_v9 = vrot.slane %v3582_v25, 3  ;;  %v3589_v22 = vld [vmem:[#allocation3 + $0xb0] sm:$0xff] }
 0x257   : > { %v4473_v16 = vmax.f32 %v4441_v24, %v15417_v53  ;;  %v4257_v1 = vsel %vm636_vm0, %v4254_v58, %v4256_v37  ;;  %v3486_v3 = vmul.f32 %v12614_v13, %v15231_v35  ;;  %v4443_v62 = vmax.f32 %v4411_v5, %v15417_v53 }
 0x258   : > { %v4199_v59 = vmax.f32 %v4018_v47, %v4077_v8  ;;  %v3714_v10 = vsel %vm491_vm4, %v3712_v4, %v3713_v2  ;;  %v3894_v54 = vsel %vm1159_vm5, %v3892_v28, %v3893_v0  ;;  %v4075_v55 = vsel %vm4047_vm7, %v4073_v9, %v4074_v23 }
 0x259   : > { %v4505_v40 = vmax.f32 %v4473_v16, %v15423_v33  ;;  %v3837_v6 = vmax.f32 %v3582_v25, %v3714_v10  ;;  %v4253_v42 = vrot.slane %v3582_v25, 4  ;;  %3565 = vst.msk [vmem:[#allocation3 + $0x19a] sm:$0xff] %vm279_vm1, %v3486_v3  ;;  %6609 = vst.msk [vmem:[#allocation4 + $0x181] sm:$0xff] %vm279_vm1, %v3486_v3  ;;  %v4475_v56 = vmax.f32 %v4443_v62, %v15423_v33 }
 0x25a   : > { %v15456_v35 = vmax.f32 %v4199_v59, %v4257_v1  ;;  %v4410_v43 = vmax.f32 %v14836_v34, %v15326_v21  ;;  %v3718_v63 = vrot.slane %v15441_v11, 1  ;;  %v3720_v26 = vrot.slane %v3587_v14, 1 }
 0x25b   : > { %4537 = vst.msk [vmem:[#allocation3 + $0x3a] sm:$0xff] %vm279_vm1, %v4505_v40  ;;  %6645 = vrot.lane.b32.xlu0 %v4505_v40, %s12762_s8  ;;  %v4017_v48 = vmax.f32 %v3837_v6, %v3894_v54  ;;  %v4255_v41 = vsel %vm636_vm0, %v4253_v42, %v4254_v58  ;;  %v3898_v2 = vrot.slane %v15441_v11, 2  ;;  %v3900_v32 = vrot.slane %v3587_v14, 2 }
 0x25c   : > { %v4507_v51 = vmax.f32 %v4475_v56, %v15456_v35  ;;  %v4442_v60 = vmax.f32 %v4410_v43, %v15328_v46  ;;  %v4079_v39 = vrot.slane %v15441_v11, 3  ;;  %v3721_v18 = vsel %vm491_vm4, %v3718_v63, %v3720_v26 }
 0x25d   : > { %v4198_v0 = vmax.f32 %v4017_v48, %v4075_v55  ;;  %v4081_v15 = vrot.slane %v3587_v14, 3  ;;  %v4259_v29 = vrot.slane %v15441_v11, 4  ;;  %v3840_v12 = vmax.f32 %v15441_v11, %v3721_v18  ;;  %v3590_v11 = vld [vmem:[#allocation3 + $0xb8] sm:$0xf] }
 0x25e   : > { %6649 = vrot.lane.b32.xlu1 %v4507_v51, %s12762_s8  ;;  %4539 = vst.msk [vmem:[#allocation3 + $0x52] sm:$0xff] %vm279_vm1, %v4507_v51  ;;  %v4474_v24 = vmax.f32 %v4442_v60, %v15343_v52  ;;  %v3901_v25 = vsel %vm1159_vm5, %v3898_v2, %v3900_v32  ;;  %v4261_v38 = vrot.slane %v3587_v14, 4  ;;  %v4413_v23 = vmax.f32 %v15412_v45, %v15417_v53 }
 0x25f   : > { %v15474_v20 = vmax.f32 %v4198_v0, %v4255_v41  ;;  %v4082_v17 = vsel %vm4047_vm7, %v4079_v39, %v4081_v15  ;;  %v3717_v50 = vrot.slane %v3585_v61, 1  ;;  %v4020_v16 = vmax.f32 %v3840_v12, %v3901_v25  ;;  %v3592_v15 = vld [vmem:[#allocation3 + $0xc8] sm:$0xff] }
 0x260   : > { %v4262_v58 = vsel %vm636_vm0, %v4259_v29, %v4261_v38  ;;  %v3897_v37 = vrot.slane %v3585_v61, 2  ;;  %v4078_v47 = vrot.slane %v3585_v61, 3  ;;  %v4445_v5 = vmax.f32 %v4413_v23, %v15423_v33 }
 0x261   : > { %v4506_v8 = vmax.f32 %v4474_v24, %v15474_v20  ;;  %v3719_v4 = vsel %vm491_vm4, %v3717_v50, %v3718_v63  ;;  %v4258_v13 = vrot.slane %v3585_v61, 4  ;;  %v4201_v40 = vmax.f32 %v4020_v16, %v4082_v17  ;;  %v3588_v63 = vld [vmem:[#allocation3 + $0xa8] sm:$0xff] }
 0x262   : > { %v3839_v1 = vmax.f32 %v3585_v61, %v3719_v4  ;;  %v3899_v28 = vsel %vm1159_vm5, %v3897_v37, %v3898_v2  ;;  %v4080_v45 = vsel %vm4047_vm7, %v4078_v47, %v4079_v39  ;;  %v4477_v9 = vmax.f32 %v4445_v5, %v15456_v35 }
 0x263   : > { %6647 = vrot.lane.b32.xlu0 %v4506_v8, %s12762_s8  ;;  %4538 = vst.msk [vmem:[#allocation3 + $0x4a] sm:$0xff] %vm279_vm1, %v4506_v8  ;;  %v4260_v3 = vsel %vm636_vm0, %v4258_v13, %v4259_v29  ;;  %v4412_v59 = vmax.f32 %v15326_v21, %v15328_v46  ;;  %v3723_v62 = vrot.slane %v3589_v22, 1  ;;  %v15491_v10 = vmax.f32 %v4201_v40, %v4262_v58 }
 0x264   : > { %v4019_v14 = vmax.f32 %v3839_v1, %v3899_v28  ;;  %v3725_v6 = vrot.slane %v3590_v11, 1  ;;  %v3903_v54 = vrot.slane %v3589_v22, 2  ;;  %v3905_v42 = vrot.slane %v3590_v11, 2 }
 0x265   : > { %v4444_v55 = vmax.f32 %v4412_v59, %v15343_v52  ;;  %v4084_v56 = vrot.slane %v3589_v22, 3  ;;  %v4086_v43 = vrot.slane %v3590_v11, 3  ;;  %v4509_v48 = vmax.f32 %v4477_v9, %v15491_v10  ;;  %v3591_v59 = vld [vmem:[#allocation3 + $0xc0] sm:$0xff] }
 0x266   : > { %v4200_v41 = vmax.f32 %v4019_v14, %v4080_v45  ;;  %v3726_v26 = vsel %vm491_vm4, %v3723_v62, %v3725_v6  ;;  %v4264_v2 = vrot.slane %v3589_v22, 4  ;;  %v3906_v60 = vsel %vm1159_vm5, %v3903_v54, %v3905_v42 }
 0x267   : > { %v4476_v21 = vmax.f32 %v4444_v55, %v15474_v20  ;;  %v3842_v51 = vmax.f32 %v3589_v22, %v3726_v26  ;;  %v4087_v32 = vsel %vm4047_vm7, %v4084_v56, %v4086_v43  ;;  %6653 = vrot.lane.b32.xlu1 %v4509_v48, %s12762_s8  ;;  %4541 = vst.msk [vmem:[#allocation3 + $0x6a] sm:$0xff] %vm279_vm1, %v4509_v48  ;;  %v4266_v61 = vrot.slane %v3590_v11, 4  ;;  %v3593_v22 = vld [vmem:[#allocation3 + $0xd0] sm:$0xf]  ;;  %v3595_v26 = vld [vmem:[#allocation3 + $0xe0] sm:$0xff] }
 0x268   : > { %v15501_v39 = vmax.f32 %v4200_v41, %v4260_v3  ;;  %v4415_v0 = vmax.f32 %v15417_v53, %v15423_v33  ;;  %v3722_v18 = vrot.slane %v3588_v63, 1  ;;  %v3902_v24 = vrot.slane %v3588_v63, 2 }
 0x269   : > { %v4022_v29 = vmax.f32 %v3842_v51, %v3906_v60  ;;  %v4083_v12 = vrot.slane %v3588_v63, 3  ;;  %v4263_v25 = vrot.slane %v3588_v63, 4  ;;  %v4267_v17 = vsel %vm636_vm0, %v4264_v2, %v4266_v61 }
 0x26a   : > { %v4508_v38 = vmax.f32 %v4476_v21, %v15501_v39  ;;  %v4447_v23 = vmax.f32 %v4415_v0, %v15456_v35  ;;  %v3724_v50 = vsel %vm491_vm4, %v3722_v18, %v3723_v62  ;;  %v3904_v37 = vsel %vm1159_vm5, %v3902_v24, %v3903_v54 }
 0x26b   : > { %v4203_v16 = vmax.f32 %v4022_v29, %v4087_v32  ;;  %v3841_v58 = vmax.f32 %v3588_v63, %v3724_v50  ;;  %v4085_v53 = vsel %vm4047_vm7, %v4083_v12, %v4084_v56  ;;  %v4265_v8 = vsel %vm636_vm0, %v4263_v25, %v4264_v2 }
 0x26c   : > { %6651 = vrot.lane.b32.xlu0 %v4508_v38, %s12762_s8  ;;  %4540 = vst.msk [vmem:[#allocation3 + $0x62] sm:$0xff] %vm279_vm1, %v4508_v38  ;;  %v4479_v47 = vmax.f32 %v4447_v23, %v15491_v10  ;;  %v4414_v5 = vmax.f32 %v15328_v46, %v15343_v52  ;;  %v3728_v4 = vrot.slane %v3592_v15, 1  ;;  %v3730_v40 = vrot.slane %v3593_v22, 1 }
 0x26d   : > { %v15517_v13 = vmax.f32 %v4203_v16, %v4267_v17  ;;  %v4021_v11 = vmax.f32 %v3841_v58, %v3904_v37  ;;  %v3908_v1 = vrot.slane %v3592_v15, 2  ;;  %v3910_v45 = vrot.slane %v3593_v22, 2 }
 0x26e   : > { %v4446_v28 = vmax.f32 %v4414_v5, %v15474_v20  ;;  %v4089_v9 = vrot.slane %v3592_v15, 3  ;;  %v4091_v3 = vrot.slane %v3593_v22, 3  ;;  %v3731_v6 = vsel %vm491_vm4, %v3728_v4, %v3730_v40  ;;  %v3594_v5 = vld [vmem:[#allocation3 + $0xd8] sm:$0xff] }
 0x26f   : > { %v4511_v62 = vmax.f32 %v4479_v47, %v15517_v13  ;;  %v4202_v14 = vmax.f32 %v4021_v11, %v4085_v53  ;;  %v4269_v54 = vrot.slane %v3592_v15, 4  ;;  %v3844_v55 = vmax.f32 %v3592_v15, %v3731_v6  ;;  %v3596_v15 = vld [vmem:[#allocation3 + $0xe8] sm:$0xf]  ;;  %v3598_v6 = vld [vmem:[#allocation3 + $0xf8] sm:$0xff] }
 0x270   : > { %v4478_v46 = vmax.f32 %v4446_v28, %v15501_v39  ;;  %v3911_v42 = vsel %vm1159_vm5, %v3908_v1, %v3910_v45  ;;  %v4092_v56 = vsel %vm4047_vm7, %v4089_v9, %v4091_v3  ;;  %v4271_v63 = vrot.slane %v3593_v22, 4 }
 0x271   : > { %6657 = vrot.lane.b32.xlu1 %v4511_v62, %s12762_s8  ;;  %4543 = vst.msk [vmem:[#allocation3 + $0x82] sm:$0xff] %vm279_vm1, %v4511_v62  ;;  %v15527_v43 = vmax.f32 %v4202_v14, %v4265_v8  ;;  %v4417_v48 = vmax.f32 %v15423_v33, %v15456_v35  ;;  %v3727_v41 = vrot.slane %v3591_v59, 1  ;;  %v4024_v2 = vmax.f32 %v3844_v55, %v3911_v42 }
 0x272   : > { %v3907_v21 = vrot.slane %v3591_v59, 2  ;;  %v4088_v51 = vrot.slane %v3591_v59, 3  ;;  %v4268_v60 = vrot.slane %v3591_v59, 4  ;;  %v4272_v61 = vsel %vm636_vm0, %v4269_v54, %v4271_v63 }
 0x273   : > { %v4510_v32 = vmax.f32 %v4478_v46, %v15527_v43  ;;  %v4449_v0 = vmax.f32 %v4417_v48, %v15491_v10  ;;  %v3729_v18 = vsel %vm491_vm4, %v3727_v41, %v3728_v4  ;;  %v4205_v29 = vmax.f32 %v4024_v2, %v4092_v56 }
 0x274   : > { %v3843_v24 = vmax.f32 %v3591_v59, %v3729_v18  ;;  %v3909_v12 = vsel %vm1159_vm5, %v3907_v21, %v3908_v1  ;;  %v4090_v33 = vsel %vm4047_vm7, %v4088_v51, %v4089_v9  ;;  %v4270_v38 = vsel %vm636_vm0, %v4268_v60, %v4269_v54 }
 0x275   : > { %6655 = vrot.lane.b32.xlu0 %v4510_v32, %s12762_s8  ;;  %4542 = vst.msk [vmem:[#allocation3 + $0x7a] sm:$0xff] %vm279_vm1, %v4510_v32  ;;  %v4481_v25 = vmax.f32 %v4449_v0, %v15517_v13  ;;  %v4416_v17 = vmax.f32 %v15343_v52, %v15474_v20  ;;  %v3733_v23 = vrot.slane %v3595_v26, 1  ;;  %v15543_v50 = vmax.f32 %v4205_v29, %v4272_v61 }
 0x276   : > { %v4023_v22 = vmax.f32 %v3843_v24, %v3909_v12  ;;  %v3735_v16 = vrot.slane %v3596_v15, 1  ;;  %v3913_v58 = vrot.slane %v3595_v26, 2  ;;  %v3915_v53 = vrot.slane %v3596_v15, 2 }
 0x277   : > { %v4448_v37 = vmax.f32 %v4416_v17, %v15501_v39  ;;  %v4094_v47 = vrot.slane %v3595_v26, 3  ;;  %v4096_v8 = vrot.slane %v3596_v15, 3  ;;  %v4513_v4 = vmax.f32 %v4481_v25, %v15543_v50  ;;  %v3597_v17 = vld [vmem:[#allocation3 + $0xf0] sm:$0xff] }
 0x278   : > { %v4204_v11 = vmax.f32 %v4023_v22, %v4090_v33  ;;  %v3736_v40 = vsel %vm491_vm4, %v3733_v23, %v3735_v16  ;;  %v4274_v1 = vrot.slane %v3595_v26, 4  ;;  %v3916_v45 = vsel %vm1159_vm5, %v3913_v58, %v3915_v53 }
 0x279   : > { %v4480_v52 = vmax.f32 %v4448_v37, %v15527_v43  ;;  %v3846_v28 = vmax.f32 %v3595_v26, %v3736_v40  ;;  %v4097_v9 = vsel %vm4047_vm7, %v4094_v47, %v4096_v8  ;;  %6661 = vrot.lane.b32.xlu1 %v4513_v4, %s12762_s8  ;;  %4545 = vst.msk [vmem:[#allocation3 + $0x9a] sm:$0xff] %vm279_vm1, %v4513_v4  ;;  %v4276_v59 = vrot.slane %v3596_v15, 4  ;;  %v3599_v26 = vld [vmem:[#allocation3 + $0x100] sm:$0xf]  ;;  %v15583_v40 = vld [vmem:[#allocation3 + $0x110] sm:$0xff] }
 0x27a   : > { %v15553_v3 = vmax.f32 %v4204_v11, %v4270_v38  ;;  %v4419_v62 = vmax.f32 %v15456_v35, %v15491_v10  ;;  %v3732_v14 = vrot.slane %v3594_v5, 1  ;;  %v3912_v46 = vrot.slane %v3594_v5, 2 }
 0x27b   : > { %v4026_v54 = vmax.f32 %v3846_v28, %v3916_v45  ;;  %v4093_v55 = vrot.slane %v3594_v5, 3  ;;  %v4273_v42 = vrot.slane %v3594_v5, 4  ;;  %v4277_v63 = vsel %vm636_vm0, %v4274_v1, %v4276_v59 }
 0x27c   : > { %v4512_v56 = vmax.f32 %v4480_v52, %v15553_v3  ;;  %v4451_v48 = vmax.f32 %v4419_v62, %v15517_v13  ;;  %v3734_v41 = vsel %vm491_vm4, %v3732_v14, %v3733_v23  ;;  %v3914_v51 = vsel %vm1159_vm5, %v3912_v46, %v3913_v58 }
 0x27d   : > { %v4207_v2 = vmax.f32 %v4026_v54, %v4097_v9  ;;  %v3845_v21 = vmax.f32 %v3594_v5, %v3734_v41  ;;  %v4095_v35 = vsel %vm4047_vm7, %v4093_v55, %v4094_v47  ;;  %v4275_v32 = vsel %vm636_vm0, %v4273_v42, %v4274_v1 }
 0x27e   : > { %6659 = vrot.lane.b32.xlu0 %v4512_v56, %s12762_s8  ;;  %4544 = vst.msk [vmem:[#allocation3 + $0x92] sm:$0xff] %vm279_vm1, %v4512_v56  ;;  %v4483_v60 = vmax.f32 %v4451_v48, %v15543_v50  ;;  %v4418_v61 = vmax.f32 %v15474_v20, %v15501_v39  ;;  %v3738_v0 = vrot.slane %v3598_v6, 1  ;;  %v3740_v29 = vrot.slane %v3599_v26, 1 }
 0x27f   : > { %v15569_v18 = vmax.f32 %v4207_v2, %v4277_v63  ;;  %v4025_v15 = vmax.f32 %v3845_v21, %v3914_v51  ;;  %v3918_v24 = vrot.slane %v3598_v6, 2  ;;  %v3920_v33 = vrot.slane %v3599_v26, 2 }
 0x280   : > { %v4450_v12 = vmax.f32 %v4418_v61, %v15527_v43  ;;  %v4099_v25 = vrot.slane %v3598_v6, 3  ;;  %v4101_v38 = vrot.slane %v3599_v26, 3  ;;  %v3741_v16 = vsel %vm491_vm4, %v3738_v0, %v3740_v29  ;;  %v15603_v61 = vld [vmem:[#allocation3 + $0x30] sm:$0xff] }
 0x281   : > { %v4515_v23 = vmax.f32 %v4483_v60, %v15569_v18  ;;  %v4206_v22 = vmax.f32 %v4025_v15, %v4095_v35  ;;  %v4279_v58 = vrot.slane %v3598_v6, 4  ;;  %v3848_v37 = vmax.f32 %v3598_v6, %v3741_v16  ;;  %v3602_v6 = vld [vmem:[#allocation3 + $0x118] sm:$0xf] }
 0x282   : > { %v4482_v20 = vmax.f32 %v4450_v12, %v15553_v3  ;;  %v3921_v53 = vsel %vm1159_vm5, %v3918_v24, %v3920_v33  ;;  %v4102_v47 = vsel %vm4047_vm7, %v4099_v25, %v4101_v38  ;;  %v4281_v5 = vrot.slane %v3599_v26, 4  ;;  %v15612_v12 = vld [vmem:[#allocation3 + $0x48] sm:$0xff]  ;;  %v15614_v33 = vld [vmem:[#allocation3 + $0x50] sm:$0xff] }
 0x283   : > { %6665 = vrot.lane.b32.xlu1 %v4515_v23, %s12762_s8  ;;  %4547 = vst.msk [vmem:[#allocation3 + $0xb2] sm:$0xff] %vm279_vm1, %v4515_v23  ;;  %v15579_v8 = vmax.f32 %v4206_v22, %v4275_v32  ;;  %v4421_v4 = vmax.f32 %v15491_v10, %v15517_v13  ;;  %v3737_v11 = vrot.slane %v3597_v17, 1  ;;  %v4028_v1 = vmax.f32 %v3848_v37, %v3921_v53  ;;  %v15624_v22 = vld [vmem:[#allocation3 + $0x60] sm:$0xff]  ;;  %v15632_v37 = vld [vmem:[#allocation3 + $0x68] sm:$0xff] }
 0x284   : > { %v3917_v52 = vrot.slane %v3597_v17, 2  ;;  %v4098_v28 = vrot.slane %v3597_v17, 3  ;;  %v4278_v45 = vrot.slane %v3597_v17, 4  ;;  %v4282_v59 = vsel %vm636_vm0, %v4279_v58, %v4281_v5 }
 0x285   : > { %v4514_v9 = vmax.f32 %v4482_v20, %v15579_v8  ;;  %v4453_v62 = vmax.f32 %v4421_v4, %v15543_v50  ;;  %v3739_v14 = vsel %vm491_vm4, %v3737_v11, %v3738_v0  ;;  %v4209_v54 = vmax.f32 %v4028_v1, %v4102_v47 }
 0x286   : > { %v3847_v46 = vmax.f32 %v3597_v17, %v3739_v14  ;;  %v3919_v10 = vsel %vm1159_vm5, %v3917_v52, %v3918_v24  ;;  %v4100_v55 = vsel %vm4047_vm7, %v4098_v28, %v4099_v25  ;;  %v4280_v56 = vsel %vm636_vm0, %v4278_v45, %v4279_v58  ;;  %v15610_v24 = vld [vmem:[#allocation3 + $0x38] sm:$0xff] }
 0x287   : > { %6663 = vrot.lane.b32.xlu0 %v4514_v9, %s12762_s8  ;;  %4546 = vst.msk [vmem:[#allocation3 + $0xaa] sm:$0xff] %vm279_vm1, %v4514_v9  ;;  %v4485_v42 = vmax.f32 %v4453_v62, %v15569_v18  ;;  %v4420_v63 = vmax.f32 %v15501_v39, %v15527_v43  ;;  %v3743_v48 = vrot.slane %v15583_v40, 1  ;;  %v15598_v41 = vmax.f32 %v4209_v54, %v4282_v59 }
 0x288   : > { %v4027_v26 = vmax.f32 %v3847_v46, %v3919_v10  ;;  %v3745_v2 = vrot.slane %v3602_v6, 1  ;;  %v3923_v21 = vrot.slane %v15583_v40, 2  ;;  %v3925_v35 = vrot.slane %v3602_v6, 2 }
 0x289   : > { %v4452_v51 = vmax.f32 %v4420_v63, %v15553_v3  ;;  %v4104_v60 = vrot.slane %v15583_v40, 3  ;;  %v4106_v32 = vrot.slane %v3602_v6, 3  ;;  %v4517_v0 = vmax.f32 %v4485_v42, %v15598_v41 }
 0x28a   : > { %v4208_v15 = vmax.f32 %v4027_v26, %v4100_v55  ;;  %v3746_v39 = vsel %vm491_vm4, %v3743_v48, %v3745_v2  ;;  %v4284_v29 = vrot.slane %v15583_v40, 4  ;;  %v3926_v17 = vsel %vm1159_vm5, %v3923_v21, %v3925_v35 }
 0x28b   : > { %v4484_v25 = vmax.f32 %v4452_v51, %v15579_v8  ;;  %v3850_v38 = vmax.f32 %v15583_v40, %v3746_v39  ;;  %v4107_v23 = vsel %vm4047_vm7, %v4104_v60, %v4106_v32  ;;  %6669 = vrot.lane.b32.xlu1 %v4517_v0, %s12762_s8  ;;  %4549 = vst.msk [vmem:[#allocation3 + $0xca] sm:$0xff] %vm279_vm1, %v4517_v0  ;;  %v4286_v58 = vrot.slane %v3602_v6, 4 }
 0x28c   : > { %v15628_v16 = vmax.f32 %v4208_v15, %v4280_v56  ;;  %v4423_v20 = vmax.f32 %v15517_v13, %v15543_v50  ;;  %v4698_v53 = vrot.slane %v15603_v61, 1  ;;  %v4699_v5 = vrot.slane %v15610_v24, 1 }
 0x28d   : > { %v4030_v47 = vmax.f32 %v3850_v38, %v3926_v17  ;;  %v4703_v4 = vrot.slane %v15612_v12, 1  ;;  %v4704_v11 = vrot.slane %v15614_v33, 1  ;;  %v4287_v52 = vsel %vm636_vm0, %v4284_v29, %v4286_v58 }
 0x28e   : > { %v4516_v1 = vmax.f32 %v4484_v25, %v15628_v16  ;;  %v4455_v28 = vmax.f32 %v4423_v20, %v15569_v18  ;;  %v4708_v13 = vrot.slane %v15624_v22, 1  ;;  %v4700_v9 = vsel %vm491_vm4, %v4698_v53, %v4699_v5 }
 0x28f   : > { %v4211_v45 = vmax.f32 %v4030_v47, %v4107_v23  ;;  %v4705_v59 = vsel %vm491_vm4, %v4703_v4, %v4704_v11  ;;  %v4709_v62 = vrot.slane %v15632_v37, 1  ;;  %v4832_v6 = vmax.f32 %v15603_v61, %v4700_v9 }
 0x290   : > { %6667 = vrot.lane.b32.xlu0 %v4516_v1, %s12762_s8  ;;  %4548 = vst.msk [vmem:[#allocation3 + $0xc2] sm:$0xff] %vm279_vm1, %v4516_v1  ;;  %v4487_v14 = vmax.f32 %v4455_v28, %v15598_v41  ;;  %v4834_v54 = vmax.f32 %v15612_v12, %v4705_v59  ;;  %v4878_v46 = vrot.slane %v15603_v61, 2  ;;  %v4879_v42 = vrot.slane %v15610_v24, 2  ;;  %v3600_v28 = vld [vmem:[#allocation3 + $0x108] sm:$0xff] }
 0x291   : > { %v15657_v10 = vmax.f32 %v4211_v45, %v4287_v52  ;;  %v4710_v55 = vsel %vm491_vm4, %v4708_v13, %v4709_v62  ;;  %v4883_v56 = vrot.slane %v15612_v12, 2  ;;  %v4884_v26 = vrot.slane %v15614_v33, 2 }
 0x292   : > { %v4836_v63 = vmax.f32 %v15624_v22, %v4710_v55  ;;  %v4888_v2 = vrot.slane %v15624_v22, 2  ;;  %v4889_v51 = vrot.slane %v15632_v37, 2  ;;  %v4880_v32 = vsel %vm1159_vm5, %v4878_v46, %v4879_v42 }
 0x293   : > { %v4519_v35 = vmax.f32 %v4487_v14, %v15657_v10  ;;  %v5058_v0 = vrot.slane %v15603_v61, 3  ;;  %v5059_v15 = vrot.slane %v15610_v24, 3  ;;  %v4885_v39 = vsel %vm1159_vm5, %v4883_v56, %v4884_v26 }
 0x294   : > { %v4890_v25 = vsel %vm1159_vm5, %v4888_v2, %v4889_v51  ;;  %v5012_v38 = vmax.f32 %v4832_v6, %v4880_v32  ;;  %v5063_v17 = vrot.slane %v15612_v12, 3  ;;  %v5014_v23 = vmax.f32 %v4834_v54, %v4885_v39  ;;  %v15714_v32 = vld [vmem:[#allocation3 + $0x28] sm:$0xf] }
 0x295   : > { %6673 = vrot.lane.b32.xlu1 %v4519_v35, %s12762_s8  ;;  %4551 = vst.msk [vmem:[#allocation3 + $0xe2] sm:$0xff] %vm279_vm1, %v4519_v35  ;;  %v5016_v58 = vmax.f32 %v4836_v63, %v4890_v25  ;;  %v5060_v20 = vsel %vm4047_vm7, %v5058_v0, %v5059_v15  ;;  %v5064_v53 = vrot.slane %v15614_v33, 3  ;;  %v5068_v47 = vrot.slane %v15624_v22, 3  ;;  %v15716_v0 = vld [vmem:[#allocation3 + $0x40] sm:$0xf] }
 0x296   : > { %v5069_v4 = vrot.slane %v15632_v37, 3  ;;  %v5192_v1 = vmax.f32 %v5012_v38, %v5060_v20  ;;  %v5238_v52 = vrot.slane %v15603_v61, 4  ;;  %v5239_v45 = vrot.slane %v15610_v24, 4 }
 0x297   : > { %v5065_v13 = vsel %vm4047_vm7, %v5063_v17, %v5064_v53  ;;  %v5243_v9 = vrot.slane %v15612_v12, 4  ;;  %v5244_v59 = vrot.slane %v15614_v33, 4  ;;  %v5248_v54 = vrot.slane %v15624_v22, 4 }
 0x298   : > { %v5070_v14 = vsel %vm4047_vm7, %v5068_v47, %v5069_v4  ;;  %v5194_v6 = vmax.f32 %v5014_v23, %v5065_v13  ;;  %v5249_v61 = vrot.slane %v15632_v37, 4  ;;  %v5240_v55 = vsel %vm636_vm0, %v5238_v52, %v5239_v45  ;;  %v15723_v23 = vld [vmem:[#allocation3 + $0x58] sm:$0xf]  ;;  %v15732_v52 = vld [vmem:[#allocation3 + $0x70] sm:$0xf] }
 0x299   : > { %v5196_v46 = vmax.f32 %v5016_v58, %v5070_v14  ;;  %v5245_v12 = vsel %vm636_vm0, %v5243_v9, %v5244_v59  ;;  %v3742_v56 = vrot.slane %v3600_v28, 1  ;;  %v15710_v2 = vmax.f32 %v5192_v1, %v5240_v55 }
 0x29a   : > { %v5250_v63 = vsel %vm636_vm0, %v5248_v54, %v5249_v61  ;;  %v15712_v35 = vmax.f32 %v5194_v6, %v5245_v12  ;;  %v3922_v22 = vrot.slane %v3600_v28, 2  ;;  %v4103_v38 = vrot.slane %v3600_v28, 3 }
 0x29b   : > { %v15718_v39 = vmax.f32 %v5196_v46, %v5250_v63  ;;  %v3744_v25 = vsel %vm491_vm4, %v3742_v56, %v3743_v48  ;;  %v4283_v17 = vrot.slane %v3600_v28, 4  ;;  %v5440_v58 = vmax.f32 %v14877_v49, %v15710_v2  ;;  %v12744_v63 = vld [vmem:[#allocation3 + $0x20] sm:$0xff] }
 0x29c   : > { %v3849_v20 = vmax.f32 %v3600_v28, %v3744_v25  ;;  %v3924_v47 = vsel %vm1159_vm5, %v3922_v22, %v3923_v21  ;;  %v4422_v1 = vmax.f32 %v15527_v43, %v15553_v3  ;;  %v4105_v48 = vsel %vm4047_vm7, %v4103_v38, %v4104_v60 }
 0x29d   : > { %v4285_v13 = vsel %vm636_vm0, %v4283_v17, %v4284_v29  ;;  %v4696_v49 = vrot.slane %v15714_v32, 1  ;;  %v4701_v28 = vrot.slane %v15716_v0, 1  ;;  %v5472_v9 = vmax.f32 %v5440_v58, %v15712_v35  ;;  %v12743_v29 = vld [vmem:[#allocation3 + $0x8] sm:$0xff] }
 0x29e   : > { %v4029_v21 = vmax.f32 %v3849_v20, %v3924_v47  ;;  %v4454_v14 = vmax.f32 %v4422_v1, %v15579_v8  ;;  %v4706_v43 = vrot.slane %v15723_v23, 1  ;;  %v4711_v60 = vrot.slane %v15732_v52, 1 }
 0x29f   : > { %v4697_v6 = vsel %vm491_vm4, %v14633_v44, %v4696_v49  ;;  %v4702_v40 = vsel %vm491_vm4, %v4699_v5, %v4701_v28  ;;  %v4829_v54 = vmax.f32 %v12743_v29, %v15107_v7  ;;  %v5504_v46 = vmax.f32 %v5472_v9, %v15718_v39 }
 0x2a0   : > { %v4210_v55 = vmax.f32 %v4029_v21, %v4105_v48  ;;  %v4486_v12 = vmax.f32 %v4454_v14, %v15628_v16  ;;  %v4707_v56 = vsel %vm491_vm4, %v4704_v11, %v4706_v43  ;;  %v4712_v44 = vsel %vm491_vm4, %v4709_v62, %v4711_v60  ;;  %v12745_v11 = vld [vmem:[#allocation3 + $0x10] sm:$0xf] }
 0x2a1   : > { %v4831_v5 = vmax.f32 %v12744_v63, %v4697_v6  ;;  %v4833_v22 = vmax.f32 %v15610_v24, %v4702_v40  ;;  %v4835_v25 = vmax.f32 %v15614_v33, %v4707_v56  ;;  %5536 = vst.msk [vmem:[#allocation3 + $0x32] sm:$0xff] %vm279_vm1, %v5504_v46  ;;  %6804 = vrot.lane.b32.xlu1 %v5504_v46, %s12763_s9  ;;  %v4871_v17 = vrot.slane %v12745_v11, 2 }
 0x2a2   : > { %v15764_v7 = vmax.f32 %v4210_v55, %v4285_v13  ;;  %v4837_v38 = vmax.f32 %v15632_v37, %v4712_v44  ;;  %v4876_v58 = vrot.slane %v15714_v32, 2  ;;  %v4881_v62 = vrot.slane %v15716_v0, 2  ;;  %v3604_v44 = vld [vmem:[#allocation3 + $0x128] sm:$0xff] }
 0x2a3   : > { %v4886_v20 = vrot.slane %v15723_v23, 2  ;;  %v4891_v47 = vrot.slane %v15732_v52, 2  ;;  %v5051_v1 = vrot.slane %v12745_v11, 3  ;;  %v4872_v49 = vsel %vm1159_vm5, %v14688_v19, %v4871_v17 }
 0x2a4   : > { %v4518_v48 = vmax.f32 %v4486_v12, %v15764_v7  ;;  %v4877_v13 = vsel %vm1159_vm5, %v14692_v36, %v4876_v58  ;;  %v5056_v28 = vrot.slane %v15714_v32, 3  ;;  %v4882_v9 = vsel %vm1159_vm5, %v4879_v42, %v4881_v62 }
 0x2a5   : > { %v4887_v21 = vsel %vm1159_vm5, %v4884_v26, %v4886_v20  ;;  %v4892_v14 = vsel %vm1159_vm5, %v4889_v51, %v4891_v47  ;;  %v5009_v43 = vmax.f32 %v4829_v54, %v4872_v49  ;;  %v5011_v19 = vmax.f32 %v4831_v5, %v4877_v13  ;;  %v3605_v47 = vld [vmem:[#allocation3 + $0x130] sm:$0xf] }
 0x2a6   : > { %6671 = vrot.lane.b32.xlu0 %v4518_v48, %s12762_s8  ;;  %4550 = vst.msk [vmem:[#allocation3 + $0xda] sm:$0xff] %vm279_vm1, %v4518_v48  ;;  %v5013_v36 = vmax.f32 %v4833_v22, %v4882_v9  ;;  %v5015_v6 = vmax.f32 %v4835_v25, %v4887_v21  ;;  %v5017_v40 = vmax.f32 %v4837_v38, %v4892_v14  ;;  %v5061_v26 = vrot.slane %v15716_v0, 3  ;;  %v3603_v38 = vld [vmem:[#allocation3 + $0x120] sm:$0xff] }
 0x2a7   : > { %v5052_v42 = vsel %vm4047_vm7, %v14720_v57, %v5051_v1  ;;  %v5057_v60 = vsel %vm4047_vm7, %v14724_v27, %v5056_v28  ;;  %v5066_v29 = vrot.slane %v15723_v23, 3  ;;  %v5071_v51 = vrot.slane %v15732_v52, 3 }
 0x2a8   : > { %v5189_v54 = vmax.f32 %v5009_v43, %v5052_v42  ;;  %v5191_v46 = vmax.f32 %v5011_v19, %v5057_v60  ;;  %v5231_v55 = vrot.slane %v12745_v11, 4  ;;  %v5062_v12 = vsel %vm4047_vm7, %v5059_v15, %v5061_v26 }
 0x2a9   : > { %v5067_v57 = vsel %vm4047_vm7, %v5064_v53, %v5066_v29  ;;  %v5236_v56 = vrot.slane %v15714_v32, 4  ;;  %v5241_v27 = vrot.slane %v15716_v0, 4  ;;  %v5072_v63 = vsel %vm4047_vm7, %v5069_v4, %v5071_v51  ;;  %v4583_v29 = vld [vmem:[#allocation3 + $0x78] sm:$0xff]  ;;  %v4584_v51 = vld [vmem:[#allocation3 + $0x80] sm:$0xff] }
 0x2aa   : > { %v5193_v5 = vmax.f32 %v5013_v36, %v5062_v12  ;;  %v5195_v22 = vmax.f32 %v5015_v6, %v5067_v57  ;;  %v5232_v25 = vsel %vm636_vm0, %v14772_v30, %v5231_v55  ;;  %v5197_v15 = vmax.f32 %v5017_v40, %v5072_v63 }
 0x2ab   : > { %v5237_v11 = vsel %vm636_vm0, %v14776_v31, %v5236_v56  ;;  %v5242_v53 = vsel %vm636_vm0, %v5239_v45, %v5241_v27  ;;  %v5246_v32 = vrot.slane %v15723_v23, 4  ;;  %v5251_v0 = vrot.slane %v15732_v52, 4 }
 0x2ac   : > { %v5369_v17 = vmax.f32 %v5189_v54, %v5232_v25  ;;  %v15815_v4 = vmax.f32 %v5191_v46, %v5237_v11  ;;  %v15817_v58 = vmax.f32 %v5193_v5, %v5242_v53  ;;  %v3747_v62 = vrot.slane %v3603_v38, 1 }
 0x2ad   : > { %v5247_v30 = vsel %vm636_vm0, %v5244_v59, %v5246_v32  ;;  %v3748_v20 = vrot.slane %v3604_v44, 1  ;;  %v3927_v31 = vrot.slane %v3603_v38, 2  ;;  %v5252_v24 = vsel %vm636_vm0, %v5249_v61, %v5251_v0 }
 0x2ae   : > { %v15825_v45 = vmax.f32 %v5195_v22, %v5247_v30  ;;  %v5409_v23 = vmax.f32 %v5369_v17, %v15815_v4  ;;  %v3928_v52 = vrot.slane %v3604_v44, 2  ;;  %v15828_v1 = vmax.f32 %v5197_v15, %v5252_v24  ;;  %v4585_v17 = vld [vmem:[#allocation3 + $0x88] sm:$0xf] }
 0x2af   : > { %v3749_v48 = vsel %vm491_vm4, %v3747_v62, %v3748_v20  ;;  %v4108_v33 = vrot.slane %v3603_v38, 3  ;;  %v4109_v49 = vrot.slane %v3604_v44, 3  ;;  %v4288_v37 = vrot.slane %v3603_v38, 4 }
 0x2b0   : > { %v5441_v59 = vmax.f32 %v5409_v23, %v15817_v58  ;;  %v3851_v13 = vmax.f32 %v3603_v38, %v3749_v48  ;;  %v3929_v28 = vsel %vm1159_vm5, %v3927_v31, %v3928_v52  ;;  %v4289_v9 = vrot.slane %v3604_v44, 4 }
 0x2b1   : > { %v4110_v61 = vsel %vm4047_vm7, %v4108_v33, %v4109_v49  ;;  %v4424_v21 = vmax.f32 %v15553_v3, %v15579_v8  ;;  %v3750_v14 = vrot.slane %v3605_v47, 1  ;;  %v3930_v36 = vrot.slane %v3605_v47, 2 }
 0x2b2   : > { %v5473_v43 = vmax.f32 %v5441_v59, %v15825_v45  ;;  %v4031_v19 = vmax.f32 %v3851_v13, %v3929_v28  ;;  %v4111_v6 = vrot.slane %v3605_v47, 3  ;;  %v4290_v40 = vsel %vm636_vm0, %v4288_v37, %v4289_v9  ;;  %v3607_v13 = vld [vmem:[#allocation3 + $0x140] sm:$0xff] }
 0x2b3   : > { %v4456_v42 = vmax.f32 %v4424_v21, %v15628_v16  ;;  %v3751_v60 = vsel %vm491_vm4, %v3748_v20, %v3750_v14  ;;  %v4291_v26 = vrot.slane %v3605_v47, 4  ;;  %v3931_v3 = vsel %vm1159_vm5, %v3928_v52, %v3930_v36  ;;  %v3606_v21 = vld [vmem:[#allocation3 + $0x138] sm:$0xff] }
 0x2b4   : > { %v5505_v54 = vmax.f32 %v5473_v43, %v15828_v1  ;;  %v4212_v46 = vmax.f32 %v4031_v19, %v4110_v61  ;;  %v3852_v55 = vmax.f32 %v3604_v44, %v3751_v60  ;;  %v4112_v57 = vsel %vm4047_vm7, %v4109_v49, %v4111_v6 }
 0x2b5   : > { %v4488_v12 = vmax.f32 %v4456_v42, %v15764_v7  ;;  %v4292_v56 = vsel %vm636_vm0, %v4289_v9, %v4291_v26  ;;  %v4425_v27 = vmax.f32 %v15543_v50, %v15569_v18  ;;  %v4713_v22 = vrot.slane %v4583_v29, 1 }
 0x2b6   : > { %5537 = vst.msk [vmem:[#allocation3 + $0x3a] sm:$0xff] %vm279_vm1, %v5505_v54  ;;  %6806 = vrot.lane.b32.xlu1 %v5505_v54, %s12763_s9  ;;  %v15849_v63 = vmax.f32 %v4212_v46, %v4290_v40  ;;  %v4032_v5 = vmax.f32 %v3852_v55, %v3931_v3  ;;  %v4714_v44 = vrot.slane %v4584_v51, 1  ;;  %v4893_v38 = vrot.slane %v4583_v29, 2 }
 0x2b7   : > { %v4457_v25 = vmax.f32 %v4425_v27, %v15598_v41  ;;  %v4894_v15 = vrot.slane %v4584_v51, 2  ;;  %v5073_v11 = vrot.slane %v4583_v29, 3  ;;  %v5074_v50 = vrot.slane %v4584_v51, 3 }
 0x2b8   : > { %v4520_v53 = vmax.f32 %v4488_v12, %v15849_v63  ;;  %v4213_v32 = vmax.f32 %v4032_v5, %v4112_v57  ;;  %v4715_v0 = vsel %vm491_vm4, %v4713_v22, %v4714_v44  ;;  %v5253_v31 = vrot.slane %v4583_v29, 4  ;;  %v3608_v57 = vld [vmem:[#allocation3 + $0x148] sm:$0xf] }
 0x2b9   : > { %v4489_v30 = vmax.f32 %v4457_v25, %v15657_v10  ;;  %v4838_v62 = vmax.f32 %v4583_v29, %v4715_v0  ;;  %v4895_v20 = vsel %vm1159_vm5, %v4893_v38, %v4894_v15  ;;  %v5075_v23 = vsel %vm4047_vm7, %v5073_v11, %v5074_v50 }
 0x2ba   : > { %6675 = vrot.lane.b32.xlu0 %v4520_v53, %s12762_s8  ;;  %4552 = vst.msk [vmem:[#allocation3 + $0xf2] sm:$0xff] %vm279_vm1, %v4520_v53  ;;  %v15858_v24 = vmax.f32 %v4213_v32, %v4292_v56  ;;  %v5254_v52 = vrot.slane %v4584_v51, 4  ;;  %v5410_v47 = vmax.f32 %v14836_v34, %v15710_v2  ;;  %v4716_v33 = vrot.slane %v4585_v17, 1 }
 0x2bb   : > { %v5018_v48 = vmax.f32 %v4838_v62, %v4895_v20  ;;  %v4896_v49 = vrot.slane %v4585_v17, 2  ;;  %v5076_v59 = vrot.slane %v4585_v17, 3  ;;  %v5256_v9 = vrot.slane %v4585_v17, 4 }
 0x2bc   : > { %v4521_v28 = vmax.f32 %v4489_v30, %v15858_v24  ;;  %v5255_v37 = vsel %vm636_vm0, %v5253_v31, %v5254_v52  ;;  %v5442_v61 = vmax.f32 %v5410_v47, %v15712_v35  ;;  %v4717_v43 = vsel %vm491_vm4, %v4714_v44, %v4716_v33 }
 0x2bd   : > { %v5198_v14 = vmax.f32 %v5018_v48, %v5075_v23  ;;  %v4897_v19 = vsel %vm1159_vm5, %v4894_v15, %v4896_v49  ;;  %v5077_v34 = vsel %vm4047_vm7, %v5074_v50, %v5076_v59  ;;  %v4839_v6 = vmax.f32 %v4584_v51, %v4717_v43  ;;  %v4586_v23 = vld [vmem:[#allocation3 + $0x90] sm:$0xff] }
 0x2be   : > { %6677 = vrot.lane.b32.xlu1 %v4521_v28, %s12762_s8  ;;  %4553 = vst.msk [vmem:[#allocation3 + $0xfa] sm:$0xff] %vm279_vm1, %v4521_v28  ;;  %v5474_v36 = vmax.f32 %v5442_v61, %v15718_v39  ;;  %v5257_v40 = vsel %vm636_vm0, %v5254_v52, %v5256_v9  ;;  %v5411_v42 = vmax.f32 %v15815_v4, %v15817_v58  ;;  %v3752_v26 = vrot.slane %v3606_v21, 1  ;;  %v4587_v52 = vld [vmem:[#allocation3 + $0x98] sm:$0xff] }
 0x2bf   : > { %v15875_v60 = vmax.f32 %v5198_v14, %v5255_v37  ;;  %v3753_v29 = vrot.slane %v3607_v13, 1  ;;  %v3932_v54 = vrot.slane %v3606_v21, 2  ;;  %v5019_v46 = vmax.f32 %v4839_v6, %v4897_v19 }
 0x2c0   : > { %v5443_v55 = vmax.f32 %v5411_v42, %v15825_v45  ;;  %v3933_v3 = vrot.slane %v3607_v13, 2  ;;  %v4113_v12 = vrot.slane %v3606_v21, 3  ;;  %v4114_v27 = vrot.slane %v3607_v13, 3  ;;  %v4588_v42 = vld [vmem:[#allocation3 + $0xa0] sm:$0xf] }
 0x2c1   : > { %v5506_v56 = vmax.f32 %v5474_v36, %v15875_v60  ;;  %v3754_v51 = vsel %vm491_vm4, %v3752_v26, %v3753_v29  ;;  %v4293_v5 = vrot.slane %v3606_v21, 4  ;;  %v5199_v22 = vmax.f32 %v5019_v46, %v5077_v34 }
 0x2c2   : > { %v5475_v4 = vmax.f32 %v5443_v55, %v15828_v1  ;;  %v3853_v44 = vmax.f32 %v3606_v21, %v3754_v51  ;;  %v3934_v25 = vsel %vm1159_vm5, %v3932_v54, %v3933_v3  ;;  %v4115_v38 = vsel %vm4047_vm7, %v4113_v12, %v4114_v27 }
 0x2c3   : > { %5538 = vst.msk [vmem:[#allocation3 + $0x4a] sm:$0xff] %vm279_vm1, %v5506_v56  ;;  %6808 = vrot.lane.b32.xlu0 %v5506_v56, %s12763_s9  ;;  %v4294_v15 = vrot.slane %v3607_v13, 4  ;;  %v4426_v11 = vmax.f32 %v15579_v8, %v15628_v16  ;;  %v3755_v53 = vrot.slane %v3608_v57, 1  ;;  %v15887_v32 = vmax.f32 %v5199_v22, %v5257_v40  ;;  %v3610_v22 = vld [vmem:[#allocation3 + $0x158] sm:$0xff] }
 0x2c4   : > { %v4033_v0 = vmax.f32 %v3853_v44, %v3934_v25  ;;  %v3935_v50 = vrot.slane %v3608_v57, 2  ;;  %v4116_v17 = vrot.slane %v3608_v57, 3  ;;  %v4296_v31 = vrot.slane %v3608_v57, 4 }
 0x2c5   : > { %v4295_v30 = vsel %vm636_vm0, %v4293_v5, %v4294_v15  ;;  %v4458_v62 = vmax.f32 %v4426_v11, %v15764_v7  ;;  %v3756_v20 = vsel %vm491_vm4, %v3753_v29, %v3755_v53  ;;  %v5507_v47 = vmax.f32 %v5475_v4, %v15887_v32 }
 0x2c6   : > { %v4214_v48 = vmax.f32 %v4033_v0, %v4115_v38  ;;  %v3854_v33 = vmax.f32 %v3607_v13, %v3756_v20  ;;  %v3936_v8 = vsel %vm1159_vm5, %v3933_v3, %v3935_v50  ;;  %v4117_v59 = vsel %vm4047_vm7, %v4114_v27, %v4116_v17 }
 0x2c7   : > { %v4490_v49 = vmax.f32 %v4458_v62, %v15849_v63  ;;  %v4297_v28 = vsel %vm636_vm0, %v4294_v15, %v4296_v31  ;;  %v4427_v37 = vmax.f32 %v15569_v18, %v15598_v41  ;;  %5539 = vst.msk [vmem:[#allocation3 + $0x52] sm:$0xff] %vm279_vm1, %v5507_v47  ;;  %6810 = vrot.lane.b32.xlu1 %v5507_v47, %s12763_s9  ;;  %v4718_v21 = vrot.slane %v4586_v23, 1  ;;  %v3609_v15 = vld [vmem:[#allocation3 + $0x150] sm:$0xff] }
 0x2c8   : > { %v15901_v61 = vmax.f32 %v4214_v48, %v4295_v30  ;;  %v4034_v9 = vmax.f32 %v3854_v33, %v3936_v8  ;;  %v4719_v13 = vrot.slane %v4587_v52, 1  ;;  %v4898_v43 = vrot.slane %v4586_v23, 2 }
 0x2c9   : > { %v4459_v14 = vmax.f32 %v4427_v37, %v15657_v10  ;;  %v4899_v19 = vrot.slane %v4587_v52, 2  ;;  %v5078_v34 = vrot.slane %v4586_v23, 3  ;;  %v5079_v18 = vrot.slane %v4587_v52, 3 }
 0x2ca   : > { %v4522_v36 = vmax.f32 %v4490_v49, %v15901_v61  ;;  %v4215_v6 = vmax.f32 %v4034_v9, %v4117_v59  ;;  %v4720_v40 = vsel %vm491_vm4, %v4718_v21, %v4719_v13  ;;  %v5258_v46 = vrot.slane %v4586_v23, 4  ;;  %v3611_v59 = vld [vmem:[#allocation3 + $0x160] sm:$0xf] }
 0x2cb   : > { %v4491_v26 = vmax.f32 %v4459_v14, %v15858_v24  ;;  %v4840_v29 = vmax.f32 %v4586_v23, %v4720_v40  ;;  %v4900_v54 = vsel %vm1159_vm5, %v4898_v43, %v4899_v19  ;;  %v5080_v3 = vsel %vm4047_vm7, %v5078_v34, %v5079_v18 }
 0x2cc   : > { %6679 = vrot.lane.b32.xlu0 %v4522_v36, %s12762_s8  ;;  %4554 = vst.msk [vmem:[#allocation3 + $0x10a] sm:$0xff] %vm279_vm1, %v4522_v36  ;;  %v15910_v55 = vmax.f32 %v4215_v6, %v4297_v28  ;;  %v5259_v12 = vrot.slane %v4587_v52, 4  ;;  %v5412_v57 = vmax.f32 %v15710_v2, %v15712_v35  ;;  %v4721_v51 = vrot.slane %v4588_v42, 1 }
 0x2cd   : > { %v5020_v56 = vmax.f32 %v4840_v29, %v4900_v54  ;;  %v4901_v27 = vrot.slane %v4588_v42, 2  ;;  %v5081_v5 = vrot.slane %v4588_v42, 3  ;;  %v5261_v38 = vrot.slane %v4588_v42, 4 }
 0x2ce   : > { %v4523_v4 = vmax.f32 %v4491_v26, %v15910_v55  ;;  %v5260_v44 = vsel %vm636_vm0, %v5258_v46, %v5259_v12  ;;  %v5444_v25 = vmax.f32 %v5412_v57, %v15718_v39  ;;  %v4722_v53 = vsel %vm491_vm4, %v4719_v13, %v4721_v51 }
 0x2cf   : > { %v5200_v11 = vmax.f32 %v5020_v56, %v5080_v3  ;;  %v4902_v0 = vsel %vm1159_vm5, %v4899_v19, %v4901_v27  ;;  %v5082_v2 = vsel %vm4047_vm7, %v5079_v18, %v5081_v5  ;;  %v4841_v17 = vmax.f32 %v4587_v52, %v4722_v53  ;;  %v4589_v3 = vld [vmem:[#allocation3 + $0xa8] sm:$0xff] }
 0x2d0   : > { %6681 = vrot.lane.b32.xlu1 %v4523_v4, %s12762_s8  ;;  %4555 = vst.msk [vmem:[#allocation3 + $0x112] sm:$0xff] %vm279_vm1, %v4523_v4  ;;  %v5476_v50 = vmax.f32 %v5444_v25, %v15875_v60  ;;  %v5262_v30 = vsel %vm636_vm0, %v5259_v12, %v5261_v38  ;;  %v5413_v62 = vmax.f32 %v15817_v58, %v15825_v45  ;;  %v3757_v31 = vrot.slane %v3609_v15, 1  ;;  %v4590_v12 = vld [vmem:[#allocation3 + $0xb0] sm:$0xff] }
 0x2d1   : > { %v15927_v20 = vmax.f32 %v5200_v11, %v5260_v44  ;;  %v3758_v23 = vrot.slane %v3610_v22, 1  ;;  %v3937_v47 = vrot.slane %v3609_v15, 2  ;;  %v5021_v48 = vmax.f32 %v4841_v17, %v4902_v0 }
 0x2d2   : > { %v5445_v33 = vmax.f32 %v5413_v62, %v15828_v1  ;;  %v3938_v8 = vrot.slane %v3610_v22, 2  ;;  %v4118_v49 = vrot.slane %v3609_v15, 3  ;;  %v4119_v37 = vrot.slane %v3610_v22, 3  ;;  %v4591_v62 = vld [vmem:[#allocation3 + $0xb8] sm:$0xf] }
 0x2d3   : > { %v5508_v28 = vmax.f32 %v5476_v50, %v15927_v20  ;;  %v3759_v52 = vsel %vm491_vm4, %v3757_v31, %v3758_v23  ;;  %v4298_v9 = vrot.slane %v3609_v15, 4  ;;  %v5201_v21 = vmax.f32 %v5021_v48, %v5082_v2 }
 0x2d4   : > { %v5477_v58 = vmax.f32 %v5445_v33, %v15887_v32  ;;  %v3855_v13 = vmax.f32 %v3609_v15, %v3759_v52  ;;  %v3939_v14 = vsel %vm1159_vm5, %v3937_v47, %v3938_v8  ;;  %v4120_v43 = vsel %vm4047_vm7, %v4118_v49, %v4119_v37 }
 0x2d5   : > { %5540 = vst.msk [vmem:[#allocation3 + $0x62] sm:$0xff] %vm279_vm1, %v5508_v28  ;;  %6812 = vrot.lane.b32.xlu0 %v5508_v28, %s12763_s9  ;;  %v4299_v19 = vrot.slane %v3610_v22, 4  ;;  %v4428_v34 = vmax.f32 %v15628_v16, %v15764_v7  ;;  %v3760_v36 = vrot.slane %v3611_v59, 1  ;;  %v15939_v6 = vmax.f32 %v5201_v21, %v5262_v30  ;;  %v3613_v21 = vld [vmem:[#allocation3 + $0x170] sm:$0xff] }
 0x2d6   : > { %v4035_v40 = vmax.f32 %v3855_v13, %v3939_v14  ;;  %v3940_v18 = vrot.slane %v3611_v59, 2  ;;  %v4121_v42 = vrot.slane %v3611_v59, 3  ;;  %v4301_v46 = vrot.slane %v3611_v59, 4 }
 0x2d7   : > { %v4300_v26 = vsel %vm636_vm0, %v4298_v9, %v4299_v19  ;;  %v4460_v29 = vmax.f32 %v4428_v34, %v15849_v63  ;;  %v3761_v54 = vsel %vm491_vm4, %v3758_v23, %v3760_v36  ;;  %v5509_v57 = vmax.f32 %v5477_v58, %v15939_v6 }
 0x2d8   : > { %v4216_v56 = vmax.f32 %v4035_v40, %v4120_v43  ;;  %v3856_v51 = vmax.f32 %v3610_v22, %v3761_v54  ;;  %v3941_v16 = vsel %vm1159_vm5, %v3938_v8, %v3940_v18  ;;  %v4122_v5 = vsel %vm4047_vm7, %v4119_v37, %v4121_v42 }
 0x2d9   : > { %v4492_v27 = vmax.f32 %v4460_v29, %v15901_v61  ;;  %v4302_v4 = vsel %vm636_vm0, %v4299_v19, %v4301_v46  ;;  %v4429_v44 = vmax.f32 %v15598_v41, %v15657_v10  ;;  %5541 = vst.msk [vmem:[#allocation3 + $0x6a] sm:$0xff] %vm279_vm1, %v5509_v57  ;;  %6814 = vrot.lane.b32.xlu1 %v5509_v57, %s12763_s9  ;;  %v4723_v15 = vrot.slane %v4589_v3, 1  ;;  %v3612_v19 = vld [vmem:[#allocation3 + $0x168] sm:$0xff] }
 0x2da   : > { %v15953_v25 = vmax.f32 %v4216_v56, %v4300_v26  ;;  %v4036_v38 = vmax.f32 %v3856_v51, %v3941_v16  ;;  %v4724_v22 = vrot.slane %v4590_v12, 1  ;;  %v4903_v53 = vrot.slane %v4589_v3, 2 }
 0x2db   : > { %v4461_v11 = vmax.f32 %v4429_v44, %v15858_v24  ;;  %v4904_v0 = vrot.slane %v4590_v12, 2  ;;  %v5083_v2 = vrot.slane %v4589_v3, 3  ;;  %v5084_v41 = vrot.slane %v4590_v12, 3 }
 0x2dc   : > { %v4524_v50 = vmax.f32 %v4492_v27, %v15953_v25  ;;  %v4217_v17 = vmax.f32 %v4036_v38, %v4122_v5  ;;  %v4725_v30 = vsel %vm491_vm4, %v4723_v15, %v4724_v22  ;;  %v5263_v48 = vrot.slane %v4589_v3, 4  ;;  %v3614_v5 = vld [vmem:[#allocation3 + $0x178] sm:$0xf] }
 0x2dd   : > { %v4493_v31 = vmax.f32 %v4461_v11, %v15910_v55  ;;  %v4842_v23 = vmax.f32 %v4589_v3, %v4725_v30  ;;  %v4905_v47 = vsel %vm1159_vm5, %v4903_v53, %v4904_v0  ;;  %v5085_v8 = vsel %vm4047_vm7, %v5083_v2, %v5084_v41 }
 0x2de   : > { %6683 = vrot.lane.b32.xlu0 %v4524_v50, %s12762_s8  ;;  %4556 = vst.msk [vmem:[#allocation3 + $0x122] sm:$0xff] %vm279_vm1, %v4524_v50  ;;  %v15962_v33 = vmax.f32 %v4217_v17, %v4302_v4  ;;  %v5264_v49 = vrot.slane %v4590_v12, 4  ;;  %v5414_v59 = vmax.f32 %v15712_v35, %v15718_v39  ;;  %v4726_v52 = vrot.slane %v4591_v62, 1 }
 0x2df   : > { %v5022_v28 = vmax.f32 %v4842_v23, %v4905_v47  ;;  %v4906_v37 = vrot.slane %v4591_v62, 2  ;;  %v5086_v9 = vrot.slane %v4591_v62, 3  ;;  %v5266_v43 = vrot.slane %v4591_v62, 4 }
 0x2e0   : > { %v4525_v58 = vmax.f32 %v4493_v31, %v15962_v33  ;;  %v5265_v13 = vsel %vm636_vm0, %v5263_v48, %v5264_v49  ;;  %v5446_v14 = vmax.f32 %v5414_v59, %v15875_v60  ;;  %v4727_v36 = vsel %vm491_vm4, %v4724_v22, %v4726_v52 }
 0x2e1   : > { %v5202_v34 = vmax.f32 %v5022_v28, %v5085_v8  ;;  %v4907_v40 = vsel %vm1159_vm5, %v4904_v0, %v4906_v37  ;;  %v5087_v35 = vsel %vm4047_vm7, %v5084_v41, %v5086_v9  ;;  %v4843_v42 = vmax.f32 %v4590_v12, %v4727_v36  ;;  %v4592_v8 = vld [vmem:[#allocation3 + $0xc0] sm:$0xff] }
 0x2e2   : > { %6685 = vrot.lane.b32.xlu1 %v4525_v58, %s12762_s8  ;;  %4557 = vst.msk [vmem:[#allocation3 + $0x12a] sm:$0xff] %vm279_vm1, %v4525_v58  ;;  %v5478_v18 = vmax.f32 %v5446_v14, %v15927_v20  ;;  %v5267_v26 = vsel %vm636_vm0, %v5264_v49, %v5266_v43  ;;  %v5415_v29 = vmax.f32 %v15825_v45, %v15828_v1  ;;  %v3762_v46 = vrot.slane %v3612_v19, 1  ;;  %v4593_v49 = vld [vmem:[#allocation3 + $0xc8] sm:$0xff] }
 0x2e3   : > { %v15979_v54 = vmax.f32 %v5202_v34, %v5265_v13  ;;  %v3763_v3 = vrot.slane %v3613_v21, 1  ;;  %v3942_v57 = vrot.slane %v3612_v19, 2  ;;  %v5023_v56 = vmax.f32 %v4843_v42, %v4907_v40 }
 0x2e4   : > { %v5447_v51 = vmax.f32 %v5415_v29, %v15887_v32  ;;  %v3943_v16 = vrot.slane %v3613_v21, 2  ;;  %v4123_v27 = vrot.slane %v3612_v19, 3  ;;  %v4124_v44 = vrot.slane %v3613_v21, 3  ;;  %v4594_v29 = vld [vmem:[#allocation3 + $0xd0] sm:$0xf] }
 0x2e5   : > { %v5510_v4 = vmax.f32 %v5478_v18, %v15979_v54  ;;  %v3764_v12 = vsel %vm491_vm4, %v3762_v46, %v3763_v3  ;;  %v4303_v38 = vrot.slane %v3612_v19, 4  ;;  %v5203_v15 = vmax.f32 %v5023_v56, %v5087_v35 }
 0x2e6   : > { %v5479_v45 = vmax.f32 %v5447_v51, %v15939_v6  ;;  %v3857_v22 = vmax.f32 %v3612_v19, %v3764_v12  ;;  %v3944_v11 = vsel %vm1159_vm5, %v3942_v57, %v3943_v16  ;;  %v4125_v53 = vsel %vm4047_vm7, %v4123_v27, %v4124_v44 }
 0x2e7   : > { %5542 = vst.msk [vmem:[#allocation3 + $0x7a] sm:$0xff] %vm279_vm1, %v5510_v4  ;;  %6816 = vrot.lane.b32.xlu0 %v5510_v4, %s12763_s9  ;;  %v4304_v0 = vrot.slane %v3613_v21, 4  ;;  %v4430_v2 = vmax.f32 %v15764_v7, %v15849_v63  ;;  %v3765_v50 = vrot.slane %v3614_v5, 1  ;;  %v15991_v17 = vmax.f32 %v5203_v15, %v5267_v26 }
 0x2e8   : > { %v4037_v30 = vmax.f32 %v3857_v22, %v3944_v11  ;;  %v3945_v41 = vrot.slane %v3614_v5, 2  ;;  %v4126_v62 = vrot.slane %v3614_v5, 3  ;;  %v4306_v48 = vrot.slane %v3614_v5, 4 }
 0x2e9   : > { %v4305_v31 = vsel %vm636_vm0, %v4303_v38, %v4304_v0  ;;  %v4462_v23 = vmax.f32 %v4430_v2, %v15901_v61  ;;  %v3766_v47 = vsel %vm491_vm4, %v3763_v3, %v3765_v50  ;;  %v5511_v59 = vmax.f32 %v5479_v45, %v15991_v17 }
 0x2ea   : > { %v4218_v28 = vmax.f32 %v4037_v30, %v4125_v53  ;;  %v3858_v52 = vmax.f32 %v3613_v21, %v3766_v47  ;;  %v3946_v7 = vsel %vm1159_vm5, %v3943_v16, %v3945_v41  ;;  %v4127_v9 = vsel %vm4047_vm7, %v4124_v44, %v4126_v62  ;;  %v3615_v53 = vld [vmem:[#allocation3 + $0x180] sm:$0xff] }
 0x2eb   : > { %v4494_v37 = vmax.f32 %v4462_v23, %v15953_v25  ;;  %v4307_v58 = vsel %vm636_vm0, %v4304_v0, %v4306_v48  ;;  %v4431_v13 = vmax.f32 %v15657_v10, %v15858_v24  ;;  %5543 = vst.msk [vmem:[#allocation3 + $0x82] sm:$0xff] %vm279_vm1, %v5511_v59  ;;  %6818 = vrot.lane.b32.xlu1 %v5511_v59, %s12763_s9  ;;  %v4728_v19 = vrot.slane %v4592_v8, 1  ;;  %v3616_v0 = vld [vmem:[#allocation3 + $0x188] sm:$0xff] }
 0x2ec   : > { %v16005_v14 = vmax.f32 %v4218_v28, %v4305_v31  ;;  %v4038_v43 = vmax.f32 %v3858_v52, %v3946_v7  ;;  %v4729_v21 = vrot.slane %v4593_v49, 1  ;;  %v4908_v36 = vrot.slane %v4592_v8, 2 }
 0x2ed   : > { %v4463_v34 = vmax.f32 %v4431_v13, %v15910_v55  ;;  %v4909_v40 = vrot.slane %v4593_v49, 2  ;;  %v5088_v35 = vrot.slane %v4592_v8, 3  ;;  %v5089_v10 = vrot.slane %v4593_v49, 3 }
 0x2ee   : > { %v4526_v18 = vmax.f32 %v4494_v37, %v16005_v14  ;;  %v4219_v42 = vmax.f32 %v4038_v43, %v4127_v9  ;;  %v4730_v26 = vsel %vm491_vm4, %v4728_v19, %v4729_v21  ;;  %v5268_v56 = vrot.slane %v4592_v8, 4  ;;  %v3617_v9 = vld [vmem:[#allocation3 + $0x190] sm:$0xf] }
 0x2ef   : > { %v4495_v46 = vmax.f32 %v4463_v34, %v15962_v33  ;;  %v4844_v3 = vmax.f32 %v4592_v8, %v4730_v26  ;;  %v4910_v57 = vsel %vm1159_vm5, %v4908_v36, %v4909_v40  ;;  %v5090_v16 = vsel %vm4047_vm7, %v5088_v35, %v5089_v10 }
 0x2f0   : > { %6687 = vrot.lane.b32.xlu0 %v4526_v18, %s12762_s8  ;;  %4558 = vst.msk [vmem:[#allocation3 + $0x13a] sm:$0xff] %vm279_vm1, %v4526_v18  ;;  %v16014_v51 = vmax.f32 %v4219_v42, %v4307_v58  ;;  %v5269_v27 = vrot.slane %v4593_v49, 4  ;;  %v5416_v5 = vmax.f32 %v15718_v39, %v15875_v60  ;;  %v4731_v12 = vrot.slane %v4594_v29, 1 }
 0x2f1   : > { %v5024_v4 = vmax.f32 %v4844_v3, %v4910_v57  ;;  %v4911_v44 = vrot.slane %v4594_v29, 2  ;;  %v5091_v38 = vrot.slane %v4594_v29, 3  ;;  %v5271_v11 = vrot.slane %v4594_v29, 4 }
 0x2f2   : > { %v4527_v15 = vmax.f32 %v4495_v46, %v16014_v51  ;;  %v5270_v45 = vsel %vm636_vm0, %v5268_v56, %v5269_v27  ;;  %v5448_v22 = vmax.f32 %v5416_v5, %v15927_v20  ;;  %v4732_v50 = vsel %vm491_vm4, %v4729_v21, %v4731_v12 }
 0x2f3   : > { %v5204_v2 = vmax.f32 %v5024_v4, %v5090_v16  ;;  %v4912_v30 = vsel %vm1159_vm5, %v4909_v40, %v4911_v44  ;;  %v5092_v39 = vsel %vm4047_vm7, %v5089_v10, %v5091_v38  ;;  %v4845_v62 = vmax.f32 %v4593_v49, %v4732_v50  ;;  %v4595_v16 = vld [vmem:[#allocation3 + $0xd8] sm:$0xff] }
 0x2f4   : > { %6689 = vrot.lane.b32.xlu1 %v4527_v15, %s12762_s8  ;;  %4559 = vst.msk [vmem:[#allocation3 + $0x142] sm:$0xff] %vm279_vm1, %v4527_v15  ;;  %v5480_v41 = vmax.f32 %v5448_v22, %v15979_v54  ;;  %v5272_v31 = vsel %vm636_vm0, %v5269_v27, %v5271_v11  ;;  %v5417_v23 = vmax.f32 %v15828_v1, %v15887_v32  ;;  %v3767_v48 = vrot.slane %v3615_v53, 1  ;;  %v4596_v27 = vld [vmem:[#allocation3 + $0xe0] sm:$0xff] }
 0x2f5   : > { %v16031_v47 = vmax.f32 %v5204_v2, %v5270_v45  ;;  %v3768_v8 = vrot.slane %v3616_v0, 1  ;;  %v3947_v59 = vrot.slane %v3615_v53, 2  ;;  %v5025_v28 = vmax.f32 %v4845_v62, %v4912_v30 }
 0x2f6   : > { %v5449_v52 = vmax.f32 %v5417_v23, %v15939_v6  ;;  %v3948_v7 = vrot.slane %v3616_v0, 2  ;;  %v4128_v37 = vrot.slane %v3615_v53, 3  ;;  %v4129_v13 = vrot.slane %v3616_v0, 3  ;;  %v4597_v23 = vld [vmem:[#allocation3 + $0xe8] sm:$0xf] }
 0x2f7   : > { %v5512_v58 = vmax.f32 %v5480_v41, %v16031_v47  ;;  %v3769_v49 = vsel %vm491_vm4, %v3767_v48, %v3768_v8  ;;  %v4308_v43 = vrot.slane %v3615_v53, 4  ;;  %v5205_v19 = vmax.f32 %v5025_v28, %v5092_v39 }
 0x2f8   : > { %v5481_v1 = vmax.f32 %v5449_v52, %v15991_v17  ;;  %v3859_v21 = vmax.f32 %v3615_v53, %v3769_v49  ;;  %v3949_v34 = vsel %vm1159_vm5, %v3947_v59, %v3948_v7  ;;  %v4130_v36 = vsel %vm4047_vm7, %v4128_v37, %v4129_v13 }
 0x2f9   : > { %5544 = vst.msk [vmem:[#allocation3 + $0x92] sm:$0xff] %vm279_vm1, %v5512_v58  ;;  %6820 = vrot.lane.b32.xlu0 %v5512_v58, %s12763_s9  ;;  %v4309_v40 = vrot.slane %v3616_v0, 4  ;;  %v4432_v35 = vmax.f32 %v15849_v63, %v15901_v61  ;;  %v3770_v18 = vrot.slane %v3617_v9, 1  ;;  %v16043_v42 = vmax.f32 %v5205_v19, %v5272_v31 }
 0x2fa   : > { %v4039_v26 = vmax.f32 %v3859_v21, %v3949_v34  ;;  %v3950_v10 = vrot.slane %v3617_v9, 2  ;;  %v4131_v29 = vrot.slane %v3617_v9, 3  ;;  %v4311_v56 = vrot.slane %v3617_v9, 4 }
 0x2fb   : > { %v4310_v46 = vsel %vm636_vm0, %v4308_v43, %v4309_v40  ;;  %v4464_v3 = vmax.f32 %v4432_v35, %v15953_v25  ;;  %v3771_v57 = vsel %vm491_vm4, %v3768_v8, %v3770_v18  ;;  %v5513_v5 = vmax.f32 %v5481_v1, %v16043_v42 }
 0x2fc   : > { %v4220_v4 = vmax.f32 %v4039_v26, %v4130_v36  ;;  %v3860_v12 = vmax.f32 %v3616_v0, %v3771_v57  ;;  %v3951_v63 = vsel %vm1159_vm5, %v3948_v7, %v3950_v10  ;;  %v4132_v38 = vsel %vm4047_vm7, %v4129_v13, %v4131_v29  ;;  %v3618_v36 = vld [vmem:[#allocation3 + $0x198] sm:$0xff] }
 0x2fd   : > { %v4496_v44 = vmax.f32 %v4464_v3, %v16005_v14  ;;  %v4312_v15 = vsel %vm636_vm0, %v4309_v40, %v4311_v56  ;;  %v4433_v45 = vmax.f32 %v15858_v24, %v15910_v55  ;;  %5545 = vst.msk [vmem:[#allocation3 + $0x9a] sm:$0xff] %vm279_vm1, %v5513_v5  ;;  %6822 = vrot.lane.b32.xlu1 %v5513_v5, %s12763_s9  ;;  %v4733_v53 = vrot.slane %v4595_v16, 1  ;;  %v3619_v40 = vld [vmem:[#allocation3 + $0x1a0] sm:$0xff] }
 0x2fe   : > { %v16057_v22 = vmax.f32 %v4220_v4, %v4310_v46  ;;  %v4040_v11 = vmax.f32 %v3860_v12, %v3951_v63  ;;  %v4734_v0 = vrot.slane %v4596_v27, 1  ;;  %v4913_v50 = vrot.slane %v4595_v16, 2 }
 0x2ff   : > { %v4465_v2 = vmax.f32 %v4433_v45, %v15962_v33  ;;  %v4914_v30 = vrot.slane %v4596_v27, 2  ;;  %v5093_v39 = vrot.slane %v4595_v16, 3  ;;  %v5094_v24 = vrot.slane %v4596_v27, 3 }
 0x300   : > { %v4528_v41 = vmax.f32 %v4496_v44, %v16057_v22  ;;  %v4221_v62 = vmax.f32 %v4040_v11, %v4132_v38  ;;  %v4735_v31 = vsel %vm491_vm4, %v4733_v53, %v4734_v0  ;;  %v5273_v28 = vrot.slane %v4595_v16, 4  ;;  %v3620_v38 = vld [vmem:[#allocation3 + $0x1a8] sm:$0xf] }
 0x301   : > { %v4497_v48 = vmax.f32 %v4465_v2, %v16014_v51  ;;  %v4846_v8 = vmax.f32 %v4595_v16, %v4735_v31  ;;  %v4915_v59 = vsel %vm1159_vm5, %v4913_v50, %v4914_v30  ;;  %v5095_v7 = vsel %vm4047_vm7, %v5093_v39, %v5094_v24 }
 0x302   : > { %6691 = vrot.lane.b32.xlu0 %v4528_v41, %s12762_s8  ;;  %4560 = vst.msk [vmem:[#allocation3 + $0x152] sm:$0xff] %vm279_vm1, %v4528_v41  ;;  %v16066_v52 = vmax.f32 %v4221_v62, %v4312_v15  ;;  %v5274_v37 = vrot.slane %v4596_v27, 4  ;;  %v5418_v9 = vmax.f32 %v15875_v60, %v15927_v20  ;;  %v4736_v49 = vrot.slane %v4597_v23, 1 }
 0x303   : > { %v5026_v58 = vmax.f32 %v4846_v8, %v4915_v59  ;;  %v4916_v13 = vrot.slane %v4597_v23, 2  ;;  %v5096_v43 = vrot.slane %v4597_v23, 3  ;;  %v5276_v34 = vrot.slane %v4597_v23, 4 }
 0x304   : > { %v4529_v19 = vmax.f32 %v4497_v48, %v16066_v52  ;;  %v5275_v1 = vsel %vm636_vm0, %v5273_v28, %v5274_v37  ;;  %v5450_v21 = vmax.f32 %v5418_v9, %v15979_v54  ;;  %v4737_v18 = vsel %vm491_vm4, %v4734_v0, %v4736_v49 }
 0x305   : > { %v5206_v35 = vmax.f32 %v5026_v58, %v5095_v7  ;;  %v4917_v26 = vsel %vm1159_vm5, %v4914_v30, %v4916_v13  ;;  %v5097_v60 = vsel %vm4047_vm7, %v5094_v24, %v5096_v43  ;;  %v4847_v29 = vmax.f32 %v4596_v27, %v4737_v18  ;;  %v4598_v7 = vld [vmem:[#allocation3 + $0xf0] sm:$0xff] }
 0x306   : > { %6693 = vrot.lane.b32.xlu1 %v4529_v19, %s12762_s8  ;;  %4561 = vst.msk [vmem:[#allocation3 + $0x15a] sm:$0xff] %vm279_vm1, %v4529_v19  ;;  %v5482_v10 = vmax.f32 %v5450_v21, %v16031_v47  ;;  %v5277_v46 = vsel %vm636_vm0, %v5274_v37, %v5276_v34  ;;  %v5419_v3 = vmax.f32 %v15887_v32, %v15939_v6  ;;  %v3772_v56 = vrot.slane %v3618_v36, 1  ;;  %v4599_v37 = vld [vmem:[#allocation3 + $0xf8] sm:$0xff] }
 0x307   : > { %v16083_v57 = vmax.f32 %v5206_v35, %v5275_v1  ;;  %v3773_v16 = vrot.slane %v3619_v40, 1  ;;  %v3952_v5 = vrot.slane %v3618_v36, 2  ;;  %v5027_v4 = vmax.f32 %v4847_v29, %v4917_v26 }
 0x308   : > { %v5451_v12 = vmax.f32 %v5419_v3, %v15991_v17  ;;  %v3953_v63 = vrot.slane %v3619_v40, 2  ;;  %v4133_v44 = vrot.slane %v3618_v36, 3  ;;  %v4134_v45 = vrot.slane %v3619_v40, 3  ;;  %v4600_v3 = vld [vmem:[#allocation3 + $0x100] sm:$0xf] }
 0x309   : > { %v5514_v15 = vmax.f32 %v5482_v10, %v16083_v57  ;;  %v3774_v27 = vsel %vm491_vm4, %v3772_v56, %v3773_v16  ;;  %v4313_v11 = vrot.slane %v3618_v36, 4  ;;  %v5207_v53 = vmax.f32 %v5027_v4, %v5097_v60 }
 0x30a   : > { %v5483_v32 = vmax.f32 %v5451_v12, %v16043_v42  ;;  %v3861_v0 = vmax.f32 %v3618_v36, %v3774_v27  ;;  %v3954_v2 = vsel %vm1159_vm5, %v3952_v5, %v3953_v63  ;;  %v4135_v50 = vsel %vm4047_vm7, %v4133_v44, %v4134_v45 }
 0x30b   : > { %5546 = vst.msk [vmem:[#allocation3 + $0xaa] sm:$0xff] %vm279_vm1, %v5514_v15  ;;  %6824 = vrot.lane.b32.xlu0 %v5514_v15, %s12763_s9  ;;  %v4314_v30 = vrot.slane %v3619_v40, 4  ;;  %v4434_v39 = vmax.f32 %v15901_v61, %v15953_v25  ;;  %v3775_v41 = vrot.slane %v3620_v38, 1  ;;  %v16095_v62 = vmax.f32 %v5207_v53, %v5277_v46 }
 0x30c   : > { %v4041_v31 = vmax.f32 %v3861_v0, %v3954_v2  ;;  %v3955_v24 = vrot.slane %v3620_v38, 2  ;;  %v4136_v23 = vrot.slane %v3620_v38, 3  ;;  %v4316_v28 = vrot.slane %v3620_v38, 4 }
 0x30d   : > { %v4315_v48 = vsel %vm636_vm0, %v4313_v11, %v4314_v30  ;;  %v4466_v8 = vmax.f32 %v4434_v39, %v16005_v14  ;;  %v3776_v59 = vsel %vm491_vm4, %v3773_v16, %v3775_v41  ;;  %v5515_v9 = vmax.f32 %v5483_v32, %v16095_v62  ;;  %v3624_v39 = vld [vmem:[#allocation3 + $0x1c8] sm:$0xff] }
 0x30e   : > { %v4222_v58 = vmax.f32 %v4041_v31, %v4135_v50  ;;  %v3862_v49 = vmax.f32 %v3619_v40, %v3776_v59  ;;  %v3956_v61 = vsel %vm1159_vm5, %v3953_v63, %v3955_v24  ;;  %v4137_v43 = vsel %vm4047_vm7, %v4134_v45, %v4136_v23  ;;  %v3621_v50 = vld [vmem:[#allocation3 + $0x1b0] sm:$0xff] }
 0x30f   : > { %v4498_v13 = vmax.f32 %v4466_v8, %v16057_v22  ;;  %v4317_v19 = vsel %vm636_vm0, %v4314_v30, %v4316_v28  ;;  %v4435_v1 = vmax.f32 %v15910_v55, %v15962_v33  ;;  %5547 = vst.msk [vmem:[#allocation3 + $0xb2] sm:$0xff] %vm279_vm1, %v5515_v9  ;;  %6826 = vrot.lane.b32.xlu1 %v5515_v9, %s12763_s9  ;;  %v4738_v36 = vrot.slane %v4598_v7, 1  ;;  %v16126_v30 = vld [vmem:[#allocation3 + $0x1b8] sm:$0xff]  ;;  %v16131_v23 = vld [vmem:[#allocation3 + $0x1d0] sm:$0xff] }
 0x310   : > { %v16109_v21 = vmax.f32 %v4222_v58, %v4315_v48  ;;  %v4042_v34 = vmax.f32 %v3862_v49, %v3956_v61  ;;  %v4739_v40 = vrot.slane %v4599_v37, 1  ;;  %v4918_v18 = vrot.slane %v4598_v7, 2 }
 0x311   : > { %v4467_v35 = vmax.f32 %v4435_v1, %v16014_v51  ;;  %v4919_v26 = vrot.slane %v4599_v37, 2  ;;  %v5098_v60 = vrot.slane %v4598_v7, 3  ;;  %v5099_v55 = vrot.slane %v4599_v37, 3 }
 0x312   : > { %v4530_v10 = vmax.f32 %v4498_v13, %v16109_v21  ;;  %v4223_v29 = vmax.f32 %v4042_v34, %v4137_v43  ;;  %v4740_v46 = vsel %vm491_vm4, %v4738_v36, %v4739_v40  ;;  %v5278_v4 = vrot.slane %v4598_v7, 4 }
 0x313   : > { %v4499_v56 = vmax.f32 %v4467_v35, %v16066_v52  ;;  %v4848_v16 = vmax.f32 %v4598_v7, %v4740_v46  ;;  %v4920_v5 = vsel %vm1159_vm5, %v4918_v18, %v4919_v26  ;;  %v5100_v63 = vsel %vm4047_vm7, %v5098_v60, %v5099_v55 }
 0x314   : > { %6695 = vrot.lane.b32.xlu0 %v4530_v10, %s12762_s8  ;;  %4562 = vst.msk [vmem:[#allocation3 + $0x16a] sm:$0xff] %vm279_vm1, %v4530_v10  ;;  %v16118_v12 = vmax.f32 %v4223_v29, %v4317_v19  ;;  %v5279_v44 = vrot.slane %v4599_v37, 4  ;;  %v5420_v38 = vmax.f32 %v15927_v20, %v15979_v54  ;;  %v4741_v27 = vrot.slane %v4600_v3, 1 }
 0x315   : > { %v5028_v15 = vmax.f32 %v4848_v16, %v4920_v5  ;;  %v4921_v45 = vrot.slane %v4600_v3, 2  ;;  %v5101_v11 = vrot.slane %v4600_v3, 3  ;;  %v5281_v2 = vrot.slane %v4600_v3, 4 }
 0x316   : > { %v4531_v53 = vmax.f32 %v4499_v56, %v16118_v12  ;;  %v5280_v32 = vsel %vm636_vm0, %v5278_v4, %v5279_v44  ;;  %v5452_v0 = vmax.f32 %v5420_v38, %v16031_v47  ;;  %v4742_v31 = vsel %vm491_vm4, %v4739_v40, %v4741_v27 }
 0x317   : > { %v5208_v41 = vmax.f32 %v5028_v15, %v5100_v63  ;;  %v4922_v20 = vsel %vm1159_vm5, %v4919_v26, %v4921_v45  ;;  %v5102_v24 = vsel %vm4047_vm7, %v5099_v55, %v5101_v11  ;;  %v4849_v8 = vmax.f32 %v4599_v37, %v4742_v31  ;;  %v3626_v11 = vld [vmem:[#allocation3 + $0x1d8] sm:$0xf] }
 0x318   : > { %6697 = vrot.lane.b32.xlu1 %v4531_v53, %s12762_s8  ;;  %4563 = vst.msk [vmem:[#allocation3 + $0x172] sm:$0xff] %vm279_vm1, %v4531_v53  ;;  %v5484_v48 = vmax.f32 %v5452_v0, %v16083_v57  ;;  %v5282_v59 = vsel %vm636_vm0, %v5279_v44, %v5281_v2  ;;  %v5421_v28 = vmax.f32 %v15939_v6, %v15991_v17  ;;  %v3777_v9 = vrot.slane %v3621_v50, 1  ;;  %v3623_v44 = vld [vmem:[#allocation3 + $0x1c0] sm:$0xf] }
 0x319   : > { %v16139_v7 = vmax.f32 %v5208_v41, %v5280_v32  ;;  %v3778_v58 = vrot.slane %v16126_v30, 1  ;;  %v3782_v49 = vrot.slane %v3624_v39, 1  ;;  %v5029_v61 = vmax.f32 %v4849_v8, %v4922_v20 }
 0x31a   : > { %v5453_v13 = vmax.f32 %v5421_v28, %v16043_v42  ;;  %v3783_v43 = vrot.slane %v16131_v23, 1  ;;  %v3957_v19 = vrot.slane %v3621_v50, 2  ;;  %v3958_v34 = vrot.slane %v16126_v30, 2 }
 0x31b   : > { %v5516_v1 = vmax.f32 %v5484_v48, %v16139_v7  ;;  %v3779_v37 = vsel %vm491_vm4, %v3777_v9, %v3778_v58  ;;  %v3962_v36 = vrot.slane %v3624_v39, 2  ;;  %v5209_v6 = vmax.f32 %v5029_v61, %v5102_v24 }
 0x31c   : > { %v5485_v40 = vmax.f32 %v5453_v13, %v16095_v62  ;;  %v3784_v35 = vsel %vm491_vm4, %v3782_v49, %v3783_v43  ;;  %v3863_v18 = vmax.f32 %v3621_v50, %v3779_v37  ;;  %v3959_v60 = vsel %vm1159_vm5, %v3957_v19, %v3958_v34 }
 0x31d   : > { %5548 = vst.msk [vmem:[#allocation3 + $0xc2] sm:$0xff] %vm279_vm1, %v5516_v1  ;;  %6828 = vrot.lane.b32.xlu0 %v5516_v1, %s12763_s9  ;;  %v3865_v26 = vmax.f32 %v3624_v39, %v3784_v35  ;;  %v3963_v10 = vrot.slane %v16131_v23, 2  ;;  %v4138_v29 = vrot.slane %v3621_v50, 3  ;;  %v16153_v46 = vmax.f32 %v5209_v6, %v5282_v59 }
 0x31e   : > { %v4043_v55 = vmax.f32 %v3863_v18, %v3959_v60  ;;  %v4139_v3 = vrot.slane %v16126_v30, 3  ;;  %v4143_v56 = vrot.slane %v3624_v39, 3  ;;  %v4144_v5 = vrot.slane %v16131_v23, 3  ;;  %v4601_v18 = vld [vmem:[#allocation3 + $0x108] sm:$0xff] }
 0x31f   : > { %v3964_v16 = vsel %vm1159_vm5, %v3962_v36, %v3963_v10  ;;  %v4318_v4 = vrot.slane %v3621_v50, 4  ;;  %v4319_v63 = vrot.slane %v16126_v30, 4  ;;  %v5517_v38 = vmax.f32 %v5485_v40, %v16153_v46 }
 0x320   : > { %v4045_v15 = vmax.f32 %v3865_v26, %v3964_v16  ;;  %v4140_v27 = vsel %vm4047_vm7, %v4138_v29, %v4139_v3  ;;  %v4323_v45 = vrot.slane %v3624_v39, 4  ;;  %v4145_v53 = vsel %vm4047_vm7, %v4143_v56, %v4144_v5 }
 0x321   : > { %v4224_v32 = vmax.f32 %v4043_v55, %v4140_v27  ;;  %v4320_v0 = vsel %vm636_vm0, %v4318_v4, %v4319_v63  ;;  %v4324_v2 = vrot.slane %v16131_v23, 4  ;;  %5549 = vst.msk [vmem:[#allocation3 + $0xca] sm:$0xff] %vm279_vm1, %v5517_v38  ;;  %6830 = vrot.lane.b32.xlu1 %v5517_v38, %s12763_s9  ;;  %v4436_v41 = vmax.f32 %v15953_v25, %v16005_v14 }
 0x322   : > { %v4226_v50 = vmax.f32 %v4045_v15, %v4145_v53  ;;  %v4438_v31 = vmax.f32 %v16005_v14, %v16057_v22  ;;  %v3780_v39 = vrot.slane %v3623_v44, 1  ;;  %v3785_v48 = vrot.slane %v3626_v11, 1 }
 0x323   : > { %v4325_v20 = vsel %vm636_vm0, %v4323_v45, %v4324_v2  ;;  %v4404_v24 = vmax.f32 %v4224_v32, %v4320_v0  ;;  %v3960_v8 = vrot.slane %v3623_v44, 2  ;;  %v4468_v28 = vmax.f32 %v4436_v41, %v16057_v22  ;;  %v4603_v45 = vld [vmem:[#allocation3 + $0x118] sm:$0xf] }
 0x324   : > { %v4406_v59 = vmax.f32 %v4226_v50, %v4325_v20  ;;  %v4470_v9 = vmax.f32 %v4438_v31, %v16109_v21  ;;  %v3781_v49 = vsel %vm491_vm4, %v3778_v58, %v3780_v39  ;;  %v3786_v61 = vsel %vm491_vm4, %v3783_v43, %v3785_v48 }
 0x325   : > { %v3864_v25 = vmax.f32 %v16126_v30, %v3781_v49  ;;  %v3961_v13 = vsel %vm1159_vm5, %v3958_v34, %v3960_v8  ;;  %v3965_v14 = vrot.slane %v3626_v11, 2  ;;  %v4500_v19 = vmax.f32 %v4468_v28, %v16109_v21  ;;  %v4602_v34 = vld [vmem:[#allocation3 + $0x110] sm:$0xff] }
 0x326   : > { %v4502_v1 = vmax.f32 %v4470_v9, %v4404_v24  ;;  %v3866_v37 = vmax.f32 %v16131_v23, %v3786_v61  ;;  %v4141_v36 = vrot.slane %v3623_v44, 3  ;;  %v4146_v40 = vrot.slane %v3626_v11, 3  ;;  %v16209_v61 = vld [vmem:[#allocation3 + $0x8] sm:$0xff] }
 0x327   : > { %v3966_v6 = vsel %vm1159_vm5, %v3963_v10, %v3965_v14  ;;  %v4044_v22 = vmax.f32 %v3864_v25, %v3961_v13  ;;  %v4321_v35 = vrot.slane %v3623_v44, 4  ;;  %v4532_v58 = vmax.f32 %v4500_v19, %v4404_v24  ;;  %v16216_v19 = vld [vmem:[#allocation3 + $0x18] sm:$0xff] }
 0x328   : > { %v16180_v26 = vmax.f32 %v4502_v1, %v4406_v59  ;;  %v4046_v43 = vmax.f32 %v3866_v37, %v3966_v6  ;;  %v4142_v30 = vsel %vm4047_vm7, %v4139_v3, %v4141_v36  ;;  %v4147_v60 = vsel %vm4047_vm7, %v4144_v5, %v4146_v40  ;;  %v16204_v59 = vld [vmem:[#allocation3] sm:$0xff]  ;;  %v16220_v37 = vld [vmem:[#allocation3 + $0x30] sm:$0xff]  ;;  %v16226_v40 = vld [vmem:[#allocation3 + $0x38] sm:$0xff] }
 0x329   : > { %v4225_v21 = vmax.f32 %v4044_v22, %v4142_v30  ;;  %v4322_v29 = vsel %vm636_vm0, %v4319_v63, %v4321_v35  ;;  %v4326_v23 = vrot.slane %v3626_v11, 4  ;;  %6699 = vrot.lane.b32.xlu0 %v4532_v58, %s12762_s8  ;;  %4564 = vst.msk [vmem:[#allocation3 + $0x182] sm:$0xff] %vm279_vm1, %v4532_v58  ;;  %v4437_v55 = vmax.f32 %v15962_v33, %v16014_v51  ;;  %v16218_v1 = vld [vmem:[#allocation3 + $0x20] sm:$0xff]  ;;  %v16232_v30 = vld [vmem:[#allocation3 + $0x48] sm:$0xff] }
 0x32a   : > { %4566 = vst.msk [vmem:[#allocation3 + $0x19a] sm:$0xff] %vm279_vm1, %v16180_v26  ;;  %v4227_v10 = vmax.f32 %v4046_v43, %v4147_v60  ;;  %v4439_v3 = vmax.f32 %v16014_v51, %v16066_v52  ;;  %v4743_v56 = vrot.slane %v4601_v18, 1  ;;  %v4744_v4 = vrot.slane %v4602_v34, 1 }
 0x32b   : > { %v4327_v16 = vsel %vm636_vm0, %v4324_v2, %v4326_v23  ;;  %v4405_v5 = vmax.f32 %v4225_v21, %v4322_v29  ;;  %v4923_v63 = vrot.slane %v4601_v18, 2  ;;  %v4469_v38 = vmax.f32 %v4437_v55, %v16066_v52  ;;  %v16238_v29 = vld [vmem:[#allocation3 + $0x60] sm:$0xff] }
 0x32c   : > { %v4407_v44 = vmax.f32 %v4227_v10, %v4327_v16  ;;  %v4471_v15 = vmax.f32 %v4439_v3, %v16118_v12  ;;  %v4924_v27 = vrot.slane %v4602_v34, 2  ;;  %v4745_v11 = vsel %vm491_vm4, %v4743_v56, %v4744_v4 }
 0x32d   : > { %v5103_v53 = vrot.slane %v4601_v18, 3  ;;  %v5104_v33 = vrot.slane %v4602_v34, 3  ;;  %v5283_v32 = vrot.slane %v4601_v18, 4  ;;  %v4501_v51 = vmax.f32 %v4469_v38, %v16118_v12 }
 0x32e   : > { %v4503_v0 = vmax.f32 %v4471_v15, %v4405_v5  ;;  %v4850_v50 = vmax.f32 %v4601_v18, %v4745_v11  ;;  %v4925_v2 = vsel %vm1159_vm5, %v4923_v63, %v4924_v27  ;;  %v5284_v31 = vrot.slane %v4602_v34, 4 }
 0x32f   : > { %v5105_v41 = vsel %vm4047_vm7, %v5103_v53, %v5104_v33  ;;  %v5422_v52 = vmax.f32 %v15979_v54, %v16031_v47  ;;  %v4746_v39 = vrot.slane %v4603_v45, 1  ;;  %v4533_v20 = vmax.f32 %v4501_v51, %v4405_v5 }
 0x330   : > { %v16202_v24 = vmax.f32 %v4503_v0, %v4407_v44  ;;  %v5030_v48 = vmax.f32 %v4850_v50, %v4925_v2  ;;  %v4926_v8 = vrot.slane %v4603_v45, 2  ;;  %v5285_v12 = vsel %vm636_vm0, %v5283_v32, %v5284_v31 }
 0x331   : > { %v5454_v28 = vmax.f32 %v5422_v52, %v16083_v57  ;;  %v4747_v9 = vsel %vm491_vm4, %v4744_v4, %v4746_v39  ;;  %v5106_v49 = vrot.slane %v4603_v45, 3  ;;  %6701 = vrot.lane.b32.xlu1 %v4533_v20, %s12762_s8  ;;  %4565 = vst.msk [vmem:[#allocation3 + $0x18a] sm:$0xff] %vm279_vm1, %v4533_v20  ;;  %v5286_v14 = vrot.slane %v4603_v45, 4 }
 0x332   : > { %20010 = vst [vmem:[#allocation27_spill] sm:$0xff] %v16202_v24  ;;  %4567 = vst.msk [vmem:[#allocation3 + $0x1a2] sm:$0xff] %vm279_vm1, %v16202_v24  ;;  %v5210_v54 = vmax.f32 %v5030_v48, %v5105_v41  ;;  %v4851_v25 = vmax.f32 %v4602_v34, %v4747_v9  ;;  %v4927_v13 = vsel %vm1159_vm5, %v4924_v27, %v4926_v8  ;;  %v5688_v35 = vrot.slane %v16204_v59, 1  ;;  %v16234_v34 = vld [vmem:[#allocation3 + $0x50] sm:$0xff]  ;;  %v16281_v48 = vpop.permute.xlu0 %6643 }
 0x333   : > { %v5486_v36 = vmax.f32 %v5454_v28, %v16139_v7  ;;  %v5107_v6 = vsel %vm4047_vm7, %v5104_v33, %v5106_v49  ;;  %v5423_v22 = vmax.f32 %v15991_v17, %v16043_v42  ;;  %v5287_v43 = vsel %vm636_vm0, %v5284_v31, %v5286_v14  ;;  %v16240_v17 = vld [vmem:[#allocation3 + $0x68] sm:$0xff]  ;;  %v16297_v14 = vpop.permute.xlu1 %6649  ;;  %6740 = vst.msk [vmem:[#allocation4 + $0x19] sm:$0xff] %vm6739_vm8, %v16281_v48 }
 0x334   : > { %v16229_v18 = vmax.f32 %v5210_v54, %v5285_v12  ;;  %v5031_v58 = vmax.f32 %v4851_v25, %v4927_v13  ;;  %v5689_v60 = vrot.slane %v16209_v61, 1  ;;  %v5693_v23 = vrot.slane %v16216_v19, 1  ;;  %6743 = vst.msk [vmem:[#allocation4 + $0x39] sm:$0xff] %vm6739_vm8, %v16297_v14 }
 0x335   : > { %v5455_v21 = vmax.f32 %v5423_v22, %v16095_v62  ;;  %v5694_v10 = vrot.slane %v16218_v1, 1  ;;  %v5698_v55 = vrot.slane %v16220_v37, 1  ;;  %v5699_v5 = vrot.slane %v16226_v40, 1 }
 0x336   : > { %v5518_v3 = vmax.f32 %v5486_v36, %v16229_v18  ;;  %v5211_v56 = vmax.f32 %v5031_v58, %v5107_v6  ;;  %v5690_v16 = vsel %vm491_vm4, %v5688_v35, %v5689_v60  ;;  %v5703_v44 = vrot.slane %v16232_v30, 1 }
 0x337   : > { %v5487_v4 = vmax.f32 %v5455_v21, %v16153_v46  ;;  %v5695_v63 = vsel %vm491_vm4, %v5693_v23, %v5694_v10  ;;  %v5704_v38 = vrot.slane %v16234_v34, 1  ;;  %v5700_v27 = vsel %vm491_vm4, %v5698_v55, %v5699_v5 }
 0x338   : > { %5550 = vst.msk [vmem:[#allocation3 + $0xda] sm:$0xff] %vm279_vm1, %v5518_v3  ;;  %6832 = vrot.lane.b32.xlu0 %v5518_v3, %s12763_s9  ;;  %v16258_v15 = vmax.f32 %v5211_v56, %v5287_v43  ;;  %v5708_v45 = vrot.slane %v16238_v29, 1  ;;  %v5709_v11 = vrot.slane %v16240_v17, 1  ;;  %v5828_v33 = vmax.f32 %v16204_v59, %v5690_v16 }
 0x339   : > { %v5705_v53 = vsel %vm491_vm4, %v5703_v44, %v5704_v38  ;;  %v5830_v32 = vmax.f32 %v16216_v19, %v5695_v63  ;;  %v5832_v51 = vmax.f32 %v16220_v37, %v5700_v27  ;;  %v5868_v41 = vrot.slane %v16204_v59, 2 }
 0x33a   : > { %v5519_v0 = vmax.f32 %v5487_v4, %v16258_v15  ;;  %v5710_v50 = vsel %vm491_vm4, %v5708_v45, %v5709_v11  ;;  %v5834_v2 = vmax.f32 %v16232_v30, %v5705_v53  ;;  %v5869_v52 = vrot.slane %v16209_v61, 2  ;;  %v16316_v45 = vpop.permute.xlu0 %6645 }
 0x33b   : > { %v5836_v31 = vmax.f32 %v16238_v29, %v5710_v50  ;;  %v5873_v39 = vrot.slane %v16216_v19, 2  ;;  %v5874_v20 = vrot.slane %v16218_v1, 2  ;;  %v5878_v8 = vrot.slane %v16220_v37, 2  ;;  %6741 = vst.msk [vmem:[#allocation4 + $0x21] sm:$0xff] %vm6739_vm8, %v16316_v45 }
 0x33c   : > { %5551 = vst.msk [vmem:[#allocation3 + $0xe2] sm:$0xff] %vm279_vm1, %v5519_v0  ;;  %6834 = vrot.lane.b32.xlu1 %v5519_v0, %s12763_s9  ;;  %v5879_v12 = vrot.slane %v16226_v40, 2  ;;  %v5883_v28 = vrot.slane %v16232_v30, 2  ;;  %v5884_v9 = vrot.slane %v16234_v34, 2  ;;  %v5870_v49 = vsel %vm1159_vm5, %v5868_v41, %v5869_v52 }
 0x33d   : > { %v5875_v54 = vsel %vm1159_vm5, %v5873_v39, %v5874_v20  ;;  %v5888_v25 = vrot.slane %v16238_v29, 2  ;;  %v5889_v13 = vrot.slane %v16240_v17, 2  ;;  %v6008_v22 = vmax.f32 %v5828_v33, %v5870_v49 }
 0x33e   : > { %v5880_v36 = vsel %vm1159_vm5, %v5878_v8, %v5879_v12  ;;  %v5885_v6 = vsel %vm1159_vm5, %v5883_v28, %v5884_v9  ;;  %v6010_v35 = vmax.f32 %v5830_v32, %v5875_v54  ;;  %v6048_v23 = vrot.slane %v16204_v59, 3 }
 0x33f   : > { %v5890_v58 = vsel %vm1159_vm5, %v5888_v25, %v5889_v13  ;;  %v6012_v43 = vmax.f32 %v5832_v51, %v5880_v36  ;;  %v6014_v21 = vmax.f32 %v5834_v2, %v5885_v6  ;;  %v6049_v3 = vrot.slane %v16209_v61, 3 }
 0x340   : > { %v6016_v55 = vmax.f32 %v5836_v31, %v5890_v58  ;;  %v6053_v56 = vrot.slane %v16216_v19, 3  ;;  %v6054_v16 = vrot.slane %v16218_v1, 3  ;;  %v6058_v4 = vrot.slane %v16220_v37, 3  ;;  %v16332_v31 = vpop.permute.xlu1 %6653 }
 0x341   : > { %v6059_v63 = vrot.slane %v16226_v40, 3  ;;  %v6063_v44 = vrot.slane %v16232_v30, 3  ;;  %v6064_v27 = vrot.slane %v16234_v34, 3  ;;  %v6050_v53 = vsel %vm4047_vm7, %v6048_v23, %v6049_v3  ;;  %6745 = vst.msk [vmem:[#allocation4 + $0x51] sm:$0xff] %vm6739_vm8, %v16332_v31  ;;  %v5589_v31 = vld [vmem:[#allocation3 + $0xa8] sm:$0xff] }
 0x342   : > { %v6055_v33 = vsel %vm4047_vm7, %v6053_v56, %v6054_v16  ;;  %v6068_v32 = vrot.slane %v16238_v29, 3  ;;  %v6069_v51 = vrot.slane %v16240_v17, 3  ;;  %v6188_v2 = vmax.f32 %v6008_v22, %v6050_v53  ;;  %v16345_v56 = vld [vmem:[#allocation3 + $0x10] sm:$0xf] }
 0x343   : > { %v6060_v0 = vsel %vm4047_vm7, %v6058_v4, %v6059_v63  ;;  %v6065_v50 = vsel %vm4047_vm7, %v6063_v44, %v6064_v27  ;;  %v6190_v41 = vmax.f32 %v6010_v35, %v6055_v33  ;;  %v6228_v49 = vrot.slane %v16204_v59, 4 }
 0x344   : > { %v6070_v39 = vsel %vm4047_vm7, %v6068_v32, %v6069_v51  ;;  %v6192_v8 = vmax.f32 %v6012_v43, %v6060_v0  ;;  %v6194_v28 = vmax.f32 %v6014_v21, %v6065_v50  ;;  %v6229_v25 = vrot.slane %v16209_v61, 4  ;;  %v16355_v21 = vld [vmem:[#allocation3 + $0x28] sm:$0xf]  ;;  %v16371_v32 = vld [vmem:[#allocation3 + $0x70] sm:$0xf] }
 0x345   : > { %v6196_v54 = vmax.f32 %v6016_v55, %v6070_v39  ;;  %v6233_v36 = vrot.slane %v16216_v19, 4  ;;  %v6234_v6 = vrot.slane %v16218_v1, 4  ;;  %v6238_v22 = vrot.slane %v16220_v37, 4  ;;  %v16357_v55 = vld [vmem:[#allocation3 + $0x40] sm:$0xf] }
 0x346   : > { %v6239_v35 = vrot.slane %v16226_v40, 4  ;;  %v6243_v58 = vrot.slane %v16232_v30, 4  ;;  %v19604_v23 = vrot.slane %v16234_v34, 4  ;;  %v6230_v59 = vsel %vm636_vm0, %v6228_v49, %v6229_v25  ;;  %v16359_v30 = vpop.permute.xlu0 %6647 }
 0x347   : > { %v6235_v19 = vsel %vm636_vm0, %v6233_v36, %v6234_v6  ;;  %v6248_v43 = vrot.slane %v16238_v29, 4  ;;  %v19603_v37 = vrot.slane %v16240_v17, 4  ;;  %v6368_v53 = vmax.f32 %v6188_v2, %v6230_v59  ;;  %v16369_v29 = vld [vmem:[#allocation3 + $0x58] sm:$0xf]  ;;  %v16381_v36 = vpop.permute.xlu1 %6657  ;;  %6742 = vst.msk [vmem:[#allocation4 + $0x31] sm:$0xff] %vm6739_vm8, %v16359_v30  ;;  %v5590_v30 = vld [vmem:[#allocation3 + $0xb0] sm:$0xff] }
 0x348   : > { %v6240_v4 = vsel %vm636_vm0, %v6238_v22, %v6239_v35  ;;  %v6245_v44 = vsel %vm636_vm0, %v6243_v58, %v19604_v23  ;;  %v16367_v33 = vmax.f32 %v6190_v41, %v6235_v19  ;;  %v5691_v49 = vrot.slane %v16345_v56, 1  ;;  %6747 = vst.msk [vmem:[#allocation4 + $0x69] sm:$0xff] %vm6739_vm8, %v16381_v36 }
 0x349   : > { %v6250_v0 = vsel %vm636_vm0, %v6248_v43, %v19603_v37  ;;  %v16376_v50 = vmax.f32 %v6192_v8, %v6240_v4  ;;  %v16378_v39 = vmax.f32 %v6194_v28, %v6245_v44  ;;  %v5696_v41 = vrot.slane %v16355_v21, 1 }
 0x34a   : > { %v16383_v22 = vmax.f32 %v6196_v54, %v6250_v0  ;;  %v6408_v2 = vmax.f32 %v6368_v53, %v16367_v33  ;;  %v5701_v58 = vrot.slane %v16357_v55, 1  ;;  %v5692_v59 = vsel %vm491_vm4, %v5689_v60, %v5691_v49 }
 0x34b   : > { %v5706_v8 = vrot.slane %v16369_v29, 1  ;;  %v5711_v28 = vrot.slane %v16371_v32, 1  ;;  %v5871_v19 = vrot.slane %v16345_v56, 2  ;;  %v5697_v54 = vsel %vm491_vm4, %v5694_v10, %v5696_v41 }
 0x34c   : > { %v6440_v43 = vmax.f32 %v6408_v2, %v16376_v50  ;;  %v5702_v4 = vsel %vm491_vm4, %v5699_v5, %v5701_v58  ;;  %v5829_v44 = vmax.f32 %v16209_v61, %v5692_v59  ;;  %v5831_v0 = vmax.f32 %v16218_v1, %v5697_v54  ;;  %v16410_v2 = vpop.permute.xlu0 %6651 }
 0x34d   : > { %v5707_v60 = vsel %vm491_vm4, %v5704_v38, %v5706_v8  ;;  %v5712_v53 = vsel %vm491_vm4, %v5709_v11, %v5711_v28  ;;  %v5833_v49 = vmax.f32 %v16226_v40, %v5702_v4  ;;  %v5872_v38 = vsel %vm1159_vm5, %v5869_v52, %v5871_v19  ;;  %v16422_v28 = vpop.permute.xlu1 %6661  ;;  %6744 = vst.msk [vmem:[#allocation4 + $0x49] sm:$0xff] %vm6739_vm8, %v16410_v2 }
 0x34e   : > { %v6472_v10 = vmax.f32 %v6440_v43, %v16378_v39  ;;  %v5835_v5 = vmax.f32 %v16234_v34, %v5707_v60  ;;  %v5837_v41 = vmax.f32 %v16240_v17, %v5712_v53  ;;  %v5876_v58 = vrot.slane %v16355_v21, 2  ;;  %6749 = vst.msk [vmem:[#allocation4 + $0x81] sm:$0xff] %vm6739_vm8, %v16422_v28 }
 0x34f   : > { %v5881_v11 = vrot.slane %v16357_v55, 2  ;;  %v5886_v59 = vrot.slane %v16369_v29, 2  ;;  %v5891_v8 = vrot.slane %v16371_v32, 2  ;;  %v6009_v54 = vmax.f32 %v5829_v44, %v5872_v38 }
 0x350   : > { %v6504_v43 = vmax.f32 %v6472_v10, %v16383_v22  ;;  %v6051_v4 = vrot.slane %v16345_v56, 3  ;;  %v6056_v60 = vrot.slane %v16355_v21, 3  ;;  %v5877_v52 = vsel %vm1159_vm5, %v5874_v20, %v5876_v58 }
 0x351   : > { %v5882_v19 = vsel %vm1159_vm5, %v5879_v12, %v5881_v11  ;;  %v5887_v53 = vsel %vm1159_vm5, %v5884_v9, %v5886_v59  ;;  %v5892_v44 = vsel %vm1159_vm5, %v5889_v13, %v5891_v8  ;;  %v6011_v10 = vmax.f32 %v5831_v0, %v5877_v52  ;;  %v16448_v13 = vpop.permute.xlu0 %6655  ;;  %v16460_v8 = vpop.permute.xlu1 %6665 }
 0x352   : > { %6965 = vrot.lane.b32.xlu0 %v6504_v43, %s12764_s10  ;;  %v6013_v38 = vmax.f32 %v5833_v49, %v5882_v19  ;;  %v6015_v37 = vmax.f32 %v5835_v5, %v5887_v53  ;;  %v6017_v23 = vmax.f32 %v5837_v41, %v5892_v44  ;;  %v6052_v20 = vsel %vm4047_vm7, %v6049_v3, %v6051_v4  ;;  %v4604_v4 = vld [vmem:[#allocation3 + $0x120] sm:$0xff] }
 0x353   : > { %v6057_v12 = vsel %vm4047_vm7, %v6054_v16, %v6056_v60  ;;  %v6061_v9 = vrot.slane %v16357_v55, 3  ;;  %v6066_v58 = vrot.slane %v16369_v29, 3  ;;  %v6071_v11 = vrot.slane %v16371_v32, 3  ;;  %v4605_v60 = vld [vmem:[#allocation3 + $0x128] sm:$0xff]  ;;  %6746 = vst.msk [vmem:[#allocation4 + $0x61] sm:$0xff] %vm6739_vm8, %v16448_v13  ;;  %6751 = vst.msk [vmem:[#allocation4 + $0x99] sm:$0xff] %vm6739_vm8, %v16460_v8 }
 0x354   : > { %v6189_v0 = vmax.f32 %v6009_v54, %v6052_v20  ;;  %v6191_v49 = vmax.f32 %v6011_v10, %v6057_v12  ;;  %v6231_v5 = vrot.slane %v16345_v56, 4  ;;  %v6236_v41 = vrot.slane %v16355_v21, 4 }
 0x355   : > { %v6062_v3 = vsel %vm4047_vm7, %v6059_v63, %v6061_v9  ;;  %v6067_v16 = vsel %vm4047_vm7, %v6064_v27, %v6066_v58  ;;  %v6241_v59 = vrot.slane %v16357_v55, 4  ;;  %v6072_v43 = vsel %vm4047_vm7, %v6069_v51, %v6071_v11  ;;  %v16483_v44 = vpop.permute.xlu0 %6659  ;;  %v16494_v58 = vpop.permute.xlu1 %6669 }
 0x356   : > { %v6193_v54 = vmax.f32 %v6013_v38, %v6062_v3  ;;  %v6195_v56 = vmax.f32 %v6015_v37, %v6067_v16  ;;  %v6232_v63 = vsel %vm636_vm0, %v6229_v25, %v6231_v5  ;;  %v6197_v52 = vmax.f32 %v6017_v23, %v6072_v43  ;;  %v4606_v38 = vld [vmem:[#allocation3 + $0x130] sm:$0xf]  ;;  %6748 = vst.msk [vmem:[#allocation4 + $0x79] sm:$0xff] %vm6739_vm8, %v16483_v44 }
 0x357   : > { %v6237_v27 = vsel %vm636_vm0, %v6234_v6, %v6236_v41  ;;  %v6242_v21 = vsel %vm636_vm0, %v6239_v35, %v6241_v59  ;;  %v6246_v55 = vrot.slane %v16369_v29, 4  ;;  %v6251_v51 = vrot.slane %v16371_v32, 4  ;;  %6753 = vst.msk [vmem:[#allocation4 + $0xb1] sm:$0xff] %vm6739_vm8, %v16494_v58 }
 0x358   : > { %v6369_v37 = vmax.f32 %v6189_v0, %v6232_v63  ;;  %v16476_v19 = vmax.f32 %v6191_v49, %v6237_v27  ;;  %v16478_v61 = vmax.f32 %v6193_v54, %v6242_v21  ;;  %v20011_v25 = vrot.slane %v16234_v34, 4 }
 0x359   : > { %v4748_v1 = vrot.slane %v4604_v4, 1  ;;  %v4749_v53 = vrot.slane %v4605_v60, 1  ;;  %v4928_v6 = vrot.slane %v4604_v4, 2  ;;  %v20012_v40 = vrot.slane %v16240_v17, 4 }
 0x35a   : > { %v6247_v23 = vsel %vm636_vm0, %v20011_v25, %v6246_v55  ;;  %v6409_v32 = vmax.f32 %v6369_v37, %v16476_v19  ;;  %v4929_v10 = vrot.slane %v4605_v60, 2  ;;  %v5108_v12 = vrot.slane %v4604_v4, 3  ;;  %v16505_v55 = vld [vmem:[#allocation3 + $0x80] sm:$0xff] }
 0x35b   : > { %v6252_v35 = vsel %vm636_vm0, %v20012_v40, %v6251_v51  ;;  %v16488_v29 = vmax.f32 %v6195_v56, %v6247_v23  ;;  %v4750_v34 = vsel %vm491_vm4, %v4748_v1, %v4749_v53  ;;  %v5109_v9 = vrot.slane %v4605_v60, 3  ;;  %v16507_v51 = vpop.permute.xlu0 %6663 }
 0x35c   : > { %v16491_v20 = vmax.f32 %v6197_v52, %v6252_v35  ;;  %v6441_v11 = vmax.f32 %v6409_v32, %v16478_v61  ;;  %v4852_v0 = vmax.f32 %v4604_v4, %v4750_v34  ;;  %v4930_v17 = vsel %vm1159_vm5, %v4928_v6, %v4929_v10  ;;  %v16516_v35 = vpop.permute.xlu1 %6673  ;;  %6750 = vst.msk [vmem:[#allocation4 + $0x91] sm:$0xff] %vm6739_vm8, %v16507_v51 }
 0x35d   : > { %v5288_v49 = vrot.slane %v4604_v4, 4  ;;  %v5110_v5 = vsel %vm4047_vm7, %v5108_v12, %v5109_v9  ;;  %v5289_v3 = vrot.slane %v4605_v60, 4  ;;  %v5424_v16 = vmax.f32 %v16031_v47, %v16083_v57  ;;  %v5583_v4 = vld [vmem:[#allocation3 + $0x78] sm:$0xff]  ;;  %6755 = vst.msk [vmem:[#allocation4 + $0xc9] sm:$0xff] %vm6739_vm8, %v16516_v35 }
 0x35e   : > { %v4751_v41 = vrot.slane %v4606_v38, 1  ;;  %v6473_v59 = vmax.f32 %v6441_v11, %v16488_v29  ;;  %v5032_v43 = vmax.f32 %v4852_v0, %v4930_v17  ;;  %v4931_v54 = vrot.slane %v4606_v38, 2 }
 0x35f   : > { %v5111_v56 = vrot.slane %v4606_v38, 3  ;;  %v5290_v63 = vsel %vm636_vm0, %v5288_v49, %v5289_v3  ;;  %v5456_v52 = vmax.f32 %v5424_v16, %v16139_v7  ;;  %v5291_v21 = vrot.slane %v4606_v38, 4 }
 0x360   : > { %v4752_v27 = vsel %vm491_vm4, %v4749_v53, %v4751_v41  ;;  %v6505_v47 = vmax.f32 %v6473_v59, %v16491_v20  ;;  %v5212_v37 = vmax.f32 %v5032_v43, %v5110_v5  ;;  %v4932_v23 = vsel %vm1159_vm5, %v4929_v10, %v4931_v54  ;;  %v5585_v5 = vld [vmem:[#allocation3 + $0x88] sm:$0xf]  ;;  %v16529_v43 = vpop.permute.xlu0 %6667 }
 0x361   : > { %v4853_v25 = vmax.f32 %v4605_v60, %v4752_v27  ;;  %v5488_v1 = vmax.f32 %v5456_v52, %v16229_v18  ;;  %v5112_v6 = vsel %vm4047_vm7, %v5109_v9, %v5111_v56  ;;  %v5292_v40 = vsel %vm636_vm0, %v5289_v3, %v5291_v21  ;;  %6752 = vst.msk [vmem:[#allocation4 + $0xa9] sm:$0xff] %vm6739_vm8, %v16529_v43 }
 0x362   : > { %v5425_v53 = vmax.f32 %v16043_v42, %v16095_v62  ;;  %6967 = vrot.lane.b32.xlu1 %v6505_v47, %s12764_s10  ;;  %v16519_v32 = vmax.f32 %v5212_v37, %v5290_v63  ;;  %v5713_v34 = vrot.slane %v5583_v4, 1  ;;  %v5714_v60 = vrot.slane %v16505_v55, 1 }
 0x363   : > { %v5033_v38 = vmax.f32 %v4853_v25, %v4932_v23  ;;  %v5893_v12 = vrot.slane %v5583_v4, 2  ;;  %v5894_v9 = vrot.slane %v16505_v55, 2  ;;  %v6073_v11 = vrot.slane %v5583_v4, 3 }
 0x364   : > { %v5457_v10 = vmax.f32 %v5425_v53, %v16153_v46  ;;  %v5520_v0 = vmax.f32 %v5488_v1, %v16519_v32  ;;  %v5715_v42 = vsel %vm491_vm4, %v5713_v34, %v5714_v60  ;;  %v6074_v49 = vrot.slane %v16505_v55, 3  ;;  %v4608_v53 = vld [vmem:[#allocation3 + $0x140] sm:$0xff] }
 0x365   : > { %v5213_v17 = vmax.f32 %v5033_v38, %v5112_v6  ;;  %v5838_v16 = vmax.f32 %v5583_v4, %v5715_v42  ;;  %v5895_v41 = vsel %vm1159_vm5, %v5893_v12, %v5894_v9  ;;  %v6253_v59 = vrot.slane %v5583_v4, 4  ;;  %v16539_v4 = vpop.permute.xlu1 %6804 }
 0x366   : > { %v5489_v3 = vmax.f32 %v5457_v10, %v16258_v15  ;;  %5552 = vst.msk [vmem:[#allocation3 + $0xf2] sm:$0xff] %vm279_vm1, %v5520_v0  ;;  %6836 = vrot.lane.b32.xlu0 %v5520_v0, %s12763_s9  ;;  %v6075_v56 = vsel %vm4047_vm7, %v6073_v11, %v6074_v49  ;;  %v6254_v63 = vrot.slane %v16505_v55, 4  ;;  %v6410_v52 = vmax.f32 %v16367_v33, %v16376_v50 }
 0x367   : > { %v16533_v54 = vmax.f32 %v5213_v17, %v5292_v40  ;;  %v6018_v27 = vmax.f32 %v5838_v16, %v5895_v41  ;;  %v5716_v21 = vrot.slane %v5585_v5, 1  ;;  %v5896_v47 = vrot.slane %v5585_v5, 2  ;;  %v4607_v40 = vld [vmem:[#allocation3 + $0x138] sm:$0xff]  ;;  %6901 = vst.msk [vmem:[#allocation4 + $0x19] sm:$0xff] %vm6900_vm9, %v16539_v4 }
 0x368   : > { %v6076_v37 = vrot.slane %v5585_v5, 3  ;;  %v6255_v23 = vsel %vm636_vm0, %v6253_v59, %v6254_v63  ;;  %v6442_v1 = vmax.f32 %v6410_v52, %v16378_v39  ;;  %v6256_v6 = vrot.slane %v5585_v5, 4 }
 0x369   : > { %v5521_v25 = vmax.f32 %v5489_v3, %v16533_v54  ;;  %v6198_v38 = vmax.f32 %v6018_v27, %v6075_v56  ;;  %v5717_v34 = vsel %vm491_vm4, %v5714_v60, %v5716_v21  ;;  %v5897_v33 = vsel %vm1159_vm5, %v5894_v9, %v5896_v47  ;;  %v16556_v3 = vpop.permute.xlu0 %6671  ;;  %v4609_v56 = vld [vmem:[#allocation3 + $0x148] sm:$0xf] }
 0x36a   : > { %v6077_v10 = vsel %vm4047_vm7, %v6074_v49, %v6076_v37  ;;  %v6474_v12 = vmax.f32 %v6442_v1, %v16383_v22  ;;  %v5839_v11 = vmax.f32 %v16505_v55, %v5717_v34  ;;  %v6257_v0 = vsel %vm636_vm0, %v6254_v63, %v6256_v6  ;;  %6754 = vst.msk [vmem:[#allocation4 + $0xc1] sm:$0xff] %vm6739_vm8, %v16556_v3 }
 0x36b   : > { %5553 = vst.msk [vmem:[#allocation3 + $0xfa] sm:$0xff] %vm279_vm1, %v5521_v25  ;;  %6838 = vrot.lane.b32.xlu1 %v5521_v25, %s12763_s9  ;;  %v6411_v17 = vmax.f32 %v16476_v19, %v16478_v61  ;;  %v16554_v42 = vmax.f32 %v6198_v38, %v6255_v23  ;;  %v4753_v60 = vrot.slane %v4607_v40, 1  ;;  %v4754_v5 = vrot.slane %v4608_v53, 1  ;;  %v16561_v19 = vpop.permute.xlu1 %6806 }
 0x36c   : > { %v4933_v9 = vrot.slane %v4607_v40, 2  ;;  %v6019_v49 = vmax.f32 %v5839_v11, %v5897_v33  ;;  %v4934_v41 = vrot.slane %v4608_v53, 2  ;;  %v5113_v59 = vrot.slane %v4607_v40, 3  ;;  %6902 = vst.msk [vmem:[#allocation4 + $0x21] sm:$0xff] %vm6900_vm9, %v16561_v19 }
 0x36d   : > { %v6443_v16 = vmax.f32 %v6411_v17, %v16488_v29  ;;  %v6506_v55 = vmax.f32 %v6474_v12, %v16554_v42  ;;  %v4755_v63 = vsel %vm491_vm4, %v4753_v60, %v4754_v5  ;;  %v5114_v52 = vrot.slane %v4608_v53, 3 }
 0x36e   : > { %v5293_v27 = vrot.slane %v4607_v40, 4  ;;  %v6199_v21 = vmax.f32 %v6019_v49, %v6077_v10  ;;  %v4854_v37 = vmax.f32 %v4607_v40, %v4755_v63  ;;  %v4935_v25 = vsel %vm1159_vm5, %v4933_v9, %v4934_v41  ;;  %v5586_v9 = vld [vmem:[#allocation3 + $0x90] sm:$0xff]  ;;  %v16574_v49 = vld [vmem:[#allocation3 + $0x98] sm:$0xff] }
 0x36f   : > { %v6475_v47 = vmax.f32 %v6443_v16, %v16491_v20  ;;  %6969 = vrot.lane.b32.xlu0 %v6506_v55, %s12764_s10  ;;  %v5115_v23 = vsel %vm4047_vm7, %v5113_v59, %v5114_v52  ;;  %v5294_v1 = vrot.slane %v4608_v53, 4  ;;  %v5426_v6 = vmax.f32 %v16083_v57, %v16139_v7  ;;  %v16576_v16 = vpop.permute.xlu0 %6675 }
 0x370   : > { %v4756_v38 = vrot.slane %v4609_v56, 1  ;;  %v16569_v34 = vmax.f32 %v6199_v21, %v6257_v0  ;;  %v5034_v33 = vmax.f32 %v4854_v37, %v4935_v25  ;;  %v4936_v12 = vrot.slane %v4609_v56, 2  ;;  %6756 = vst.msk [vmem:[#allocation4 + $0xd9] sm:$0xff] %vm6739_vm8, %v16576_v16 }
 0x371   : > { %v5116_v11 = vrot.slane %v4609_v56, 3  ;;  %v5295_v10 = vsel %vm636_vm0, %v5293_v27, %v5294_v1  ;;  %v5458_v40 = vmax.f32 %v5426_v6, %v16229_v18  ;;  %v5296_v60 = vrot.slane %v4609_v56, 4  ;;  %v16585_v56 = vpop.permute.xlu1 %6677 }
 0x372   : > { %v4757_v17 = vsel %vm491_vm4, %v4754_v5, %v4756_v38  ;;  %v6507_v57 = vmax.f32 %v6475_v47, %v16569_v34  ;;  %v5214_v59 = vmax.f32 %v5034_v33, %v5115_v23  ;;  %v4937_v55 = vsel %vm1159_vm5, %v4934_v41, %v4936_v12  ;;  %v5588_v12 = vld [vmem:[#allocation3 + $0xa0] sm:$0xf]  ;;  %6757 = vst.msk [vmem:[#allocation4 + $0xe1] sm:$0xff] %vm6739_vm8, %v16585_v56 }
 0x373   : > { %v4855_v0 = vmax.f32 %v4608_v53, %v4757_v17  ;;  %v5490_v63 = vmax.f32 %v5458_v40, %v16519_v32  ;;  %v5117_v27 = vsel %vm4047_vm7, %v5114_v52, %v5116_v11  ;;  %v5297_v21 = vsel %vm636_vm0, %v5294_v1, %v5296_v60  ;;  %v16598_v60 = vpop.permute.xlu0 %6808 }
 0x374   : > { %v5427_v5 = vmax.f32 %v16095_v62, %v16153_v46  ;;  %6971 = vrot.lane.b32.xlu1 %v6507_v57, %s12764_s10  ;;  %v16588_v37 = vmax.f32 %v5214_v59, %v5295_v10  ;;  %v5718_v25 = vrot.slane %v5586_v9, 1  ;;  %v5719_v53 = vrot.slane %v16574_v49, 1  ;;  %6903 = vst.msk [vmem:[#allocation4 + $0x31] sm:$0xff] %vm6900_vm9, %v16598_v60 }
 0x375   : > { %v5035_v47 = vmax.f32 %v4855_v0, %v4937_v55  ;;  %v5898_v23 = vrot.slane %v5586_v9, 2  ;;  %v5899_v52 = vrot.slane %v16574_v49, 2  ;;  %v6078_v6 = vrot.slane %v5586_v9, 3 }
 0x376   : > { %v5459_v41 = vmax.f32 %v5427_v5, %v16258_v15  ;;  %v5522_v1 = vmax.f32 %v5490_v63, %v16588_v37  ;;  %v5720_v62 = vsel %vm491_vm4, %v5718_v25, %v5719_v53  ;;  %v6079_v33 = vrot.slane %v16574_v49, 3 }
 0x377   : > { %v5215_v38 = vmax.f32 %v5035_v47, %v5117_v27  ;;  %v5840_v10 = vmax.f32 %v5586_v9, %v5720_v62  ;;  %v5900_v40 = vsel %vm1159_vm5, %v5898_v23, %v5899_v52  ;;  %v6258_v17 = vrot.slane %v5586_v9, 4  ;;  %v16608_v9 = vpop.permute.xlu1 %6810 }
 0x378   : > { %v5491_v11 = vmax.f32 %v5459_v41, %v16533_v54  ;;  %5554 = vst.msk [vmem:[#allocation3 + $0x10a] sm:$0xff] %vm279_vm1, %v5522_v1  ;;  %6840 = vrot.lane.b32.xlu0 %v5522_v1, %s12763_s9  ;;  %v6080_v59 = vsel %vm4047_vm7, %v6078_v6, %v6079_v33  ;;  %v6259_v0 = vrot.slane %v16574_v49, 4  ;;  %v6412_v55 = vmax.f32 %v16376_v50, %v16378_v39  ;;  %v4610_v1 = vld [vmem:[#allocation3 + $0x150] sm:$0xff]  ;;  %v16613_v6 = vld [vmem:[#allocation3 + $0x158] sm:$0xff] }
 0x379   : > { %v16602_v57 = vmax.f32 %v5215_v38, %v5297_v21  ;;  %v6020_v63 = vmax.f32 %v5840_v10, %v5900_v40  ;;  %v5721_v27 = vrot.slane %v5588_v12, 1  ;;  %v5901_v5 = vrot.slane %v5588_v12, 2  ;;  %6904 = vst.msk [vmem:[#allocation4 + $0x39] sm:$0xff] %vm6900_vm9, %v16608_v9 }
 0x37a   : > { %v6081_v47 = vrot.slane %v5588_v12, 3  ;;  %v6260_v41 = vsel %vm636_vm0, %v6258_v17, %v6259_v0  ;;  %v6444_v21 = vmax.f32 %v6412_v55, %v16383_v22  ;;  %v6261_v23 = vrot.slane %v5588_v12, 4 }
 0x37b   : > { %v5523_v25 = vmax.f32 %v5491_v11, %v16602_v57  ;;  %v6200_v38 = vmax.f32 %v6020_v63, %v6080_v59  ;;  %v5722_v62 = vsel %vm491_vm4, %v5719_v53, %v5721_v27  ;;  %v5902_v50 = vsel %vm1159_vm5, %v5899_v52, %v5901_v5 }
 0x37c   : > { %v6082_v10 = vsel %vm4047_vm7, %v6079_v33, %v6081_v47  ;;  %v6476_v11 = vmax.f32 %v6444_v21, %v16554_v42  ;;  %v5841_v40 = vmax.f32 %v16574_v49, %v5722_v62  ;;  %v6262_v12 = vsel %vm636_vm0, %v6259_v0, %v6261_v23  ;;  %v6680_v33 = vpop.permute.xlu0 %6679  ;;  %v6682_v21 = vpop.permute.xlu1 %6681 }
 0x37d   : > { %5555 = vst.msk [vmem:[#allocation3 + $0x112] sm:$0xff] %vm279_vm1, %v5523_v25  ;;  %6842 = vrot.lane.b32.xlu1 %v5523_v25, %s12763_s9  ;;  %v6413_v17 = vmax.f32 %v16478_v61, %v16488_v29  ;;  %v16625_v59 = vmax.f32 %v6200_v38, %v6260_v41  ;;  %v4758_v53 = vrot.slane %v4610_v1, 1  ;;  %v4759_v52 = vrot.slane %v16613_v6, 1  ;;  %v4612_v41 = vld [vmem:[#allocation3 + $0x160] sm:$0xf] }
 0x37e   : > { %v4938_v55 = vrot.slane %v4610_v1, 2  ;;  %v6021_v63 = vmax.f32 %v5841_v40, %v5902_v50  ;;  %v4939_v5 = vrot.slane %v16613_v6, 2  ;;  %v5118_v47 = vrot.slane %v4610_v1, 3  ;;  %6758 = vst.msk [vmem:[#allocation4 + $0xf1] sm:$0xff] %vm6739_vm8, %v6680_v33  ;;  %6759 = vst.msk [vmem:[#allocation4 + $0xf9] sm:$0xff] %vm6739_vm8, %v6682_v21 }
 0x37f   : > { %v6445_v27 = vmax.f32 %v6413_v17, %v16491_v20  ;;  %v6508_v49 = vmax.f32 %v6476_v11, %v16625_v59  ;;  %v4760_v0 = vsel %vm491_vm4, %v4758_v53, %v4759_v52  ;;  %v5119_v25 = vrot.slane %v16613_v6, 3 }
 0x380   : > { %v5298_v61 = vrot.slane %v4610_v1, 4  ;;  %v6201_v23 = vmax.f32 %v6021_v63, %v6082_v10  ;;  %v4856_v62 = vmax.f32 %v4610_v1, %v4760_v0  ;;  %v4940_v50 = vsel %vm1159_vm5, %v4938_v55, %v4939_v5  ;;  %v16682_v36 = vpop.permute.xlu0 %6812 }
 0x381   : > { %v6477_v38 = vmax.f32 %v6445_v27, %v16569_v34  ;;  %6973 = vrot.lane.b32.xlu0 %v6508_v49, %s12764_s10  ;;  %v5120_v40 = vsel %vm4047_vm7, %v5118_v47, %v5119_v25  ;;  %v5299_v17 = vrot.slane %v16613_v6, 4  ;;  %v5428_v11 = vmax.f32 %v16139_v7, %v16229_v18  ;;  %6905 = vst.msk [vmem:[#allocation4 + $0x49] sm:$0xff] %vm6900_vm9, %v16682_v36 }
 0x382   : > { %v16640_v53 = vmax.f32 %v6201_v23, %v6262_v12  ;;  %v5036_v24 = vmax.f32 %v4856_v62, %v4940_v50  ;;  %v4761_v10 = vrot.slane %v4612_v41, 1  ;;  %v4941_v1 = vrot.slane %v4612_v41, 2 }
 0x383   : > { %v5300_v7 = vsel %vm636_vm0, %v5298_v61, %v5299_v17  ;;  %v5460_v48 = vmax.f32 %v5428_v11, %v16519_v32  ;;  %v5121_v14 = vrot.slane %v4612_v41, 3  ;;  %v5301_v45 = vrot.slane %v4612_v41, 4 }
 0x384   : > { %v6509_v2 = vmax.f32 %v6477_v38, %v16640_v53  ;;  %v5216_v28 = vmax.f32 %v5036_v24, %v5120_v40  ;;  %v4762_v13 = vsel %vm491_vm4, %v4759_v52, %v4761_v10  ;;  %v4942_v8 = vsel %vm1159_vm5, %v4939_v5, %v4941_v1  ;;  %v5591_v5 = vld [vmem:[#allocation3 + $0xb8] sm:$0xf]  ;;  %v17076_v36 = vld [vmem:[#allocation3 + $0x110] sm:$0xff] }
 0x385   : > { %v5492_v44 = vmax.f32 %v5460_v48, %v16588_v37  ;;  %v4857_v58 = vmax.f32 %v16613_v6, %v4762_v13  ;;  %v5122_v51 = vsel %vm4047_vm7, %v5119_v25, %v5121_v14  ;;  %v5302_v35 = vsel %vm636_vm0, %v5299_v17, %v5301_v45  ;;  %v16709_v17 = vpop.permute.xlu1 %6814  ;;  %v4613_v48 = vld [vmem:[#allocation3 + $0x168] sm:$0xff]  ;;  %v4614_v14 = vld [vmem:[#allocation3 + $0x170] sm:$0xff] }
 0x386   : > { %6975 = vrot.lane.b32.xlu1 %v6509_v2, %s12764_s10  ;;  %v16692_v43 = vmax.f32 %v5216_v28, %v5300_v7  ;;  %v5429_v3 = vmax.f32 %v16153_v46, %v16258_v15  ;;  %v5723_v24 = vrot.slane %v5589_v31, 1  ;;  %v5724_v16 = vrot.slane %v5590_v30, 1  ;;  %v6684_v46 = vpop.permute.xlu0 %6683  ;;  %6906 = vst.msk [vmem:[#allocation4 + $0x51] sm:$0xff] %vm6900_vm9, %v16709_v17 }
 0x387   : > { %v5037_v56 = vmax.f32 %v4857_v58, %v4942_v8  ;;  %v5903_v12 = vrot.slane %v5589_v31, 2  ;;  %v5904_v52 = vrot.slane %v5590_v30, 2  ;;  %v6083_v55 = vrot.slane %v5589_v31, 3  ;;  %6760 = vst.msk [vmem:[#allocation4 + $0x109] sm:$0xff] %vm6739_vm8, %v6684_v46 }
 0x388   : > { %v5524_v33 = vmax.f32 %v5492_v44, %v16692_v43  ;;  %v5461_v6 = vmax.f32 %v5429_v3, %v16533_v54  ;;  %v5725_v63 = vsel %vm491_vm4, %v5723_v24, %v5724_v16  ;;  %v6084_v27 = vrot.slane %v5590_v30, 3 }
 0x389   : > { %v5217_v47 = vmax.f32 %v5037_v56, %v5122_v51  ;;  %v5842_v49 = vmax.f32 %v5589_v31, %v5725_v63  ;;  %v5905_v0 = vsel %vm1159_vm5, %v5903_v12, %v5904_v52  ;;  %v6263_v25 = vrot.slane %v5589_v31, 4  ;;  %v6686_v63 = vpop.permute.xlu1 %6685 }
 0x38a   : > { %5556 = vst.msk [vmem:[#allocation3 + $0x122] sm:$0xff] %vm279_vm1, %v5524_v33  ;;  %6844 = vrot.lane.b32.xlu0 %v5524_v33, %s12763_s9  ;;  %v5493_v61 = vmax.f32 %v5461_v6, %v16602_v57  ;;  %v6085_v41 = vsel %vm4047_vm7, %v6083_v55, %v6084_v27  ;;  %v6264_v21 = vrot.slane %v5590_v30, 4  ;;  %v6414_v23 = vmax.f32 %v16378_v39, %v16383_v22  ;;  %v4615_v6 = vld [vmem:[#allocation3 + $0x178] sm:$0xf] }
 0x38b   : > { %v16707_v38 = vmax.f32 %v5217_v47, %v5302_v35  ;;  %v6022_v62 = vmax.f32 %v5842_v49, %v5905_v0  ;;  %v5726_v50 = vrot.slane %v5591_v5, 1  ;;  %v5906_v40 = vrot.slane %v5591_v5, 2  ;;  %6761 = vst.msk [vmem:[#allocation4 + $0x111] sm:$0xff] %vm6739_vm8, %v6686_v63 }
 0x38c   : > { %v6265_v11 = vsel %vm636_vm0, %v6263_v25, %v6264_v21  ;;  %v6446_v10 = vmax.f32 %v6414_v23, %v16554_v42  ;;  %v6086_v1 = vrot.slane %v5591_v5, 3  ;;  %v6266_v7 = vrot.slane %v5591_v5, 4 }
 0x38d   : > { %v5525_v45 = vmax.f32 %v5493_v61, %v16707_v38  ;;  %v6202_v39 = vmax.f32 %v6022_v62, %v6085_v41  ;;  %v5727_v31 = vsel %vm491_vm4, %v5724_v16, %v5726_v50  ;;  %v5907_v2 = vsel %vm1159_vm5, %v5904_v52, %v5906_v40 }
 0x38e   : > { %v6478_v28 = vmax.f32 %v6446_v10, %v16625_v59  ;;  %v5843_v13 = vmax.f32 %v5590_v30, %v5727_v31  ;;  %v6087_v8 = vsel %vm4047_vm7, %v6084_v27, %v6086_v1  ;;  %v6267_v44 = vsel %vm636_vm0, %v6264_v21, %v6266_v7  ;;  %v5592_v10 = vld [vmem:[#allocation3 + $0xc0] sm:$0xff]  ;;  %v16739_v1 = vld [vmem:[#allocation3 + $0xc8] sm:$0xff]  ;;  %v16741_v7 = vpop.permute.xlu0 %6816 }
 0x38f   : > { %5557 = vst.msk [vmem:[#allocation3 + $0x12a] sm:$0xff] %vm279_vm1, %v5525_v45  ;;  %6846 = vrot.lane.b32.xlu1 %v5525_v45, %s12763_s9  ;;  %v16721_v58 = vmax.f32 %v6202_v39, %v6265_v11  ;;  %v6415_v51 = vmax.f32 %v16488_v29, %v16491_v20  ;;  %v4763_v35 = vrot.slane %v4613_v48, 1  ;;  %v4764_v3 = vrot.slane %v4614_v14, 1 }
 0x390   : > { %v6023_v24 = vmax.f32 %v5843_v13, %v5907_v2  ;;  %v4943_v16 = vrot.slane %v4613_v48, 2  ;;  %v4944_v56 = vrot.slane %v4614_v14, 2  ;;  %v5123_v12 = vrot.slane %v4613_v48, 3  ;;  %6907 = vst.msk [vmem:[#allocation4 + $0x61] sm:$0xff] %vm6900_vm9, %v16741_v7 }
 0x391   : > { %v6510_v30 = vmax.f32 %v6478_v28, %v16721_v58  ;;  %v6447_v52 = vmax.f32 %v6415_v51, %v16569_v34  ;;  %v4765_v55 = vsel %vm491_vm4, %v4763_v35, %v4764_v3  ;;  %v5124_v33 = vrot.slane %v4614_v14, 3 }
 0x392   : > { %v6203_v27 = vmax.f32 %v6023_v24, %v6087_v8  ;;  %v4858_v5 = vmax.f32 %v4613_v48, %v4765_v55  ;;  %v4945_v47 = vsel %vm1159_vm5, %v4943_v16, %v4944_v56  ;;  %v5303_v29 = vrot.slane %v4613_v48, 4  ;;  %v5594_v55 = vld [vmem:[#allocation3 + $0xd0] sm:$0xf] }
 0x393   : > { %6977 = vrot.lane.b32.xlu0 %v6510_v30, %s12764_s10  ;;  %v6479_v49 = vmax.f32 %v6447_v52, %v16640_v53  ;;  %v5125_v0 = vsel %vm4047_vm7, %v5123_v12, %v5124_v33  ;;  %v5304_v25 = vrot.slane %v4614_v14, 4  ;;  %v5430_v46 = vmax.f32 %v16229_v18, %v16519_v32 }
 0x394   : > { %v16735_v61 = vmax.f32 %v6203_v27, %v6267_v44  ;;  %v5038_v41 = vmax.f32 %v4858_v5, %v4945_v47  ;;  %v4766_v21 = vrot.slane %v4615_v6, 1  ;;  %v4946_v23 = vrot.slane %v4615_v6, 2  ;;  %v16761_v27 = vpop.permute.xlu1 %6818  ;;  %v6688_v5 = vpop.permute.xlu0 %6687 }
 0x395   : > { %v5305_v62 = vsel %vm636_vm0, %v5303_v29, %v5304_v25  ;;  %v5462_v50 = vmax.f32 %v5430_v46, %v16588_v37  ;;  %v5126_v40 = vrot.slane %v4615_v6, 3  ;;  %v5306_v11 = vrot.slane %v4615_v6, 4  ;;  %6762 = vst.msk [vmem:[#allocation4 + $0x121] sm:$0xff] %vm6739_vm8, %v6688_v5 }
 0x396   : > { %v6511_v48 = vmax.f32 %v6479_v49, %v16735_v61  ;;  %v5218_v45 = vmax.f32 %v5038_v41, %v5125_v0  ;;  %v4767_v18 = vsel %vm491_vm4, %v4764_v3, %v4766_v21  ;;  %v4947_v39 = vsel %vm1159_vm5, %v4944_v56, %v4946_v23  ;;  %6908 = vst.msk [vmem:[#allocation4 + $0x69] sm:$0xff] %vm6900_vm9, %v16761_v27 }
 0x397   : > { %v5494_v31 = vmax.f32 %v5462_v50, %v16692_v43  ;;  %v4859_v2 = vmax.f32 %v4614_v14, %v4767_v18  ;;  %v5127_v28 = vsel %vm4047_vm7, %v5124_v33, %v5126_v40  ;;  %v5307_v13 = vsel %vm636_vm0, %v5304_v25, %v5306_v11  ;;  %v4616_v11 = vld [vmem:[#allocation3 + $0x180] sm:$0xff] }
 0x398   : > { %6979 = vrot.lane.b32.xlu1 %v6511_v48, %s12764_s10  ;;  %v16750_v8 = vmax.f32 %v5218_v45, %v5305_v62  ;;  %v5431_v44 = vmax.f32 %v16258_v15, %v16533_v54  ;;  %v5728_v51 = vrot.slane %v5592_v10, 1  ;;  %v5729_v35 = vrot.slane %v16739_v1, 1 }
 0x399   : > { %v5039_v3 = vmax.f32 %v4859_v2, %v4947_v39  ;;  %v5908_v24 = vrot.slane %v5592_v10, 2  ;;  %v5909_v16 = vrot.slane %v16739_v1, 2  ;;  %v6088_v56 = vrot.slane %v5592_v10, 3  ;;  %v6690_v39 = vpop.permute.xlu1 %6689 }
 0x39a   : > { %v5526_v14 = vmax.f32 %v5494_v31, %v16750_v8  ;;  %v5463_v12 = vmax.f32 %v5431_v44, %v16602_v57  ;;  %v5730_v30 = vsel %vm491_vm4, %v5728_v51, %v5729_v35  ;;  %v6089_v52 = vrot.slane %v16739_v1, 3  ;;  %v16780_v31 = vpop.permute.xlu0 %6820  ;;  %6763 = vst.msk [vmem:[#allocation4 + $0x129] sm:$0xff] %vm6739_vm8, %v6690_v39 }
 0x39b   : > { %v5219_v33 = vmax.f32 %v5039_v3, %v5127_v28  ;;  %v5844_v6 = vmax.f32 %v5592_v10, %v5730_v30  ;;  %v5910_v15 = vsel %vm1159_vm5, %v5908_v24, %v5909_v16  ;;  %v6268_v63 = vrot.slane %v5592_v10, 4  ;;  %v16775_v10 = vld [vmem:[#allocation3 + $0x188] sm:$0xff]  ;;  %6909 = vst.msk [vmem:[#allocation4 + $0x79] sm:$0xff] %vm6900_vm9, %v16780_v31 }
 0x39c   : > { %5558 = vst.msk [vmem:[#allocation3 + $0x13a] sm:$0xff] %vm279_vm1, %v5526_v14  ;;  %6848 = vrot.lane.b32.xlu0 %v5526_v14, %s12763_s9  ;;  %v5495_v47 = vmax.f32 %v5463_v12, %v16707_v38  ;;  %v6090_v29 = vsel %vm4047_vm7, %v6088_v56, %v6089_v52  ;;  %v6269_v49 = vrot.slane %v16739_v1, 4  ;;  %v6416_v0 = vmax.f32 %v16383_v22, %v16554_v42 }
 0x39d   : > { %v16771_v25 = vmax.f32 %v5219_v33, %v5307_v13  ;;  %v6024_v46 = vmax.f32 %v5844_v6, %v5910_v15  ;;  %v5731_v41 = vrot.slane %v5594_v55, 1  ;;  %v5911_v21 = vrot.slane %v5594_v55, 2  ;;  %v4618_v33 = vld [vmem:[#allocation3 + $0x190] sm:$0xf]  ;;  %v16802_v6 = vpop.permute.xlu1 %6822 }
 0x39e   : > { %v6270_v23 = vsel %vm636_vm0, %v6268_v63, %v6269_v49  ;;  %v6448_v62 = vmax.f32 %v6416_v0, %v16625_v59  ;;  %v6091_v50 = vrot.slane %v5594_v55, 3  ;;  %v6271_v40 = vrot.slane %v5594_v55, 4  ;;  %v6692_v15 = vpop.permute.xlu0 %6691  ;;  %6910 = vst.msk [vmem:[#allocation4 + $0x81] sm:$0xff] %vm6900_vm9, %v16802_v6 }
 0x39f   : > { %v5527_v48 = vmax.f32 %v5495_v47, %v16771_v25  ;;  %v6204_v45 = vmax.f32 %v6024_v46, %v6090_v29  ;;  %v5732_v22 = vsel %vm491_vm4, %v5729_v35, %v5731_v41  ;;  %v5912_v18 = vsel %vm1159_vm5, %v5909_v16, %v5911_v21  ;;  %6764 = vst.msk [vmem:[#allocation4 + $0x139] sm:$0xff] %vm6739_vm8, %v6692_v15 }
 0x3a0   : > { %v6480_v2 = vmax.f32 %v6448_v62, %v16721_v58  ;;  %v5845_v28 = vmax.f32 %v16739_v1, %v5732_v22  ;;  %v6092_v13 = vsel %vm4047_vm7, %v6089_v52, %v6091_v50  ;;  %v6272_v44 = vsel %vm636_vm0, %v6269_v49, %v6271_v40  ;;  %v4619_v22 = vld [vmem:[#allocation3 + $0x198] sm:$0xff] }
 0x3a1   : > { %6850 = vrot.lane.b32.xlu1 %v5527_v48, %s12763_s9  ;;  %5559 = vst.msk [vmem:[#allocation3 + $0x142] sm:$0xff] %vm279_vm1, %v5527_v48  ;;  %v16789_v51 = vmax.f32 %v6204_v45, %v6270_v23  ;;  %v6417_v35 = vmax.f32 %v16491_v20, %v16569_v34  ;;  %v4768_v3 = vrot.slane %v4616_v11, 1  ;;  %v4769_v24 = vrot.slane %v16775_v10, 1  ;;  %v10612_v20 = vld [vmem:[%s19520_s4 + $0x18] sm:$0xff]  ;;  %v6694_v39 = vpop.permute.xlu1 %6693 }
 0x3a2   : > { %v6025_v16 = vmax.f32 %v5845_v28, %v5912_v18  ;;  %v4948_v1 = vrot.slane %v4616_v11, 2  ;;  %v4949_v56 = vrot.slane %v16775_v10, 2  ;;  %v5128_v14 = vrot.slane %v4616_v11, 3  ;;  %12006 = vmatprep.subr.mxu1 %v10612_v20  ;;  %v16816_v18 = vld [vmem:[#allocation3 + $0x1a0] sm:$0xff]  ;;  %6765 = vst.msk [vmem:[#allocation4 + $0x141] sm:$0xff] %vm6739_vm8, %v6694_v39 }
 0x3a3   : > { %v6512_v12 = vmax.f32 %v6480_v2, %v16789_v51  ;;  %v6449_v30 = vmax.f32 %v6417_v35, %v16640_v53  ;;  %v4770_v52 = vsel %vm491_vm4, %v4768_v3, %v4769_v24  ;;  %v5129_v55 = vrot.slane %v16775_v10, 3  ;;  %12007 = vmatpush3.msra.mxu1 %v10612_v20  ;;  %v16818_v2 = vpop.permute.xlu0 %6824 }
 0x3a4   : > { %v6205_v63 = vmax.f32 %v6025_v16, %v6092_v13  ;;  %v4860_v5 = vmax.f32 %v4616_v11, %v4770_v52  ;;  %v4950_v47 = vsel %vm1159_vm5, %v4948_v1, %v4949_v56  ;;  %v5308_v29 = vrot.slane %v4616_v11, 4  ;;  %6911 = vst.msk [vmem:[#allocation4 + $0x91] sm:$0xff] %vm6900_vm9, %v16818_v2 }
 0x3a5   : > { %6981 = vrot.lane.b32.xlu0 %v6512_v12, %s12764_s10  ;;  %v6481_v49 = vmax.f32 %v6449_v30, %v16735_v61  ;;  %v5130_v0 = vsel %vm4047_vm7, %v5128_v14, %v5129_v55  ;;  %v5309_v46 = vrot.slane %v16775_v10, 4  ;;  %v5432_v41 = vmax.f32 %v16519_v32, %v16588_v37 }
 0x3a6   : > { %v16812_v21 = vmax.f32 %v6205_v63, %v6272_v44  ;;  %v5040_v23 = vmax.f32 %v4860_v5, %v4950_v47  ;;  %v4771_v62 = vrot.slane %v4618_v33, 1  ;;  %v4951_v50 = vrot.slane %v4618_v33, 2 }
 0x3a7   : > { %v5310_v40 = vsel %vm636_vm0, %v5308_v29, %v5309_v46  ;;  %v5464_v11 = vmax.f32 %v5432_v41, %v16692_v43  ;;  %v5131_v48 = vrot.slane %v4618_v33, 3  ;;  %v5311_v45 = vrot.slane %v4618_v33, 4 }
 0x3a8   : > { %v6513_v32 = vmax.f32 %v6481_v49, %v16812_v21  ;;  %v5220_v28 = vmax.f32 %v5040_v23, %v5130_v0  ;;  %v4772_v13 = vsel %vm491_vm4, %v4769_v24, %v4771_v62  ;;  %v4952_v44 = vsel %vm1159_vm5, %v4949_v56, %v4951_v50 }
 0x3a9   : > { %v5496_v35 = vmax.f32 %v5464_v11, %v16750_v8  ;;  %v4861_v3 = vmax.f32 %v16775_v10, %v4772_v13  ;;  %v5132_v16 = vsel %vm4047_vm7, %v5129_v55, %v5131_v48  ;;  %v5312_v1 = vsel %vm636_vm0, %v5309_v46, %v5311_v45  ;;  %v16835_v10 = vpop.permute.xlu1 %6826  ;;  %v6696_v55 = vpop.permute.xlu0 %6695 }
 0x3aa   : > { %6983 = vrot.lane.b32.xlu1 %v6513_v32, %s12764_s10  ;;  %v16829_v14 = vmax.f32 %v5220_v28, %v5310_v40  ;;  %v5433_v12 = vmax.f32 %v16533_v54, %v16602_v57  ;;  %v4773_v24 = vrot.slane %v4619_v22, 1  ;;  %v4774_v56 = vrot.slane %v16816_v18, 1  ;;  %v4621_v54 = vld [vmem:[#allocation3 + $0x1a8] sm:$0xf]  ;;  %6766 = vst.msk [vmem:[#allocation4 + $0x151] sm:$0xff] %vm6739_vm8, %v6696_v55  ;;  %v7149_v32 = vld [vmem:[%s19520_s4 + $0x8] sm:$0xff] }
 0x3ab   : > { %v5041_v30 = vmax.f32 %v4861_v3, %v4952_v44  ;;  %v4953_v52 = vrot.slane %v4619_v22, 2  ;;  %v4954_v33 = vrot.slane %v16816_v18, 2  ;;  %v5133_v20 = vrot.slane %v4619_v22, 3  ;;  %v7148_v28 = vld [vmem:[%s19520_s4] sm:$0xff]  ;;  %12058 = vmatprep.subr.mxu0 %v7149_v32  ;;  %6912 = vst.msk [vmem:[#allocation4 + $0x99] sm:$0xff] %vm6900_vm9, %v16835_v10 }
 0x3ac   : > { %v5528_v15 = vmax.f32 %v5496_v35, %v16829_v14  ;;  %v5465_v63 = vmax.f32 %v5433_v12, %v16707_v38  ;;  %v4775_v5 = vsel %vm491_vm4, %v4773_v24, %v4774_v56  ;;  %v5134_v47 = vrot.slane %v16816_v18, 3  ;;  %12059 = vmatpush3.msra.mxu0 %v7149_v32 }
 0x3ad   : > { %v5221_v29 = vmax.f32 %v5041_v30, %v5132_v16  ;;  %v4862_v49 = vmax.f32 %v4619_v22, %v4775_v5  ;;  %v4955_v0 = vsel %vm1159_vm5, %v4953_v52, %v4954_v33  ;;  %v5313_v46 = vrot.slane %v4619_v22, 4  ;;  %v6698_v39 = vpop.permute.xlu1 %6697  ;;  %v16852_v22 = vpop.permute.xlu0 %6828  ;;  %v5595_v16 = vld [vmem:[#allocation3 + $0xd8] sm:$0xff]  ;;  %12060 = vmatprep.subr.mxu0 %v7148_v28 }
 0x3ae   : > { %6852 = vrot.lane.b32.xlu0 %v5528_v15, %s12763_s9  ;;  %5560 = vst.msk [vmem:[#allocation3 + $0x152] sm:$0xff] %vm279_vm1, %v5528_v15  ;;  %v5497_v41 = vmax.f32 %v5465_v63, %v16771_v25  ;;  %v5135_v23 = vsel %vm4047_vm7, %v5133_v20, %v5134_v47  ;;  %v5314_v62 = vrot.slane %v16816_v18, 4  ;;  %v5434_v50 = vmax.f32 %v16588_v37, %v16692_v43  ;;  %v10611_v37 = vld [vmem:[%s19520_s4 + $0x10] sm:$0xff] }
 0x3af   : > { %v16850_v40 = vmax.f32 %v5221_v29, %v5312_v1  ;;  %v5042_v11 = vmax.f32 %v4862_v49, %v4955_v0  ;;  %v4776_v48 = vrot.slane %v4621_v54, 1  ;;  %v4956_v45 = vrot.slane %v4621_v54, 2  ;;  %v16865_v1 = vld [vmem:[#allocation3 + $0xe0] sm:$0xff]  ;;  %6767 = vst.msk [vmem:[#allocation4 + $0x159] sm:$0xff] %vm6739_vm8, %v6698_v39  ;;  %12008 = vmatprep.subr.mxu1 %v10611_v37  ;;  %12061 = vmatpush3.msra.mxu0 %v7148_v28 }
 0x3b0   : > { %v5315_v13 = vsel %vm636_vm0, %v5313_v46, %v5314_v62  ;;  %v5466_v44 = vmax.f32 %v5434_v50, %v16750_v8  ;;  %v5136_v35 = vrot.slane %v4621_v54, 3  ;;  %v5316_v3 = vrot.slane %v4621_v54, 4  ;;  %12009 = vmatpush3.msra.mxu1 %v10611_v37  ;;  %v5597_v50 = vld [vmem:[#allocation3 + $0xe8] sm:$0xf]  ;;  %6913 = vst.msk [vmem:[#allocation4 + $0xa9] sm:$0xff] %vm6900_vm9, %v16852_v22 }
 0x3b1   : > { %v5529_v12 = vmax.f32 %v5497_v41, %v16850_v40  ;;  %v5222_v24 = vmax.f32 %v5042_v11, %v5135_v23  ;;  %v4777_v30 = vsel %vm491_vm4, %v4774_v56, %v4776_v48  ;;  %v4957_v52 = vsel %vm1159_vm5, %v4954_v33, %v4956_v45  ;;  %v16882_v29 = vpop.permute.xlu1 %6830 }
 0x3b2   : > { %v5498_v20 = vmax.f32 %v5466_v44, %v16829_v14  ;;  %v4863_v55 = vmax.f32 %v16816_v18, %v4777_v30  ;;  %v5137_v15 = vsel %vm4047_vm7, %v5134_v47, %v5136_v35  ;;  %v5317_v63 = vsel %vm636_vm0, %v5314_v62, %v5316_v3  ;;  %v6700_v18 = vpop.permute.xlu0 %6699  ;;  %6914 = vst.msk [vmem:[#allocation4 + $0xb1] sm:$0xff] %vm6900_vm9, %v16882_v29 }
 0x3b3   : > { %6854 = vrot.lane.b32.xlu1 %v5529_v12, %s12763_s9  ;;  %5561 = vst.msk [vmem:[#allocation3 + $0x15a] sm:$0xff] %vm279_vm1, %v5529_v12  ;;  %v16877_v5 = vmax.f32 %v5222_v24, %v5315_v13  ;;  %v5435_v56 = vmax.f32 %v16602_v57, %v16707_v38  ;;  %v5733_v33 = vrot.slane %v5595_v16, 1  ;;  %v5734_v54 = vrot.slane %v16865_v1, 1 }
 0x3b4   : > { %v5043_v47 = vmax.f32 %v4863_v55, %v4957_v52  ;;  %v5913_v49 = vrot.slane %v5595_v16, 2  ;;  %v5914_v0 = vrot.slane %v16865_v1, 2  ;;  %v6093_v46 = vrot.slane %v5595_v16, 3  ;;  %6768 = vst.msk [vmem:[#allocation4 + $0x169] sm:$0xff] %vm6739_vm8, %v6700_v18  ;;  %v4622_v55 = vld [vmem:[#allocation3 + $0x1b0] sm:$0xff]  ;;  %v4625_v18 = vld [vmem:[#allocation3 + $0x1c8] sm:$0xff] }
 0x3b5   : > { %v5530_v41 = vmax.f32 %v5498_v20, %v16877_v5  ;;  %v5467_v23 = vmax.f32 %v5435_v56, %v16771_v25  ;;  %v5735_v57 = vsel %vm491_vm4, %v5733_v33, %v5734_v54  ;;  %v6094_v62 = vrot.slane %v16865_v1, 3  ;;  %v6702_v44 = vpop.permute.xlu1 %6701 }
 0x3b6   : > { %v5223_v11 = vmax.f32 %v5043_v47, %v5137_v15  ;;  %v5846_v48 = vmax.f32 %v5595_v16, %v5735_v57  ;;  %v5915_v45 = vsel %vm1159_vm5, %v5913_v49, %v5914_v0  ;;  %v6273_v39 = vrot.slane %v5595_v16, 4  ;;  %6769 = vst.msk [vmem:[#allocation4 + $0x171] sm:$0xff] %vm6739_vm8, %v6702_v44  ;;  %v16903_v15 = vld [vmem:[#allocation3 + $0x1b8] sm:$0xff]  ;;  %v16908_v47 = vld [vmem:[#allocation3 + $0x1d0] sm:$0xff] }
 0x3b7   : > { %6856 = vrot.lane.b32.xlu0 %v5530_v41, %s12763_s9  ;;  %5562 = vst.msk [vmem:[#allocation3 + $0x16a] sm:$0xff] %vm279_vm1, %v5530_v41  ;;  %v5499_v32 = vmax.f32 %v5467_v23, %v16850_v40  ;;  %v6095_v28 = vsel %vm4047_vm7, %v6093_v46, %v6094_v62  ;;  %v6274_v37 = vrot.slane %v16865_v1, 4  ;;  %v6418_v13 = vmax.f32 %v16554_v42, %v16625_v59  ;;  %v10678_v49 = vld [vmem:[%s19520_s4 + $0x28] sm:$0xff] }
 0x3b8   : > { %v16898_v35 = vmax.f32 %v5223_v11, %v5317_v63  ;;  %v6026_v3 = vmax.f32 %v5846_v48, %v5915_v45  ;;  %v5736_v12 = vrot.slane %v5597_v50, 1  ;;  %v5916_v24 = vrot.slane %v5597_v50, 2  ;;  %12110 = vmatprep.subr.mxu1 %v10678_v49 }
 0x3b9   : > { %v6275_v16 = vsel %vm636_vm0, %v6273_v39, %v6274_v37  ;;  %v6450_v30 = vmax.f32 %v6418_v13, %v16721_v58  ;;  %v6096_v52 = vrot.slane %v5597_v50, 3  ;;  %v6276_v20 = vrot.slane %v5597_v50, 4 }
 0x3ba   : > { %v5531_v56 = vmax.f32 %v5499_v32, %v16898_v35  ;;  %v6206_v42 = vmax.f32 %v6026_v3, %v6095_v28  ;;  %v5737_v63 = vsel %vm491_vm4, %v5734_v54, %v5736_v12  ;;  %v5917_v33 = vsel %vm1159_vm5, %v5914_v0, %v5916_v24 }
 0x3bb   : > { %v6482_v46 = vmax.f32 %v6450_v30, %v16789_v51  ;;  %v5847_v41 = vmax.f32 %v16865_v1, %v5737_v63  ;;  %v6097_v23 = vsel %vm4047_vm7, %v6094_v62, %v6096_v52  ;;  %v6277_v57 = vsel %vm636_vm0, %v6274_v37, %v6276_v20 }
 0x3bc   : > { %6858 = vrot.lane.b32.xlu1 %v5531_v56, %s12763_s9  ;;  %5563 = vst.msk [vmem:[#allocation3 + $0x172] sm:$0xff] %vm279_vm1, %v5531_v56  ;;  %v16919_v54 = vmax.f32 %v6206_v42, %v6275_v16  ;;  %v6419_v0 = vmax.f32 %v16569_v34, %v16640_v53  ;;  %v4778_v50 = vrot.slane %v4622_v55, 1  ;;  %v16924_v11 = vrot.slane %v16903_v15, 1 }
 0x3bd   : > { %v6027_v48 = vmax.f32 %v5847_v41, %v5917_v33  ;;  %v4783_v1 = vrot.slane %v4625_v18, 1  ;;  %v16927_v62 = vrot.slane %v16908_v47, 1  ;;  %v4958_v45 = vrot.slane %v4622_v55, 2 }
 0x3be   : > { %v6514_v39 = vmax.f32 %v6482_v46, %v16919_v54  ;;  %v6451_v32 = vmax.f32 %v6419_v0, %v16735_v61  ;;  %v4780_v28 = vsel %vm491_vm4, %v4778_v50, %v16924_v11  ;;  %v16934_v37 = vrot.slane %v16903_v15, 2  ;;  %v4624_v50 = vld [vmem:[#allocation3 + $0x1c0] sm:$0xf] }
 0x3bf   : > { %v6207_v34 = vmax.f32 %v6027_v48, %v6097_v23  ;;  %v4785_v13 = vsel %vm491_vm4, %v4783_v1, %v16927_v62  ;;  %v4864_v44 = vmax.f32 %v4622_v55, %v4780_v28  ;;  %v4963_v3 = vrot.slane %v4625_v18, 2  ;;  %v4627_v48 = vld [vmem:[#allocation3 + $0x1d8] sm:$0xf] }
 0x3c0   : > { %6985 = vrot.lane.b32.xlu0 %v6514_v39, %s12764_s10  ;;  %v6483_v12 = vmax.f32 %v6451_v32, %v16812_v21  ;;  %v4866_v24 = vmax.f32 %v4625_v18, %v4785_v13  ;;  %v4960_v16 = vsel %vm1159_vm5, %v4958_v45, %v16934_v37  ;;  %v16943_v30 = vrot.slane %v16908_v47, 2 }
 0x3c1   : > { %v16945_v52 = vmax.f32 %v6207_v34, %v6277_v57  ;;  %v5044_v20 = vmax.f32 %v4864_v44, %v4960_v16  ;;  %v5138_v56 = vrot.slane %v4622_v55, 3  ;;  %v16948_v42 = vrot.slane %v16903_v15, 3 }
 0x3c2   : > { %v4965_v63 = vsel %vm1159_vm5, %v4963_v3, %v16943_v30  ;;  %v5143_v33 = vrot.slane %v4625_v18, 3  ;;  %v16953_v49 = vrot.slane %v16908_v47, 3  ;;  %v5318_v46 = vrot.slane %v4622_v55, 4 }
 0x3c3   : > { %v6515_v41 = vmax.f32 %v6483_v12, %v16945_v52  ;;  %v5046_v23 = vmax.f32 %v4866_v24, %v4965_v63  ;;  %v5140_v57 = vsel %vm4047_vm7, %v5138_v56, %v16948_v42  ;;  %v16959_v0 = vrot.slane %v16903_v15, 4 }
 0x3c4   : > { %v5145_v1 = vsel %vm4047_vm7, %v5143_v33, %v16953_v49  ;;  %v5224_v45 = vmax.f32 %v5044_v20, %v5140_v57  ;;  %v5323_v39 = vrot.slane %v4625_v18, 4  ;;  %v16964_v32 = vrot.slane %v16908_v47, 4 }
 0x3c5   : > { %6987 = vrot.lane.b32.xlu1 %v6515_v41, %s12764_s10  ;;  %v5226_v55 = vmax.f32 %v5046_v23, %v5145_v1  ;;  %v5320_v28 = vsel %vm636_vm0, %v5318_v46, %v16959_v0  ;;  %v5436_v34 = vmax.f32 %v16692_v43, %v16750_v8  ;;  %v5438_v13 = vmax.f32 %v16750_v8, %v16829_v14 }
 0x3c6   : > { %v5325_v44 = vsel %vm636_vm0, %v5323_v39, %v16964_v32  ;;  %v16975_v3 = vmax.f32 %v5224_v45, %v5320_v28  ;;  %v4781_v18 = vrot.slane %v4624_v50, 1  ;;  %v4786_v12 = vrot.slane %v4627_v48, 1 }
 0x3c7   : > { %v16977_v24 = vmax.f32 %v5226_v55, %v5325_v44  ;;  %v5468_v16 = vmax.f32 %v5436_v34, %v16829_v14  ;;  %v5470_v20 = vmax.f32 %v5438_v13, %v16877_v5  ;;  %v4961_v56 = vrot.slane %v4624_v50, 2  ;;  %v16995_v55 = vld [vmem:[#allocation3 + $0xf0] sm:$0xff]  ;;  %v17001_v44 = vld [vmem:[#allocation3 + $0xf8] sm:$0xff] }
 0x3c8   : > { %v4782_v43 = vsel %vm491_vm4, %v16924_v11, %v4781_v18  ;;  %v4787_v8 = vsel %vm491_vm4, %v16927_v62, %v4786_v12  ;;  %v4966_v63 = vrot.slane %v4627_v48, 2  ;;  %v5141_v33 = vrot.slane %v4624_v50, 3 }
 0x3c9   : > { %v5500_v46 = vmax.f32 %v5468_v16, %v16877_v5  ;;  %v5502_v41 = vmax.f32 %v5470_v20, %v16975_v3  ;;  %v4865_v23 = vmax.f32 %v16903_v15, %v4782_v43  ;;  %v4867_v57 = vmax.f32 %v16908_v47, %v4787_v8 }
 0x3ca   : > { %v4962_v14 = vsel %vm1159_vm5, %v16934_v37, %v4961_v56  ;;  %v4967_v1 = vsel %vm1159_vm5, %v16943_v30, %v4966_v63  ;;  %v5142_v45 = vsel %vm4047_vm7, %v16948_v42, %v5141_v33  ;;  %v5146_v39 = vrot.slane %v4627_v48, 3  ;;  %v6833_v56 = vpop.permute.xlu0 %6832 }
 0x3cb   : > { %v5532_v5 = vmax.f32 %v5500_v46, %v16975_v3  ;;  %v16999_v28 = vmax.f32 %v5502_v41, %v16977_v24  ;;  %v5045_v34 = vmax.f32 %v4865_v23, %v4962_v14  ;;  %v5047_v13 = vmax.f32 %v4867_v57, %v4967_v1  ;;  %6915 = vst.msk [vmem:[#allocation4 + $0xc1] sm:$0xff] %vm6900_vm9, %v6833_v56 }
 0x3cc   : > { %v5147_v18 = vsel %vm4047_vm7, %v16953_v49, %v5146_v39  ;;  %v5321_v12 = vrot.slane %v4624_v50, 4  ;;  %v5326_v16 = vrot.slane %v4627_v48, 4  ;;  %v5437_v20 = vmax.f32 %v16707_v38, %v16771_v25 }
 0x3cd   : > { %6860 = vrot.lane.b32.xlu0 %v5532_v5, %s12763_s9  ;;  %5564 = vst.msk [vmem:[#allocation3 + $0x182] sm:$0xff] %vm279_vm1, %v5532_v5  ;;  %5566 = vst.msk [vmem:[#allocation3 + $0x19a] sm:$0xff] %vm279_vm1, %v16999_v28  ;;  %v5225_v43 = vmax.f32 %v5045_v34, %v5142_v45  ;;  %v5227_v8 = vmax.f32 %v5047_v13, %v5147_v18  ;;  %v5439_v63 = vmax.f32 %v16771_v25, %v16850_v40  ;;  %v6835_v5 = vpop.permute.xlu1 %6834 }
 0x3ce   : > { %v5738_v33 = vrot.slane %v16995_v55, 1  ;;  %v5322_v50 = vsel %vm636_vm0, %v16959_v0, %v5321_v12  ;;  %v5327_v38 = vsel %vm636_vm0, %v16964_v32, %v5326_v16  ;;  %v5469_v48 = vmax.f32 %v5437_v20, %v16850_v40  ;;  %v5600_v12 = vld [vmem:[#allocation3 + $0x100] sm:$0xf]  ;;  %6916 = vst.msk [vmem:[#allocation4 + $0xc9] sm:$0xff] %vm6900_vm9, %v6835_v5 }
 0x3cf   : > { %v5739_v46 = vrot.slane %v17001_v44, 1  ;;  %v5405_v41 = vmax.f32 %v5225_v43, %v5322_v50  ;;  %v5407_v23 = vmax.f32 %v5227_v8, %v5327_v38  ;;  %v5471_v57 = vmax.f32 %v5439_v63, %v16898_v35  ;;  %v17033_v8 = vpop.permute.xlu0 %6965  ;;  %v17037_v50 = vld [vmem:[#allocation3 + $0x108] sm:$0xff] }
 0x3d0   : > { %v5918_v14 = vrot.slane %v16995_v55, 2  ;;  %v5501_v25 = vmax.f32 %v5469_v48, %v16898_v35  ;;  %v5919_v45 = vrot.slane %v17001_v44, 2  ;;  %v6098_v39 = vrot.slane %v16995_v55, 3  ;;  %7062 = vst.msk [vmem:[#allocation4 + $0x19] sm:$0xff] %vm7061_vm10, %v17033_v8 }
 0x3d1   : > { %v5740_v1 = vsel %vm491_vm4, %v5738_v33, %v5739_v46  ;;  %v5503_v34 = vmax.f32 %v5471_v57, %v5405_v41  ;;  %v6099_v13 = vrot.slane %v17001_v44, 3  ;;  %v6278_v18 = vrot.slane %v16995_v55, 4 }
 0x3d2   : > { %v5848_v40 = vmax.f32 %v16995_v55, %v5740_v1  ;;  %v5533_v16 = vmax.f32 %v5501_v25, %v5405_v41  ;;  %v5920_v20 = vsel %vm1159_vm5, %v5918_v14, %v5919_v45  ;;  %v6279_v35 = vrot.slane %v17001_v44, 4  ;;  %v5603_v1 = vld [vmem:[#allocation3 + $0x118] sm:$0xf] }
 0x3d3   : > { %v6420_v43 = vmax.f32 %v16625_v59, %v16721_v58  ;;  %v17035_v63 = vmax.f32 %v5503_v34, %v5407_v23  ;;  %v6100_v55 = vsel %vm4047_vm7, %v6098_v39, %v6099_v13  ;;  %v5741_v59 = vrot.slane %v5600_v12, 1 }
 0x3d4   : > { %v6028_v33 = vmax.f32 %v5848_v40, %v5920_v20  ;;  %6862 = vrot.lane.b32.xlu1 %v5533_v16, %s12763_s9  ;;  %5565 = vst.msk [vmem:[#allocation3 + $0x18a] sm:$0xff] %vm279_vm1, %v5533_v16  ;;  %v5921_v48 = vrot.slane %v5600_v12, 2  ;;  %v6280_v19 = vsel %vm636_vm0, %v6278_v18, %v6279_v35  ;;  %v6101_v60 = vrot.slane %v5600_v12, 3  ;;  %v17083_v6 = vpop.permute.xlu1 %6967 }
 0x3d5   : > { %v6452_v38 = vmax.f32 %v6420_v43, %v16789_v51  ;;  %5567 = vst.msk [vmem:[#allocation3 + $0x1a2] sm:$0xff] %vm279_vm1, %v17035_v63  ;;  %v6281_v9 = vrot.slane %v5600_v12, 4  ;;  %v5742_v7 = vsel %vm491_vm4, %v5739_v46, %v5741_v59  ;;  %v6421_v27 = vmax.f32 %v16640_v53, %v16735_v61 }
 0x3d6   : > { %v6208_v4 = vmax.f32 %v6028_v33, %v6100_v55  ;;  %v5743_v31 = vrot.slane %v17037_v50, 1  ;;  %v5849_v10 = vmax.f32 %v17001_v44, %v5742_v7  ;;  %v5922_v22 = vsel %vm1159_vm5, %v5919_v45, %v5921_v48  ;;  %7063 = vst.msk [vmem:[#allocation4 + $0x21] sm:$0xff] %vm7061_vm10, %v17083_v6 }
 0x3d7   : > { %v6484_v17 = vmax.f32 %v6452_v38, %v16919_v54  ;;  %v6102_v29 = vsel %vm4047_vm7, %v6099_v13, %v6101_v60  ;;  %v6453_v56 = vmax.f32 %v6421_v27, %v16812_v21  ;;  %v5744_v41 = vrot.slane %v17076_v36, 1 }
 0x3d8   : > { %v17085_v2 = vmax.f32 %v6208_v4, %v6280_v19  ;;  %v5923_v46 = vrot.slane %v17037_v50, 2  ;;  %v5924_v53 = vrot.slane %v17076_v36, 2  ;;  %v6837_v23 = vpop.permute.xlu0 %6836  ;;  %v6029_v14 = vmax.f32 %v5849_v10, %v5922_v22  ;;  %v5604_v4 = vld [vmem:[#allocation3 + $0x120] sm:$0xff] }
 0x3d9   : > { %v6103_v25 = vrot.slane %v17037_v50, 3  ;;  %v6104_v44 = vrot.slane %v17076_v36, 3  ;;  %6917 = vst.msk [vmem:[#allocation4 + $0xd9] sm:$0xff] %vm6900_vm9, %v6837_v23  ;;  %v6282_v45 = vsel %vm636_vm0, %v6279_v35, %v6281_v9  ;;  %v6485_v39 = vmax.f32 %v6453_v56, %v16945_v52 }
 0x3da   : > { %v6516_v57 = vmax.f32 %v6484_v17, %v17085_v2  ;;  %v5745_v5 = vsel %vm491_vm4, %v5743_v31, %v5744_v41  ;;  %v6283_v34 = vrot.slane %v17037_v50, 4  ;;  %v6209_v40 = vmax.f32 %v6029_v14, %v6102_v29 }
 0x3db   : > { %v5850_v13 = vmax.f32 %v17037_v50, %v5745_v5  ;;  %v5925_v18 = vsel %vm1159_vm5, %v5923_v46, %v5924_v53  ;;  %v6284_v12 = vrot.slane %v17076_v36, 4  ;;  %v6422_v16 = vmax.f32 %v16721_v58, %v16789_v51  ;;  %v17112_v50 = vld [vmem:[#allocation3 + $0x128] sm:$0xff] }
 0x3dc   : > { %6989 = vrot.lane.b32.xlu0 %v6516_v57, %s12764_s10  ;;  %v5746_v20 = vrot.slane %v5603_v1, 1  ;;  %v5926_v35 = vrot.slane %v5603_v1, 2  ;;  %v6106_v43 = vrot.slane %v5603_v1, 3  ;;  %v17108_v55 = vmax.f32 %v6209_v40, %v6282_v45 }
 0x3dd   : > { %v6839_v33 = vpop.permute.xlu1 %6838  ;;  %v6030_v38 = vmax.f32 %v5850_v13, %v5925_v18  ;;  %v6105_v59 = vsel %vm4047_vm7, %v6103_v25, %v6104_v44  ;;  %v6285_v48 = vsel %vm636_vm0, %v6283_v34, %v6284_v12  ;;  %v6454_v19 = vmax.f32 %v6422_v16, %v16919_v54 }
 0x3de   : > { %6918 = vst.msk [vmem:[#allocation4 + $0xe1] sm:$0xff] %vm6900_vm9, %v6839_v33  ;;  %v5747_v58 = vsel %vm491_vm4, %v5744_v41, %v5746_v20  ;;  %v5927_v60 = vsel %vm1159_vm5, %v5924_v53, %v5926_v35  ;;  %v6286_v9 = vrot.slane %v5603_v1, 4  ;;  %v6517_v17 = vmax.f32 %v6485_v39, %v17108_v55 }
 0x3df   : > { %v6210_v7 = vmax.f32 %v6030_v38, %v6105_v59  ;;  %v5851_v27 = vmax.f32 %v17076_v36, %v5747_v58  ;;  %v6107_v31 = vsel %vm4047_vm7, %v6104_v44, %v6106_v43  ;;  %v6486_v10 = vmax.f32 %v6454_v19, %v17085_v2  ;;  %v5606_v44 = vld [vmem:[#allocation3 + $0x130] sm:$0xf] }
 0x3e0   : > { %v6423_v22 = vmax.f32 %v16735_v61, %v16812_v21  ;;  %v5748_v29 = vrot.slane %v5604_v4, 1  ;;  %v5749_v56 = vrot.slane %v17112_v50, 1  ;;  %6991 = vrot.lane.b32.xlu1 %v6517_v17, %s12764_s10  ;;  %v5928_v53 = vrot.slane %v5604_v4, 2 }
 0x3e1   : > { %v17126_v41 = vmax.f32 %v6210_v7, %v6285_v48  ;;  %v6031_v46 = vmax.f32 %v5851_v27, %v5927_v60  ;;  %v5929_v23 = vrot.slane %v17112_v50, 2  ;;  %v6108_v14 = vrot.slane %v5604_v4, 3  ;;  %v17137_v18 = vpop.permute.xlu0 %6969  ;;  %v5607_v48 = vld [vmem:[#allocation3 + $0x138] sm:$0xff] }
 0x3e2   : > { %v6455_v36 = vmax.f32 %v6423_v22, %v16945_v52  ;;  %v5750_v57 = vsel %vm491_vm4, %v5748_v29, %v5749_v56  ;;  %v6109_v25 = vrot.slane %v17112_v50, 3  ;;  %v6287_v45 = vsel %vm636_vm0, %v6284_v12, %v6286_v9  ;;  %v17149_v9 = vld [vmem:[#allocation3 + $0x140] sm:$0xff]  ;;  %7064 = vst.msk [vmem:[#allocation4 + $0x31] sm:$0xff] %vm7061_vm10, %v17137_v18 }
 0x3e3   : > { %v6518_v61 = vmax.f32 %v6486_v10, %v17126_v41  ;;  %v6211_v1 = vmax.f32 %v6031_v46, %v6107_v31  ;;  %v5852_v39 = vmax.f32 %v5604_v4, %v5750_v57  ;;  %v5930_v34 = vsel %vm1159_vm5, %v5928_v53, %v5929_v23 }
 0x3e4   : > { %v6487_v5 = vmax.f32 %v6455_v36, %v17108_v55  ;;  %v6288_v40 = vrot.slane %v5604_v4, 4  ;;  %v6289_v13 = vrot.slane %v17112_v50, 4  ;;  %v6424_v35 = vmax.f32 %v16789_v51, %v16919_v54 }
 0x3e5   : > { %6993 = vrot.lane.b32.xlu0 %v6518_v61, %s12764_s10  ;;  %v17140_v16 = vmax.f32 %v6211_v1, %v6287_v45  ;;  %v6032_v20 = vmax.f32 %v5852_v39, %v5930_v34  ;;  %v5751_v43 = vrot.slane %v5606_v44, 1  ;;  %v6110_v12 = vsel %vm4047_vm7, %v6108_v14, %v6109_v25  ;;  %v5609_v61 = vld [vmem:[#allocation3 + $0x148] sm:$0xf] }
 0x3e6   : > { %v6290_v33 = vsel %vm636_vm0, %v6288_v40, %v6289_v13  ;;  %v5931_v38 = vrot.slane %v5606_v44, 2  ;;  %v6111_v59 = vrot.slane %v5606_v44, 3  ;;  %v6456_v58 = vmax.f32 %v6424_v35, %v17085_v2  ;;  %v17154_v31 = vpop.permute.xlu1 %6971 }
 0x3e7   : > { %v6519_v4 = vmax.f32 %v6487_v5, %v17140_v16  ;;  %v6212_v19 = vmax.f32 %v6032_v20, %v6110_v12  ;;  %v5752_v60 = vsel %vm491_vm4, %v5749_v56, %v5751_v43  ;;  %v6291_v27 = vrot.slane %v5606_v44, 4  ;;  %7065 = vst.msk [vmem:[#allocation4 + $0x39] sm:$0xff] %vm7061_vm10, %v17154_v31 }
 0x3e8   : > { %v5853_v17 = vmax.f32 %v17112_v50, %v5752_v60  ;;  %v5932_v51 = vsel %vm1159_vm5, %v5929_v23, %v5931_v38  ;;  %v6112_v7 = vsel %vm4047_vm7, %v6109_v25, %v6111_v59  ;;  %v6488_v22 = vmax.f32 %v6456_v58, %v17126_v41  ;;  %v5610_v58 = vld [vmem:[#allocation3 + $0x150] sm:$0xff] }
 0x3e9   : > { %6995 = vrot.lane.b32.xlu1 %v6519_v4, %s12764_s10  ;;  %v17157_v10 = vmax.f32 %v6212_v19, %v6290_v33  ;;  %v6425_v29 = vmax.f32 %v16812_v21, %v16945_v52  ;;  %v5753_v56 = vrot.slane %v5607_v48, 1  ;;  %v5754_v50 = vrot.slane %v17149_v9, 1 }
 0x3ea   : > { %v6033_v46 = vmax.f32 %v5853_v17, %v5932_v51  ;;  %v5933_v53 = vrot.slane %v5607_v48, 2  ;;  %v5934_v23 = vrot.slane %v17149_v9, 2  ;;  %v6841_v36 = vpop.permute.xlu0 %6840  ;;  %v6113_v25 = vrot.slane %v5607_v48, 3 }
 0x3eb   : > { %v6520_v57 = vmax.f32 %v6488_v22, %v17157_v10  ;;  %v6457_v14 = vmax.f32 %v6425_v29, %v17108_v55  ;;  %v6114_v44 = vrot.slane %v17149_v9, 3  ;;  %6919 = vst.msk [vmem:[#allocation4 + $0xf1] sm:$0xff] %vm6900_vm9, %v6841_v36  ;;  %v6292_v21 = vsel %vm636_vm0, %v6289_v13, %v6291_v27 }
 0x3ec   : > { %v6213_v1 = vmax.f32 %v6033_v46, %v6112_v7  ;;  %v5755_v45 = vsel %vm491_vm4, %v5753_v56, %v5754_v50  ;;  %v6293_v39 = vrot.slane %v5607_v48, 4  ;;  %v5935_v40 = vsel %vm1159_vm5, %v5933_v53, %v5934_v23 }
 0x3ed   : > { %6997 = vrot.lane.b32.xlu0 %v6520_v57, %s12764_s10  ;;  %v6489_v5 = vmax.f32 %v6457_v14, %v17140_v16  ;;  %v5854_v34 = vmax.f32 %v5607_v48, %v5755_v45  ;;  %v6294_v20 = vrot.slane %v17149_v9, 4  ;;  %v6426_v43 = vmax.f32 %v16919_v54, %v17085_v2  ;;  %v17180_v48 = vld [vmem:[#allocation3 + $0x158] sm:$0xff] }
 0x3ee   : > { %v17174_v35 = vmax.f32 %v6213_v1, %v6292_v21  ;;  %v5756_v12 = vrot.slane %v5609_v61, 1  ;;  %v5936_v33 = vrot.slane %v5609_v61, 2  ;;  %v6115_v59 = vsel %vm4047_vm7, %v6113_v25, %v6114_v44  ;;  %v5612_v1 = vld [vmem:[#allocation3 + $0x160] sm:$0xf] }
 0x3ef   : > { %v6843_v13 = vpop.permute.xlu1 %6842  ;;  %v6034_v38 = vmax.f32 %v5854_v34, %v5935_v40  ;;  %v6295_v4 = vsel %vm636_vm0, %v6293_v39, %v6294_v20  ;;  %v6116_v19 = vrot.slane %v5609_v61, 3  ;;  %v6458_v17 = vmax.f32 %v6426_v43, %v17126_v41 }
 0x3f0   : > { %6920 = vst.msk [vmem:[#allocation4 + $0xf9] sm:$0xff] %vm6900_vm9, %v6843_v13  ;;  %v6521_v60 = vmax.f32 %v6489_v5, %v17174_v35  ;;  %v5757_v54 = vsel %vm491_vm4, %v5754_v50, %v5756_v12  ;;  %v6296_v51 = vrot.slane %v5609_v61, 4  ;;  %v5937_v22 = vsel %vm1159_vm5, %v5934_v23, %v5936_v33 }
 0x3f1   : > { %v6214_v7 = vmax.f32 %v6034_v38, %v6115_v59  ;;  %v5855_v27 = vmax.f32 %v17149_v9, %v5757_v54  ;;  %v6117_v29 = vsel %vm4047_vm7, %v6114_v44, %v6116_v19  ;;  %v6490_v56 = vmax.f32 %v6458_v17, %v17157_v10 }
 0x3f2   : > { %6999 = vrot.lane.b32.xlu1 %v6521_v60, %s12764_s10  ;;  %v6427_v46 = vmax.f32 %v16945_v52, %v17108_v55  ;;  %v5758_v53 = vrot.slane %v5610_v58, 1  ;;  %v5759_v36 = vrot.slane %v17180_v48, 1  ;;  %v5938_v14 = vrot.slane %v5610_v58, 2 }
 0x3f3   : > { %v17194_v57 = vmax.f32 %v6214_v7, %v6295_v4  ;;  %v6035_v50 = vmax.f32 %v5855_v27, %v5937_v22  ;;  %v5939_v9 = vrot.slane %v17180_v48, 2  ;;  %v6118_v44 = vrot.slane %v5610_v58, 3  ;;  %v17205_v12 = vpop.permute.xlu0 %6973  ;;  %v17217_v27 = vld [vmem:[#allocation3 + $0x170] sm:$0xff] }
 0x3f4   : > { %v6459_v23 = vmax.f32 %v6427_v46, %v17140_v16  ;;  %v5760_v25 = vsel %vm491_vm4, %v5758_v53, %v5759_v36  ;;  %v6119_v61 = vrot.slane %v17180_v48, 3  ;;  %v6297_v45 = vsel %vm636_vm0, %v6294_v20, %v6296_v51  ;;  %7066 = vst.msk [vmem:[#allocation4 + $0x49] sm:$0xff] %vm7061_vm10, %v17205_v12 }
 0x3f5   : > { %v6522_v21 = vmax.f32 %v6490_v56, %v17194_v57  ;;  %v6215_v52 = vmax.f32 %v6035_v50, %v6117_v29  ;;  %v5856_v39 = vmax.f32 %v5610_v58, %v5760_v25  ;;  %v5940_v34 = vsel %vm1159_vm5, %v5938_v14, %v5939_v9 }
 0x3f6   : > { %v6491_v5 = vmax.f32 %v6459_v23, %v17174_v35  ;;  %v6298_v40 = vrot.slane %v5610_v58, 4  ;;  %v6299_v43 = vrot.slane %v17180_v48, 4  ;;  %v6428_v38 = vmax.f32 %v17085_v2, %v17126_v41  ;;  %v5613_v58 = vld [vmem:[#allocation3 + $0x168] sm:$0xff] }
 0x3f7   : > { %7001 = vrot.lane.b32.xlu0 %v6522_v21, %s12764_s10  ;;  %v17208_v33 = vmax.f32 %v6215_v52, %v6297_v45  ;;  %v6036_v13 = vmax.f32 %v5856_v39, %v5940_v34  ;;  %v5761_v59 = vrot.slane %v5612_v1, 1  ;;  %v6120_v20 = vsel %vm4047_vm7, %v6118_v44, %v6119_v61  ;;  %v5615_v45 = vld [vmem:[#allocation3 + $0x178] sm:$0xf] }
 0x3f8   : > { %v6300_v4 = vsel %vm636_vm0, %v6298_v40, %v6299_v43  ;;  %v5941_v19 = vrot.slane %v5612_v1, 2  ;;  %v6121_v60 = vrot.slane %v5612_v1, 3  ;;  %v6460_v51 = vmax.f32 %v6428_v38, %v17157_v10 }
 0x3f9   : > { %v6523_v17 = vmax.f32 %v6491_v5, %v17208_v33  ;;  %v6216_v54 = vmax.f32 %v6036_v13, %v6120_v20  ;;  %v5762_v7 = vsel %vm491_vm4, %v5759_v36, %v5761_v59  ;;  %v6301_v56 = vrot.slane %v5612_v1, 4  ;;  %v17228_v36 = vpop.permute.xlu1 %6975 }
 0x3fa   : > { %v5857_v22 = vmax.f32 %v17180_v48, %v5762_v7  ;;  %v5942_v2 = vsel %vm1159_vm5, %v5939_v9, %v5941_v19  ;;  %v6122_v29 = vsel %vm4047_vm7, %v6119_v61, %v6121_v60  ;;  %v6492_v53 = vmax.f32 %v6460_v51, %v17194_v57  ;;  %v5616_v7 = vld [vmem:[#allocation3 + $0x180] sm:$0xff]  ;;  %7067 = vst.msk [vmem:[#allocation4 + $0x51] sm:$0xff] %vm7061_vm10, %v17228_v36 }
 0x3fb   : > { %7003 = vrot.lane.b32.xlu1 %v6523_v17, %s12764_s10  ;;  %v17223_v46 = vmax.f32 %v6216_v54, %v6300_v4  ;;  %v6429_v50 = vmax.f32 %v17108_v55, %v17140_v16  ;;  %v5763_v14 = vrot.slane %v5613_v58, 1  ;;  %v5764_v48 = vrot.slane %v17217_v27, 1 }
 0x3fc   : > { %v6037_v23 = vmax.f32 %v5857_v22, %v5942_v2  ;;  %v5943_v25 = vrot.slane %v5613_v58, 2  ;;  %v5944_v9 = vrot.slane %v17217_v27, 2  ;;  %v6845_v44 = vpop.permute.xlu0 %6844  ;;  %v6123_v21 = vrot.slane %v5613_v58, 3  ;;  %v17248_v22 = vld [vmem:[#allocation3 + $0x188] sm:$0xff] }
 0x3fd   : > { %v6524_v61 = vmax.f32 %v6492_v53, %v17223_v46  ;;  %v6461_v1 = vmax.f32 %v6429_v50, %v17174_v35  ;;  %v6124_v52 = vrot.slane %v17217_v27, 3  ;;  %6921 = vst.msk [vmem:[#allocation4 + $0x109] sm:$0xff] %vm6900_vm9, %v6845_v44  ;;  %v6302_v39 = vsel %vm636_vm0, %v6299_v43, %v6301_v56 }
 0x3fe   : > { %v6217_v55 = vmax.f32 %v6037_v23, %v6122_v29  ;;  %v5765_v5 = vsel %vm491_vm4, %v5763_v14, %v5764_v48  ;;  %v6303_v34 = vrot.slane %v5613_v58, 4  ;;  %v5945_v38 = vsel %vm1159_vm5, %v5943_v25, %v5944_v9 }
 0x3ff   : > { %7005 = vrot.lane.b32.xlu0 %v6524_v61, %s12764_s10  ;;  %v6493_v40 = vmax.f32 %v6461_v1, %v17208_v33  ;;  %v5858_v13 = vmax.f32 %v5613_v58, %v5765_v5  ;;  %v6304_v59 = vrot.slane %v17217_v27, 4  ;;  %v6430_v4 = vmax.f32 %v17126_v41, %v17157_v10  ;;  %v5618_v5 = vld [vmem:[#allocation3 + $0x190] sm:$0xf] }
 0x400   : > { %v17242_v20 = vmax.f32 %v6217_v55, %v6302_v39  ;;  %v5766_v19 = vrot.slane %v5615_v45, 1  ;;  %v5946_v60 = vrot.slane %v5615_v45, 2  ;;  %v6125_v17 = vsel %vm4047_vm7, %v6123_v21, %v6124_v52 }
 0x401   : > { %v6038_v43 = vmax.f32 %v5858_v13, %v5945_v38  ;;  %v6305_v54 = vsel %vm636_vm0, %v6303_v34, %v6304_v59  ;;  %v6126_v51 = vrot.slane %v5615_v45, 3  ;;  %v6847_v58 = vpop.permute.xlu1 %6846  ;;  %v6462_v29 = vmax.f32 %v6430_v4, %v17194_v57 }
 0x402   : > { %v6525_v2 = vmax.f32 %v6493_v40, %v17242_v20  ;;  %v5767_v56 = vsel %vm491_vm4, %v5764_v48, %v5766_v19  ;;  %v6306_v53 = vrot.slane %v5615_v45, 4  ;;  %6922 = vst.msk [vmem:[#allocation4 + $0x111] sm:$0xff] %vm6900_vm9, %v6847_v58  ;;  %v5947_v14 = vsel %vm1159_vm5, %v5944_v9, %v5946_v60 }
 0x403   : > { %v6218_v41 = vmax.f32 %v6038_v43, %v6125_v17  ;;  %v5859_v50 = vmax.f32 %v17217_v27, %v5767_v56  ;;  %v6127_v23 = vsel %vm4047_vm7, %v6124_v52, %v6126_v51  ;;  %v6494_v25 = vmax.f32 %v6462_v29, %v17223_v46 }
 0x404   : > { %7007 = vrot.lane.b32.xlu1 %v6525_v2, %s12764_s10  ;;  %v6431_v44 = vmax.f32 %v17140_v16, %v17174_v35  ;;  %v5768_v61 = vrot.slane %v5616_v7, 1  ;;  %v5769_v48 = vrot.slane %v17248_v22, 1  ;;  %v5948_v45 = vrot.slane %v5616_v7, 2 }
 0x405   : > { %v17262_v1 = vmax.f32 %v6218_v41, %v6305_v54  ;;  %v6039_v21 = vmax.f32 %v5859_v50, %v5947_v14  ;;  %v5949_v27 = vrot.slane %v17248_v22, 2  ;;  %v6128_v55 = vrot.slane %v5616_v7, 3  ;;  %v17273_v43 = vpop.permute.xlu0 %6977 }
 0x406   : > { %v6463_v9 = vmax.f32 %v6431_v44, %v17208_v33  ;;  %v5770_v52 = vsel %vm491_vm4, %v5768_v61, %v5769_v48  ;;  %v6129_v39 = vrot.slane %v17248_v22, 3  ;;  %v6307_v40 = vsel %vm636_vm0, %v6304_v59, %v6306_v53  ;;  %7068 = vst.msk [vmem:[#allocation4 + $0x61] sm:$0xff] %vm7061_vm10, %v17273_v43 }
 0x407   : > { %v6526_v34 = vmax.f32 %v6494_v25, %v17262_v1  ;;  %v6219_v16 = vmax.f32 %v6039_v21, %v6127_v23  ;;  %v5860_v13 = vmax.f32 %v5616_v7, %v5770_v52  ;;  %v5950_v4 = vsel %vm1159_vm5, %v5948_v45, %v5949_v27  ;;  %v17285_v23 = vld [vmem:[#allocation3 + $0x1a0] sm:$0xff] }
 0x408   : > { %v6495_v38 = vmax.f32 %v6463_v9, %v17242_v20  ;;  %v6308_v19 = vrot.slane %v5616_v7, 4  ;;  %v6309_v60 = vrot.slane %v17248_v22, 4  ;;  %v6432_v51 = vmax.f32 %v17157_v10, %v17194_v57  ;;  %v5619_v7 = vld [vmem:[#allocation3 + $0x198] sm:$0xff] }
 0x409   : > { %7009 = vrot.lane.b32.xlu0 %v6526_v34, %s12764_s10  ;;  %v17276_v17 = vmax.f32 %v6219_v16, %v6307_v40  ;;  %v6040_v54 = vmax.f32 %v5860_v13, %v5950_v4  ;;  %v5771_v58 = vrot.slane %v5618_v5, 1  ;;  %v6130_v59 = vsel %vm4047_vm7, %v6128_v55, %v6129_v39 }
 0x40a   : > { %v6310_v2 = vsel %vm636_vm0, %v6308_v19, %v6309_v60  ;;  %v5951_v29 = vrot.slane %v5618_v5, 2  ;;  %v6131_v56 = vrot.slane %v5618_v5, 3  ;;  %v6464_v50 = vmax.f32 %v6432_v51, %v17223_v46 }
 0x40b   : > { %v6527_v53 = vmax.f32 %v6495_v38, %v17276_v17  ;;  %v6220_v41 = vmax.f32 %v6040_v54, %v6130_v59  ;;  %v5772_v14 = vsel %vm491_vm4, %v5769_v48, %v5771_v58  ;;  %v6311_v61 = vrot.slane %v5618_v5, 4  ;;  %v17296_v48 = vpop.permute.xlu1 %6979  ;;  %v5621_v38 = vld [vmem:[#allocation3 + $0x1a8] sm:$0xf] }
 0x40c   : > { %v5861_v25 = vmax.f32 %v17248_v22, %v5772_v14  ;;  %v5952_v10 = vsel %vm1159_vm5, %v5949_v27, %v5951_v29  ;;  %v6132_v44 = vsel %vm4047_vm7, %v6129_v39, %v6131_v56  ;;  %v6496_v45 = vmax.f32 %v6464_v50, %v17262_v1  ;;  %7069 = vst.msk [vmem:[#allocation4 + $0x69] sm:$0xff] %vm7061_vm10, %v17296_v48 }
 0x40d   : > { %7011 = vrot.lane.b32.xlu1 %v6527_v53, %s12764_s10  ;;  %v17291_v21 = vmax.f32 %v6220_v41, %v6310_v2  ;;  %v6433_v9 = vmax.f32 %v17174_v35, %v17208_v33  ;;  %v5773_v52 = vrot.slane %v5619_v7, 1  ;;  %v5774_v22 = vrot.slane %v17285_v23, 1 }
 0x40e   : > { %v6041_v55 = vmax.f32 %v5861_v25, %v5952_v10  ;;  %v5953_v34 = vrot.slane %v5619_v7, 2  ;;  %v5954_v27 = vrot.slane %v17285_v23, 2  ;;  %v6849_v39 = vpop.permute.xlu0 %6848  ;;  %v6133_v40 = vrot.slane %v5619_v7, 3  ;;  %v5624_v10 = vld [vmem:[#allocation3 + $0x1c0] sm:$0xf] }
 0x40f   : > { %v6528_v5 = vmax.f32 %v6496_v45, %v17291_v21  ;;  %v6465_v16 = vmax.f32 %v6433_v9, %v17242_v20  ;;  %v6134_v13 = vrot.slane %v17285_v23, 3  ;;  %6923 = vst.msk [vmem:[#allocation4 + $0x121] sm:$0xff] %vm6900_vm9, %v6849_v39  ;;  %v6312_v4 = vsel %vm636_vm0, %v6309_v60, %v6311_v61 }
 0x410   : > { %v6221_v35 = vmax.f32 %v6041_v55, %v6132_v44  ;;  %v5775_v19 = vsel %vm491_vm4, %v5773_v52, %v5774_v22  ;;  %v6313_v54 = vrot.slane %v5619_v7, 4  ;;  %v5955_v59 = vsel %vm1159_vm5, %v5953_v34, %v5954_v27 }
 0x411   : > { %7013 = vrot.lane.b32.xlu0 %v6528_v5, %s12764_s10  ;;  %v6497_v51 = vmax.f32 %v6465_v16, %v17276_v17  ;;  %v5862_v58 = vmax.f32 %v5619_v7, %v5775_v19  ;;  %v6314_v2 = vrot.slane %v17285_v23, 4  ;;  %v6434_v56 = vmax.f32 %v17194_v57, %v17223_v46 }
 0x412   : > { %v17310_v29 = vmax.f32 %v6221_v35, %v6312_v4  ;;  %v5776_v53 = vrot.slane %v5621_v38, 1  ;;  %v5956_v41 = vrot.slane %v5621_v38, 2  ;;  %v6135_v50 = vsel %vm4047_vm7, %v6133_v40, %v6134_v13 }
 0x413   : > { %v6042_v60 = vmax.f32 %v5862_v58, %v5955_v59  ;;  %v6315_v14 = vsel %vm636_vm0, %v6313_v54, %v6314_v2  ;;  %v6136_v25 = vrot.slane %v5621_v38, 3  ;;  %v6851_v44 = vpop.permute.xlu1 %6850  ;;  %v6466_v61 = vmax.f32 %v6434_v56, %v17262_v1  ;;  %v17336_v58 = vld [vmem:[#allocation3 + $0x1d8] sm:$0xf] }
 0x414   : > { %v6529_v7 = vmax.f32 %v6497_v51, %v17310_v29  ;;  %v5777_v45 = vsel %vm491_vm4, %v5774_v22, %v5776_v53  ;;  %v6316_v9 = vrot.slane %v5621_v38, 4  ;;  %6924 = vst.msk [vmem:[#allocation4 + $0x129] sm:$0xff] %vm6900_vm9, %v6851_v44  ;;  %v5957_v55 = vsel %vm1159_vm5, %v5954_v27, %v5956_v41 }
 0x415   : > { %v6222_v57 = vmax.f32 %v6042_v60, %v6135_v50  ;;  %v5863_v52 = vmax.f32 %v17285_v23, %v5777_v45  ;;  %v6137_v34 = vsel %vm4047_vm7, %v6134_v13, %v6136_v25  ;;  %v6498_v39 = vmax.f32 %v6466_v61, %v17291_v21 }
 0x416   : > { %7015 = vrot.lane.b32.xlu1 %v6529_v7, %s12764_s10  ;;  %v6435_v5 = vmax.f32 %v17208_v33, %v17242_v20  ;;  %v6436_v22 = vmax.f32 %v17223_v46, %v17262_v1  ;;  %v5781_v16 = vrot.slane %v5624_v10, 1  ;;  %v5961_v35 = vrot.slane %v5624_v10, 2 }
 0x417   : > { %v6402_v40 = vmax.f32 %v6222_v57, %v6315_v14  ;;  %v6043_v38 = vmax.f32 %v5863_v52, %v5957_v55  ;;  %v6141_v4 = vrot.slane %v5624_v10, 3  ;;  %v6321_v19 = vrot.slane %v5624_v10, 4  ;;  %v6982_v60 = vpop.permute.xlu0 %6981  ;;  %v17489_v52 = vld [vmem:[#allocation4 + $0x20] sm:$0xff] }
 0x418   : > { %v6467_v23 = vmax.f32 %v6435_v5, %v17276_v17  ;;  %v6468_v27 = vmax.f32 %v6436_v22, %v17291_v21  ;;  %v5782_v13 = vsel %vm491_vm4, %v16924_v11, %v5781_v16  ;;  %v5962_v46 = vsel %vm1159_vm5, %v16934_v37, %v5961_v35  ;;  %7070 = vst.msk [vmem:[#allocation4 + $0x79] sm:$0xff] %vm7061_vm10, %v6982_v60 }
 0x419   : > { %v6530_v54 = vmax.f32 %v6498_v39, %v6402_v40  ;;  %v6223_v51 = vmax.f32 %v6043_v38, %v6137_v34  ;;  %v5865_v33 = vmax.f32 %v16903_v15, %v5782_v13  ;;  %v6317_v59 = vsel %vm636_vm0, %v6314_v2, %v6316_v9  ;;  %v17497_v39 = vld [vmem:[#allocation4 + $0x38] sm:$0xff] }
 0x41a   : > { %v6499_v56 = vmax.f32 %v6467_v23, %v17310_v29  ;;  %v6500_v53 = vmax.f32 %v6468_v27, %v6402_v40  ;;  %v6142_v41 = vsel %vm4047_vm7, %v16948_v42, %v6141_v4  ;;  %v6437_v15 = vmax.f32 %v17242_v20, %v17276_v17 }
 0x41b   : > { %7017 = vrot.lane.b32.xlu0 %v6530_v54, %s12764_s10  ;;  %v17343_v11 = vmax.f32 %v6223_v51, %v6317_v59  ;;  %v6045_v50 = vmax.f32 %v5865_v33, %v5962_v46  ;;  %v6322_v37 = vsel %vm636_vm0, %v16959_v0, %v6321_v19  ;;  %v6438_v2 = vmax.f32 %v17262_v1, %v17291_v21  ;;  %v17362_v1 = vld [vmem:[%s19520_s4 + $0x38] sm:$0xff]  ;;  %v10711_v59 = vld [vmem:[%s19520_s4 + $0x30] sm:$0xff] }
 0x41c   : > { %v5786_v14 = vrot.slane %v17336_v58, 1  ;;  %v5966_v25 = vrot.slane %v17336_v58, 2  ;;  %v6532_v10 = vmax.f32 %v6500_v53, %v16975_v3  ;;  %v6469_v7 = vmax.f32 %v6437_v15, %v17310_v29  ;;  %v6984_v61 = vpop.permute.xlu1 %6983  ;;  %12162 = vmatprep.subr.mxu0 %v17362_v1 }
 0x41d   : > { %v6531_v42 = vmax.f32 %v6499_v56, %v17343_v11  ;;  %v6225_v44 = vmax.f32 %v6045_v50, %v6142_v41  ;;  %v6146_v0 = vrot.slane %v17336_v58, 3  ;;  %7071 = vst.msk [vmem:[#allocation4 + $0x81] sm:$0xff] %vm7061_vm10, %v6984_v61  ;;  %v6439_v8 = vmax.f32 %v17276_v17, %v17310_v29  ;;  %v20014_v29 = vld [vmem:[#allocation27_spill] sm:$0xff]  ;;  %v10677_v50 = vld [vmem:[%s19520_s4 + $0x20] sm:$0xff] }
 0x41e   : > { %v5787_v20 = vsel %vm491_vm4, %v16927_v62, %v5786_v14  ;;  %v6501_v45 = vmax.f32 %v6469_v7, %v17343_v11  ;;  %v5967_v9 = vsel %vm1159_vm5, %v16943_v30, %v5966_v25  ;;  %v17371_v62 = vmax.f32 %v6438_v2, %v6402_v40  ;;  %v17561_v14 = vld [vmem:[#allocation4 + $0x68] sm:$0xff]  ;;  %v12746_v25 = vld [vmem:[%s19520_s4 + $0x28] sm:$0xff] }
 0x41f   : > { %7019 = vrot.lane.b32.xlu1 %v6531_v42, %s12764_s10  ;;  %7021 = vrot.lane.b32.xlu0 %v6532_v10, %s12764_s10  ;;  %v17366_v21 = vmax.f32 %v6225_v44, %v6322_v37  ;;  %v5867_v57 = vmax.f32 %v16908_v47, %v5787_v20  ;;  %v20013_v6 = vmov 0.0   ;;  %v6147_v31 = vsel %vm4047_vm7, %v16953_v49, %v6146_v0  ;;  %v17573_v7 = vld [vmem:[%s19520_s4 + $0x48] sm:$0xff] }
 0x420   : > { %v6853_v47 = vpop.permute.xlu0 %6852  ;;  %6537 = vst.msk [vmem:[#allocation4] sm:$0xff] %vm6536_vm11, %v20013_v6  ;;  %6538 = vst.msk [vmem:[#allocation4 + $0x8] sm:$0xff] %vm6536_vm11, %v20013_v6  ;;  %v6326_v12 = vrot.slane %v17336_v58, 4  ;;  %v6502_v49 = vmax.f32 %v17371_v62, %v16975_v3  ;;  %v6471_v43 = vmax.f32 %v6439_v8, %v17343_v11  ;;  %v7207_v34 = vrot.slane %v17489_v52, 1 }
 0x421   : > { %v6533_v30 = vmax.f32 %v6501_v45, %v17366_v21  ;;  %6542 = vst.msk [vmem:[#allocation4 + $0x198] sm:$0xff] %vm6536_vm11, %v20013_v6  ;;  %6543 = vst.msk [vmem:[#allocation4 + $0x1a0] sm:$0xff] %vm6536_vm11, %v20013_v6  ;;  %v6047_v18 = vmax.f32 %v5867_v57, %v5967_v9  ;;  %v7212_v19 = vrot.slane %v17497_v39, 1  ;;  %v7222_v62 = vrot.slane %v17561_v14, 1 }
 0x422   : > { %6925 = vst.msk [vmem:[#allocation4 + $0x139] sm:$0xff] %vm6900_vm9, %v6853_v47  ;;  %v6327_v48 = vsel %vm636_vm0, %v16964_v32, %v6326_v12  ;;  %v6503_v5 = vmax.f32 %v6471_v43, %v17366_v21 }
 0x423   : > { %6547 = vst.msk [vmem:[#allocation4 + $0x18] sm:$0x1] %vm6546_vm12, %v20013_v6  ;;  %6548 = vst.msk [vmem:[#allocation4 + $0x30] sm:$0x1] %vm6546_vm12, %v20013_v6  ;;  %7023 = vrot.lane.b32.xlu1 %v6533_v30, %s12764_s10  ;;  %6703 = vrot.lane.b32.xlu0 %v16180_v26, %s12762_s8  ;;  %v6227_v36 = vmax.f32 %v6047_v18, %v6147_v31  ;;  %v6534_v26 = vmax.f32 %v6502_v49, %v16977_v24 }
 0x424   : > { %6549 = vst.msk [vmem:[#allocation4 + $0x48] sm:$0x1] %vm6546_vm12, %v20013_v6  ;;  %6550 = vst.msk [vmem:[#allocation4 + $0x60] sm:$0x1] %vm6546_vm12, %v20013_v6  ;;  %v17600_v47 = vld [vmem:[#allocation4 + $0x80] sm:$0xff] }
 0x425   : > { %6551 = vst.msk [vmem:[#allocation4 + $0x78] sm:$0x1] %vm6546_vm12, %v20013_v6  ;;  %6552 = vst.msk [vmem:[#allocation4 + $0x90] sm:$0x1] %vm6546_vm12, %v20013_v6  ;;  %v6855_v17 = vpop.permute.xlu1 %6854  ;;  %v6407_v32 = vmax.f32 %v6227_v36, %v6327_v48  ;;  %v7227_v12 = vrot.slane %v17600_v47, 1 }
 0x426   : > { %6553 = vst.msk [vmem:[#allocation4 + $0xa8] sm:$0x1] %vm6546_vm12, %v20013_v6  ;;  %6554 = vst.msk [vmem:[#allocation4 + $0xc0] sm:$0x1] %vm6546_vm12, %v20013_v6 }
 0x427   : > { %6555 = vst.msk [vmem:[#allocation4 + $0xd8] sm:$0x1] %vm6546_vm12, %v20013_v6  ;;  %6556 = vst.msk [vmem:[#allocation4 + $0xf0] sm:$0x1] %vm6546_vm12, %v20013_v6  ;;  %6705 = vrot.lane.b32.xlu1 %v20014_v29, %s12762_s8  ;;  %6864 = vrot.lane.b32.xlu0 %v16999_v28, %s12763_s9  ;;  %v17492_v3 = vld [vmem:[#allocation4] sm:$0xff]  ;;  %v17494_v55 = vld [vmem:[#allocation4 + $0x8] sm:$0xff]  ;;  %v6535_v46 = vmax.f32 %v6503_v5, %v6407_v32 }
 0x428   : > { %6557 = vst.msk [vmem:[#allocation4 + $0x108] sm:$0x1] %vm6546_vm12, %v20013_v6  ;;  %6558 = vst.msk [vmem:[#allocation4 + $0x120] sm:$0x1] %vm6546_vm12, %v20013_v6  ;;  %v7201_v22 = vrot.slane %v17492_v3, 1  ;;  %12062 = vmatprep.mubr.msk.f32.mxu0 %vm6536_vm11, %v17492_v3  ;;  %v7202_v24 = vrot.slane %v17494_v55, 1 }
 0x429   : > { %6559 = vst.msk [vmem:[#allocation4 + $0x138] sm:$0x1] %vm6546_vm12, %v20013_v6  ;;  %6560 = vst.msk [vmem:[#allocation4 + $0x150] sm:$0x1] %vm6546_vm12, %v20013_v6  ;;  %v6857_v40 = vpop.permute.xlu0 %6856  ;;  %12063 = vmatmul.mubr.msk.f32.vlgmr.msra.gmra.mxu0 %vm6536_vm11, %v17494_v55  ;;  %v7862_v56 = vrot.slane %v17492_v3, 2  ;;  %v7863_v42 = vrot.slane %v17494_v55, 2 }
 0x42a   : > { %6561 = vst.msk [vmem:[#allocation4 + $0x168] sm:$0x1] %vm6546_vm12, %v20013_v6  ;;  %6562 = vst.msk [vmem:[#allocation4 + $0x180] sm:$0x1] %vm6546_vm12, %v20013_v6  ;;  %v17503_v28 = vld [vmem:[#allocation4 + $0x18] sm:$0xff]  ;;  %v17511_v23 = vld [vmem:[#allocation4 + $0x30] sm:$0xff]  ;;  %v7203_v27 = vsel %vm491_vm4, %v7201_v22, %v7202_v24  ;;  %12163 = vmatpush3.msra.mxu0 %v17362_v1 }
 0x42b   : > { %6563 = vst.msk [vmem:[#allocation4 + $0x29] sm:$0x1] %vm6546_vm12, %v20013_v6  ;;  %6564 = vst.msk [vmem:[#allocation4 + $0x41] sm:$0x1] %vm6546_vm12, %v20013_v6  ;;  %v7206_v38 = vrot.slane %v17503_v28, 1  ;;  %6866 = vrot.lane.b32.xlu1 %v17035_v63, %s12763_s9  ;;  %7025 = vrot.lane.b32.xlu0 %v6534_v26, %s12764_s10  ;;  %v17529_v63 = vld [vmem:[#allocation4 + $0x50] sm:$0xff]  ;;  %v17586_v21 = vsel %vm1159_vm5, %v7862_v56, %v7863_v42 }
 0x42c   : > { %6565 = vst.msk [vmem:[#allocation4 + $0x59] sm:$0x1] %vm6546_vm12, %v20013_v6  ;;  %6566 = vst.msk [vmem:[#allocation4 + $0x71] sm:$0x1] %vm6546_vm12, %v20013_v6  ;;  %12065 = vmatprep.mubr.msk.f32.mxu0 %vm6536_vm11, %v17503_v28  ;;  %12010 = vmatprep.mubr.msk.f32.mxu1 %vm6536_vm11, %v7203_v27  ;;  %v7211_v58 = vrot.slane %v17511_v23, 1  ;;  %v17546_v60 = vld [vmem:[#allocation4 + $0x48] sm:$0xff] }
 0x42d   : > { %6567 = vst.msk [vmem:[#allocation4 + $0x89] sm:$0x1] %vm6546_vm12, %v20013_v6  ;;  %6568 = vst.msk [vmem:[#allocation4 + $0xa1] sm:$0x1] %vm6546_vm12, %v20013_v6  ;;  %v17527_v33 = vsel %vm491_vm4, %v7206_v38, %v7207_v34  ;;  %12066 = vmatmul.mubr.msk.f32.gmra.mxu0 %vm6536_vm11, %v17489_v52  ;;  %v7217_v37 = vrot.slane %v17529_v63, 1  ;;  %12164 = vmatprep.subr.mxu0 %v10711_v59  ;;  %v7216_v44 = vrot.slane %v17546_v60, 1 }
 0x42e   : > { %6569 = vst.msk [vmem:[#allocation4 + $0xb9] sm:$0x1] %vm6546_vm12, %v20013_v6  ;;  %6570 = vst.msk [vmem:[#allocation4 + $0xd1] sm:$0x1] %vm6546_vm12, %v20013_v6  ;;  %v6859_v11 = vpop.permute.xlu1 %6858  ;;  %12068 = vmatprep.mubr.msk.f32.mxu0 %vm6536_vm11, %v17511_v23  ;;  %v17555_v15 = vsel %vm491_vm4, %v7211_v58, %v7212_v19  ;;  %v17583_v0 = vld [vmem:[#allocation4 + $0x60] sm:$0xff]  ;;  %12165 = vmatpush3.msra.mxu0 %v10711_v59  ;;  %v17614_v18 = vld [vmem:[#allocation4 + $0x78] sm:$0xff] }
 0x42f   : > { %6571 = vst.msk [vmem:[#allocation4 + $0xe9] sm:$0x1] %vm6546_vm12, %v20013_v6  ;;  %6572 = vst.msk [vmem:[#allocation4 + $0x101] sm:$0x1] %vm6546_vm12, %v20013_v6  ;;  %7027 = vrot.lane.b32.xlu1 %v6535_v46, %s12764_s10  ;;  %v17594_v9 = vsel %vm491_vm4, %v7216_v44, %v7217_v37  ;;  %v7221_v30 = vrot.slane %v17583_v0, 1  ;;  %v7226_v43 = vrot.slane %v17614_v18, 1 }
 0x430   : > { %6573 = vst.msk [vmem:[#allocation4 + $0x119] sm:$0x1] %vm6546_vm12, %v20013_v6  ;;  %6574 = vst.msk [vmem:[#allocation4 + $0x131] sm:$0x1] %vm6546_vm12, %v20013_v6 }
 0x431   : > { %6575 = vst.msk [vmem:[#allocation4 + $0x149] sm:$0x1] %vm6546_vm12, %v20013_v6  ;;  %6576 = vst.msk [vmem:[#allocation4 + $0x161] sm:$0x1] %vm6546_vm12, %v20013_v6  ;;  %12069 = vmatmul.mubr.msk.f32.gmra.mxu0 %vm6536_vm11, %v17497_v39  ;;  %v17619_v31 = vsel %vm491_vm4, %v7221_v30, %v7222_v62  ;;  %v17639_v29 = vsel %vm491_vm4, %v7226_v43, %v7227_v12 }
 0x432   : > { %6577 = vst.msk [vmem:[#allocation4 + $0x179] sm:$0x1] %vm6546_vm12, %v20013_v6  ;;  %6578 = vst.msk [vmem:[#allocation4 + $0x191] sm:$0x1] %vm6546_vm12, %v20013_v6  ;;  %v17509_v4 = vld [vmem:[#allocation4 + $0x28] sm:$0x3]  ;;  %v6986_v1 = vpop.permute.xlu0 %6985  ;;  %12071 = vmatprep.mubr.msk.f32.mxu0 %vm6536_vm11, %v17546_v60 }
 0x433   : > { %6540 = vst.msk [vmem:[#allocation4 + $0x10] sm:$0x3] %vm6539_vm13, %v20013_v6  ;;  %6544 = vst.msk [vmem:[#allocation4 + $0x1a8] sm:$0x3] %vm6539_vm13, %v20013_v6  ;;  %v7209_v13 = vrot.slane %v17509_v4, 1 }
 0x434   : > { %6926 = vst.msk [vmem:[#allocation4 + $0x141] sm:$0xff] %vm6900_vm9, %v6855_v17  ;;  %6927 = vst.msk [vmem:[#allocation4 + $0x151] sm:$0xff] %vm6900_vm9, %v6857_v40  ;;  %v17520_v54 = vld [vmem:[#allocation4 + $0x40] sm:$0x3]  ;;  %v17558_v2 = vld [vmem:[#allocation4 + $0x58] sm:$0x3] }
 0x435   : > { %v17543_v53 = vsel %vm491_vm4, %v7207_v34, %v7209_v13  ;;  %v7214_v41 = vrot.slane %v17520_v54, 1  ;;  %6928 = vst.msk [vmem:[#allocation4 + $0x159] sm:$0xff] %vm6900_vm9, %v6859_v11  ;;  %v7219_v20 = vrot.slane %v17558_v2, 1  ;;  %v17597_v57 = vld [vmem:[#allocation4 + $0x70] sm:$0x3]  ;;  %12072 = vmatmul.mubr.msk.f32.gmra.mxu0 %vm6536_vm11, %v17529_v63  ;;  %20015 = vst [vmem:[#allocation21_spill] sm:$0xff] %v17639_v29 }
 0x436   : > { %7072 = vst.msk [vmem:[#allocation4 + $0x91] sm:$0xff] %vm7061_vm10, %v6986_v1  ;;  %v7224_v6 = vrot.slane %v17597_v57, 1  ;;  %12074 = vmatprep.mubr.msk.f32.mxu0 %vm6536_vm11, %v17583_v0  ;;  %v17622_v36 = vld [vmem:[#allocation4 + $0x88] sm:$0x3] }
 0x437   : > { %v17580_v61 = vsel %vm491_vm4, %v7212_v19, %v7214_v41  ;;  %v17611_v8 = vsel %vm491_vm4, %v7217_v37, %v7219_v20  ;;  %v6988_v49 = vpop.permute.xlu1 %6987  ;;  %v7229_v48 = vrot.slane %v17622_v36, 1  ;;  %v17703_v37 = vld [vmem:[%s19520_s4 + $0x58] sm:$0xff] }
 0x438   : > { %7073 = vst.msk [vmem:[#allocation4 + $0x99] sm:$0xff] %vm7061_vm10, %v6988_v49  ;;  %v17633_v17 = vsel %vm491_vm4, %v7222_v62, %v7224_v6  ;;  %12266 = vmatprep.subr.mxu0 %v17703_v37 }
 0x439   : > { %12075 = vmatmul.mubr.msk.f32.gmra.mxu0 %vm6536_vm11, %v17561_v14  ;;  %v17650_v3 = vsel %vm491_vm4, %v7227_v12, %v7229_v48 }
 0x43a   : > { %v7096_v16 = vld [vmem:[#allocation4 + $0x10] sm:$0x3]  ;;  %12077 = vmatprep.mubr.msk.f32.mxu0 %vm6536_vm11, %v17614_v18  ;;  %20016 = vst [vmem:[#allocation24_spill] sm:$0xff] %v17650_v3 }
 0x43b   : > { %v7204_v35 = vrot.slane %v7096_v16, 1  ;;  %v7865_v10 = vrot.slane %v7096_v16, 2 }
 0x43d   : > { %v7205_v51 = vsel %vm491_vm4, %v7202_v24, %v7204_v35  ;;  %v17589_v45 = vsel %vm1159_vm5, %v7863_v42, %v7865_v10  ;;  %v17641_v26 = vld [vmem:[#allocation4 + $0x90] sm:$0xff]  ;;  %12078 = vmatmul.mubr.msk.f32.gmra.mxu0 %vm6536_vm11, %v17600_v47 }
 0x43e   : > { %12011 = vmatmul.mubr.msk.f32.vlgmr.msra.gmra.mxu1 %vm6536_vm11, %v7205_v51  ;;  %12080 = vmatprep.mubr.msk.f32.mxu0 %vm6536_vm11, %v17641_v26  ;;  %v7231_v5 = vrot.slane %v17641_v26, 1 }
 0x43f   : > { %12013 = vmatprep.mubr.msk.f32.mxu1 %vm6536_vm11, %v17527_v33  ;;  %12111 = vmatpush3.msra.mxu1 %v12746_v25  ;;  %v6861_v55 = vpop.permute.xlu0 %6860  ;;  %v17654_v34 = vld [vmem:[#allocation4 + $0x98] sm:$0xff]  ;;  %v17656_v32 = vld [vmem:[#allocation4 + $0xa0] sm:$0x3] }
 0x440   : > { %12112 = vmatprep.subr.mxu1 %v10677_v50  ;;  %6929 = vst.msk [vmem:[#allocation4 + $0x169] sm:$0xff] %vm6900_vm9, %v6861_v55  ;;  %v7232_v22 = vrot.slane %v17654_v34, 1  ;;  %v7234_v24 = vrot.slane %v17656_v32, 1 }
 0x441   : > { %12113 = vmatpush3.msra.mxu1 %v10677_v50  ;;  %12081 = vmatmul.mubr.msk.f32.gmra.mxu0 %vm6536_vm11, %v17654_v34 }
 0x442   : > { %12014 = vmatmul.mubr.msk.f32.gmra.mxu1 %vm6536_vm11, %v17543_v53  ;;  %12214 = vmatprep.subr.mxu1 %v17573_v7  ;;  %v17667_v16 = vsel %vm491_vm4, %v7231_v5, %v7232_v22  ;;  %v17670_v40 = vsel %vm491_vm4, %v7232_v22, %v7234_v24 }
 0x443   : > { %12016 = vmatprep.mubr.msk.f32.mxu1 %vm6536_vm11, %v17555_v15  ;;  %20017 = vst [vmem:[#allocation35_spill] sm:$0xff] %v17667_v16  ;;  %20018 = vst [vmem:[#allocation30_spill] sm:$0xff] %v17670_v40 }
 0x446   : > { %12017 = vmatmul.mubr.msk.f32.gmra.mxu1 %vm6536_vm11, %v17580_v61  ;;  %v6863_v38 = vpop.permute.xlu1 %6862 }
 0x447   : > { %12019 = vmatprep.mubr.msk.f32.mxu1 %vm6536_vm11, %v17594_v9  ;;  %6930 = vst.msk [vmem:[#allocation4 + $0x171] sm:$0xff] %vm6900_vm9, %v6863_v38 }
 0x44a   : > { %12020 = vmatmul.mubr.msk.f32.gmra.mxu1 %vm6536_vm11, %v17611_v8 }
 0x44b   : > { %12022 = vmatprep.mubr.msk.f32.mxu1 %vm6536_vm11, %v17619_v31 }
 0x44e   : > { %12023 = vmatmul.mubr.msk.f32.gmra.mxu1 %vm6536_vm11, %v17633_v17  ;;  %v6990_v35 = vpop.permute.xlu0 %6989 }
 0x44f   : > { %12025 = vmatprep.mubr.msk.f32.mxu1 %vm6536_vm11, %v17639_v29  ;;  %7074 = vst.msk [vmem:[#allocation4 + $0xa9] sm:$0xff] %vm7061_vm10, %v6990_v35 }
 0x452   : > { %12026 = vmatmul.mubr.msk.f32.gmra.mxu1 %vm6536_vm11, %v17650_v3  ;;  %v6992_v27 = vpop.permute.xlu1 %6991 }
 0x453   : > { %12028 = vmatprep.mubr.msk.f32.mxu1 %vm6536_vm11, %v17667_v16  ;;  %7075 = vst.msk [vmem:[#allocation4 + $0xb1] sm:$0xff] %vm7061_vm10, %v6992_v27 }
 0x456   : > { %12029 = vmatmul.mubr.msk.f32.gmra.mxu1 %vm6536_vm11, %v17670_v40  ;;  %v17679_v13 = vld [vmem:[#allocation4 + $0xa8] sm:$0xff] }
 0x457   : > { %12083 = vmatprep.mubr.msk.f32.mxu0 %vm6536_vm11, %v17679_v13  ;;  %v6994_v19 = vpop.permute.xlu0 %6993  ;;  %v7236_v59 = vrot.slane %v17679_v13, 1 }
 0x458   : > { %7076 = vst.msk [vmem:[#allocation4 + $0xc1] sm:$0xff] %vm7061_vm10, %v6994_v19 }
 0x45a   : > { %v17684_v46 = vld [vmem:[#allocation4 + $0xb0] sm:$0xff]  ;;  %v17686_v58 = vld [vmem:[#allocation4 + $0xb8] sm:$0x3] }
 0x45b   : > { %v6996_v51 = vpop.permute.xlu1 %6995  ;;  %12084 = vmatmul.mubr.msk.f32.gmra.mxu0 %vm6536_vm11, %v17684_v46  ;;  %v7237_v56 = vrot.slane %v17684_v46, 1  ;;  %v7239_v41 = vrot.slane %v17686_v58, 1 }
 0x45c   : > { %7077 = vst.msk [vmem:[#allocation4 + $0xc9] sm:$0xff] %vm7061_vm10, %v6996_v51 }
 0x45d   : > { %v17695_v11 = vsel %vm491_vm4, %v7236_v59, %v7237_v56  ;;  %v17698_v50 = vsel %vm491_vm4, %v7237_v56, %v7239_v41 }
 0x45e   : > { %20019 = vst [vmem:[#allocation33_spill] sm:$0xff] %v17695_v11  ;;  %20020 = vst [vmem:[#allocation40_spill] sm:$0xff] %v17698_v50  ;;  %12031 = vmatprep.mubr.msk.f32.mxu1 %vm6536_vm11, %v17695_v11 }
 0x45f   : > { %v6998_v25 = vpop.permute.xlu0 %6997  ;;  %v17705_v42 = vld [vmem:[#allocation4 + $0xc0] sm:$0xff]  ;;  %12032 = vmatmul.mubr.msk.f32.gmra.mxu1 %vm6536_vm11, %v17698_v50 }
 0x460   : > { %7078 = vst.msk [vmem:[#allocation4 + $0xd9] sm:$0xff] %vm7061_vm10, %v6998_v25  ;;  %12086 = vmatprep.mubr.msk.f32.mxu0 %vm6536_vm11, %v17705_v42  ;;  %v7241_v1 = vrot.slane %v17705_v42, 1 }
 0x463   : > { %v17715_v10 = vld [vmem:[#allocation4 + $0xc8] sm:$0xff]  ;;  %v17717_v44 = vld [vmem:[#allocation4 + $0xd0] sm:$0x3] }
 0x464   : > { %v7000_v20 = vpop.permute.xlu1 %6999  ;;  %12087 = vmatmul.mubr.msk.f32.gmra.mxu0 %vm6536_vm11, %v17715_v10  ;;  %v7242_v62 = vrot.slane %v17715_v10, 1  ;;  %v7244_v30 = vrot.slane %v17717_v44, 1 }
 0x465   : > { %7079 = vst.msk [vmem:[#allocation4 + $0xe1] sm:$0xff] %vm7061_vm10, %v7000_v20 }
 0x466   : > { %v17726_v6 = vsel %vm491_vm4, %v7241_v1, %v7242_v62  ;;  %v17729_v12 = vsel %vm491_vm4, %v7242_v62, %v7244_v30 }
 0x467   : > { %20021 = vst [vmem:[#allocation38_spill] sm:$0xff] %v17726_v6  ;;  %20022 = vst [vmem:[#allocation39_spill] sm:$0xff] %v17729_v12  ;;  %v17731_v49 = vld [vmem:[#allocation4 + $0xd8] sm:$0xff]  ;;  %12034 = vmatprep.mubr.msk.f32.mxu1 %vm6536_vm11, %v17726_v6 }
 0x468   : > { %12089 = vmatprep.mubr.msk.f32.mxu0 %vm6536_vm11, %v17731_v49  ;;  %12035 = vmatmul.mubr.msk.f32.gmra.mxu1 %vm6536_vm11, %v17729_v12  ;;  %v7246_v22 = vrot.slane %v17731_v49, 1 }
 0x469   : > { %v7002_v43 = vpop.permute.xlu0 %7001 }
 0x46a   : > { %7080 = vst.msk [vmem:[#allocation4 + $0xf1] sm:$0xff] %vm7061_vm10, %v7002_v43 }
 0x46c   : > { %v17740_v48 = vld [vmem:[#allocation4 + $0xe0] sm:$0xff]  ;;  %v17742_v55 = vld [vmem:[#allocation4 + $0xe8] sm:$0x3] }
 0x46d   : > { %20023 = vst [vmem:[#allocation43_spill] sm:$0xff] %v17740_v48  ;;  %v7004_v5 = vpop.permute.xlu1 %7003  ;;  %12090 = vmatmul.mubr.msk.f32.gmra.mxu0 %vm6536_vm11, %v17740_v48  ;;  %v7247_v24 = vrot.slane %v17740_v48, 1  ;;  %v7249_v38 = vrot.slane %v17742_v55, 1 }
 0x46e   : > { %7081 = vst.msk [vmem:[#allocation4 + $0xf9] sm:$0xff] %vm7061_vm10, %v7004_v5 }
 0x46f   : > { %v17751_v35 = vsel %vm491_vm4, %v7246_v22, %v7247_v24  ;;  %v17754_v27 = vsel %vm491_vm4, %v7247_v24, %v7249_v38 }
 0x470   : > { %20024 = vst [vmem:[#allocation41_spill] sm:$0xff] %v17751_v35  ;;  %20025 = vst [vmem:[#allocation42_spill] sm:$0xff] %v17754_v27  ;;  %12037 = vmatprep.mubr.msk.f32.mxu1 %vm6536_vm11, %v17751_v35 }
 0x471   : > { %v7006_v19 = vpop.permute.xlu0 %7005  ;;  %v17758_v51 = vld [vmem:[#allocation4 + $0xf0] sm:$0xff]  ;;  %12038 = vmatmul.mubr.msk.f32.gmra.mxu1 %vm6536_vm11, %v17754_v27 }
 0x472   : > { %7082 = vst.msk [vmem:[#allocation4 + $0x109] sm:$0xff] %vm7061_vm10, %v7006_v19  ;;  %12092 = vmatprep.mubr.msk.f32.mxu0 %vm6536_vm11, %v17758_v51  ;;  %v7251_v25 = vrot.slane %v17758_v51, 1 }
 0x475   : > { %v17765_v59 = vld [vmem:[#allocation4 + $0xf8] sm:$0xff]  ;;  %v17767_v56 = vld [vmem:[#allocation4 + $0x100] sm:$0x3] }
 0x476   : > { %20026 = vst [vmem:[#allocation44_spill] sm:$0xff] %v17765_v59  ;;  %v7008_v41 = vpop.permute.xlu1 %7007  ;;  %12093 = vmatmul.mubr.msk.f32.gmra.mxu0 %vm6536_vm11, %v17765_v59  ;;  %v7252_v20 = vrot.slane %v17765_v59, 1  ;;  %v7254_v1 = vrot.slane %v17767_v56, 1 }
 0x477   : > { %7083 = vst.msk [vmem:[#allocation4 + $0x111] sm:$0xff] %vm7061_vm10, %v7008_v41 }
 0x478   : > { %v17776_v62 = vsel %vm491_vm4, %v7251_v25, %v7252_v20  ;;  %v17779_v30 = vsel %vm491_vm4, %v7252_v20, %v7254_v1 }
 0x479   : > { %20027 = vst [vmem:[#allocation52_spill] sm:$0xff] %v17776_v62  ;;  %20028 = vst [vmem:[#allocation45_spill] sm:$0xff] %v17779_v30  ;;  %v17781_v43 = vld [vmem:[#allocation4 + $0x108] sm:$0xff]  ;;  %12040 = vmatprep.mubr.msk.f32.mxu1 %vm6536_vm11, %v17776_v62 }
 0x47a   : > { %12095 = vmatprep.mubr.msk.f32.mxu0 %vm6536_vm11, %v17781_v43  ;;  %12041 = vmatmul.mubr.msk.f32.gmra.mxu1 %vm6536_vm11, %v17779_v30  ;;  %v7256_v19 = vrot.slane %v17781_v43, 1 }
 0x47b   : > { %v7010_v5 = vpop.permute.xlu0 %7009 }
 0x47c   : > { %7084 = vst.msk [vmem:[#allocation4 + $0x121] sm:$0xff] %vm7061_vm10, %v7010_v5 }
 0x47e   : > { %v17790_v22 = vld [vmem:[#allocation4 + $0x110] sm:$0xff]  ;;  %v17792_v24 = vld [vmem:[#allocation4 + $0x118] sm:$0x3] }
 0x47f   : > { %20029 = vst [vmem:[#allocation48_spill] sm:$0xff] %v17790_v22  ;;  %v7012_v38 = vpop.permute.xlu1 %7011  ;;  %12096 = vmatmul.mubr.msk.f32.gmra.mxu0 %vm6536_vm11, %v17790_v22  ;;  %v7257_v41 = vrot.slane %v17790_v22, 1  ;;  %v7259_v25 = vrot.slane %v17792_v24, 1 }
 0x480   : > { %7085 = vst.msk [vmem:[#allocation4 + $0x129] sm:$0xff] %vm7061_vm10, %v7012_v38 }
 0x481   : > { %v17801_v20 = vsel %vm491_vm4, %v7256_v19, %v7257_v41  ;;  %v17804_v1 = vsel %vm491_vm4, %v7257_v41, %v7259_v25 }
 0x482   : > { %20030 = vst [vmem:[#allocation46_spill] sm:$0xff] %v17801_v20  ;;  %20031 = vst [vmem:[#allocation47_spill] sm:$0xff] %v17804_v1  ;;  %12043 = vmatprep.mubr.msk.f32.mxu1 %vm6536_vm11, %v17801_v20 }
 0x483   : > { %v7014_v5 = vpop.permute.xlu0 %7013  ;;  %v17808_v30 = vld [vmem:[#allocation4 + $0x120] sm:$0xff]  ;;  %12044 = vmatmul.mubr.msk.f32.gmra.mxu1 %vm6536_vm11, %v17804_v1 }
 0x484   : > { %7086 = vst.msk [vmem:[#allocation4 + $0x139] sm:$0xff] %vm7061_vm10, %v7014_v5  ;;  %12098 = vmatprep.mubr.msk.f32.mxu0 %vm6536_vm11, %v17808_v30  ;;  %v7261_v25 = vrot.slane %v17808_v30, 1 }
 0x487   : > { %v17815_v38 = vld [vmem:[#allocation4 + $0x128] sm:$0xff]  ;;  %v17817_v19 = vld [vmem:[#allocation4 + $0x130] sm:$0x3] }
 0x488   : > { %20032 = vst [vmem:[#allocation51_spill] sm:$0xff] %v17815_v38  ;;  %v7016_v41 = vpop.permute.xlu1 %7015  ;;  %12099 = vmatmul.mubr.msk.f32.gmra.mxu0 %vm6536_vm11, %v17815_v38  ;;  %v7262_v20 = vrot.slane %v17815_v38, 1  ;;  %v7264_v62 = vrot.slane %v17817_v19, 1 }
 0x489   : > { %7087 = vst.msk [vmem:[#allocation4 + $0x141] sm:$0xff] %vm7061_vm10, %v7016_v41 }
 0x48a   : > { %v17826_v5 = vsel %vm491_vm4, %v7261_v25, %v7262_v20  ;;  %v17829_v1 = vsel %vm491_vm4, %v7262_v20, %v7264_v62 }
 0x48b   : > { %20033 = vst [vmem:[#allocation49_spill] sm:$0xff] %v17826_v5  ;;  %20034 = vst [vmem:[#allocation50_spill] sm:$0xff] %v17829_v1  ;;  %v17831_v27 = vld [vmem:[#allocation4 + $0x138] sm:$0xff]  ;;  %12046 = vmatprep.mubr.msk.f32.mxu1 %vm6536_vm11, %v17826_v5 }
 0x48c   : > { %20035 = vst [vmem:[#allocation55_spill] sm:$0xff] %v17831_v27  ;;  %12101 = vmatprep.mubr.msk.f32.mxu0 %vm6536_vm11, %v17831_v27  ;;  %12047 = vmatmul.mubr.msk.f32.gmra.mxu1 %vm6536_vm11, %v17829_v1  ;;  %v7266_v5 = vrot.slane %v17831_v27, 1 }
 0x48d   : > { %v7018_v35 = vpop.permute.xlu0 %7017 }
 0x48e   : > { %7088 = vst.msk [vmem:[#allocation4 + $0x151] sm:$0xff] %vm7061_vm10, %v7018_v35 }
 0x490   : > { %v17840_v41 = vld [vmem:[#allocation4 + $0x140] sm:$0xff]  ;;  %v17842_v25 = vld [vmem:[#allocation4 + $0x148] sm:$0x3] }
 0x491   : > { %20036 = vst [vmem:[#allocation53_spill] sm:$0xff] %v17840_v41  ;;  %v7020_v62 = vpop.permute.xlu1 %7019  ;;  %v7022_v20 = vpop.permute.xlu0 %7021  ;;  %12102 = vmatmul.mubr.msk.f32.gmra.mxu0 %vm6536_vm11, %v17840_v41  ;;  %v7267_v12 = vrot.slane %v17840_v41, 1  ;;  %v7269_v6 = vrot.slane %v17842_v25, 1 }
 0x492   : > { %7089 = vst.msk [vmem:[#allocation4 + $0x159] sm:$0xff] %vm7061_vm10, %v7020_v62  ;;  %7090 = vst.msk [vmem:[#allocation4 + $0x169] sm:$0xff] %vm7061_vm10, %v7022_v20 }
 0x493   : > { %v17852_v35 = vsel %vm491_vm4, %v7266_v5, %v7267_v12  ;;  %v17855_v1 = vsel %vm491_vm4, %v7267_v12, %v7269_v6 }
 0x494   : > { %20037 = vst [vmem:[#allocation54_spill] sm:$0xff] %v17852_v35  ;;  %20038 = vst [vmem:[#allocation56_spill] sm:$0xff] %v17855_v1  ;;  %12049 = vmatprep.mubr.msk.f32.mxu1 %vm6536_vm11, %v17852_v35 }
 0x495   : > { %v7024_v50 = vpop.permute.xlu1 %7023  ;;  %v6704_v11 = vpop.permute.xlu0 %6703  ;;  %v17859_v40 = vld [vmem:[#allocation4 + $0x150] sm:$0xff]  ;;  %12050 = vmatmul.mubr.msk.f32.gmra.mxu1 %vm6536_vm11, %v17855_v1 }
 0x496   : > { %7091 = vst.msk [vmem:[#allocation4 + $0x171] sm:$0xff] %vm7061_vm10, %v7024_v50  ;;  %12104 = vmatprep.mubr.msk.f32.mxu0 %vm6536_vm11, %v17859_v40 }
 0x497   : > { %6770 = vst.msk [vmem:[#allocation4 + $0x181] sm:$0xff] %vm6739_vm8, %v6704_v11  ;;  %v7271_v11 = vrot.slane %v17859_v40, 1 }
 0x499   : > { %v6706_v5 = vpop.permute.xlu1 %6705  ;;  %v6865_v6 = vpop.permute.xlu0 %6864  ;;  %v17867_v12 = vld [vmem:[#allocation4 + $0x158] sm:$0xff]  ;;  %v17869_v62 = vld [vmem:[#allocation4 + $0x168] sm:$0xff]  ;;  %v17871_v20 = vld [vmem:[#allocation4 + $0x160] sm:$0x3] }
 0x49a   : > { %20039 = vst [vmem:[#allocation57_spill] sm:$0xff] %v17867_v12  ;;  %6771 = vst.msk [vmem:[#allocation4 + $0x189] sm:$0xff] %vm6739_vm8, %v6706_v5  ;;  %12105 = vmatmul.mubr.msk.f32.gmra.mxu0 %vm6536_vm11, %v17867_v12  ;;  %v7272_v50 = vrot.slane %v17867_v12, 1  ;;  %v7274_v1 = vrot.slane %v17871_v20, 1 }
 0x49b   : > { %6931 = vst.msk [vmem:[#allocation4 + $0x181] sm:$0xff] %vm6900_vm9, %v6865_v6  ;;  %12107 = vmatprep.mubr.msk.f32.mxu0 %vm6536_vm11, %v17869_v62 }
 0x49c   : > { %v17883_v35 = vsel %vm491_vm4, %v7271_v11, %v7272_v50  ;;  %v17886_v16 = vsel %vm491_vm4, %v7272_v50, %v7274_v1  ;;  %v7276_v1 = vrot.slane %v17869_v62, 1 }
 0x49d   : > { %20040 = vst [vmem:[#allocation60_spill] sm:$0xff] %v17883_v35  ;;  %20041 = vst [vmem:[#allocation58_spill] sm:$0xff] %v17886_v16  ;;  %v6867_v5 = vpop.permute.xlu1 %6866  ;;  %12052 = vmatprep.mubr.msk.f32.mxu1 %vm6536_vm11, %v17883_v35  ;;  %v7026_v6 = vpop.permute.xlu0 %7025  ;;  %v17890_v3 = vld [vmem:[#allocation4 + $0x170] sm:$0xff]  ;;  %v17892_v29 = vld [vmem:[#allocation4 + $0x178] sm:$0x3] }
 0x49e   : > { %20042 = vst [vmem:[#allocation59_spill] sm:$0xff] %v17890_v3  ;;  %6932 = vst.msk [vmem:[#allocation4 + $0x189] sm:$0xff] %vm6900_vm9, %v6867_v5  ;;  %12053 = vmatmul.mubr.msk.f32.gmra.mxu1 %vm6536_vm11, %v17886_v16  ;;  %12108 = vmatmul.mubr.msk.f32.gmra.mxu0 %vm6536_vm11, %v17890_v3  ;;  %v7277_v11 = vrot.slane %v17890_v3, 1  ;;  %v7279_v50 = vrot.slane %v17892_v29, 1  ;;  %v7868_v16 = vrot.slane %v17489_v52, 2 }
 0x49f   : > { %7092 = vst.msk [vmem:[#allocation4 + $0x181] sm:$0xff] %vm7061_vm10, %v7026_v6  ;;  %12166 = vmatprep.mubr.msk.f32.mxu0 %vm6536_vm11, %v17503_v28 }
 0x4a0   : > { %v17906_v35 = vsel %vm491_vm4, %v7276_v1, %v7277_v11  ;;  %v17909_v5 = vsel %vm491_vm4, %v7277_v11, %v7279_v50  ;;  %v10779_v1 = vld [vmem:[%s19520_s4 + $0x50] sm:$0xff]  ;;  %v7867_v11 = vrot.slane %v17503_v28, 2  ;;  %v7870_v50 = vrot.slane %v17509_v4, 2 }
 0x4a1   : > { %v7028_v6 = vpop.permute.xlu1 %7027  ;;  %12055 = vmatprep.mubr.msk.f32.mxu1 %vm6536_vm11, %v17906_v35  ;;  %v7873_v28 = vrot.slane %v17497_v39, 2  ;;  %v7872_v4 = vrot.slane %v17511_v23, 2 }
 0x4a2   : > { %7093 = vst.msk [vmem:[#allocation4 + $0x189] sm:$0xff] %vm7061_vm10, %v7028_v6  ;;  %12056 = vmatmul.mubr.msk.f32.gmra.mxu1 %vm6536_vm11, %v17909_v5  ;;  %12167 = vmatmul.mubr.msk.f32.vlgmr.msra.gmra.mxu0 %vm6536_vm11, %v17489_v52  ;;  %v10745_v52 = vld [vmem:[%s19520_s4 + $0x40] sm:$0xff]  ;;  %v17937_v6 = vsel %vm1159_vm5, %v7867_v11, %v7868_v16  ;;  %v7882_v11 = vrot.slane %v17583_v0, 2 }
 0x4a3   : > { %12169 = vmatprep.mubr.msk.f32.mxu0 %vm6536_vm11, %v17511_v23  ;;  %12114 = vmatprep.mubr.msk.f32.mxu1 %vm6536_vm11, %v17586_v21  ;;  %v17947_v21 = vsel %vm1159_vm5, %v7868_v16, %v7870_v50  ;;  %v17965_v23 = vsel %vm1159_vm5, %v7872_v4, %v7873_v28  ;;  %v7877_v16 = vrot.slane %v17546_v60, 2  ;;  %v7885_v50 = vrot.slane %v17597_v57, 2 }
 0x4a4   : > { %12267 = vmatpush3.msra.mxu0 %v17703_v37  ;;  %v7890_v4 = vrot.slane %v17622_v36, 2 }
 0x4a5   : > { %12268 = vmatprep.subr.mxu0 %v10779_v1 }
 0x4a6   : > { %12115 = vmatmul.mubr.msk.f32.vlgmr.msra.gmra.mxu1 %vm6536_vm11, %v17589_v45  ;;  %12170 = vmatmul.mubr.msk.f32.gmra.mxu0 %vm6536_vm11, %v17497_v39  ;;  %v7875_v45 = vrot.slane %v17520_v54, 2  ;;  %v17953_v39 = vld [vmem:[%s19520_s4 + $0x68] sm:$0xff]  ;;  %v7878_v54 = vrot.slane %v17529_v63, 2 }
 0x4a7   : > { %12215 = vmatpush3.msra.mxu1 %v17573_v7  ;;  %12117 = vmatprep.mubr.msk.f32.mxu1 %vm6536_vm11, %v17937_v6  ;;  %v17958_v7 = vld [vmem:[%s19520_s4 + $0x78] sm:$0xff] }
 0x4a8   : > { %12172 = vmatprep.mubr.msk.f32.mxu0 %vm6536_vm11, %v17546_v60  ;;  %12216 = vmatprep.subr.mxu1 %v10745_v52  ;;  %v17976_v37 = vsel %vm1159_vm5, %v7873_v28, %v7875_v45  ;;  %v7883_v60 = vrot.slane %v17561_v14, 2  ;;  %v7887_v28 = vrot.slane %v17614_v18, 2 }
 0x4a9   : > { %12217 = vmatpush3.msra.mxu1 %v10745_v52  ;;  %12269 = vmatpush3.msra.mxu0 %v10779_v1  ;;  %v7880_v1 = vrot.slane %v17558_v2, 2  ;;  %v7888_v52 = vrot.slane %v17600_v47, 2 }
 0x4aa   : > { %12118 = vmatmul.mubr.msk.f32.gmra.mxu1 %vm6536_vm11, %v17947_v21  ;;  %12173 = vmatmul.mubr.msk.f32.gmra.mxu0 %vm6536_vm11, %v17529_v63  ;;  %v17984_v63 = vsel %vm1159_vm5, %v7877_v16, %v7878_v54  ;;  %v18010_v57 = vsel %vm1159_vm5, %v7883_v60, %v7885_v50  ;;  %v7892_v16 = vrot.slane %v17641_v26, 2  ;;  %v7897_v50 = vrot.slane %v17679_v13, 2 }
 0x4ab   : > { %12120 = vmatprep.mubr.msk.f32.mxu1 %vm6536_vm11, %v17965_v23  ;;  %12175 = vmatprep.mubr.msk.f32.mxu0 %vm6536_vm11, %v17583_v0  ;;  %v17993_v2 = vsel %vm1159_vm5, %v7878_v54, %v7880_v1  ;;  %20044 = vst [vmem:[#allocation61_spill] sm:$0xff] %v18010_v57  ;;  %v18018_v45 = vsel %vm1159_vm5, %v7887_v28, %v7888_v52  ;;  %v7893_v54 = vrot.slane %v17654_v34, 2  ;;  %v7895_v1 = vrot.slane %v17656_v32, 2 }
 0x4ac   : > { %12318 = vmatprep.subr.mxu1 %v17953_v39  ;;  %12370 = vmatprep.subr.mxu0 %v17958_v7  ;;  %20045 = vst [vmem:[#allocation62_spill] sm:$0xff] %v18018_v45  ;;  %v18027_v36 = vsel %vm1159_vm5, %v7888_v52, %v7890_v4  ;;  %v7900_v52 = vrot.slane %v17686_v58, 2  ;;  %v7903_v4 = vrot.slane %v17715_v10, 2 }
 0x4ad   : > { %20046 = vst [vmem:[#allocation65_spill] sm:$0xff] %v18027_v36  ;;  %v18044_v32 = vsel %vm1159_vm5, %v7893_v54, %v7895_v1 }
 0x4ae   : > { %12121 = vmatmul.mubr.msk.f32.gmra.mxu1 %vm6536_vm11, %v17976_v37  ;;  %12176 = vmatmul.mubr.msk.f32.gmra.mxu0 %vm6536_vm11, %v17561_v14  ;;  %v18001_v14 = vsel %vm1159_vm5, %v7882_v11, %v7883_v60  ;;  %v18035_v60 = vsel %vm1159_vm5, %v7892_v16, %v7893_v54  ;;  %v7898_v11 = vrot.slane %v17684_v46, 2  ;;  %20048 = vst [vmem:[#allocation69_spill] sm:$0xff] %v18044_v32  ;;  %v7902_v54 = vrot.slane %v17705_v42, 2 }
 0x4af   : > { %12123 = vmatprep.mubr.msk.f32.mxu1 %vm6536_vm11, %v17984_v63  ;;  %12178 = vmatprep.mubr.msk.f32.mxu0 %vm6536_vm11, %v17614_v18  ;;  %20043 = vst [vmem:[#allocation63_spill] sm:$0xff] %v18001_v14  ;;  %20047 = vst [vmem:[#allocation67_spill] sm:$0xff] %v18035_v60  ;;  %v7905_v16 = vrot.slane %v17717_v44, 2 }
 0x4b0   : > { %v18052_v28 = vsel %vm1159_vm5, %v7897_v50, %v7898_v11  ;;  %v18061_v58 = vsel %vm1159_vm5, %v7898_v11, %v7900_v52  ;;  %v18069_v1 = vsel %vm1159_vm5, %v7902_v54, %v7903_v4  ;;  %v7908_v50 = vrot.slane %v17740_v48, 2 }
 0x4b1   : > { %20049 = vst [vmem:[#allocation71_spill] sm:$0xff] %v18052_v28  ;;  %20050 = vst [vmem:[#allocation73_spill] sm:$0xff] %v18061_v58  ;;  %v7907_v11 = vrot.slane %v17731_v49, 2  ;;  %v18078_v44 = vsel %vm1159_vm5, %v7903_v4, %v7905_v16  ;;  %v7910_v52 = vrot.slane %v17742_v55, 2  ;;  %v7912_v4 = vrot.slane %v17758_v51, 2 }
 0x4b2   : > { %12124 = vmatmul.mubr.msk.f32.gmra.mxu1 %vm6536_vm11, %v17993_v2  ;;  %12179 = vmatmul.mubr.msk.f32.gmra.mxu0 %vm6536_vm11, %v17600_v47  ;;  %20051 = vst [vmem:[#allocation64_spill] sm:$0xff] %v18069_v1  ;;  %20052 = vst [vmem:[#allocation66_spill] sm:$0xff] %v18078_v44  ;;  %v7915_v16 = vrot.slane %v17767_v56, 2 }
 0x4b3   : > { %12126 = vmatprep.mubr.msk.f32.mxu1 %vm6536_vm11, %v18001_v14  ;;  %12181 = vmatprep.mubr.msk.f32.mxu0 %vm6536_vm11, %v17641_v26  ;;  %v18086_v54 = vsel %vm1159_vm5, %v7907_v11, %v7908_v50  ;;  %v18095_v55 = vsel %vm1159_vm5, %v7908_v50, %v7910_v52  ;;  %v7917_v50 = vrot.slane %v17781_v43, 2  ;;  %v7920_v52 = vrot.slane %v17792_v24, 2 }
 0x4b4   : > { %20053 = vst [vmem:[#allocation68_spill] sm:$0xff] %v18086_v54  ;;  %20054 = vst [vmem:[#allocation70_spill] sm:$0xff] %v18095_v55 }
 0x4b6   : > { %12127 = vmatmul.mubr.msk.f32.gmra.mxu1 %vm6536_vm11, %v18010_v57  ;;  %12182 = vmatmul.mubr.msk.f32.gmra.mxu0 %vm6536_vm11, %v17654_v34 }
 0x4b7   : > { %12129 = vmatprep.mubr.msk.f32.mxu1 %vm6536_vm11, %v18018_v45  ;;  %12184 = vmatprep.mubr.msk.f32.mxu0 %vm6536_vm11, %v17679_v13 }
 0x4ba   : > { %12130 = vmatmul.mubr.msk.f32.gmra.mxu1 %vm6536_vm11, %v18027_v36  ;;  %12185 = vmatmul.mubr.msk.f32.gmra.mxu0 %vm6536_vm11, %v17684_v46 }
 0x4bb   : > { %12132 = vmatprep.mubr.msk.f32.mxu1 %vm6536_vm11, %v18035_v60  ;;  %12187 = vmatprep.mubr.msk.f32.mxu0 %vm6536_vm11, %v17705_v42 }
 0x4be   : > { %12133 = vmatmul.mubr.msk.f32.gmra.mxu1 %vm6536_vm11, %v18044_v32  ;;  %12188 = vmatmul.mubr.msk.f32.gmra.mxu0 %vm6536_vm11, %v17715_v10 }
 0x4bf   : > { %12135 = vmatprep.mubr.msk.f32.mxu1 %vm6536_vm11, %v18052_v28  ;;  %12190 = vmatprep.mubr.msk.f32.mxu0 %vm6536_vm11, %v17731_v49 }
 0x4c2   : > { %12136 = vmatmul.mubr.msk.f32.gmra.mxu1 %vm6536_vm11, %v18061_v58  ;;  %12191 = vmatmul.mubr.msk.f32.gmra.mxu0 %vm6536_vm11, %v17740_v48  ;;  %v7913_v48 = vrot.slane %v17765_v59, 2 }
 0x4c3   : > { %12138 = vmatprep.mubr.msk.f32.mxu1 %vm6536_vm11, %v18069_v1  ;;  %12193 = vmatprep.mubr.msk.f32.mxu0 %vm6536_vm11, %v17758_v51 }
 0x4c4   : > { %v18103_v11 = vsel %vm1159_vm5, %v7912_v4, %v7913_v48  ;;  %v18112_v56 = vsel %vm1159_vm5, %v7913_v48, %v7915_v16  ;;  %v7922_v48 = vrot.slane %v17808_v30, 2  ;;  %v7925_v16 = vrot.slane %v17817_v19, 2 }
 0x4c5   : > { %20055 = vst [vmem:[#allocation75_spill] sm:$0xff] %v18103_v11  ;;  %20056 = vst [vmem:[#allocation77_spill] sm:$0xff] %v18112_v56 }
 0x4c6   : > { %12139 = vmatmul.mubr.msk.f32.gmra.mxu1 %vm6536_vm11, %v18078_v44  ;;  %12194 = vmatmul.mubr.msk.f32.gmra.mxu0 %vm6536_vm11, %v17765_v59  ;;  %v7918_v59 = vrot.slane %v17790_v22, 2 }
 0x4c7   : > { %12141 = vmatprep.mubr.msk.f32.mxu1 %vm6536_vm11, %v18086_v54  ;;  %12196 = vmatprep.mubr.msk.f32.mxu0 %vm6536_vm11, %v17781_v43 }
 0x4c8   : > { %v18120_v4 = vsel %vm1159_vm5, %v7917_v50, %v7918_v59  ;;  %v18129_v24 = vsel %vm1159_vm5, %v7918_v59, %v7920_v52  ;;  %v7927_v59 = vrot.slane %v17831_v27, 2  ;;  %v7930_v52 = vrot.slane %v17842_v25, 2 }
 0x4c9   : > { %20057 = vst [vmem:[#allocation72_spill] sm:$0xff] %v18120_v4  ;;  %20058 = vst [vmem:[#allocation79_spill] sm:$0xff] %v18129_v24 }
 0x4ca   : > { %12142 = vmatmul.mubr.msk.f32.gmra.mxu1 %vm6536_vm11, %v18095_v55  ;;  %12197 = vmatmul.mubr.msk.f32.gmra.mxu0 %vm6536_vm11, %v17790_v22  ;;  %v7923_v22 = vrot.slane %v17815_v38, 2 }
 0x4cb   : > { %12144 = vmatprep.mubr.msk.f32.mxu1 %vm6536_vm11, %v18103_v11  ;;  %12199 = vmatprep.mubr.msk.f32.mxu0 %vm6536_vm11, %v17808_v30 }
 0x4cc   : > { %v18137_v50 = vsel %vm1159_vm5, %v7922_v48, %v7923_v22  ;;  %v18146_v19 = vsel %vm1159_vm5, %v7923_v22, %v7925_v16  ;;  %v7932_v22 = vrot.slane %v17859_v40, 2  ;;  %v7935_v16 = vrot.slane %v17871_v20, 2 }
 0x4cd   : > { %20059 = vst [vmem:[#allocation74_spill] sm:$0xff] %v18137_v50  ;;  %20060 = vst [vmem:[#allocation76_spill] sm:$0xff] %v18146_v19 }
 0x4ce   : > { %12145 = vmatmul.mubr.msk.f32.gmra.mxu1 %vm6536_vm11, %v18112_v56  ;;  %12200 = vmatmul.mubr.msk.f32.gmra.mxu0 %vm6536_vm11, %v17815_v38  ;;  %v7928_v38 = vrot.slane %v17840_v41, 2 }
 0x4cf   : > { %12147 = vmatprep.mubr.msk.f32.mxu1 %vm6536_vm11, %v18120_v4  ;;  %12202 = vmatprep.mubr.msk.f32.mxu0 %vm6536_vm11, %v17831_v27  ;;  %v7938_v27 = vrot.slane %v17890_v3, 2 }
 0x4d0   : > { %v18154_v48 = vsel %vm1159_vm5, %v7927_v59, %v7928_v38  ;;  %v18163_v25 = vsel %vm1159_vm5, %v7928_v38, %v7930_v52  ;;  %v7937_v38 = vrot.slane %v17869_v62, 2  ;;  %v18184_v52 = vld [vmem:[#allocation4 + $0x188] sm:$0xff] }
 0x4d1   : > { %20061 = vst [vmem:[#allocation83_spill] sm:$0xff] %v18154_v48  ;;  %20062 = vst [vmem:[#allocation78_spill] sm:$0xff] %v18163_v25 }
 0x4d2   : > { %12148 = vmatmul.mubr.msk.f32.gmra.mxu1 %vm6536_vm11, %v18129_v24  ;;  %12203 = vmatmul.mubr.msk.f32.gmra.mxu0 %vm6536_vm11, %v17840_v41  ;;  %v7933_v41 = vrot.slane %v17867_v12, 2 }
 0x4d3   : > { %12150 = vmatprep.mubr.msk.f32.mxu1 %vm6536_vm11, %v18137_v50  ;;  %12205 = vmatprep.mubr.msk.f32.mxu0 %vm6536_vm11, %v17859_v40 }
 0x4d4   : > { %v18171_v59 = vsel %vm1159_vm5, %v7932_v22, %v7933_v41  ;;  %v18182_v20 = vsel %vm1159_vm5, %v7933_v41, %v7935_v16  ;;  %v7940_v22 = vrot.slane %v17892_v29, 2  ;;  %v10847_v29 = vld [vmem:[%s19520_s4 + $0x70] sm:$0xff] }
 0x4d5   : > { %20063 = vst [vmem:[#allocation80_spill] sm:$0xff] %v18171_v59  ;;  %20064 = vst [vmem:[#allocation81_spill] sm:$0xff] %v18182_v20 }
 0x4d6   : > { %12151 = vmatmul.mubr.msk.f32.gmra.mxu1 %vm6536_vm11, %v18146_v19  ;;  %12206 = vmatmul.mubr.msk.f32.gmra.mxu0 %vm6536_vm11, %v17867_v12  ;;  %v18173_v12 = vld [vmem:[#allocation4 + $0x180] sm:$0xff]  ;;  %v18199_v41 = vsel %vm1159_vm5, %v7938_v27, %v7940_v22 }
 0x4d7   : > { %12153 = vmatprep.mubr.msk.f32.mxu1 %vm6536_vm11, %v18154_v48  ;;  %12208 = vmatprep.mubr.msk.f32.mxu0 %vm6536_vm11, %v17869_v62  ;;  %20066 = vst [vmem:[#allocation84_spill] sm:$0xff] %v18199_v41 }
 0x4da   : > { %12154 = vmatmul.mubr.msk.f32.gmra.mxu1 %vm6536_vm11, %v18163_v25  ;;  %12209 = vmatmul.mubr.msk.f32.gmra.mxu0 %vm6536_vm11, %v17890_v3  ;;  %v18192_v3 = vsel %vm1159_vm5, %v7937_v38, %v7938_v27  ;;  %v10813_v27 = vld [vmem:[%s19520_s4 + $0x60] sm:$0xff] }
 0x4db   : > { %12156 = vmatprep.mubr.msk.f32.mxu1 %vm6536_vm11, %v18171_v59  ;;  %12211 = vmatprep.mubr.msk.f32.mxu0 %vm6536_vm11, %v18173_v12  ;;  %20065 = vst [vmem:[#allocation82_spill] sm:$0xff] %v18192_v3 }
 0x4de   : > { %12157 = vmatmul.mubr.msk.f32.gmra.mxu1 %vm6536_vm11, %v18182_v20  ;;  %12212 = vmatmul.mubr.msk.f32.gmra.mxu0 %vm6536_vm11, %v18184_v52 }
 0x4df   : > { %12159 = vmatprep.mubr.msk.f32.mxu1 %vm6536_vm11, %v18192_v3  ;;  %12270 = vmatprep.mubr.msk.f32.mxu0 %vm6536_vm11, %v17937_v6 }
 0x4e2   : > { %12160 = vmatmul.mubr.msk.f32.gmra.mxu1 %vm6536_vm11, %v18199_v41  ;;  %12271 = vmatmul.mubr.msk.f32.vlgmr.msra.gmra.mxu0 %vm6536_vm11, %v17947_v21 }
 0x4e3   : > { %12218 = vmatprep.mubr.msk.f32.mxu1 %vm6536_vm11, %v17527_v33  ;;  %12273 = vmatprep.mubr.msk.f32.mxu0 %vm6536_vm11, %v17965_v23  ;;  %v18228_v33 = vld [vmem:[%s19520_s4 + $0x88] sm:$0xff] }
 0x4e4   : > { %12371 = vmatpush3.msra.mxu0 %v17958_v7 }
 0x4e5   : > { %12372 = vmatprep.subr.mxu0 %v10847_v29 }
 0x4e6   : > { %12219 = vmatmul.mubr.msk.f32.vlgmr.msra.gmra.mxu1 %vm6536_vm11, %v17543_v53  ;;  %12274 = vmatmul.mubr.msk.f32.gmra.mxu0 %vm6536_vm11, %v17976_v37 }
 0x4e7   : > { %12319 = vmatpush3.msra.mxu1 %v17953_v39  ;;  %12221 = vmatprep.mubr.msk.f32.mxu1 %vm6536_vm11, %v17555_v15 }
 0x4e8   : > { %12276 = vmatprep.mubr.msk.f32.mxu0 %vm6536_vm11, %v17984_v63  ;;  %12320 = vmatprep.subr.mxu1 %v10813_v27 }
 0x4e9   : > { %12321 = vmatpush3.msra.mxu1 %v10813_v27  ;;  %12373 = vmatpush3.msra.mxu0 %v10847_v29  ;;  %v12064_v53 = vpop.f32.mrf.mxu0 }
 0x4ea   : > { %12222 = vmatmul.mubr.msk.f32.gmra.mxu1 %vm6536_vm11, %v17580_v61  ;;  %12277 = vmatmul.mubr.msk.f32.gmra.mxu0 %vm6536_vm11, %v17993_v2 }
 0x4eb   : > { %12224 = vmatprep.mubr.msk.f32.mxu1 %vm6536_vm11, %v17594_v9  ;;  %12279 = vmatprep.mubr.msk.f32.mxu0 %vm6536_vm11, %v18001_v14  ;;  %v18238_v6 = vpop.f32.mrf.mxu0  ;;  %v20072_v14 = vld [vmem:[#allocation24_spill] sm:$0xff] }
 0x4ec   : > { %12422 = vmatprep.subr.mxu1 %v18228_v33 }
 0x4ed   : > { %v12067_v7 = vpop.f32.mrf.mxu0 }
 0x4ee   : > { %12225 = vmatmul.mubr.msk.f32.gmra.mxu1 %vm6536_vm11, %v17611_v8  ;;  %12280 = vmatmul.mubr.msk.f32.gmra.mxu0 %vm6536_vm11, %v18010_v57 }
 0x4ef   : > { %12227 = vmatprep.mubr.msk.f32.mxu1 %vm6536_vm11, %v17619_v31  ;;  %12282 = vmatprep.mubr.msk.f32.mxu0 %vm6536_vm11, %v18018_v45  ;;  %v18253_v38 = vpop.f32.mrf.mxu0 }
 0x4f0   : > { %20067 = vst [vmem:[#allocation87_spill] sm:$0xff] %v18253_v38  ;;  %v20077_v38 = vld [vmem:[#allocation30_spill] sm:$0xff] }
 0x4f1   : > { %v12070_v27 = vpop.f32.mrf.mxu0 }
 0x4f2   : > { %12228 = vmatmul.mubr.msk.f32.gmra.mxu1 %vm6536_vm11, %v17633_v17  ;;  %12283 = vmatmul.mubr.msk.f32.gmra.mxu0 %vm6536_vm11, %v18027_v36  ;;  %v20074_v36 = vld [vmem:[#allocation35_spill] sm:$0xff] }
 0x4f3   : > { %12285 = vmatprep.mubr.msk.f32.mxu0 %vm6536_vm11, %v18035_v60  ;;  %v18267_v45 = vpop.f32.mrf.mxu0 }
 0x4f4   : > { %20071 = vst [vmem:[#allocation13_spill] sm:$0xff] %v18267_v45 }
 0x4f6   : > { %12286 = vmatmul.mubr.msk.f32.gmra.mxu0 %vm6536_vm11, %v18044_v32  ;;  %v20079_v32 = vld [vmem:[#allocation33_spill] sm:$0xff] }
 0x4f7   : > { %12288 = vmatprep.mubr.msk.f32.mxu0 %vm6536_vm11, %v18052_v28 }
 0x4fa   : > { %12289 = vmatmul.mubr.msk.f32.gmra.mxu0 %vm6536_vm11, %v18061_v58 }
 0x4fb   : > { %12291 = vmatprep.mubr.msk.f32.mxu0 %vm6536_vm11, %v18069_v1 }
 0x4fe   : > { %v12012_v21 = vpop.f32.mrf.mxu1  ;;  %12292 = vmatmul.mubr.msk.f32.gmra.mxu0 %vm6536_vm11, %v18078_v44 }
 0x4ff   : > { %v18245_v39 = vadd.f32 %v12064_v53, %v12012_v21  ;;  %v20069_v53 = vld [vmem:[#allocation21_spill] sm:$0xff]  ;;  %12294 = vmatprep.mubr.msk.f32.mxu0 %vm6536_vm11, %v18086_v54 }
 0x500   : > { %v18251_v16 = vpop.f32.mrf.mxu1  ;;  %12230 = vmatprep.mubr.msk.f32.mxu1 %vm6536_vm11, %v20069_v53 }
 0x501   : > { %12231 = vmatmul.mubr.msk.f32.gmra.mxu1 %vm6536_vm11, %v20072_v14 }
 0x502   : > { %v12015_v22 = vpop.f32.mrf.mxu1  ;;  %12233 = vmatprep.mubr.msk.f32.mxu1 %vm6536_vm11, %v20074_v36  ;;  %12295 = vmatmul.mubr.msk.f32.gmra.mxu0 %vm6536_vm11, %v18095_v55  ;;  %v20095_v55 = vld [vmem:[#allocation46_spill] sm:$0xff] }
 0x503   : > { %v18259_v29 = vadd.f32 %v12067_v7, %v12015_v22  ;;  %v12073_v22 = vpop.f32.mrf.mxu0  ;;  %12297 = vmatprep.mubr.msk.f32.mxu0 %vm6536_vm11, %v18103_v11  ;;  %v20094_v11 = vld [vmem:[#allocation45_spill] sm:$0xff] }
 0x504   : > { %v18265_v21 = vpop.f32.mrf.mxu1 }
 0x505   : > { %20068 = vst [vmem:[#allocation85_spill] sm:$0xff] %v18259_v29  ;;  %20070 = vst [vmem:[#allocation86_spill] sm:$0xff] %v18265_v21  ;;  %v18281_v29 = vpop.f32.mrf.mxu0  ;;  %12234 = vmatmul.mubr.msk.f32.gmra.mxu1 %vm6536_vm11, %v20077_v38 }
 0x506   : > { %v12018_v57 = vpop.f32.mrf.mxu1  ;;  %20076 = vst [vmem:[#allocation7_spill] sm:$0xff] %v18281_v29  ;;  %12236 = vmatprep.mubr.msk.f32.mxu1 %vm6536_vm11, %v20079_v32  ;;  %12298 = vmatmul.mubr.msk.f32.gmra.mxu0 %vm6536_vm11, %v18112_v56  ;;  %v20101_v56 = vld [vmem:[#allocation60_spill] sm:$0xff] }
 0x507   : > { %v18273_v7 = vadd.f32 %v12070_v27, %v12018_v57  ;;  %v12076_v27 = vpop.f32.mrf.mxu0  ;;  %12300 = vmatprep.mubr.msk.f32.mxu0 %vm6536_vm11, %v18120_v4  ;;  %v20098_v4 = vld [vmem:[#allocation50_spill] sm:$0xff] }
 0x508   : > { %v18279_v60 = vpop.f32.mrf.mxu1 }
 0x509   : > { %20073 = vst [vmem:[#allocation8_spill] sm:$0xff] %v18273_v7  ;;  %20075 = vst [vmem:[#allocation10_spill] sm:$0xff] %v18279_v60  ;;  %v18295_v7 = vpop.f32.mrf.mxu0  ;;  %v20082_v60 = vld [vmem:[#allocation40_spill] sm:$0xff] }
 0x50a   : > { %v12021_v45 = vpop.f32.mrf.mxu1  ;;  %20081 = vst [vmem:[#allocation22_spill] sm:$0xff] %v18295_v7  ;;  %12237 = vmatmul.mubr.msk.f32.gmra.mxu1 %vm6536_vm11, %v20082_v60  ;;  %v20086_v7 = vld [vmem:[#allocation39_spill] sm:$0xff]  ;;  %12301 = vmatmul.mubr.msk.f32.gmra.mxu0 %vm6536_vm11, %v18129_v24  ;;  %v20099_v24 = vld [vmem:[#allocation54_spill] sm:$0xff] }
 0x50b   : > { %v18287_v57 = vadd.f32 %v12073_v22, %v12021_v45  ;;  %v20084_v22 = vld [vmem:[#allocation38_spill] sm:$0xff]  ;;  %v12079_v58 = vpop.f32.mrf.mxu0  ;;  %12303 = vmatprep.mubr.msk.f32.mxu0 %vm6536_vm11, %v18137_v50  ;;  %v20100_v50 = vld [vmem:[#allocation56_spill] sm:$0xff] }
 0x50c   : > { %v18293_v28 = vpop.f32.mrf.mxu1  ;;  %12239 = vmatprep.mubr.msk.f32.mxu1 %vm6536_vm11, %v20084_v22 }
 0x50d   : > { %20078 = vst [vmem:[#allocation16_spill] sm:$0xff] %v18287_v57  ;;  %20080 = vst [vmem:[#allocation11_spill] sm:$0xff] %v18293_v28 }
 0x50e   : > { %v12024_v29 = vpop.f32.mrf.mxu1  ;;  %12240 = vmatmul.mubr.msk.f32.gmra.mxu1 %vm6536_vm11, %v20086_v7  ;;  %12304 = vmatmul.mubr.msk.f32.gmra.mxu0 %vm6536_vm11, %v18146_v19  ;;  %v7144_v19 = vld [vmem:[#allocation4 + $0x190] sm:$0x3] }
 0x50f   : > { %v18301_v45 = vadd.f32 %v12076_v27, %v12024_v29  ;;  %v20088_v29 = vld [vmem:[#allocation41_spill] sm:$0xff]  ;;  %v18319_v27 = vpop.f32.mrf.mxu0  ;;  %12306 = vmatprep.mubr.msk.f32.mxu0 %vm6536_vm11, %v18154_v48  ;;  %v8803_v48 = vrot.slane %v18184_v52, 2  ;;  %v8536_v21 = vrot.slane %v7144_v19, 1 }
 0x510   : > { %v18307_v1 = vpop.f32.mrf.mxu1  ;;  %12242 = vmatprep.mubr.msk.f32.mxu1 %vm6536_vm11, %v20088_v29  ;;  %20089 = vst [vmem:[#allocation12_spill] sm:$0xff] %v18319_v27 }
 0x511   : > { %20083 = vst [vmem:[#allocation37_spill] sm:$0xff] %v18301_v45  ;;  %20085 = vst [vmem:[#allocation17_spill] sm:$0xff] %v18307_v1  ;;  %v12082_v44 = vpop.f32.mrf.mxu0  ;;  %v20091_v1 = vld [vmem:[#allocation42_spill] sm:$0xff] }
 0x512   : > { %v12027_v57 = vpop.f32.mrf.mxu1  ;;  %12243 = vmatmul.mubr.msk.f32.gmra.mxu1 %vm6536_vm11, %v20091_v1  ;;  %12307 = vmatmul.mubr.msk.f32.gmra.mxu0 %vm6536_vm11, %v18163_v25  ;;  %v8802_v25 = vrot.slane %v18173_v12, 2 }
 0x513   : > { %v18313_v28 = vadd.f32 %v12079_v58, %v12027_v57  ;;  %v20093_v57 = vld [vmem:[#allocation52_spill] sm:$0xff]  ;;  %12309 = vmatprep.mubr.msk.f32.mxu0 %vm6536_vm11, %v18171_v59  ;;  %v8534_v59 = vrot.slane %v18184_v52, 1  ;;  %v18380_v27 = vpop.f32.mrf.mxu0 }
 0x514   : > { %v18321_v54 = vpop.f32.mrf.mxu1  ;;  %12245 = vmatprep.mubr.msk.f32.mxu1 %vm6536_vm11, %v20093_v57  ;;  %20104 = vst [vmem:[#allocation23_spill] sm:$0xff] %v18380_v27  ;;  %v12747_v27 = vld [vmem:[#allocation4 + $0x30] sm:$0xff] }
 0x515   : > { %20087 = vst [vmem:[#allocation14_spill] sm:$0xff] %v18313_v28  ;;  %20090 = vst [vmem:[#allocation20_spill] sm:$0xff] %v18321_v54  ;;  %v20102_v28 = vld [vmem:[#allocation58_spill] sm:$0xff] }
 0x516   : > { %v12030_v45 = vpop.f32.mrf.mxu1  ;;  %12246 = vmatmul.mubr.msk.f32.gmra.mxu1 %vm6536_vm11, %v20094_v11  ;;  %12310 = vmatmul.mubr.msk.f32.gmra.mxu0 %vm6536_vm11, %v18182_v20  ;;  %v18372_v20 = vsel %vm1159_vm5, %v8802_v25, %v8803_v48 }
 0x517   : > { %v18327_v58 = vadd.f32 %v12082_v44, %v12030_v45  ;;  %12248 = vmatprep.mubr.msk.f32.mxu1 %vm6536_vm11, %v20095_v55  ;;  %v20096_v44 = vld [vmem:[#allocation47_spill] sm:$0xff]  ;;  %v20097_v45 = vld [vmem:[#allocation49_spill] sm:$0xff]  ;;  %12312 = vmatprep.mubr.msk.f32.mxu0 %vm6536_vm11, %v18192_v3  ;;  %20103 = vst [vmem:[#allocation28_spill] sm:$0xff] %v18372_v20  ;;  %v8533_v3 = vrot.slane %v18173_v12, 1 }
 0x519   : > { %20092 = vst [vmem:[#allocation19_spill] sm:$0xff] %v18327_v58  ;;  %v8805_v58 = vrot.slane %v7144_v19, 2  ;;  %v18390_v25 = vsel %vm491_vm4, %v8533_v3, %v8534_v59  ;;  %v18399_v19 = vsel %vm491_vm4, %v8534_v59, %v8536_v21  ;;  %v10881_v59 = vld [vmem:[%s19520_s4 + $0x80] sm:$0xff]  ;;  %v12749_v21 = vld [vmem:[#allocation4 + $0x48] sm:$0xff] }
 0x51a   : > { %12249 = vmatmul.mubr.msk.f32.gmra.mxu1 %vm6536_vm11, %v20096_v44  ;;  %12313 = vmatmul.mubr.msk.f32.gmra.mxu0 %vm6536_vm11, %v18199_v41  ;;  %v18392_v41 = vpop.f32.mrf.mxu1 }
 0x51b   : > { %12251 = vmatprep.mubr.msk.f32.mxu1 %vm6536_vm11, %v20097_v45  ;;  %12315 = vmatprep.mubr.msk.f32.mxu0 %vm6536_vm11, %v18372_v20  ;;  %v18383_v54 = vsel %vm1159_vm5, %v8803_v48, %v8805_v58  ;;  %v12085_v20 = vpop.f32.mrf.mxu0 }
 0x51c   : > { %20105 = vst [vmem:[#allocation25_spill] sm:$0xff] %v18383_v54 }
 0x51d   : > { %v7770_v3 = vpop.f32.mrf.mxu0 }
 0x51e   : > { %12252 = vmatmul.mubr.msk.f32.gmra.mxu1 %vm6536_vm11, %v20098_v4  ;;  %12316 = vmatmul.mubr.msk.f32.gmra.mxu0 %vm6536_vm11, %v18383_v54 }
 0x51f   : > { %12254 = vmatprep.mubr.msk.f32.mxu1 %vm6536_vm11, %v20099_v24  ;;  %12374 = vmatprep.mubr.msk.f32.mxu0 %vm6536_vm11, %v17555_v15  ;;  %v12033_v48 = vpop.f32.mrf.mxu1 }
 0x520   : > { %v18401_v58 = vadd.f32 %v12085_v20, %v12033_v48  ;;  %v12748_v20 = vld [vmem:[#allocation4 + $0x38] sm:$0xff] }
 0x521   : > { %v7481_v54 = vpop.f32.mrf.mxu1 }
 0x522   : > { %12255 = vmatmul.mubr.msk.f32.gmra.mxu1 %vm6536_vm11, %v20100_v50  ;;  %12375 = vmatmul.mubr.msk.f32.vlgmr.msra.gmra.mxu0 %vm6536_vm11, %v17580_v61  ;;  %v18410_v15 = vadd.f32 %v7770_v3, %v7481_v54 }
 0x523   : > { %12257 = vmatprep.mubr.msk.f32.mxu1 %vm6536_vm11, %v20101_v56  ;;  %12377 = vmatprep.mubr.msk.f32.mxu0 %vm6536_vm11, %v17594_v9 }
 0x524   : > { %v12088_v61 = vpop.f32.mrf.mxu0 }
 0x526   : > { %12258 = vmatmul.mubr.msk.f32.gmra.mxu1 %vm6536_vm11, %v20102_v28  ;;  %12378 = vmatmul.mubr.msk.f32.gmra.mxu0 %vm6536_vm11, %v17611_v8  ;;  %v7780_v8 = vpop.f32.mrf.mxu0 }
 0x527   : > { %12260 = vmatprep.mubr.msk.f32.mxu1 %vm6536_vm11, %v17906_v35  ;;  %12380 = vmatprep.mubr.msk.f32.mxu0 %vm6536_vm11, %v17619_v31 }
 0x528   : > { %v12036_v9 = vpop.f32.mrf.mxu1 }
 0x529   : > { %v18422_v54 = vadd.f32 %v12088_v61, %v12036_v9 }
 0x52a   : > { %12261 = vmatmul.mubr.msk.f32.gmra.mxu1 %vm6536_vm11, %v17909_v5  ;;  %12381 = vmatmul.mubr.msk.f32.gmra.mxu0 %vm6536_vm11, %v17633_v17  ;;  %v7491_v48 = vpop.f32.mrf.mxu1 }
 0x52b   : > { %12263 = vmatprep.mubr.msk.f32.mxu1 %vm6536_vm11, %v18390_v25  ;;  %12383 = vmatprep.mubr.msk.f32.mxu0 %vm6536_vm11, %v20069_v53  ;;  %v18431_v31 = vadd.f32 %v7780_v8, %v7491_v48 }
 0x52d   : > { %v12091_v17 = vpop.f32.mrf.mxu0 }
 0x52e   : > { %12264 = vmatmul.mubr.msk.f32.gmra.mxu1 %vm6536_vm11, %v18399_v19  ;;  %12384 = vmatmul.mubr.msk.f32.gmra.mxu0 %vm6536_vm11, %v20072_v14 }
 0x52f   : > { %12322 = vmatprep.mubr.msk.f32.mxu1 %vm6536_vm11, %v12747_v27  ;;  %v12750_v27 = vld [vmem:[#allocation4 + $0x50] sm:$0xff]  ;;  %12386 = vmatprep.mubr.msk.f32.mxu0 %vm6536_vm11, %v20074_v36 }
 0x531   : > { %v12039_v3 = vpop.f32.mrf.mxu1 }
 0x532   : > { %12323 = vmatmul.mubr.msk.f32.vlgmr.msra.gmra.mxu1 %vm6536_vm11, %v12748_v20  ;;  %12387 = vmatmul.mubr.msk.f32.gmra.mxu0 %vm6536_vm11, %v20077_v38  ;;  %v20107_v38 = vld [vmem:[#allocation44_spill] sm:$0xff] }
 0x533   : > { %12423 = vmatpush3.msra.mxu1 %v18228_v33  ;;  %12325 = vmatprep.mubr.msk.f32.mxu1 %vm6536_vm11, %v12749_v21  ;;  %v12751_v33 = vld [vmem:[#allocation4 + $0x68] sm:$0xff]  ;;  %v7501_v14 = vpop.f32.mrf.mxu1  ;;  %v20112_v21 = vld [vmem:[#allocation57_spill] sm:$0xff] }
 0x534   : > { %12424 = vmatprep.subr.mxu1 %v10881_v59  ;;  %12389 = vmatprep.mubr.msk.f32.mxu0 %vm6536_vm11, %v20079_v32  ;;  %v18534_v20 = vld [vmem:[#allocation4 + $0x1a8] sm:$0x3] }
 0x535   : > { %12425 = vmatpush3.msra.mxu1 %v10881_v59 }
 0x536   : > { %12326 = vmatmul.mubr.msk.f32.gmra.mxu1 %vm6536_vm11, %v12750_v27  ;;  %12390 = vmatmul.mubr.msk.f32.gmra.mxu0 %vm6536_vm11, %v20082_v60 }
 0x537   : > { %12328 = vmatprep.mubr.msk.f32.mxu1 %vm6536_vm11, %v17583_v0  ;;  %v18444_v0 = vadd.f32 %v12091_v17, %v12039_v3  ;;  %12392 = vmatprep.mubr.msk.f32.mxu0 %vm6536_vm11, %v20084_v22 }
 0x53a   : > { %12329 = vmatmul.mubr.msk.f32.gmra.mxu1 %vm6536_vm11, %v12751_v33  ;;  %12393 = vmatmul.mubr.msk.f32.gmra.mxu0 %vm6536_vm11, %v20086_v7  ;;  %v20113_v33 = vld [vmem:[#allocation59_spill] sm:$0xff] }
 0x53b   : > { %12331 = vmatprep.mubr.msk.f32.mxu1 %vm6536_vm11, %v17614_v18  ;;  %v7790_v18 = vpop.f32.mrf.mxu0  ;;  %12395 = vmatprep.mubr.msk.f32.mxu0 %vm6536_vm11, %v20088_v29 }
 0x53c   : > { %v18450_v53 = vadd.f32 %v7790_v18, %v7501_v14 }
 0x53e   : > { %12332 = vmatmul.mubr.msk.f32.gmra.mxu1 %vm6536_vm11, %v17600_v47  ;;  %v12094_v47 = vpop.f32.mrf.mxu0  ;;  %12396 = vmatmul.mubr.msk.f32.gmra.mxu0 %vm6536_vm11, %v20091_v1 }
 0x53f   : > { %12334 = vmatprep.mubr.msk.f32.mxu1 %vm6536_vm11, %v17641_v26  ;;  %v12042_v26 = vpop.f32.mrf.mxu1  ;;  %12398 = vmatprep.mubr.msk.f32.mxu0 %vm6536_vm11, %v20093_v57 }
 0x541   : > { %v7511_v36 = vpop.f32.mrf.mxu1 }
 0x542   : > { %12335 = vmatmul.mubr.msk.f32.gmra.mxu1 %vm6536_vm11, %v17654_v34  ;;  %v18468_v34 = vadd.f32 %v12094_v47, %v12042_v26  ;;  %12399 = vmatmul.mubr.msk.f32.gmra.mxu0 %vm6536_vm11, %v20094_v11 }
 0x543   : > { %12337 = vmatprep.mubr.msk.f32.mxu1 %vm6536_vm11, %v17679_v13  ;;  %v7800_v13 = vpop.f32.mrf.mxu0  ;;  %12401 = vmatprep.mubr.msk.f32.mxu0 %vm6536_vm11, %v20095_v55 }
 0x544   : > { %v18470_v60 = vadd.f32 %v7800_v13, %v7511_v36 }
 0x546   : > { %12338 = vmatmul.mubr.msk.f32.gmra.mxu1 %vm6536_vm11, %v17684_v46  ;;  %v12097_v46 = vpop.f32.mrf.mxu0  ;;  %12402 = vmatmul.mubr.msk.f32.gmra.mxu0 %vm6536_vm11, %v20096_v44  ;;  %v20110_v44 = vld [vmem:[#allocation55_spill] sm:$0xff] }
 0x547   : > { %12340 = vmatprep.mubr.msk.f32.mxu1 %vm6536_vm11, %v17705_v42  ;;  %v20106_v42 = vld [vmem:[#allocation43_spill] sm:$0xff]  ;;  %12404 = vmatprep.mubr.msk.f32.mxu0 %vm6536_vm11, %v20097_v45  ;;  %v20111_v45 = vld [vmem:[#allocation53_spill] sm:$0xff] }
 0x54a   : > { %12341 = vmatmul.mubr.msk.f32.gmra.mxu1 %vm6536_vm11, %v17715_v10  ;;  %v12045_v10 = vpop.f32.mrf.mxu1  ;;  %12405 = vmatmul.mubr.msk.f32.gmra.mxu0 %vm6536_vm11, %v20098_v4  ;;  %v18520_v4 = vld [vmem:[#allocation4 + $0x198] sm:$0xff] }
 0x54b   : > { %12343 = vmatprep.mubr.msk.f32.mxu1 %vm6536_vm11, %v17731_v49  ;;  %v18488_v32 = vadd.f32 %v12097_v46, %v12045_v10  ;;  %v7810_v49 = vpop.f32.mrf.mxu0  ;;  %12407 = vmatprep.mubr.msk.f32.mxu0 %vm6536_vm11, %v20099_v24  ;;  %v18522_v24 = vld [vmem:[#allocation4 + $0x1a0] sm:$0xff]  ;;  %v7701_v10 = vadd.f32 %v18238_v6, %v18251_v16 }
 0x54c   : > { %v7521_v1 = vpop.f32.mrf.mxu1  ;;  %v9339_v59 = vrot.slane %v18522_v24, 1  ;;  %v20117_v16 = vld [vmem:[#allocation63_spill] sm:$0xff] }
 0x54d   : > { %v18494_v7 = vadd.f32 %v7810_v49, %v7521_v1  ;;  %v12100_v55 = vpop.f32.mrf.mxu0 }
 0x54e   : > { %12344 = vmatmul.mubr.msk.f32.gmra.mxu1 %vm6536_vm11, %v20106_v42  ;;  %v12048_v11 = vpop.f32.mrf.mxu1  ;;  %12408 = vmatmul.mubr.msk.f32.gmra.mxu0 %vm6536_vm11, %v20100_v50 }
 0x54f   : > { %12346 = vmatprep.mubr.msk.f32.mxu1 %vm6536_vm11, %v17758_v51  ;;  %v20108_v51 = vld [vmem:[#allocation48_spill] sm:$0xff]  ;;  %v18508_v22 = vadd.f32 %v12100_v55, %v12048_v11  ;;  %v7820_v29 = vpop.f32.mrf.mxu0  ;;  %12410 = vmatprep.mubr.msk.f32.mxu0 %vm6536_vm11, %v20101_v56  ;;  %v9338_v56 = vrot.slane %v18520_v4, 1 }
 0x550   : > { %v7531_v57 = vpop.f32.mrf.mxu1 }
 0x551   : > { %v12103_v50 = vpop.f32.mrf.mxu0  ;;  %v9340_v8 = vsel %vm491_vm4, %v9338_v56, %v9339_v59 }
 0x552   : > { %12347 = vmatmul.mubr.msk.f32.gmra.mxu1 %vm6536_vm11, %v20107_v38  ;;  %12411 = vmatmul.mubr.msk.f32.gmra.mxu0 %vm6536_vm11, %v20102_v28 }
 0x553   : > { %12349 = vmatprep.mubr.msk.f32.mxu1 %vm6536_vm11, %v17781_v43  ;;  %v20109_v43 = vld [vmem:[#allocation51_spill] sm:$0xff]  ;;  %12413 = vmatprep.mubr.msk.f32.mxu0 %vm6536_vm11, %v17906_v35  ;;  %v7830_v28 = vpop.f32.mrf.mxu0  ;;  %v9341_v35 = vrot.slane %v18534_v20, 1 }
 0x555   : > { %v12051_v61 = vpop.f32.mrf.mxu1 }
 0x556   : > { %12350 = vmatmul.mubr.msk.f32.gmra.mxu1 %vm6536_vm11, %v20108_v51  ;;  %12414 = vmatmul.mubr.msk.f32.gmra.mxu0 %vm6536_vm11, %v17909_v5  ;;  %v18540_v9 = vadd.f32 %v12103_v50, %v12051_v61  ;;  %v20118_v61 = vld [vmem:[#allocation61_spill] sm:$0xff] }
 0x557   : > { %12352 = vmatprep.mubr.msk.f32.mxu1 %vm6536_vm11, %v17808_v30  ;;  %v18518_v30 = vadd.f32 %v7820_v29, %v7531_v57  ;;  %12416 = vmatprep.mubr.msk.f32.mxu0 %vm6536_vm11, %v18390_v25  ;;  %v20116_v57 = vld [vmem:[#allocation85_spill] sm:$0xff] }
 0x55a   : > { %12353 = vmatmul.mubr.msk.f32.gmra.mxu1 %vm6536_vm11, %v20109_v43  ;;  %v12106_v48 = vpop.f32.mrf.mxu0  ;;  %12417 = vmatmul.mubr.msk.f32.gmra.mxu0 %vm6536_vm11, %v18399_v19  ;;  %v20114_v43 = vld [vmem:[#allocation86_spill] sm:$0xff] }
 0x55b   : > { %12355 = vmatprep.mubr.msk.f32.mxu1 %vm6536_vm11, %v20110_v44  ;;  %12419 = vmatprep.mubr.msk.f32.mxu0 %vm6536_vm11, %v9340_v8  ;;  %v20122_v8 = vld [vmem:[#allocation62_spill] sm:$0xff] }
 0x55c   : > { %v7840_v5 = vpop.f32.mrf.mxu0 }
 0x55e   : > { %12356 = vmatmul.mubr.msk.f32.gmra.mxu1 %vm6536_vm11, %v20111_v45  ;;  %v12109_v17 = vpop.f32.mrf.mxu0 }
 0x55f   : > { %12358 = vmatprep.mubr.msk.f32.mxu1 %vm6536_vm11, %v17859_v40  ;;  %v7541_v40 = vpop.f32.mrf.mxu1 }
 0x560   : > { %v18547_v27 = vadd.f32 %v7830_v28, %v7541_v40  ;;  %v7850_v18 = vpop.f32.mrf.mxu0  ;;  %v20121_v40 = vld [vmem:[#allocation8_spill] sm:$0xff] }
 0x561   : > { %v12054_v25 = vpop.f32.mrf.mxu1 }
 0x562   : > { %12359 = vmatmul.mubr.msk.f32.gmra.mxu1 %vm6536_vm11, %v20112_v21  ;;  %v18561_v3 = vadd.f32 %v12106_v48, %v12054_v25  ;;  %v12168_v47 = vpop.f32.mrf.mxu0  ;;  %v20120_v21 = vld [vmem:[#allocation13_spill] sm:$0xff] }
 0x563   : > { %12361 = vmatprep.mubr.msk.f32.mxu1 %vm6536_vm11, %v17869_v62  ;;  %v9342_v62 = vsel %vm491_vm4, %v9339_v59, %v9341_v35  ;;  %v7551_v19 = vpop.f32.mrf.mxu1 }
 0x564   : > { %12420 = vmatmul.mubr.msk.f32.gmra.mxu0 %vm6536_vm11, %v9342_v62  ;;  %v8338_v13 = vpop.f32.mrf.mxu0 }
 0x565   : > { %v12057_v14 = vpop.f32.mrf.mxu1 }
 0x566   : > { %12362 = vmatmul.mubr.msk.f32.gmra.mxu1 %vm6536_vm11, %v20113_v33  ;;  %v18569_v26 = vadd.f32 %v12109_v17, %v12057_v14  ;;  %v12171_v42 = vpop.f32.mrf.mxu0  ;;  %v20124_v14 = vld [vmem:[#allocation11_spill] sm:$0xff] }
 0x567   : > { %12364 = vmatprep.mubr.msk.f32.mxu1 %vm6536_vm11, %v18173_v12  ;;  %v18565_v12 = vadd.f32 %v7840_v5, %v7551_v19 }
 0x568   : > { %v8348_v38 = vpop.f32.mrf.mxu0 }
 0x56a   : > { %12365 = vmatmul.mubr.msk.f32.gmra.mxu1 %vm6536_vm11, %v18184_v52  ;;  %v7561_v52 = vpop.f32.mrf.mxu1  ;;  %v12174_v11 = vpop.f32.mrf.mxu0 }
 0x56b   : > { %12367 = vmatprep.mubr.msk.f32.mxu1 %vm6536_vm11, %v18520_v4  ;;  %v18573_v36 = vadd.f32 %v7850_v18, %v7561_v52  ;;  %v20123_v18 = vld [vmem:[#allocation65_spill] sm:$0xff] }
 0x56c   : > { %v12116_v46 = vpop.f32.mrf.mxu1  ;;  %v8358_v44 = vpop.f32.mrf.mxu0 }
 0x56d   : > { %v8232_v49 = vadd.f32 %v12116_v46, %v18245_v39 }
 0x56e   : > { %12368 = vmatmul.mubr.msk.f32.gmra.mxu1 %vm6536_vm11, %v18522_v24  ;;  %v8072_v1 = vpop.f32.mrf.mxu1  ;;  %v12177_v59 = vpop.f32.mrf.mxu0 }
 0x56f   : > { %12426 = vmatprep.mubr.msk.f32.mxu1 %vm6536_vm11, %v17965_v23  ;;  %v8231_v23 = vadd.f32 %v8072_v1, %v7701_v10  ;;  %v18582_v51 = vadd.f32 %v12168_v47, %v8232_v49  ;;  %v20125_v47 = vld [vmem:[#allocation7_spill] sm:$0xff] }
 0x570   : > { %v12119_v55 = vpop.f32.mrf.mxu1  ;;  %v8368_v62 = vpop.f32.mrf.mxu0  ;;  %v7731_v52 = vadd.f32 %v20125_v47, %v20124_v14 }
 0x571   : > { %v8234_v6 = vadd.f32 %v12119_v55, %v20116_v57  ;;  %v18591_v39 = vadd.f32 %v8338_v13, %v8231_v23  ;;  %v20126_v13 = vld [vmem:[#allocation16_spill] sm:$0xff] }
 0x572   : > { %12427 = vmatmul.mubr.msk.f32.vlgmr.msra.gmra.mxu1 %vm6536_vm11, %v17976_v37  ;;  %v20115_v37 = vld [vmem:[#allocation87_spill] sm:$0xff]  ;;  %v12180_v19 = vpop.f32.mrf.mxu0 }
 0x573   : > { %12429 = vmatprep.mubr.msk.f32.mxu1 %vm6536_vm11, %v17984_v63  ;;  %v7711_v29 = vadd.f32 %v20115_v37, %v20114_v43  ;;  %v8082_v63 = vpop.f32.mrf.mxu1  ;;  %v18593_v50 = vadd.f32 %v12171_v42, %v8234_v6  ;;  %v20127_v42 = vld [vmem:[#allocation67_spill] sm:$0xff]  ;;  %v20128_v43 = vld [vmem:[#allocation69_spill] sm:$0xff] }
 0x574   : > { %v8378_v1 = vpop.f32.mrf.mxu0  ;;  %v20129_v37 = vld [vmem:[#allocation17_spill] sm:$0xff] }
 0x575   : > { %v8233_v45 = vadd.f32 %v8082_v63, %v7711_v29  ;;  %v12122_v56 = vpop.f32.mrf.mxu1  ;;  %v20130_v29 = vld [vmem:[#allocation22_spill] sm:$0xff]  ;;  %v20131_v6 = vld [vmem:[#allocation37_spill] sm:$0xff]  ;;  %v20132_v63 = vld [vmem:[#allocation71_spill] sm:$0xff] }
 0x576   : > { %12430 = vmatmul.mubr.msk.f32.gmra.mxu1 %vm6536_vm11, %v17993_v2  ;;  %v20119_v2 = vld [vmem:[#allocation10_spill] sm:$0xff]  ;;  %v8236_v35 = vadd.f32 %v12122_v56, %v20121_v40  ;;  %v7741_v57 = vadd.f32 %v20130_v29, %v20129_v37  ;;  %v20134_v40 = vld [vmem:[#allocation20_spill] sm:$0xff] }
 0x577   : > { %12432 = vmatprep.mubr.msk.f32.mxu1 %vm6536_vm11, %v20117_v16  ;;  %v7721_v28 = vadd.f32 %v20120_v21, %v20119_v2  ;;  %v18602_v48 = vadd.f32 %v8348_v38, %v8233_v45  ;;  %v8092_v33 = vpop.f32.mrf.mxu1 }
 0x578   : > { %v18604_v25 = vadd.f32 %v12174_v11, %v8236_v35  ;;  %v12183_v11 = vpop.f32.mrf.mxu0  ;;  %v20135_v35 = vld [vmem:[#allocation12_spill] sm:$0xff] }
 0x579   : > { %v8235_v5 = vadd.f32 %v8092_v33, %v7721_v28  ;;  %v12125_v17 = vpop.f32.mrf.mxu1  ;;  %v20133_v28 = vld [vmem:[#allocation73_spill] sm:$0xff]  ;;  %v20136_v33 = vld [vmem:[#allocation14_spill] sm:$0xff] }
 0x57a   : > { %12433 = vmatmul.mubr.msk.f32.gmra.mxu1 %vm6536_vm11, %v20118_v61  ;;  %v8238_v46 = vadd.f32 %v12125_v17, %v20126_v13  ;;  %v8388_v56 = vpop.f32.mrf.mxu0  ;;  %v20137_v17 = vld [vmem:[#allocation64_spill] sm:$0xff] }
 0x57b   : > { %12435 = vmatprep.mubr.msk.f32.mxu1 %vm6536_vm11, %v20122_v8  ;;  %v18613_v10 = vadd.f32 %v8358_v44, %v8235_v5  ;;  %v8102_v49 = vpop.f32.mrf.mxu1  ;;  %v7751_v8 = vadd.f32 %v20135_v35, %v20134_v40 }
 0x57c   : > { %v8237_v38 = vadd.f32 %v8102_v49, %v7731_v52  ;;  %v18615_v23 = vadd.f32 %v12177_v59, %v8238_v46  ;;  %v12186_v21 = vpop.f32.mrf.mxu0  ;;  %v20138_v46 = vld [vmem:[#allocation66_spill] sm:$0xff] }
 0x57d   : > { %v12128_v55 = vpop.f32.mrf.mxu1 }
 0x57e   : > { %12436 = vmatmul.mubr.msk.f32.gmra.mxu1 %vm6536_vm11, %v20123_v18  ;;  %v8240_v16 = vadd.f32 %v12128_v55, %v20131_v6  ;;  %v18624_v44 = vadd.f32 %v8368_v62, %v8237_v38  ;;  %v8398_v14 = vpop.f32.mrf.mxu0  ;;  %v20140_v38 = vld [vmem:[#allocation19_spill] sm:$0xff] }
 0x57f   : > { %12438 = vmatprep.mubr.msk.f32.mxu1 %vm6536_vm11, %v20127_v42  ;;  %v8112_v45 = vpop.f32.mrf.mxu1  ;;  %v20139_v42 = vld [vmem:[#allocation23_spill] sm:$0xff] }
 0x580   : > { %v8239_v61 = vadd.f32 %v8112_v45, %v7741_v57  ;;  %v18626_v59 = vadd.f32 %v12180_v19, %v8240_v16  ;;  %v12189_v13 = vpop.f32.mrf.mxu0  ;;  %v7761_v49 = vadd.f32 %v20139_v42, %v18392_v41  ;;  %v20143_v41 = vld [vmem:[#allocation75_spill] sm:$0xff]  ;;  %v20147_v42 = vld [vmem:[#allocation74_spill] sm:$0xff] }
 0x581   : > { %v12131_v2 = vpop.f32.mrf.mxu1 }
 0x582   : > { %12439 = vmatmul.mubr.msk.f32.gmra.mxu1 %vm6536_vm11, %v20128_v43  ;;  %v8242_v5 = vadd.f32 %v12131_v2, %v20136_v33  ;;  %v18635_v62 = vadd.f32 %v8378_v1, %v8239_v61  ;;  %v20141_v43 = vld [vmem:[#allocation68_spill] sm:$0xff]  ;;  %v8408_v29 = vpop.f32.mrf.mxu0 }
 0x583   : > { %12441 = vmatprep.mubr.msk.f32.mxu1 %vm6536_vm11, %v20132_v63  ;;  %v8122_v18 = vpop.f32.mrf.mxu1  ;;  %v20142_v63 = vld [vmem:[#allocation70_spill] sm:$0xff] }
 0x584   : > { %v8241_v47 = vadd.f32 %v8122_v18, %v7751_v8  ;;  %v18637_v19 = vadd.f32 %v12183_v11, %v8242_v5  ;;  %v12192_v16 = vpop.f32.mrf.mxu0  ;;  %v20144_v8 = vld [vmem:[#allocation77_spill] sm:$0xff]  ;;  %v20145_v5 = vld [vmem:[#allocation72_spill] sm:$0xff] }
 0x585   : > { %v12134_v52 = vpop.f32.mrf.mxu1 }
 0x586   : > { %12442 = vmatmul.mubr.msk.f32.gmra.mxu1 %vm6536_vm11, %v20133_v28  ;;  %v8244_v55 = vadd.f32 %v12134_v52, %v20140_v38  ;;  %v18646_v1 = vadd.f32 %v8388_v56, %v8241_v47  ;;  %v8418_v56 = vpop.f32.mrf.mxu0 }
 0x587   : > { %12444 = vmatprep.mubr.msk.f32.mxu1 %vm6536_vm11, %v20137_v17  ;;  %v8132_v37 = vpop.f32.mrf.mxu1 }
 0x588   : > { %v8243_v57 = vadd.f32 %v8132_v37, %v7761_v49  ;;  %v18648_v11 = vadd.f32 %v12186_v21, %v8244_v55  ;;  %v12195_v35 = vpop.f32.mrf.mxu0 }
 0x589   : > { %v12137_v6 = vpop.f32.mrf.mxu1 }
 0x58a   : > { %12445 = vmatmul.mubr.msk.f32.gmra.mxu1 %vm6536_vm11, %v20138_v46  ;;  %v8246_v45 = vadd.f32 %v12137_v6, %v18401_v58  ;;  %v18655_v61 = vadd.f32 %v8398_v14, %v8243_v57  ;;  %v8428_v18 = vpop.f32.mrf.mxu0  ;;  %v20149_v6 = vld [vmem:[#allocation83_spill] sm:$0xff] }
 0x58b   : > { %12447 = vmatprep.mubr.msk.f32.mxu1 %vm6536_vm11, %v20141_v43  ;;  %v8142_v2 = vpop.f32.mrf.mxu1 }
 0x58c   : > { %v8245_v28 = vadd.f32 %v8142_v2, %v18410_v15  ;;  %v18658_v40 = vadd.f32 %v12189_v13, %v8246_v45  ;;  %v12198_v52 = vpop.f32.mrf.mxu0  ;;  %v20146_v13 = vld [vmem:[#allocation79_spill] sm:$0xff] }
 0x58d   : > { %v12140_v21 = vpop.f32.mrf.mxu1 }
 0x58e   : > { %12448 = vmatmul.mubr.msk.f32.gmra.mxu1 %vm6536_vm11, %v20142_v63  ;;  %v8248_v33 = vadd.f32 %v12140_v21, %v18422_v54  ;;  %v18665_v58 = vadd.f32 %v8408_v29, %v8245_v28  ;;  %v8438_v38 = vpop.f32.mrf.mxu0  ;;  %v20148_v29 = vld [vmem:[#allocation76_spill] sm:$0xff] }
 0x58f   : > { %12450 = vmatprep.mubr.msk.f32.mxu1 %vm6536_vm11, %v20143_v41  ;;  %v8152_v17 = vpop.f32.mrf.mxu1  ;;  %v20151_v21 = vld [vmem:[#allocation80_spill] sm:$0xff] }
 0x590   : > { %v8247_v14 = vadd.f32 %v8152_v17, %v18431_v31  ;;  %v18668_v47 = vadd.f32 %v12192_v16, %v8248_v33  ;;  %v12201_v37 = vpop.f32.mrf.mxu0 }
 0x591   : > { %v12143_v15 = vpop.f32.mrf.mxu1 }
 0x592   : > { %12451 = vmatmul.mubr.msk.f32.gmra.mxu1 %vm6536_vm11, %v20144_v8  ;;  %v8250_v46 = vadd.f32 %v12143_v15, %v18444_v0  ;;  %v18675_v54 = vadd.f32 %v8418_v56, %v8247_v14  ;;  %v8448_v63 = vpop.f32.mrf.mxu0  ;;  %v20150_v56 = vld [vmem:[#allocation78_spill] sm:$0xff] }
 0x593   : > { %12453 = vmatprep.mubr.msk.f32.mxu1 %vm6536_vm11, %v20145_v5  ;;  %v8162_v49 = vpop.f32.mrf.mxu1  ;;  %v20153_v15 = vld [vmem:[#allocation82_spill] sm:$0xff] }
 0x594   : > { %v8249_v55 = vadd.f32 %v8162_v49, %v18450_v53  ;;  %v18678_v43 = vadd.f32 %v12195_v35, %v8250_v46  ;;  %v12204_v2 = vpop.f32.mrf.mxu0 }
 0x595   : > { %v12146_v31 = vpop.f32.mrf.mxu1 }
 0x596   : > { %12454 = vmatmul.mubr.msk.f32.gmra.mxu1 %vm6536_vm11, %v20146_v13  ;;  %v8252_v57 = vadd.f32 %v12146_v31, %v18468_v34  ;;  %v18685_v0 = vadd.f32 %v8428_v18, %v8249_v55  ;;  %v8458_v8 = vpop.f32.mrf.mxu0  ;;  %v20152_v18 = vld [vmem:[#allocation81_spill] sm:$0xff]  ;;  %v20154_v31 = vld [vmem:[#allocation84_spill] sm:$0xff] }
 0x597   : > { %12456 = vmatprep.mubr.msk.f32.mxu1 %vm6536_vm11, %v20147_v42  ;;  %v8172_v16 = vpop.f32.mrf.mxu1 }
 0x598   : > { %v8251_v45 = vadd.f32 %v8172_v16, %v18470_v60  ;;  %v18688_v41 = vadd.f32 %v12198_v52, %v8252_v57  ;;  %v12207_v17 = vpop.f32.mrf.mxu0  ;;  %v9607_v52 = vrot.slane %v18520_v4, 2  ;;  %v9610_v4 = vrot.slane %v18534_v20, 2 }
 0x599   : > { %v12149_v53 = vpop.f32.mrf.mxu1 }
 0x59a   : > { %12457 = vmatmul.mubr.msk.f32.gmra.mxu1 %vm6536_vm11, %v20148_v29  ;;  %v8254_v28 = vadd.f32 %v12149_v53, %v18488_v32  ;;  %v18695_v34 = vadd.f32 %v8438_v38, %v8251_v45  ;;  %v8468_v46 = vpop.f32.mrf.mxu0  ;;  %v20156_v53 = vld [vmem:[#allocation25_spill] sm:$0xff] }
 0x59b   : > { %12459 = vmatprep.mubr.msk.f32.mxu1 %vm6536_vm11, %v20149_v6  ;;  %v8182_v35 = vpop.f32.mrf.mxu1 }
 0x59c   : > { %v8253_v33 = vadd.f32 %v8182_v35, %v18494_v7  ;;  %v18698_v5 = vadd.f32 %v12201_v37, %v8254_v28  ;;  %v9608_v7 = vrot.slane %v18522_v24, 2  ;;  %v12210_v55 = vpop.f32.mrf.mxu0  ;;  %v20155_v37 = vld [vmem:[#allocation28_spill] sm:$0xff] }
 0x59d   : > { %v12152_v60 = vpop.f32.mrf.mxu1 }
 0x59e   : > { %12460 = vmatmul.mubr.msk.f32.gmra.mxu1 %vm6536_vm11, %v20150_v56  ;;  %v8256_v14 = vadd.f32 %v12152_v60, %v18508_v22  ;;  %v18705_v32 = vadd.f32 %v8448_v63, %v8253_v33  ;;  %v8478_v24 = vpop.f32.mrf.mxu0  ;;  %v9611_v20 = vsel %vm1159_vm5, %v9608_v7, %v9610_v4 }
 0x59f   : > { %12462 = vmatprep.mubr.msk.f32.mxu1 %vm6536_vm11, %v20151_v21  ;;  %v8192_v13 = vpop.f32.mrf.mxu1 }
 0x5a0   : > { %v8255_v42 = vadd.f32 %v8192_v13, %v18518_v30  ;;  %v18710_v49 = vadd.f32 %v12204_v2, %v8256_v14  ;;  %v9609_v30 = vsel %vm1159_vm5, %v9607_v52, %v9608_v7  ;;  %v12213_v45 = vpop.f32.mrf.mxu0 }
 0x5a1   : > { %v12155_v38 = vpop.f32.mrf.mxu1 }
 0x5a2   : > { %12463 = vmatmul.mubr.msk.f32.gmra.mxu1 %vm6536_vm11, %v20152_v18  ;;  %v8258_v22 = vadd.f32 %v12155_v38, %v18540_v9  ;;  %v18718_v29 = vadd.f32 %v8458_v8, %v8255_v42  ;;  %v8488_v28 = vpop.f32.mrf.mxu0 }
 0x5a3   : > { %12465 = vmatprep.mubr.msk.f32.mxu1 %vm6536_vm11, %v20153_v15  ;;  %v8202_v57 = vpop.f32.mrf.mxu1 }
 0x5a4   : > { %v8257_v6 = vadd.f32 %v8202_v57, %v18547_v27  ;;  %v18722_v16 = vadd.f32 %v12207_v17, %v8258_v22  ;;  %v18734_v8 = vpop.f32.mrf.mxu0 }
 0x5a5   : > { %v12158_v63 = vpop.f32.mrf.mxu1 }
 0x5a6   : > { %12466 = vmatmul.mubr.msk.f32.gmra.mxu1 %vm6536_vm11, %v20154_v31  ;;  %v8260_v9 = vadd.f32 %v12158_v63, %v18561_v3  ;;  %v18729_v2 = vadd.f32 %v8468_v46, %v8257_v6  ;;  %v18740_v17 = vpop.f32.mrf.mxu0 }
 0x5a7   : > { %12468 = vmatprep.mubr.msk.f32.mxu1 %vm6536_vm11, %v20155_v37  ;;  %v8212_v56 = vpop.f32.mrf.mxu1 }
 0x5a8   : > { %v8259_v21 = vadd.f32 %v8212_v56, %v18565_v12  ;;  %v18732_v27 = vadd.f32 %v12210_v55, %v8260_v9  ;;  %v18745_v12 = vpop.f32.mrf.mxu0 }
 0x5a9   : > { %v12161_v35 = vpop.f32.mrf.mxu1 }
 0x5aa   : > { %12469 = vmatmul.mubr.msk.f32.gmra.mxu1 %vm6536_vm11, %v20156_v53  ;;  %v8262_v33 = vadd.f32 %v12161_v35, %v18569_v26  ;;  %v18738_v3 = vadd.f32 %v8478_v24, %v8259_v21  ;;  %v18752_v7 = vpop.f32.mrf.mxu0 }
 0x5ab   : > { %12471 = vmatprep.mubr.msk.f32.mxu1 %vm6536_vm11, %v9609_v30  ;;  %v8222_v60 = vpop.f32.mrf.mxu1 }
 0x5ac   : > { %v8261_v18 = vadd.f32 %v8222_v60, %v18573_v36  ;;  %v18743_v14 = vadd.f32 %v12213_v45, %v8262_v33  ;;  %v18757_v38 = vpop.f32.mrf.mxu0 }
 0x5ad   : > { %v12220_v15 = vpop.f32.mrf.mxu1 }
 0x5ae   : > { %12472 = vmatmul.mubr.msk.f32.gmra.mxu1 %vm6536_vm11, %v9611_v20  ;;  %v18748_v52 = vadd.f32 %v12220_v15, %v18582_v51  ;;  %v18750_v13 = vadd.f32 %v8488_v28, %v8261_v18  ;;  %v18762_v31 = vpop.f32.mrf.mxu0 }
 0x5af   : > { %v8608_v46 = vpop.f32.mrf.mxu1 }
 0x5b0   : > { %v18755_v26 = vadd.f32 %v8608_v46, %v18591_v39  ;;  %v18767_v37 = vpop.f32.mrf.mxu0 }
 0x5b1   : > { %v12223_v42 = vpop.f32.mrf.mxu1 }
 0x5b2   : > { %v18760_v36 = vadd.f32 %v12223_v42, %v18593_v50  ;;  %v18772_v57 = vpop.f32.mrf.mxu0 }
 0x5b3   : > { %v8618_v55 = vpop.f32.mrf.mxu1 }
 0x5b4   : > { %v18765_v51 = vadd.f32 %v8618_v55, %v18602_v48  ;;  %v18777_v30 = vpop.f32.mrf.mxu0 }
 0x5b5   : > { %v12226_v22 = vpop.f32.mrf.mxu1 }
 0x5b6   : > { %v18770_v4 = vadd.f32 %v12226_v22, %v18604_v25  ;;  %v18782_v63 = vpop.f32.mrf.mxu0 }
 0x5b7   : > { %v8628_v39 = vpop.f32.mrf.mxu1 }
 0x5b8   : > { %v18775_v24 = vadd.f32 %v8628_v39, %v18613_v10  ;;  %v18787_v53 = vpop.f32.mrf.mxu0 }
 0x5b9   : > { %v12229_v50 = vpop.f32.mrf.mxu1 }
 0x5ba   : > { %v18780_v6 = vadd.f32 %v12229_v50, %v18615_v23  ;;  %v18792_v20 = vpop.f32.mrf.mxu0 }
 0x5bb   : > { %v8638_v48 = vpop.f32.mrf.mxu1 }
 0x5bc   : > { %v18785_v45 = vadd.f32 %v8638_v48, %v18624_v44  ;;  %v18797_v28 = vpop.f32.mrf.mxu0 }
 0x5be   : > { %v18802_v35 = vpop.f32.mrf.mxu0 }
 0x5c0   : > { %v18807_v60 = vpop.f32.mrf.mxu0 }
 0x5c1   : > { %v12232_v25 = vpop.f32.mrf.mxu1 }
 0x5c2   : > { %v18790_v9 = vadd.f32 %v12232_v25, %v18626_v59  ;;  %v18812_v15 = vpop.f32.mrf.mxu0 }
 0x5c3   : > { %v8648_v10 = vpop.f32.mrf.mxu1 }
 0x5c4   : > { %v18795_v56 = vadd.f32 %v8648_v10, %v18635_v62  ;;  %v18817_v42 = vpop.f32.mrf.mxu0 }
 0x5c5   : > { %v12235_v23 = vpop.f32.mrf.mxu1 }
 0x5c6   : > { %v18800_v21 = vadd.f32 %v12235_v23, %v18637_v19  ;;  %v18822_v22 = vpop.f32.mrf.mxu0 }
 0x5c7   : > { %v8658_v44 = vpop.f32.mrf.mxu1 }
 0x5c8   : > { %v18805_v33 = vadd.f32 %v8658_v44, %v18646_v1  ;;  %v18827_v50 = vpop.f32.mrf.mxu0 }
 0x5ca   : > { %v12238_v59 = vpop.f32.mrf.mxu1  ;;  %v18832_v25 = vpop.f32.mrf.mxu0 }
 0x5cb   : > { %v18810_v18 = vadd.f32 %v12238_v59, %v18648_v11 }
 0x5cc   : > { %v8668_v62 = vpop.f32.mrf.mxu1  ;;  %v18837_v23 = vpop.f32.mrf.mxu0 }
 0x5cd   : > { %v18815_v46 = vadd.f32 %v8668_v62, %v18655_v61 }
 0x5ce   : > { %v12241_v19 = vpop.f32.mrf.mxu1  ;;  %v18842_v59 = vpop.f32.mrf.mxu0 }
 0x5cf   : > { %v18820_v55 = vadd.f32 %v12241_v19, %v18658_v40  ;;  %20157 = vst [vmem:[#allocation31_spill] sm:$0xff] %v18842_v59 }
 0x5d0   : > { %v8678_v1 = vpop.f32.mrf.mxu1  ;;  %v18847_v19 = vpop.f32.mrf.mxu0 }
 0x5d1   : > { %v18825_v39 = vadd.f32 %v8678_v1, %v18665_v58  ;;  %20158 = vst [vmem:[#allocation26_spill] sm:$0xff] %v18847_v19 }
 0x5d2   : > { %v12244_v11 = vpop.f32.mrf.mxu1 }
 0x5d3   : > { %v18830_v48 = vadd.f32 %v12244_v11, %v18668_v47  ;;  %v18852_v11 = vpop.f32.mrf.mxu0 }
 0x5d4   : > { %v8688_v61 = vpop.f32.mrf.mxu1  ;;  %20159 = vst [vmem:[#allocation9_spill] sm:$0xff] %v18852_v11 }
 0x5d5   : > { %v18835_v10 = vadd.f32 %v8688_v61, %v18675_v54 }
 0x5d6   : > { %v12247_v40 = vpop.f32.mrf.mxu1 }
 0x5d7   : > { %v18840_v44 = vadd.f32 %v12247_v40, %v18678_v43  ;;  %v18857_v40 = vpop.f32.mrf.mxu0 }
 0x5d8   : > { %v8698_v58 = vpop.f32.mrf.mxu1  ;;  %20160 = vst [vmem:[#allocation32_spill] sm:$0xff] %v18857_v40 }
 0x5d9   : > { %v18845_v62 = vadd.f32 %v8698_v58, %v18685_v0  ;;  %v18862_v58 = vpop.f32.mrf.mxu0 }
 0x5da   : > { %v12250_v47 = vpop.f32.mrf.mxu1  ;;  %20161 = vst [vmem:[#allocation18_spill] sm:$0xff] %v18862_v58 }
 0x5db   : > { %v18850_v1 = vadd.f32 %v12250_v47, %v18688_v41  ;;  %v18867_v47 = vpop.f32.mrf.mxu0 }
 0x5dc   : > { %v8708_v54 = vpop.f32.mrf.mxu1  ;;  %20162 = vst [vmem:[#allocation29_spill] sm:$0xff] %v18867_v47 }
 0x5dd   : > { %v18855_v61 = vadd.f32 %v8708_v54, %v18695_v34  ;;  %v18872_v54 = vpop.f32.mrf.mxu0 }
 0x5de   : > { %v12253_v43 = vpop.f32.mrf.mxu1  ;;  %20163 = vst [vmem:[#allocation15_spill] sm:$0xff] %v18872_v54 }
 0x5df   : > { %v18860_v59 = vadd.f32 %v12253_v43, %v18698_v5  ;;  %v18877_v43 = vpop.f32.mrf.mxu0 }
 0x5e0   : > { %v8718_v0 = vpop.f32.mrf.mxu1  ;;  %20165 = vst [vmem:[#allocation36_spill] sm:$0xff] %v18877_v43 }
 0x5e1   : > { %v18865_v19 = vadd.f32 %v8718_v0, %v18705_v32  ;;  %v18882_v0 = vpop.f32.mrf.mxu0 }
 0x5e2   : > { %v12256_v41 = vpop.f32.mrf.mxu1  ;;  %20166 = vst [vmem:[#allocation5_spill] sm:$0xff] %v18882_v0 }
 0x5e3   : > { %v18870_v11 = vadd.f32 %v12256_v41, %v18710_v49  ;;  %v18887_v41 = vpop.f32.mrf.mxu0 }
 0x5e4   : > { %v8728_v34 = vpop.f32.mrf.mxu1  ;;  %20167 = vst [vmem:[#allocation6_spill] sm:$0xff] %v18887_v41 }
 0x5e5   : > { %v18875_v40 = vadd.f32 %v8728_v34, %v18718_v29  ;;  %v9027_v34 = vpop.f32.mrf.mxu0 }
 0x5e6   : > { %v12259_v5 = vpop.f32.mrf.mxu1 }
 0x5e7   : > { %20164 = vst [vmem:[#allocation34_spill] sm:$0xff] %v18875_v40  ;;  %v18880_v58 = vadd.f32 %v12259_v5, %v18722_v16  ;;  %v18895_v16 = vpop.f32.mrf.mxu0 }
 0x5e8   : > { %v8738_v32 = vpop.f32.mrf.mxu1  ;;  %20170 = vst [vmem:[#allocation24_spill] sm:$0xff] %v18895_v16 }
 0x5e9   : > { %v18885_v47 = vadd.f32 %v8738_v32, %v18729_v2  ;;  %v18900_v2 = vpop.f32.mrf.mxu0 }
 0x5ea   : > { %v12262_v49 = vpop.f32.mrf.mxu1  ;;  %20172 = vst [vmem:[#allocation30_spill] sm:$0xff] %v18900_v2 }
 0x5eb   : > { %v18890_v54 = vadd.f32 %v12262_v49, %v18732_v27  ;;  %v18905_v27 = vpop.f32.mrf.mxu0 }
 0x5ec   : > { %v8748_v29 = vpop.f32.mrf.mxu1  ;;  %20173 = vst [vmem:[#allocation33_spill] sm:$0xff] %v18905_v27 }
 0x5ed   : > { %20168 = vst [vmem:[#allocation27_spill] sm:$0xff] %v18890_v54  ;;  %v18893_v40 = vadd.f32 %v8748_v29, %v18738_v3  ;;  %v18911_v3 = vpop.f32.mrf.mxu0 }
 0x5ee   : > { %v12265_v43 = vpop.f32.mrf.mxu1  ;;  %20175 = vst [vmem:[#allocation38_spill] sm:$0xff] %v18911_v3 }
 0x5ef   : > { %20169 = vst [vmem:[#allocation21_spill] sm:$0xff] %v18893_v40  ;;  %v18898_v5 = vadd.f32 %v12265_v43, %v18743_v14  ;;  %v18915_v40 = vpop.f32.mrf.mxu0 }
 0x5f0   : > { %v8758_v0 = vpop.f32.mrf.mxu1  ;;  %20176 = vst [vmem:[#allocation39_spill] sm:$0xff] %v18915_v40 }
 0x5f1   : > { %20171 = vst [vmem:[#allocation35_spill] sm:$0xff] %v18898_v5  ;;  %v8797_v32 = vadd.f32 %v8758_v0, %v18750_v13  ;;  %v18919_v43 = vpop.f32.mrf.mxu0 }
 0x5f2   : > { %v18903_v41 = vpop.f32.mrf.mxu1  ;;  %20177 = vst [vmem:[#allocation41_spill] sm:$0xff] %v18919_v43 }
 0x5f3   : > { %v18907_v49 = vadd.f32 %v9027_v34, %v8797_v32  ;;  %v18923_v13 = vpop.f32.mrf.mxu0 }
 0x5f4   : > { %v18909_v54 = vpop.f32.mrf.mxu1  ;;  %20178 = vst [vmem:[#allocation42_spill] sm:$0xff] %v18923_v13 }
 0x5f5   : > { %20174 = vst [vmem:[#allocation40_spill] sm:$0xff] %v18907_v49  ;;  %v18929_v32 = vpop.f32.mrf.mxu0 }
 0x5f6   : > { %v18913_v29 = vpop.f32.mrf.mxu1  ;;  %20181 = vst [vmem:[#allocation46_spill] sm:$0xff] %v18929_v32 }
 0x5f7   : > { %v18935_v5 = vpop.f32.mrf.mxu0 }
 0x5f8   : > { %v18917_v14 = vpop.f32.mrf.mxu1  ;;  %20184 = vst [vmem:[#allocation50_spill] sm:$0xff] %v18935_v5 }
 0x5f9   : > { %v18941_v43 = vpop.f32.mrf.mxu0 }
 0x5fa   : > { %v18921_v2 = vpop.f32.mrf.mxu1  ;;  %20187 = vst [vmem:[#allocation60_spill] sm:$0xff] %v18941_v43 }
 0x5fc   : > { %v18925_v0 = vpop.f32.mrf.mxu1 }
 0x5fd   : > { %20179 = vst [vmem:[#allocation52_spill] sm:$0xff] %v18925_v0  ;;  %v18947_v0 = vpop.f32.mrf.mxu0 }
 0x5fe   : > { %v18927_v34 = vpop.f32.mrf.mxu1  ;;  %20190 = vst [vmem:[#allocation44_spill] sm:$0xff] %v18947_v0 }
 0x5ff   : > { %20180 = vst [vmem:[#allocation45_spill] sm:$0xff] %v18927_v34 }
 0x600   : > { %v18931_v27 = vpop.f32.mrf.mxu1 }
 0x601   : > { %20182 = vst [vmem:[#allocation47_spill] sm:$0xff] %v18931_v27  ;;  %v18953_v27 = vpop.f32.mrf.mxu0 }
 0x602   : > { %v18933_v3 = vpop.f32.mrf.mxu1  ;;  %20193 = vst [vmem:[#allocation55_spill] sm:$0xff] %v18953_v27 }
 0x603   : > { %20183 = vst [vmem:[#allocation49_spill] sm:$0xff] %v18933_v3 }
 0x604   : > { %v18937_v40 = vpop.f32.mrf.mxu1 }
 0x605   : > { %20185 = vst [vmem:[#allocation54_spill] sm:$0xff] %v18937_v40  ;;  %v18959_v40 = vpop.f32.mrf.mxu0 }
 0x606   : > { %v18939_v16 = vpop.f32.mrf.mxu1  ;;  %20196 = vst [vmem:[#allocation59_spill] sm:$0xff] %v18959_v40 }
 0x607   : > { %20186 = vst [vmem:[#allocation56_spill] sm:$0xff] %v18939_v16 }
 0x608   : > { %v18943_v49 = vpop.f32.mrf.mxu1 }
 0x609   : > { %20188 = vst [vmem:[#allocation58_spill] sm:$0xff] %v18943_v49  ;;  %v18965_v49 = vpop.f32.mrf.mxu0 }
 0x60a   : > { %v18945_v13 = vpop.f32.mrf.mxu1  ;;  %20199 = vst [vmem:[#allocation85_spill] sm:$0xff] %v18965_v49 }
 0x60b   : > { %20189 = vst [vmem:[#allocation43_spill] sm:$0xff] %v18945_v13 }
 0x60c   : > { %v18949_v34 = vpop.f32.mrf.mxu1 }
 0x60d   : > { %20191 = vst [vmem:[#allocation48_spill] sm:$0xff] %v18949_v34  ;;  %v18971_v34 = vpop.f32.mrf.mxu0 }
 0x60e   : > { %v18951_v32 = vpop.f32.mrf.mxu1 }
 0x60f   : > { %20192 = vst [vmem:[#allocation51_spill] sm:$0xff] %v18951_v32 }
 0x610   : > { %v18955_v3 = vpop.f32.mrf.mxu1 }
 0x611   : > { %20194 = vst [vmem:[#allocation53_spill] sm:$0xff] %v18955_v3  ;;  %v18977_v3 = vpop.f32.mrf.mxu0 }
 0x612   : > { %v18957_v5 = vpop.f32.mrf.mxu1 }
 0x613   : > { %20195 = vst [vmem:[#allocation57_spill] sm:$0xff] %v18957_v5 }
 0x614   : > { %v18961_v16 = vpop.f32.mrf.mxu1 }
 0x615   : > { %20197 = vst [vmem:[#allocation86_spill] sm:$0xff] %v18961_v16  ;;  %v18983_v16 = vpop.f32.mrf.mxu0 }
 0x616   : > { %v18963_v43 = vpop.f32.mrf.mxu1 }
 0x617   : > { %20198 = vst [vmem:[#allocation87_spill] sm:$0xff] %v18963_v43 }
 0x618   : > { %v18967_v13 = vpop.f32.mrf.mxu1 }
 0x619   : > { %20200 = vst [vmem:[#allocation63_spill] sm:$0xff] %v18967_v13  ;;  %v18989_v13 = vpop.f32.mrf.mxu0 }
 0x61a   : > { %v18969_v0 = vpop.f32.mrf.mxu1 }
 0x61b   : > { %20201 = vst [vmem:[#allocation61_spill] sm:$0xff] %v18969_v0  ;;  %v9037_v0 = vadd.f32 %v18734_v8, %v18748_v52  ;;  %v9043_v8 = vadd.f32 %v18767_v37, %v18780_v6  ;;  %v9042_v52 = vadd.f32 %v18772_v57, %v18785_v45  ;;  %v9051_v37 = vadd.f32 %v18807_v60, %v18820_v55  ;;  %v20212_v55 = vld [vmem:[#allocation34_spill] sm:$0xff] }
 0x61c   : > { %v18973_v32 = vpop.f32.mrf.mxu1  ;;  %v19033_v57 = vadd.f32 %v18817_v42, %v18830_v48  ;;  %v19040_v6 = vadd.f32 %v18822_v22, %v18835_v10  ;;  %v19048_v45 = vadd.f32 %v18832_v25, %v18845_v62  ;;  %v20213_v22 = vld [vmem:[#allocation18_spill] sm:$0xff]  ;;  %v20214_v48 = vld [vmem:[#allocation29_spill] sm:$0xff]  ;;  %v20215_v10 = vld [vmem:[#allocation15_spill] sm:$0xff] }
 0x61d   : > { %20202 = vst [vmem:[#allocation10_spill] sm:$0xff] %v18973_v32  ;;  %v19083_v25 = vadd.f32 %v20214_v48, %v18880_v58  ;;  %v20221_v58 = vld [vmem:[#allocation45_spill] sm:$0xff] }
 0x61e   : > { %v18975_v27 = vpop.f32.mrf.mxu1  ;;  %v20229_v48 = vld [vmem:[#allocation33_spill] sm:$0xff] }
 0x61f   : > { %20203 = vst [vmem:[#allocation13_spill] sm:$0xff] %v18975_v27  ;;  %v9036_v27 = vadd.f32 %v18740_v17, %v18755_v26  ;;  %v9045_v17 = vadd.f32 %v18777_v30, %v18790_v9  ;;  %v9303_v30 = vadd.f32 %v18903_v41, %v9037_v0  ;;  %v20208_v9 = vld [vmem:[#allocation31_spill] sm:$0xff]  ;;  %v20224_v0 = vld [vmem:[#allocation5_spill] sm:$0xff] }
 0x620   : > { %v18979_v5 = vpop.f32.mrf.mxu1 }
 0x621   : > { %20204 = vst [vmem:[#allocation8_spill] sm:$0xff] %v18979_v5  ;;  %v9039_v5 = vadd.f32 %v18745_v12, %v18760_v36  ;;  %v9044_v12 = vadd.f32 %v18782_v63, %v18795_v56  ;;  %v9049_v36 = vadd.f32 %v18797_v28, %v18810_v18  ;;  %v19044_v63 = vadd.f32 %v18827_v50, %v18840_v44  ;;  %v20209_v56 = vld [vmem:[#allocation26_spill] sm:$0xff]  ;;  %v20216_v44 = vld [vmem:[#allocation27_spill] sm:$0xff] }
 0x622   : > { %v18981_v40 = vpop.f32.mrf.mxu1  ;;  %v19060_v28 = vadd.f32 %v20209_v56, %v18860_v59  ;;  %v9302_v60 = vadd.f32 %v18909_v54, %v9036_v27  ;;  %v20217_v59 = vld [vmem:[#allocation36_spill] sm:$0xff]  ;;  %v9309_v27 = vadd.f32 %v20221_v58, %v9043_v8  ;;  %v20225_v56 = vld [vmem:[#allocation35_spill] sm:$0xff]  ;;  %v19125_v58 = vld [vmem:[%s19522_s6] ss:$0 sm:$0xff] }
 0x623   : > { %20205 = vst [vmem:[#allocation62_spill] sm:$0xff] %v18981_v40  ;;  %v9038_v40 = vadd.f32 %v18752_v7, %v18765_v51  ;;  %v9047_v7 = vadd.f32 %v18787_v53, %v18800_v21  ;;  %v9048_v51 = vadd.f32 %v18802_v35, %v18815_v46  ;;  %v19052_v53 = vadd.f32 %v18837_v23, %v18850_v1  ;;  %v20210_v21 = vld [vmem:[#allocation9_spill] sm:$0xff]  ;;  %v20211_v46 = vld [vmem:[#allocation32_spill] sm:$0xff] }
 0x624   : > { %v18985_v43 = vpop.f32.mrf.mxu1  ;;  %v19064_v35 = vadd.f32 %v20210_v21, %v18865_v19  ;;  %v9305_v18 = vadd.f32 %v18913_v29, %v9039_v5  ;;  %v19074_v42 = vadd.f32 %v20211_v46, %v18870_v11  ;;  %v19087_v23 = vadd.f32 %v20215_v10, %v18885_v47  ;;  %v20218_v11 = vld [vmem:[#allocation52_spill] sm:$0xff]  ;;  %v20222_v29 = vld [vmem:[#allocation47_spill] sm:$0xff]  ;;  %v20223_v47 = vld [vmem:[#allocation21_spill] sm:$0xff] }
 0x625   : > { %20206 = vst [vmem:[#allocation65_spill] sm:$0xff] %v18985_v43  ;;  %v9041_v43 = vadd.f32 %v18757_v38, %v18770_v4  ;;  %v9046_v38 = vadd.f32 %v18792_v20, %v18805_v33  ;;  %v19029_v4 = vadd.f32 %v18812_v15, %v18825_v39  ;;  %v19056_v20 = vadd.f32 %v20208_v9, %v18855_v61  ;;  %v20219_v54 = vld [vmem:[#allocation40_spill] sm:$0xff]  ;;  %v20226_v21 = vld [vmem:[#allocation6_spill] sm:$0xff] }
 0x626   : > { %v18987_v49 = vpop.f32.mrf.mxu1  ;;  %v19078_v39 = vadd.f32 %v20213_v22, %v20212_v55  ;;  %v9304_v50 = vadd.f32 %v18917_v14, %v9038_v40  ;;  %v19091_v62 = vadd.f32 %v20217_v59, %v20216_v44  ;;  %v20220_v40 = vld [vmem:[#allocation24_spill] sm:$0xff]  ;;  %v9308_v14 = vadd.f32 %v20222_v29, %v9042_v52  ;;  %v20228_v52 = vld [vmem:[#allocation30_spill] sm:$0xff] }
 0x627   : > { %20207 = vst [vmem:[#allocation11_spill] sm:$0xff] %v18987_v49  ;;  %v9040_v49 = vadd.f32 %v18762_v31, %v18775_v24  ;;  %v19021_v31 = vpop.f32.mrf.mxu0  ;;  %v9307_v1 = vadd.f32 %v18921_v2, %v9041_v43  ;;  %v9573_v5 = vadd.f32 %v20220_v40, %v9303_v30  ;;  %v19103_v9 = vadd.f32 %v20224_v0, %v20223_v47  ;;  %v20227_v43 = vld [vmem:[#allocation49_spill] sm:$0xff]  ;;  %v20230_v44 = vld [vmem:[#allocation54_spill] sm:$0xff] }
 0x628   : > { %v18993_v32 = vpop.f32.mrf.mxu1  ;;  %v19107_v46 = vadd.f32 %v20226_v21, %v20225_v56  ;;  %v9311_v30 = vadd.f32 %v20227_v43, %v9045_v17  ;;  %v9572_v22 = vadd.f32 %v20228_v52, %v9302_v60  ;;  %v9575_v10 = vadd.f32 %v20229_v48, %v9305_v18  ;;  %v20233_v17 = vld [vmem:[#allocation38_spill] sm:$0xff]  ;;  %v20234_v60 = vld [vmem:[#allocation39_spill] sm:$0xff]  ;;  %v20235_v18 = vld [vmem:[#allocation41_spill] sm:$0xff] }
 0x629   : > { %v19070_v15 = vpop.f32.mrf.mxu0  ;;  %v9306_v61 = vadd.f32 %v20218_v11, %v9040_v49  ;;  %v19112_v49 = vld [vmem:[%s19521_s5] ss:$0 sm:$0xff]  ;;  %v9310_v59 = vadd.f32 %v20230_v44, %v9044_v12  ;;  %v9574_v47 = vadd.f32 %v20233_v17, %v9304_v50  ;;  %v9577_v56 = vadd.f32 %v20234_v60, %v9307_v1  ;;  %v20236_v12 = vld [vmem:[#allocation43_spill] sm:$0xff]  ;;  %v20238_v52 = vld [vmem:[#allocation42_spill] sm:$0xff] }
 0x62a   : > { %v19011_v26 = vpop.f32.mrf.mxu1  ;;  %v9579_v48 = vadd.f32 %v20238_v52, %v9309_v27  ;;  %v20239_v44 = vld [vmem:[#allocation46_spill] sm:$0xff]  ;;  %v20242_v60 = vld [vmem:[#allocation60_spill] sm:$0xff] }
 0x62b   : > { %v19115_v55 = vpop.f32.mrf.mxu0  ;;  %v9576_v21 = vadd.f32 %v20235_v18, %v9306_v61  ;;  %v20240_v1 = vld [vmem:[#allocation50_spill] sm:$0xff]  ;;  %v20241_v61 = vld [vmem:[#allocation51_spill] sm:$0xff]  ;;  %v20243_v18 = vld [vmem:[#allocation44_spill] sm:$0xff] }
 0x62c   : > { %v19035_v24 = vpop.f32.mrf.mxu1  ;;  %v9317_v17 = vadd.f32 %v20241_v61, %v9051_v37  ;;  %v20245_v37 = vld [vmem:[#allocation53_spill] sm:$0xff] }
 0x62e   : > { %v19066_v33 = vpop.f32.mrf.mxu1 }
 0x630   : > { %v9293_v19 = vpop.f32.mrf.mxu1 }
 0x631   : > { %v19096_v41 = vadd.f32 %v9293_v19, %v20219_v54  ;;  %v20231_v19 = vld [vmem:[#allocation56_spill] sm:$0xff]  ;;  %v20232_v54 = vld [vmem:[#allocation58_spill] sm:$0xff] }
 0x632   : > { %v12428_v2 = vpop.f32.mrf.mxu1  ;;  %v9313_v11 = vadd.f32 %v20231_v19, %v9047_v7  ;;  %v9312_v40 = vadd.f32 %v20232_v54, %v9046_v38  ;;  %v20237_v7 = vld [vmem:[#allocation48_spill] sm:$0xff]  ;;  %v9578_v19 = vadd.f32 %v20239_v44, %v9308_v14  ;;  %v19135_v54 = vpop.f32.mrf.mxu0  ;;  %v20244_v14 = vld [vmem:[#allocation55_spill] sm:$0xff] }
 0x633   : > { %v9842_v8 = vadd.f32 %v12428_v2, %v9573_v5  ;;  %v9315_v2 = vadd.f32 %v20236_v12, %v9049_v36  ;;  %v9314_v43 = vadd.f32 %v20237_v7, %v9048_v51  ;;  %v19144_v51 = vadd.f32 %v20242_v60, %v9310_v59  ;;  %v20246_v59 = vld [vmem:[#allocation57_spill] sm:$0xff] }
 0x634   : > { %v9682_v29 = vpop.f32.mrf.mxu1  ;;  %v19147_v27 = vadd.f32 %v20243_v18, %v9313_v11  ;;  %v19150_v12 = vadd.f32 %v20244_v14, %v9312_v40  ;;  %v20247_v11 = vld [vmem:[#allocation59_spill] sm:$0xff]  ;;  %v20248_v40 = vld [vmem:[#allocation85_spill] sm:$0xff]  ;;  %v12409_v61 = vpop.f32.mrf.mxu0 }
 0x635   : > { %v9881_v5 = vmul.f32 %v19112_v49, %v9842_v8  ;;  %v9841_v0 = vadd.f32 %v9682_v29, %v9572_v22  ;;  %v9581_v29 = vadd.f32 %v20240_v1, %v9311_v30  ;;  %v19162_v44 = vadd.f32 %v20247_v11, %v9315_v2 }
 0x636   : > { %v12431_v38 = vpop.f32.mrf.mxu1  ;;  %v19165_v1 = vadd.f32 %v20248_v40, %v9314_v43  ;;  %v19177_v43 = vadd.f32 %v18971_v34, %v9317_v17  ;;  %v9523_v34 = vpop.f32.mrf.mxu0 }
 0x637   : > { %v19138_v50 = vadd.f32 %v19125_v58, %v9881_v5  ;;  %v9880_v8 = vmul.f32 %v19112_v49, %v9841_v0  ;;  %v9844_v22 = vadd.f32 %v12431_v38, %v9575_v10  ;;  %v9316_v0 = vadd.f32 %v20245_v37, %v19029_v4  ;;  %v20249_v4 = vld [vmem:[#allocation86_spill] sm:$0xff] }
 0x638   : > { %v9692_v36 = vpop.f32.mrf.mxu1  ;;  %v9319_v38 = vadd.f32 %v20246_v59, %v19033_v57  ;;  %v20250_v57 = vld [vmem:[#allocation87_spill] sm:$0xff] }
 0x639   : > { %v10918_v5 = vmul.f32 -1.442695, %v19138_v50  ;;  %v19154_v7 = vadd.f32 %v19125_v58, %v9880_v8  ;;  %v9883_v10 = vmul.f32 %v19112_v49, %v9844_v22  ;;  %v9843_v30 = vadd.f32 %v9692_v36, %v9574_v47 }
 0x63a   : > { %v12434_v52 = vpop.f32.mrf.mxu1  ;;  %v9318_v36 = vadd.f32 %v20249_v4, %v19040_v6  ;;  %v9321_v60 = vadd.f32 %v20250_v57, %v19044_v63  ;;  %v19187_v63 = vadd.f32 %v18977_v3, %v9316_v0  ;;  %v20254_v4 = vld [vmem:[#allocation13_spill] sm:$0xff] }
 0x63b   : > { %12615 = vpow2.f32 %v10918_v5  ;;  %v10917_v8 = vmul.f32 -1.442695, %v19154_v7  ;;  %v19169_v22 = vadd.f32 %v19125_v58, %v9883_v10  ;;  %v9882_v47 = vmul.f32 %v19112_v49, %v9843_v30  ;;  %v20251_v30 = vld [vmem:[#allocation63_spill] sm:$0xff] }
 0x63c   : > { %v9846_v2 = vadd.f32 %v12434_v52, %v9577_v56  ;;  %v9702_v18 = vpop.f32.mrf.mxu1  ;;  %v9320_v37 = vadd.f32 %v20251_v30, %v19048_v45  ;;  %v19190_v56 = vadd.f32 %v18983_v16, %v9319_v38  ;;  %v19200_v3 = vadd.f32 %v18989_v13, %v9318_v36 }
 0x63d   : > { %12617 = vpow2.f32 %v10917_v8  ;;  %v10920_v14 = vmul.f32 -1.442695, %v19169_v22  ;;  %v19181_v5 = vadd.f32 %v19125_v58, %v9882_v47  ;;  %v9845_v10 = vadd.f32 %v9702_v18, %v9576_v21  ;;  %v20252_v21 = vld [vmem:[#allocation61_spill] sm:$0xff]  ;;  %v20253_v47 = vld [vmem:[#allocation10_spill] sm:$0xff] }
 0x63e   : > { %v9885_v6 = vmul.f32 %v19112_v49, %v9846_v2  ;;  %v12437_v59 = vpop.f32.mrf.mxu1  ;;  %v9323_v40 = vadd.f32 %v20252_v21, %v19052_v53  ;;  %v19203_v16 = vadd.f32 %v19021_v31, %v9321_v60  ;;  %v9322_v53 = vadd.f32 %v20253_v47, %v19056_v20  ;;  %v12412_v31 = vpop.f32.mrf.mxu0  ;;  %v20255_v20 = vld [vmem:[#allocation8_spill] sm:$0xff] }
 0x63f   : > { %12619 = vpow2.f32 %v10920_v14  ;;  %v10919_v17 = vmul.f32 -1.442695, %v19181_v5  ;;  %v9884_v52 = vmul.f32 %v19112_v49, %v9845_v10  ;;  %v9848_v11 = vadd.f32 %v12437_v59, %v9579_v48 }
 0x640   : > { %v19197_v45 = vadd.f32 %v19125_v58, %v9885_v6  ;;  %v9712_v8 = vpop.f32.mrf.mxu1  ;;  %v9325_v57 = vadd.f32 %v20254_v4, %v19060_v28  ;;  %v19215_v36 = vadd.f32 %v19070_v15, %v9320_v37  ;;  %v9324_v10 = vadd.f32 %v20255_v20, %v19064_v35  ;;  %v20256_v28 = vld [vmem:[#allocation62_spill] sm:$0xff] }
 0x641   : > { %12621 = vpow2.f32 %v10919_v17  ;;  %v19206_v0 = vadd.f32 %v19125_v58, %v9884_v52  ;;  %v9887_v38 = vmul.f32 %v19112_v49, %v9848_v11  ;;  %v9847_v48 = vadd.f32 %v9712_v8, %v9578_v19 }
 0x642   : > { %v10922_v2 = vmul.f32 -1.442695, %v19197_v45  ;;  %v12440_v13 = vpop.f32.mrf.mxu1  ;;  %v9327_v30 = vadd.f32 %v20256_v28, %v19074_v42  ;;  %v19227_v15 = vadd.f32 %v19115_v55, %v9323_v40  ;;  %v19238_v42 = vadd.f32 %v19135_v54, %v9322_v53  ;;  %v9533_v55 = vpop.f32.mrf.mxu0 }
 0x643   : > { %v10921_v60 = vmul.f32 -1.442695, %v19206_v0  ;;  %v19219_v18 = vadd.f32 %v19125_v58, %v9887_v38  ;;  %v9886_v19 = vmul.f32 %v19112_v49, %v9847_v48  ;;  %v9850_v14 = vadd.f32 %v12440_v13, %v9581_v29  ;;  %v20257_v29 = vld [vmem:[#allocation65_spill] sm:$0xff] }
 0x644   : > { %12623 = vpow2.f32 %v10922_v2  ;;  %v9722_v6 = vpop.f32.mrf.mxu1  ;;  %v9326_v52 = vadd.f32 %v20257_v29, %v19078_v39  ;;  %v19240_v21 = vadd.f32 %v12409_v61, %v9325_v57  ;;  %v20258_v39 = vld [vmem:[#allocation11_spill] sm:$0xff]  ;;  %v19250_v54 = vadd.f32 %v9523_v34, %v9324_v10 }
 0x645   : > { %12625 = vpow2.f32 %v10921_v60  ;;  %v10924_v37 = vmul.f32 -1.442695, %v19219_v18  ;;  %v19231_v59 = vadd.f32 %v19125_v58, %v9886_v19  ;;  %v9889_v17 = vmul.f32 %v19112_v49, %v9850_v14 }
 0x646   : > { %v9849_v35 = vadd.f32 %v9722_v6, %v19144_v51  ;;  %v12443_v11 = vpop.f32.mrf.mxu1  ;;  %v9329_v47 = vadd.f32 %v20258_v39, %v19083_v25  ;;  %v19252_v61 = vadd.f32 %v12412_v31, %v9327_v30  ;;  %v19262_v34 = vadd.f32 %v9533_v55, %v9326_v52  ;;  %v12415_v31 = vpop.f32.mrf.mxu0 }
 0x647   : > { %12627 = vpow2.f32 %v10924_v37  ;;  %v10923_v40 = vmul.f32 -1.442695, %v19231_v59  ;;  %v19244_v8 = vadd.f32 %v19125_v58, %v9889_v17  ;;  %v9852_v38 = vadd.f32 %v12443_v11, %v19147_v27 }
 0x648   : > { %v12616_v48 = vpop.eup %12615  ;;  %v9888_v51 = vmul.f32 %v19112_v49, %v9849_v35  ;;  %v9732_v4 = vpop.f32.mrf.mxu1  ;;  %v9328_v27 = vadd.f32 %v18993_v32, %v19087_v23  ;;  %v19270_v6 = vadd.f32 %v12415_v31, %v9329_v47  ;;  %v9331_v52 = vadd.f32 %v19011_v26, %v19091_v62 }
 0x649   : > { %v10048_v53 = vadd.f32 1.0, %v12616_v48  ;;  %12629 = vpow2.f32 %v10923_v40  ;;  %v10926_v57 = vmul.f32 -1.442695, %v19244_v8  ;;  %v9891_v2 = vmul.f32 %v19112_v49, %v9852_v38  ;;  %v9543_v55 = vpop.f32.mrf.mxu0 }
 0x64a   : > { %v12618_v13 = vpop.eup %12617  ;;  %v19259_v60 = vadd.f32 %v19125_v58, %v9888_v51  ;;  %v9851_v25 = vadd.f32 %v9732_v4, %v19150_v12  ;;  %v12446_v19 = vpop.f32.mrf.mxu1  ;;  %v19286_v47 = vadd.f32 %v9543_v55, %v9328_v27 }
 0x64b   : > { %12631 = vrcp.f32 %v10048_v53  ;;  %v10047_v14 = vadd.f32 1.0, %v12618_v13  ;;  %v19265_v20 = vadd.f32 %v19125_v58, %v9891_v2  ;;  %v9854_v10 = vadd.f32 %v12446_v19, %v19162_v44  ;;  %v12418_v27 = vpop.f32.mrf.mxu0 }
 0x64c   : > { %v12620_v28 = vpop.eup %12619  ;;  %12633 = vpow2.f32 %v10926_v57  ;;  %v10925_v32 = vmul.f32 -1.442695, %v19259_v60  ;;  %v9890_v23 = vmul.f32 %v19112_v49, %v9851_v25  ;;  %v9742_v30 = vpop.f32.mrf.mxu1 }
 0x64d   : > { %12635 = vrcp.f32 %v10047_v14  ;;  %v10050_v12 = vadd.f32 1.0, %v12620_v28  ;;  %v10928_v37 = vmul.f32 -1.442695, %v19265_v20  ;;  %v9893_v17 = vmul.f32 %v19112_v49, %v9854_v10 }
 0x64e   : > { %v12622_v29 = vpop.eup %12621  ;;  %12637 = vpow2.f32 %v10925_v32  ;;  %v19277_v44 = vadd.f32 %v19125_v58, %v9890_v23  ;;  %v9853_v35 = vadd.f32 %v9742_v30, %v19165_v1  ;;  %v12449_v11 = vpop.f32.mrf.mxu1  ;;  %v19302_v28 = vadd.f32 %v12418_v27, %v9331_v52 }
 0x64f   : > { %12639 = vrcp.f32 %v10050_v12  ;;  %v10049_v40 = vadd.f32 1.0, %v12622_v29  ;;  %v19281_v38 = vadd.f32 %v19125_v58, %v9893_v17  ;;  %v9856_v48 = vadd.f32 %v12449_v11, %v19177_v43  ;;  %v9553_v52 = vpop.f32.mrf.mxu0 }
 0x650   : > { %12641 = vpow2.f32 %v10928_v37  ;;  %v10927_v39 = vmul.f32 -1.442695, %v19277_v44  ;;  %v9892_v26 = vmul.f32 %v19112_v49, %v9853_v35  ;;  %v9752_v62 = vpop.f32.mrf.mxu1  ;;  %v9330_v43 = vadd.f32 %v19035_v24, %v19103_v9 }
 0x651   : > { %v12624_v51 = vpop.eup %12623  ;;  %12643 = vrcp.f32 %v10049_v40  ;;  %v10930_v1 = vmul.f32 -1.442695, %v19281_v38  ;;  %v9895_v4 = vmul.f32 %v19112_v49, %v9856_v48  ;;  %v9855_v53 = vadd.f32 %v9752_v62, %v19187_v63 }
 0x652   : > { %v12626_v57 = vpop.eup %12625  ;;  %v10052_v2 = vadd.f32 1.0, %v12624_v51  ;;  %12645 = vpow2.f32 %v10927_v39  ;;  %v19294_v13 = vadd.f32 %v19125_v58, %v9892_v26  ;;  %v12452_v25 = vpop.f32.mrf.mxu1  ;;  %v9333_v37 = vadd.f32 %v19066_v33, %v19107_v46 }
 0x653   : > { %v10051_v19 = vadd.f32 1.0, %v12626_v57  ;;  %12647 = vpow2.f32 %v10930_v1  ;;  %v19297_v31 = vadd.f32 %v19125_v58, %v9895_v4  ;;  %v9894_v14 = vmul.f32 %v19112_v49, %v9855_v53  ;;  %v12421_v26 = vpop.f32.mrf.mxu0 }
 0x654   : > { %v12628_v10 = vpop.eup %12627  ;;  %12649 = vrcp.f32 %v10052_v2  ;;  %v10929_v63 = vmul.f32 -1.442695, %v19294_v13  ;;  %v9858_v24 = vadd.f32 %v12452_v25, %v19190_v56  ;;  %v9762_v9 = vpop.f32.mrf.mxu1  ;;  %v19325_v48 = vadd.f32 %v9553_v52, %v9330_v43 }
 0x655   : > { %12651 = vrcp.f32 %v10051_v19  ;;  %v10054_v32 = vadd.f32 1.0, %v12628_v10  ;;  %v10932_v23 = vmul.f32 -1.442695, %v19297_v31  ;;  %v19306_v30 = vadd.f32 %v19125_v58, %v9894_v14 }
 0x656   : > { %v12630_v12 = vpop.eup %12629  ;;  %12653 = vpow2.f32 %v10929_v63  ;;  %v9897_v17 = vmul.f32 %v19112_v49, %v9858_v24  ;;  %v9857_v56 = vadd.f32 %v9762_v9, %v19200_v3  ;;  %v12455_v29 = vpop.f32.mrf.mxu1  ;;  %v19342_v14 = vadd.f32 %v12421_v26, %v9333_v37 }
 0x657   : > { %12655 = vrcp.f32 %v10054_v32  ;;  %v10053_v35 = vadd.f32 1.0, %v12630_v12  ;;  %v10931_v11 = vmul.f32 -1.442695, %v19306_v30  ;;  %v9860_v55 = vadd.f32 %v12455_v29, %v19203_v16 }
 0x658   : > { %v12632_v40 = vpop.eup %12631  ;;  %12657 = vpow2.f32 %v10932_v23  ;;  %v19322_v33 = vadd.f32 %v19125_v58, %v9897_v17  ;;  %v9896_v46 = vmul.f32 %v19112_v49, %v9857_v56  ;;  %v9772_v3 = vpop.f32.mrf.mxu1 }
 0x659   : > { %v12634_v39 = vpop.eup %12633  ;;  %v10144_v16 = vmul.f32 %v12632_v40, %v19138_v50  ;;  %12659 = vrcp.f32 %v10053_v35  ;;  %v9899_v62 = vmul.f32 %v19112_v49, %v9860_v55  ;;  %v9859_v51 = vadd.f32 %v9772_v3, %v19215_v36 }
 0x65a   : > { %v12636_v1 = vpop.eup %12635  ;;  %v10056_v4 = vadd.f32 1.0, %v12634_v39  ;;  %12661 = vpow2.f32 %v10931_v11  ;;  %v10934_v53 = vmul.f32 -1.442695, %v19322_v33  ;;  %v19332_v57 = vadd.f32 %v19125_v58, %v9896_v46  ;;  %v12458_v43 = vpop.f32.mrf.mxu1 }
 0x65b   : > { %v12638_v2 = vpop.eup %12637  ;;  %10177 = vst.msk [vmem:[%s19319_s16 + $0x8] sm:$0xff] %vm10175_vm14, %v10144_v16  ;;  %v10143_v50 = vmul.f32 %v12636_v1, %v19154_v7  ;;  %v19338_v25 = vadd.f32 %v19125_v58, %v9899_v62  ;;  %v9898_v36 = vmul.f32 %v19112_v49, %v9859_v51  ;;  %v9862_v27 = vadd.f32 %v12458_v43, %v19227_v15 }
 0x65c   : > { %v12640_v19 = vpop.eup %12639  ;;  %12663 = vrcp.f32 %v10056_v4  ;;  %v10055_v10 = vadd.f32 1.0, %v12638_v2  ;;  %v10933_v63 = vmul.f32 -1.442695, %v19332_v57  ;;  %v9782_v24 = vpop.f32.mrf.mxu1 }
 0x65d   : > { %v12642_v9 = vpop.eup %12641  ;;  %10176 = vst.msk [vmem:[%s19319_s16] sm:$0xff] %vm10175_vm14, %v10143_v50  ;;  %v10146_v7 = vmul.f32 %v12640_v19, %v19169_v22  ;;  %12665 = vpow2.f32 %v10934_v53  ;;  %v10936_v32 = vmul.f32 -1.442695, %v19338_v25  ;;  %v19350_v23 = vadd.f32 %v19125_v58, %v9898_v36 }
 0x65e   : > { %v12644_v15 = vpop.eup %12643  ;;  %12667 = vrcp.f32 %v10055_v10  ;;  %v10058_v12 = vadd.f32 1.0, %v12642_v9  ;;  %v9901_v37 = vmul.f32 %v19112_v49, %v9862_v27  ;;  %v9861_v17 = vadd.f32 %v9782_v24, %v19238_v42  ;;  %v12461_v56 = vpop.f32.mrf.mxu1 }
 0x65f   : > { %v12646_v29 = vpop.eup %12645  ;;  %10179 = vst.msk [vmem:[%s19319_s16 + $0x18] sm:$0xff] %vm10175_vm14, %v10146_v7  ;;  %v10145_v22 = vmul.f32 %v12644_v15, %v19181_v5  ;;  %12669 = vpow2.f32 %v10933_v63  ;;  %v10935_v52 = vmul.f32 -1.442695, %v19350_v23  ;;  %v9864_v35 = vadd.f32 %v12461_v56, %v19240_v21  ;;  %v9563_v9 = vpop.f32.mrf.mxu0 }
 0x660   : > { %v12648_v11 = vpop.eup %12647  ;;  %12671 = vrcp.f32 %v10058_v12  ;;  %v10057_v55 = vadd.f32 1.0, %v12646_v29  ;;  %v19360_v40 = vadd.f32 %v19125_v58, %v9901_v37  ;;  %v9900_v46 = vmul.f32 %v19112_v49, %v9861_v17  ;;  %v9792_v42 = vpop.f32.mrf.mxu1 }
 0x661   : > { %v12650_v3 = vpop.eup %12649  ;;  %10178 = vst.msk [vmem:[%s19319_s16 + $0x10] sm:$0xff] %vm10175_vm14, %v10145_v22  ;;  %v10060_v39 = vadd.f32 1.0, %v12648_v11  ;;  %12673 = vpow2.f32 %v10936_v32  ;;  %v9903_v5 = vmul.f32 %v19112_v49, %v9864_v35  ;;  %v9863_v26 = vadd.f32 %v9792_v42, %v19250_v54 }
 0x662   : > { %v12652_v21 = vpop.eup %12651  ;;  %v10148_v16 = vmul.f32 %v12650_v3, %v19197_v45  ;;  %12675 = vrcp.f32 %v10057_v55  ;;  %v10938_v62 = vmul.f32 -1.442695, %v19360_v40  ;;  %v19370_v51 = vadd.f32 %v19125_v58, %v9900_v46  ;;  %v12464_v1 = vpop.f32.mrf.mxu1 }
 0x663   : > { %v12654_v4 = vpop.eup %12653  ;;  %v10147_v53 = vmul.f32 %v12652_v21, %v19206_v0  ;;  %12677 = vrcp.f32 %v10060_v39  ;;  %v19374_v43 = vadd.f32 %v19125_v58, %v9903_v5  ;;  %v9902_v54 = vmul.f32 %v19112_v49, %v9863_v26 }
 0x664   : > { %v12656_v2 = vpop.eup %12655  ;;  %10181 = vst.msk [vmem:[%s19319_s16 + $0x28] sm:$0xff] %vm10175_vm14, %v10148_v16  ;;  %v10059_v45 = vadd.f32 1.0, %v12654_v4  ;;  %12679 = vpow2.f32 %v10935_v52  ;;  %v10937_v50 = vmul.f32 -1.442695, %v19370_v51  ;;  %v9866_v36 = vadd.f32 %v12464_v1, %v19252_v61  ;;  %v9802_v27 = vpop.f32.mrf.mxu1 }
 0x665   : > { %v12658_v19 = vpop.eup %12657  ;;  %10180 = vst.msk [vmem:[%s19319_s16 + $0x20] sm:$0xff] %vm10175_vm14, %v10147_v53  ;;  %v10150_v0 = vmul.f32 %v12656_v2, %v19219_v18  ;;  %12681 = vpow2.f32 %v10938_v62  ;;  %v10940_v10 = vmul.f32 -1.442695, %v19374_v43  ;;  %v19386_v63 = vadd.f32 %v19125_v58, %v9902_v54 }
 0x666   : > { %v12660_v24 = vpop.eup %12659  ;;  %12683 = vrcp.f32 %v10059_v45  ;;  %v10062_v7 = vadd.f32 1.0, %v12658_v19  ;;  %v9905_v32 = vmul.f32 %v19112_v49, %v9866_v36  ;;  %v9865_v61 = vadd.f32 %v9802_v27, %v19262_v34  ;;  %v12467_v15 = vpop.f32.mrf.mxu1 }
 0x667   : > { %v12662_v12 = vpop.eup %12661  ;;  %10183 = vst.msk [vmem:[%s19319_s16 + $0x38] sm:$0xff] %vm10175_vm14, %v10150_v0  ;;  %v10149_v18 = vmul.f32 %v12660_v24, %v19231_v59  ;;  %12685 = vpow2.f32 %v10937_v50  ;;  %v10939_v37 = vmul.f32 -1.442695, %v19386_v63  ;;  %v9868_v17 = vadd.f32 %v12467_v15, %v19270_v6 }
 0x668   : > { %12687 = vrcp.f32 %v10062_v7  ;;  %v10061_v56 = vadd.f32 1.0, %v12662_v12  ;;  %v19396_v29 = vadd.f32 %v19125_v58, %v9905_v32  ;;  %v9904_v22 = vmul.f32 %v19112_v49, %v9865_v61  ;;  %v9812_v52 = vpop.f32.mrf.mxu1 }
 0x669   : > { %v12664_v34 = vpop.eup %12663  ;;  %v9602_v35 = vadd.f32 %v9563_v9, %v19096_v41  ;;  %10182 = vst.msk [vmem:[%s19319_s16 + $0x30] sm:$0xff] %vm10175_vm14, %v10149_v18  ;;  %12689 = vpow2.f32 %v10940_v10  ;;  %v9907_v59 = vmul.f32 %v19112_v49, %v9868_v17  ;;  %v9867_v11 = vadd.f32 %v9812_v52, %v19286_v47 }
 0x66a   : > { %v12666_v6 = vpop.eup %12665  ;;  %v10152_v55 = vmul.f32 %v12664_v34, %v19244_v8  ;;  %12691 = vrcp.f32 %v10061_v56  ;;  %v10942_v46 = vmul.f32 -1.442695, %v19396_v29  ;;  %v19407_v42 = vadd.f32 %v19125_v58, %v9904_v22  ;;  %v12470_v3 = vpop.f32.mrf.mxu1 }
 0x66b   : > { %v12668_v39 = vpop.eup %12667  ;;  %v10064_v41 = vadd.f32 1.0, %v12666_v6  ;;  %12693 = vpow2.f32 %v10939_v37  ;;  %v19410_v5 = vadd.f32 %v19125_v58, %v9907_v59  ;;  %v9906_v26 = vmul.f32 %v19112_v49, %v9867_v11 }
 0x66c   : > { %v12670_v47 = vpop.eup %12669  ;;  %10185 = vst.msk [vmem:[%s19319_s16 + $0x48] sm:$0xff] %vm10175_vm14, %v10152_v55  ;;  %v10151_v8 = vmul.f32 %v12668_v39, %v19259_v60  ;;  %12695 = vpow2.f32 %v10942_v46  ;;  %v10941_v21 = vmul.f32 -1.442695, %v19407_v42  ;;  %v9870_v16 = vadd.f32 %v12470_v3, %v19302_v28  ;;  %v9822_v62 = vpop.f32.mrf.mxu1 }
 0x66d   : > { %v12672_v1 = vpop.eup %12671  ;;  %12697 = vrcp.f32 %v10064_v41  ;;  %v10063_v4 = vadd.f32 1.0, %v12670_v47  ;;  %v10944_v53 = vmul.f32 -1.442695, %v19410_v5  ;;  %v19420_v54 = vadd.f32 %v19125_v58, %v9906_v26 }
 0x66e   : > { %v12674_v2 = vpop.eup %12673  ;;  %10184 = vst.msk [vmem:[%s19319_s16 + $0x40] sm:$0xff] %vm10175_vm14, %v10151_v8  ;;  %v10154_v60 = vmul.f32 %v12672_v1, %v19265_v20  ;;  %12699 = vpow2.f32 %v10941_v21  ;;  %v9909_v45 = vmul.f32 %v19112_v49, %v9870_v16  ;;  %v9869_v28 = vadd.f32 %v9822_v62, %v19325_v48  ;;  %v12473_v50 = vpop.f32.mrf.mxu1 }
 0x66f   : > { %v12676_v36 = vpop.eup %12675  ;;  %12701 = vrcp.f32 %v10063_v4  ;;  %v10066_v27 = vadd.f32 1.0, %v12674_v2  ;;  %v10943_v19 = vmul.f32 -1.442695, %v19420_v54  ;;  %v9872_v0 = vadd.f32 %v12473_v50, %v19342_v14 }
 0x670   : > { %v12678_v10 = vpop.eup %12677  ;;  %10187 = vst.msk [vmem:[%s19319_s16 + $0x58] sm:$0xff] %vm10175_vm14, %v10154_v60  ;;  %v10153_v24 = vmul.f32 %v12676_v36, %v19277_v44  ;;  %12703 = vpow2.f32 %v10944_v53  ;;  %v19433_v20 = vadd.f32 %v19125_v58, %v9909_v45  ;;  %v9908_v48 = vmul.f32 %v19112_v49, %v9869_v28  ;;  %v9832_v9 = vpop.f32.mrf.mxu1 }
 0x671   : > { %v12680_v7 = vpop.eup %12679  ;;  %v10156_v32 = vmul.f32 %v12678_v10, %v19281_v38  ;;  %12705 = vrcp.f32 %v10066_v27  ;;  %v9911_v61 = vmul.f32 %v19112_v49, %v9872_v0  ;;  %v9871_v14 = vadd.f32 %v9832_v9, %v9602_v35 }
 0x672   : > { %v12682_v15 = vpop.eup %12681  ;;  %10186 = vst.msk [vmem:[%s19319_s16 + $0x50] sm:$0xff] %vm10175_vm14, %v10153_v24  ;;  %v10065_v12 = vadd.f32 1.0, %v12680_v7  ;;  %12707 = vpow2.f32 %v10943_v19  ;;  %v10946_v44 = vmul.f32 -1.442695, %v19433_v20  ;;  %v19442_v18 = vadd.f32 %v19125_v58, %v9908_v48 }
 0x673   : > { %v12684_v37 = vpop.eup %12683  ;;  %10189 = vst.msk [vmem:[%s19319_s16 + $0x68] sm:$0xff] %vm10175_vm14, %v10156_v32  ;;  %v10068_v17 = vadd.f32 1.0, %v12682_v15  ;;  %v19447_v38 = vadd.f32 %v19125_v58, %v9911_v61  ;;  %v9910_v56 = vmul.f32 %v19112_v49, %v9871_v14 }
 0x674   : > { %v12686_v22 = vpop.eup %12685  ;;  %v10155_v52 = vmul.f32 %v12684_v37, %v19294_v13  ;;  %12709 = vrcp.f32 %v10065_v12  ;;  %v10945_v34 = vmul.f32 -1.442695, %v19442_v18 }
 0x675   : > { %v12688_v35 = vpop.eup %12687  ;;  %12711 = vrcp.f32 %v10068_v17  ;;  %v10067_v59 = vadd.f32 1.0, %v12686_v22  ;;  %v19453_v11 = vadd.f32 %v19125_v58, %v9910_v56  ;;  %v10948_v49 = vmul.f32 -1.442695, %v19447_v38 }
 0x676   : > { %v12690_v6 = vpop.eup %12689  ;;  %10188 = vst.msk [vmem:[%s19319_s16 + $0x60] sm:$0xff] %vm10175_vm14, %v10155_v52  ;;  %v10158_v55 = vmul.f32 %v12688_v35, %v19297_v31  ;;  %12713 = vpow2.f32 %v10946_v44 }
 0x677   : > { %v12692_v13 = vpop.eup %12691  ;;  %12715 = vrcp.f32 %v10067_v59  ;;  %v10070_v46 = vadd.f32 1.0, %v12690_v6  ;;  %v10947_v26 = vmul.f32 -1.442695, %v19453_v11 }
 0x678   : > { %v12694_v3 = vpop.eup %12693  ;;  %10191 = vst.msk [vmem:[%s19319_s16 + $0x78] sm:$0xff] %vm10175_vm14, %v10158_v55  ;;  %v10157_v39 = vmul.f32 %v12692_v13, %v19306_v30  ;;  %12717 = vpow2.f32 %v10945_v34 }
 0x679   : > { %v12696_v58 = vpop.eup %12695  ;;  %12719 = vrcp.f32 %v10070_v46  ;;  %v10069_v41 = vadd.f32 1.0, %v12694_v3 }
 0x67a   : > { %v12698_v47 = vpop.eup %12697  ;;  %10190 = vst.msk [vmem:[%s19319_s16 + $0x70] sm:$0xff] %vm10175_vm14, %v10157_v39  ;;  %v10072_v31 = vadd.f32 1.0, %v12696_v58  ;;  %12721 = vpow2.f32 %v10948_v49 }
 0x67b   : > { %v12700_v8 = vpop.eup %12699  ;;  %v10160_v21 = vmul.f32 %v12698_v47, %v19322_v33  ;;  %12723 = vrcp.f32 %v10069_v41 }
 0x67c   : > { %v12702_v16 = vpop.eup %12701  ;;  %12725 = vrcp.f32 %v10072_v31  ;;  %v10071_v30 = vadd.f32 1.0, %v12700_v8 }
 0x67d   : > { %v12704_v62 = vpop.eup %12703  ;;  %10193 = vst.msk [vmem:[%s19319_s16 + $0x88] sm:$0xff] %vm10175_vm14, %v10160_v21  ;;  %v10159_v1 = vmul.f32 %v12702_v16, %v19332_v57  ;;  %12727 = vpow2.f32 %v10947_v26 }
 0x67e   : > { %v12706_v4 = vpop.eup %12705  ;;  %12729 = vrcp.f32 %v10071_v30  ;;  %v10074_v53 = vadd.f32 1.0, %v12704_v62 }
 0x67f   : > { %v12708_v2 = vpop.eup %12707  ;;  %10192 = vst.msk [vmem:[%s19319_s16 + $0x80] sm:$0xff] %vm10175_vm14, %v10159_v1  ;;  %v10162_v33 = vmul.f32 %v12706_v4, %v19338_v25 }
 0x680   : > { %12731 = vrcp.f32 %v10074_v53  ;;  %v10073_v60 = vadd.f32 1.0, %v12708_v2 }
 0x681   : > { %v12710_v45 = vpop.eup %12709  ;;  %10195 = vst.msk [vmem:[%s19319_s16 + $0x98] sm:$0xff] %vm10175_vm14, %v10162_v33 }
 0x682   : > { %v12712_v28 = vpop.eup %12711  ;;  %v10161_v57 = vmul.f32 %v12710_v45, %v19350_v23  ;;  %12733 = vrcp.f32 %v10073_v60 }
 0x683   : > { %v12714_v50 = vpop.eup %12713  ;;  %v10164_v36 = vmul.f32 %v12712_v28, %v19360_v40 }
 0x684   : > { %v12716_v27 = vpop.eup %12715  ;;  %10194 = vst.msk [vmem:[%s19319_s16 + $0x90] sm:$0xff] %vm10175_vm14, %v10161_v57  ;;  %v10076_v19 = vadd.f32 1.0, %v12714_v50 }
 0x685   : > { %v12718_v0 = vpop.eup %12717  ;;  %10197 = vst.msk [vmem:[%s19319_s16 + $0xa8] sm:$0xff] %vm10175_vm14, %v10164_v36  ;;  %v10163_v25 = vmul.f32 %v12716_v27, %v19370_v51 }
 0x686   : > { %v12720_v10 = vpop.eup %12719  ;;  %12735 = vrcp.f32 %v10076_v19  ;;  %v10075_v24 = vadd.f32 1.0, %v12718_v0 }
 0x687   : > { %v12722_v23 = vpop.eup %12721  ;;  %10196 = vst.msk [vmem:[%s19319_s16 + $0xa0] sm:$0xff] %vm10175_vm14, %v10163_v25  ;;  %v10166_v40 = vmul.f32 %v12720_v10, %v19374_v43 }
 0x688   : > { %v12724_v48 = vpop.eup %12723  ;;  %12737 = vrcp.f32 %v10075_v24  ;;  %v10078_v9 = vadd.f32 1.0, %v12722_v23 }
 0x689   : > { %v12726_v7 = vpop.eup %12725  ;;  %10199 = vst.msk [vmem:[%s19319_s16 + $0xb8] sm:$0xff] %vm10175_vm14, %v10166_v40  ;;  %v10165_v51 = vmul.f32 %v12724_v48, %v19386_v63 }
 0x68a   : > { %v12728_v32 = vpop.eup %12727  ;;  %v10168_v61 = vmul.f32 %v12726_v7, %v19396_v29  ;;  %12739 = vrcp.f32 %v10078_v9 }
 0x68b   : > { %v12730_v14 = vpop.eup %12729  ;;  %10198 = vst.msk [vmem:[%s19319_s16 + $0xb0] sm:$0xff] %vm10175_vm14, %v10165_v51  ;;  %v10077_v43 = vadd.f32 1.0, %v12728_v32 }
 0x68c   : > { %10201 = vst.msk [vmem:[%s19319_s16 + $0xc8] sm:$0xff] %vm10175_vm14, %v10168_v61  ;;  %v10167_v15 = vmul.f32 %v12730_v14, %v19407_v42 }
 0x68d   : > { %v12732_v12 = vpop.eup %12731  ;;  %12741 = vrcp.f32 %v10077_v43 }
 0x68e   : > { %10200 = vst.msk [vmem:[%s19319_s16 + $0xc0] sm:$0xff] %vm10175_vm14, %v10167_v15  ;;  %v10170_v63 = vmul.f32 %v12732_v12, %v19410_v5 }
 0x68f   : > { %v12734_v29 = vpop.eup %12733 }
 0x690   : > { %10203 = vst.msk [vmem:[%s19319_s16 + $0xd8] sm:$0xff] %vm10175_vm14, %v10170_v63  ;;  %v10169_v44 = vmul.f32 %v12734_v29, %v19420_v54 }
 0x692   : > { %10202 = vst.msk [vmem:[%s19319_s16 + $0xd0] sm:$0xff] %vm10175_vm14, %v10169_v44 }
 0x693   : > { %v12736_v37 = vpop.eup %12735 }
 0x694   : > { %v10172_v17 = vmul.f32 %v12736_v37, %v19433_v20 }
 0x695   : > { %v12738_v56 = vpop.eup %12737 }
 0x696   : > { %10205 = vst.msk [vmem:[%s19319_s16 + $0xe8] sm:$0xff] %vm10175_vm14, %v10172_v17  ;;  %v10171_v42 = vmul.f32 %v12738_v56, %v19442_v18 }
 0x697   : > { %v12740_v22 = vpop.eup %12739 }
 0x698   : > { %10204 = vst.msk [vmem:[%s19319_s16 + $0xe0] sm:$0xff] %vm10175_vm14, %v10171_v42  ;;  %v10174_v5 = vmul.f32 %v12740_v22, %v19447_v38 }
 0x69a   : > { %v12742_v52 = vpop.eup %12741  ;;  %10207 = vst.msk [vmem:[%s19319_s16 + $0xf8] sm:$0xff] %vm10175_vm14, %v10174_v5 }
 0x69b   : > { %v10173_v54 = vmul.f32 %v12742_v52, %v19453_v11 }
 0x69d   : > { %10206 = vst.msk [vmem:[%s19319_s16 + $0xf0] sm:$0xff] %vm10175_vm14, %v10173_v54 }
 0x69e PF: > { %s17_s24 = sadd.s32 1, %s12758_s24  }
 0x69f   : > { %p14_p4 = scmp.ge.s32.totalorder %s17_s24, 4  }
 0x6a1   :  { %16 = sbr.rel (!%p14_p4) target bundleno = 1 (0x1), region = 100 }

</bundles_post_ra>
